<compile_context>
chip_gen: v5e
topology: v5e:2x2
jax: 0.10.0
libtpu: 0.0.40
codegen_flags: <defaults>
</compile_context>

<pallas_src>
import numpy as np

import jax
import jax.numpy as jnp
from jax import lax
from jax.experimental import pallas as pl
from jax.experimental.pallas import tpu as pltpu


def _round_up(v, m):
    return (v + m - 1) // m * m


# ----------------------------------------------------------------------------
# Fused LeNet5 kernel: one batch tile of Bt images per grid step.
# Row layout of every intermediate is (h * Bt + b); lane layout is
# (channel * width + w).  With Bt a multiple of 8 every row slice below is
# sublane-tile aligned and every store is lane-dense.
# ----------------------------------------------------------------------------
def _lenet5_kernel(
    x_ref,                      # (1, 28*Bt, 28) f32, rows h*Bt + b
    t1_ref, b1_ref,             # conv1: (140,144) bf16, (1,144) f32
    sel1_ref,                   # pool1 even-lane pick: (144,72) bf16
    t2_ref, b2_ref,             # conv2: (360,128) bf16, (1,128) f32
    sel2_ref,                   # pool2 even-lane pick: (128,64) bf16
    g1_ref, fb1_ref,            # fc1: (256,120) bf16, (1,120) f32
    w2_ref, fb2_ref,            # fc2: (120,84) bf16, (1,84) f32
    w3_ref, fb3_ref,            # fc3 (padded to 128 lanes): (84,128) bf16, (1,128) f32
    out_ref,                    # (Bt, 128) f32, logits in lanes 0..9
):
    f32, bf16 = jnp.float32, jnp.bfloat16
    Bt = out_ref.shape[0]

    x = x_ref[0].astype(bf16)                        # (28*Bt, 28), rows h*Bt + b

    # ---- conv1 + bias + ReLU : single fused-K dot (K = 5*28 = 140) ----------
    # slab rows: oh*Bt + b ; lanes: kh*28 + w
    slab1 = jnp.concatenate(
        [x[kh * Bt:(kh + 24) * Bt, :] for kh in range(5)], axis=1)   # (24*Bt, 140)
    y1 = jnp.dot(slab1, t1_ref[...], preferred_element_type=f32)     # (24*Bt, 144)
    y1 = jnp.maximum(y1 + b1_ref[...], 0.0)          # lanes: oc*24 + ow

    # ---- pool1 (2x2 / 2) ------------------------------------------------------
    # H direction: exact f32 max of adjacent Bt-row blocks (sublane aligned).
    h1 = jnp.concatenate(
        [jnp.maximum(y1[(2 * i) * Bt:(2 * i + 1) * Bt, :],
                     y1[(2 * i + 1) * Bt:(2 * i + 2) * Bt, :]) for i in range(12)],
        axis=0)                                       # (12*Bt, 144)
    # W direction: max with +1-lane shifted copy, then one bf16 even-lane pick.
    h1s = jnp.concatenate([h1[:, 1:], h1[:, :1]], axis=1)
    m1 = jnp.maximum(h1, h1s).astype(bf16)
    p1 = jnp.dot(m1, sel1_ref[...], preferred_element_type=f32)      # (12*Bt, 72)
    p1 = p1.astype(bf16)                              # lanes: ic*12 + w

    # ---- conv2 + bias + ReLU : single fused-K dot (K = 5*72 = 360) -----------
    slab2 = jnp.concatenate(
        [p1[kh * Bt:(kh + 8) * Bt, :] for kh in range(5)], axis=1)   # (8*Bt, 360)
    y2 = jnp.dot(slab2, t2_ref[...], preferred_element_type=f32)     # (8*Bt, 128)
    y2 = jnp.maximum(y2 + b2_ref[...], 0.0)           # lanes: oc*8 + ow

    # ---- pool2 ----------------------------------------------------------------
    h2 = jnp.concatenate(
        [jnp.maximum(y2[(2 * i) * Bt:(2 * i + 1) * Bt, :],
                     y2[(2 * i + 1) * Bt:(2 * i + 2) * Bt, :]) for i in range(4)],
        axis=0)                                       # (4*Bt, 128)
    h2s = jnp.concatenate([h2[:, 1:], h2[:, :1]], axis=1)
    m2 = jnp.maximum(h2, h2s).astype(bf16)
    p2 = jnp.dot(m2, sel2_ref[...], preferred_element_type=f32)      # (4*Bt, 64)
    p2 = p2.astype(bf16)                              # lanes: oc*4 + w

    # ---- fc1 / fc2 / fc3 (no ReLU between FC layers, as in the torch module) --
    # Gather the 4 pooled rows of every image into lanes -> (Bt, 256), one dot.
    feat = jnp.concatenate([p2[i * Bt:(i + 1) * Bt, :] for i in range(4)], axis=1)
    z = jnp.dot(feat, g1_ref[...], preferred_element_type=f32) + fb1_ref[...]
    z = jnp.dot(z.astype(bf16), w2_ref[...], preferred_element_type=f32) + fb2_ref[...]
    z = jnp.dot(z.astype(bf16), w3_ref[...], preferred_element_type=f32) + fb3_ref[...]
    out_ref[...] = z.astype(out_ref.dtype)            # lane-dense (Bt,128) store


def _const_spec(a):
    nd = a.ndim
    return pl.BlockSpec(a.shape, lambda g, _nd=nd: (0,) * _nd)


def lenet5_forward(x, packed, *, block_b=32):
    """x: (N, 1, 28, 28) f32; packed: tuple from pack_params().  Returns (N, 10)."""
    N = x.shape[0]
    Bt = min(block_b, _round_up(N, 8))
    Bt = max(8, _round_up(Bt, 8))
    Npad = _round_up(N, Bt)
    G = Npad // Bt

    x2 = x.reshape(N, 28, 28)
    if Npad != N:
        x2 = jnp.pad(x2, ((0, Npad - N), (0, 0), (0, 0)))
    # Pre-block to (G, 28*Bt, 28) with rows h*Bt + b inside each grid block so
    # the kernel never reshapes/transposes the image tile (pure layout plumbing).
    xb = x2.reshape(G, Bt, 28, 28).transpose(0, 2, 1, 3).reshape(G, 28 * Bt, 28)

    out = pl.pallas_call(
        _lenet5_kernel,
        out_shape=jax.ShapeDtypeStruct((Npad, 128), jnp.float32),
        grid=(G,),
        in_specs=[pl.BlockSpec((1, 28 * Bt, 28), lambda g: (g, 0, 0))]
                 + [_const_spec(a) for a in packed],
        out_specs=pl.BlockSpec((Bt, 128), lambda g: (g, 0)),
        compiler_params=pltpu.CompilerParams(
            dimension_semantics=("parallel",)),        # batch tiles across TCs
    )(xb, *packed)
    return out[:N, :10]


# ----------------------------------------------------------------------------
# One-time weight packing (PyTorch layouts -> kernel operands).  Exact
# rearrangement / zero-stuffing; only the final bf16 cast of matmul weights
# loses precision.
# ----------------------------------------------------------------------------
def pack_params(params):
    w1 = np.asarray(params["conv1_w"], np.float32)   # (6, 1, 5, 5)
    b1 = np.asarray(params["conv1_b"], np.float32)   # (6,)
    w2 = np.asarray(params["conv2_w"], np.float32)   # (16, 6, 5, 5)
    b2 = np.asarray(params["conv2_b"], np.float32)   # (16,)
    fw1 = np.asarray(params["fc1_w"], np.float32)    # (120, 256)
    fb1 = np.asarray(params["fc1_b"], np.float32)
    fw2 = np.asarray(params["fc2_w"], np.float32)    # (84, 120)
    fb2 = np.asarray(params["fc2_b"], np.float32)
    fw3 = np.asarray(params["fc3_w"], np.float32)    # (10, 84)
    fb3 = np.asarray(params["fc3_b"], np.float32)

    # conv1 fused-K banded weights: T1[kh*28 + wi, oc*24 + ow] = w1[oc,0,kh,wi-ow]
    T1 = np.zeros((5 * 28, 6 * 24), np.float32)
    for kh in range(5):
        for oc in range(6):
            for ow in range(24):
                for kw in range(5):
                    T1[kh * 28 + ow + kw, oc * 24 + ow] = w1[oc, 0, kh, kw]
    b1row = np.repeat(b1, 24)[None, :]               # (1, 144)

    # pool1 even-lane pick: in-lane oc*24 + 2j -> out-lane oc*12 + j
    Sel1 = np.zeros((144, 72), np.float32)
    for oc in range(6):
        for j in range(12):
            Sel1[oc * 24 + 2 * j, oc * 12 + j] = 1.0

    # conv2 fused-K banded weights:
    #   T2[kh*72 + ic*12 + wi, oc*8 + ow] = w2[oc, ic, kh, wi - ow]
    T2 = np.zeros((5 * 72, 16 * 8), np.float32)
    for kh in range(5):
        for oc in range(16):
            for ic in range(6):
                for ow in range(8):
                    for kw in range(5):
                        T2[kh * 72 + ic * 12 + ow + kw, oc * 8 + ow] = w2[oc, ic, kh, kw]
    b2row = np.repeat(b2, 8)[None, :]                # (1, 128)

    # pool2 even-lane pick: in-lane oc*8 + 2j -> out-lane oc*4 + j
    Sel2 = np.zeros((128, 64), np.float32)
    for oc in range(16):
        for j in range(4):
            Sel2[oc * 8 + 2 * j, oc * 4 + j] = 1.0

    # fc1: kernel feature lane = i2*64 + oc*4 + j ; torch flatten = oc*16 + i2*4 + j
    G1 = fw1.reshape(120, 16, 4, 4).transpose(2, 1, 3, 0).reshape(256, 120)

    # fc3 padded to 128 output lanes for a lane-dense output store.
    W3p = np.zeros((84, 128), np.float32)
    W3p[:, :10] = fw3.T
    fb3p = np.zeros((1, 128), np.float32)
    fb3p[0, :10] = fb3

    bf16, f32 = jnp.bfloat16, jnp.float32
    return (
        jnp.asarray(T1, bf16), jnp.asarray(b1row, f32),
        jnp.asarray(Sel1, bf16),
        jnp.asarray(T2, bf16), jnp.asarray(b2row, f32),
        jnp.asarray(Sel2, bf16),
        jnp.asarray(G1, bf16), jnp.asarray(fb1[None, :], f32),
        jnp.asarray(fw2.T, bf16), jnp.asarray(fb2[None, :], f32),
        jnp.asarray(W3p, bf16), jnp.asarray(fb3p, f32),
    )


# ----------------------------------------------------------------------------
# Pure-JAX reference (PyTorch semantics) for a correctness check.
# ----------------------------------------------------------------------------
def lenet5_reference(x, params):
    def conv(x, w, b):
        y = lax.conv_general_dilated(
            x, w, window_strides=(1, 1), padding="VALID",
            dimension_numbers=("NCHW", "OIHW", "NCHW"))
        return y + b.reshape(1, -1, 1, 1)

    def pool(x):  # MaxPool2d(2, 2) on even spatial dims
        return jnp.maximum(
            jnp.maximum(x[:, :, 0::2, 0::2], x[:, :, 0::2, 1::2]),
            jnp.maximum(x[:, :, 1::2, 0::2], x[:, :, 1::2, 1::2]))

    x = pool(jnp.maximum(conv(x, params["conv1_w"], params["conv1_b"]), 0.0))
    x = pool(jnp.maximum(conv(x, params["conv2_w"], params["conv2_b"]), 0.0))
    x = x.reshape(x.shape[0], -1)
    x = x @ params["fc1_w"].T + params["fc1_b"]
    x = x @ params["fc2_w"].T + params["fc2_b"]
    x = x @ params["fc3_w"].T + params["fc3_b"]
    return x


# ----------------------------------------------------------------------------
# Deterministic PyTorch-style parameter init + run
# ----------------------------------------------------------------------------
def _init_params(key):
    keys = jax.random.split(key, 10)

    def u(k, shape, fan_in):
        bound = 1.0 / (fan_in ** 0.5)
        return jax.random.uniform(k, shape, jnp.float32, -bound, bound)

    return {
        "conv1_w": u(keys[0], (6, 1, 5, 5), 1 * 5 * 5),
        "conv1_b": u(keys[1], (6,), 1 * 5 * 5),
        "conv2_w": u(keys[2], (16, 6, 5, 5), 6 * 5 * 5),
        "conv2_b": u(keys[3], (16,), 6 * 5 * 5),
        "fc1_w": u(keys[4], (120, 256), 256),
        "fc1_b": u(keys[5], (120,), 256),
        "fc2_w": u(keys[6], (84, 120), 120),
        "fc2_b": u(keys[7], (84,), 120),
        "fc3_w": u(keys[8], (10, 84), 84),
        "fc3_b": u(keys[9], (10,), 84),
    }


if __name__ == "__main__":
    root = jax.random.PRNGKey(0)
    pkey, xkey = jax.random.split(root)
    params = _init_params(pkey)
    packed = pack_params(params)

    # fc1 in_features=256 => 1x28x28 input.  N=64 -> 2 batch tiles of 32.
    N = 64
    x = jax.random.normal(xkey, (N, 1, 28, 28), jnp.float32)

    out = jax.jit(lenet5_forward)(x, packed)
    out = jax.block_until_ready(out)
    assert out.shape == (N, 10), out.shape
    assert bool(jnp.all(jnp.isfinite(out)))

    # Correctness check against an f32 reference using the same bf16-rounded
    # weights (isolates layout/packing; residual diff comes only from casting
    # activations to bf16 at the MXU dots and at the pooling pick matmuls).
    ref_params = {
        k: (v.astype(jnp.bfloat16).astype(jnp.float32) if k.endswith("_w") else v)
        for k, v in params.items()
    }
    ref = lenet5_reference(x, ref_params)
    err = float(jnp.max(jnp.abs(out - ref)))
    assert err < 0.2, f"max |out - ref| too large: {err}"

    print("KERNEL_OK")
</pallas_src>

<mosaic_0001>
module attributes {stable_mosaic.version = 11 : i64} {
  func.func @_lenet5_kernel(%arg0: i32, %arg1: memref<1x896x28xf32, #tpu.memory_space<vmem>>, %arg2: memref<140x144xbf16, #tpu.memory_space<vmem>>, %arg3: memref<1x144xf32, #tpu.memory_space<vmem>>, %arg4: memref<144x72xbf16, #tpu.memory_space<vmem>>, %arg5: memref<360x128xbf16, #tpu.memory_space<vmem>>, %arg6: memref<1x128xf32, #tpu.memory_space<vmem>>, %arg7: memref<128x64xbf16, #tpu.memory_space<vmem>>, %arg8: memref<256x120xbf16, #tpu.memory_space<vmem>>, %arg9: memref<1x120xf32, #tpu.memory_space<vmem>>, %arg10: memref<120x84xbf16, #tpu.memory_space<vmem>>, %arg11: memref<1x84xf32, #tpu.memory_space<vmem>>, %arg12: memref<84x128xbf16, #tpu.memory_space<vmem>>, %arg13: memref<1x128xf32, #tpu.memory_space<vmem>>, %arg14: memref<32x128xf32, #tpu.memory_space<vmem>>) attributes {dimension_semantics = [#tpu.dimension_semantics<parallel>], iteration_bounds = array<i64: 2>, scalar_prefetch = 0 : i64, scratch_operands = 0 : i64, tpu.core_type = #tpu.core_type<tc>, window_params = [{transform_indices = @transform_0, window_bounds = array<i64: 1, 896, 28>}, {pipeline_mode = #tpu.pipeline_mode<synchronous>, transform_indices = @transform_1, window_bounds = array<i64: 140, 144>}, {pipeline_mode = #tpu.pipeline_mode<synchronous>, transform_indices = @transform_2, window_bounds = array<i64: 1, 144>}, {pipeline_mode = #tpu.pipeline_mode<synchronous>, transform_indices = @transform_3, window_bounds = array<i64: 144, 72>}, {pipeline_mode = #tpu.pipeline_mode<synchronous>, transform_indices = @transform_4, window_bounds = array<i64: 360, 128>}, {pipeline_mode = #tpu.pipeline_mode<synchronous>, transform_indices = @transform_5, window_bounds = array<i64: 1, 128>}, {pipeline_mode = #tpu.pipeline_mode<synchronous>, transform_indices = @transform_6, window_bounds = array<i64: 128, 64>}, {pipeline_mode = #tpu.pipeline_mode<synchronous>, transform_indices = @transform_7, window_bounds = array<i64: 256, 120>}, {pipeline_mode = #tpu.pipeline_mode<synchronous>, transform_indices = @transform_8, window_bounds = array<i64: 1, 120>}, {pipeline_mode = #tpu.pipeline_mode<synchronous>, transform_indices = @transform_9, window_bounds = array<i64: 120, 84>}, {pipeline_mode = #tpu.pipeline_mode<synchronous>, transform_indices = @transform_10, window_bounds = array<i64: 1, 84>}, {pipeline_mode = #tpu.pipeline_mode<synchronous>, transform_indices = @transform_11, window_bounds = array<i64: 84, 128>}, {pipeline_mode = #tpu.pipeline_mode<synchronous>, transform_indices = @transform_12, window_bounds = array<i64: 1, 128>}, {transform_indices = @transform_13, window_bounds = array<i64: 32, 128>}]} {
    %c0 = arith.constant 0 : index
    %c0_0 = arith.constant 0 : index
    %c0_1 = arith.constant 0 : index
    %0 = vector.load %arg1[%c0, %c0_0, %c0_1] : memref<1x896x28xf32, #tpu.memory_space<vmem>>, vector<1x896x28xf32>
    %1 = vector.shape_cast %0 : vector<1x896x28xf32> to vector<896x28xf32>
    %2 = arith.truncf %1 : vector<896x28xf32> to vector<896x28xbf16>
    %3 = vector.extract_strided_slice %2 {offsets = [0, 0], sizes = [768, 28], strides = [1, 1]} : vector<896x28xbf16> to vector<768x28xbf16>
    %4 = vector.extract_strided_slice %2 {offsets = [32, 0], sizes = [768, 28], strides = [1, 1]} : vector<896x28xbf16> to vector<768x28xbf16>
    %5 = vector.extract_strided_slice %2 {offsets = [64, 0], sizes = [768, 28], strides = [1, 1]} : vector<896x28xbf16> to vector<768x28xbf16>
    %6 = vector.extract_strided_slice %2 {offsets = [96, 0], sizes = [768, 28], strides = [1, 1]} : vector<896x28xbf16> to vector<768x28xbf16>
    %7 = vector.extract_strided_slice %2 {offsets = [128, 0], sizes = [768, 28], strides = [1, 1]} : vector<896x28xbf16> to vector<768x28xbf16>
    %8 = tpu.concatenate %3, %4, %5, %6, %7 in 1 : vector<768x28xbf16>, vector<768x28xbf16>, vector<768x28xbf16>, vector<768x28xbf16>, vector<768x28xbf16> -> vector<768x140xbf16>
    %c0_2 = arith.constant 0 : index
    %c0_3 = arith.constant 0 : index
    %9 = vector.load %arg2[%c0_2, %c0_3] : memref<140x144xbf16, #tpu.memory_space<vmem>>, vector<140x144xbf16>
    %cst = arith.constant dense<0.000000e+00> : vector<768x144xf32>
    %10 = tpu.matmul %8, %9, %cst {dimension_numbers = #tpu.dot_dimension_numbers<[1], [0], [0], [1], [0, 0, 1, 1], [], []>} : vector<768x140xbf16>, vector<140x144xbf16>, vector<768x144xf32> -> vector<768x144xf32>
    %c0_4 = arith.constant 0 : index
    %c0_5 = arith.constant 0 : index
    %11 = vector.load %arg3[%c0_4, %c0_5] : memref<1x144xf32, #tpu.memory_space<vmem>>, vector<1x144xf32>
    %12 = vector.broadcast %11 : vector<1x144xf32> to vector<768x144xf32>
    %13 = arith.addf %10, %12 : vector<768x144xf32>
    %cst_6 = arith.constant 0.000000e+00 : f32
    %14 = vector.broadcast %cst_6 : f32 to vector<768x144xf32>
    %15 = arith.maximumf %13, %14 : vector<768x144xf32>
    %16 = vector.extract_strided_slice %15 {offsets = [0, 0], sizes = [32, 144], strides = [1, 1]} : vector<768x144xf32> to vector<32x144xf32>
    %17 = vector.extract_strided_slice %15 {offsets = [32, 0], sizes = [32, 144], strides = [1, 1]} : vector<768x144xf32> to vector<32x144xf32>
    %18 = arith.maximumf %16, %17 : vector<32x144xf32>
    %19 = vector.extract_strided_slice %15 {offsets = [64, 0], sizes = [32, 144], strides = [1, 1]} : vector<768x144xf32> to vector<32x144xf32>
    %20 = vector.extract_strided_slice %15 {offsets = [96, 0], sizes = [32, 144], strides = [1, 1]} : vector<768x144xf32> to vector<32x144xf32>
    %21 = arith.maximumf %19, %20 : vector<32x144xf32>
    %22 = vector.extract_strided_slice %15 {offsets = [128, 0], sizes = [32, 144], strides = [1, 1]} : vector<768x144xf32> to vector<32x144xf32>
    %23 = vector.extract_strided_slice %15 {offsets = [160, 0], sizes = [32, 144], strides = [1, 1]} : vector<768x144xf32> to vector<32x144xf32>
    %24 = arith.maximumf %22, %23 : vector<32x144xf32>
    %25 = vector.extract_strided_slice %15 {offsets = [192, 0], sizes = [32, 144], strides = [1, 1]} : vector<768x144xf32> to vector<32x144xf32>
    %26 = vector.extract_strided_slice %15 {offsets = [224, 0], sizes = [32, 144], strides = [1, 1]} : vector<768x144xf32> to vector<32x144xf32>
    %27 = arith.maximumf %25, %26 : vector<32x144xf32>
    %28 = vector.extract_strided_slice %15 {offsets = [256, 0], sizes = [32, 144], strides = [1, 1]} : vector<768x144xf32> to vector<32x144xf32>
    %29 = vector.extract_strided_slice %15 {offsets = [288, 0], sizes = [32, 144], strides = [1, 1]} : vector<768x144xf32> to vector<32x144xf32>
    %30 = arith.maximumf %28, %29 : vector<32x144xf32>
    %31 = vector.extract_strided_slice %15 {offsets = [320, 0], sizes = [32, 144], strides = [1, 1]} : vector<768x144xf32> to vector<32x144xf32>
    %32 = vector.extract_strided_slice %15 {offsets = [352, 0], sizes = [32, 144], strides = [1, 1]} : vector<768x144xf32> to vector<32x144xf32>
    %33 = arith.maximumf %31, %32 : vector<32x144xf32>
    %34 = vector.extract_strided_slice %15 {offsets = [384, 0], sizes = [32, 144], strides = [1, 1]} : vector<768x144xf32> to vector<32x144xf32>
    %35 = vector.extract_strided_slice %15 {offsets = [416, 0], sizes = [32, 144], strides = [1, 1]} : vector<768x144xf32> to vector<32x144xf32>
    %36 = arith.maximumf %34, %35 : vector<32x144xf32>
    %37 = vector.extract_strided_slice %15 {offsets = [448, 0], sizes = [32, 144], strides = [1, 1]} : vector<768x144xf32> to vector<32x144xf32>
    %38 = vector.extract_strided_slice %15 {offsets = [480, 0], sizes = [32, 144], strides = [1, 1]} : vector<768x144xf32> to vector<32x144xf32>
    %39 = arith.maximumf %37, %38 : vector<32x144xf32>
    %40 = vector.extract_strided_slice %15 {offsets = [512, 0], sizes = [32, 144], strides = [1, 1]} : vector<768x144xf32> to vector<32x144xf32>
    %41 = vector.extract_strided_slice %15 {offsets = [544, 0], sizes = [32, 144], strides = [1, 1]} : vector<768x144xf32> to vector<32x144xf32>
    %42 = arith.maximumf %40, %41 : vector<32x144xf32>
    %43 = vector.extract_strided_slice %15 {offsets = [576, 0], sizes = [32, 144], strides = [1, 1]} : vector<768x144xf32> to vector<32x144xf32>
    %44 = vector.extract_strided_slice %15 {offsets = [608, 0], sizes = [32, 144], strides = [1, 1]} : vector<768x144xf32> to vector<32x144xf32>
    %45 = arith.maximumf %43, %44 : vector<32x144xf32>
    %46 = vector.extract_strided_slice %15 {offsets = [640, 0], sizes = [32, 144], strides = [1, 1]} : vector<768x144xf32> to vector<32x144xf32>
    %47 = vector.extract_strided_slice %15 {offsets = [672, 0], sizes = [32, 144], strides = [1, 1]} : vector<768x144xf32> to vector<32x144xf32>
    %48 = arith.maximumf %46, %47 : vector<32x144xf32>
    %49 = vector.extract_strided_slice %15 {offsets = [704, 0], sizes = [32, 144], strides = [1, 1]} : vector<768x144xf32> to vector<32x144xf32>
    %50 = vector.extract_strided_slice %15 {offsets = [736, 0], sizes = [32, 144], strides = [1, 1]} : vector<768x144xf32> to vector<32x144xf32>
    %51 = arith.maximumf %49, %50 : vector<32x144xf32>
    %52 = tpu.concatenate %18, %21, %24, %27, %30, %33, %36, %39, %42, %45, %48, %51 in 0 : vector<32x144xf32>, vector<32x144xf32>, vector<32x144xf32>, vector<32x144xf32>, vector<32x144xf32>, vector<32x144xf32>, vector<32x144xf32>, vector<32x144xf32>, vector<32x144xf32>, vector<32x144xf32>, vector<32x144xf32>, vector<32x144xf32> -> vector<384x144xf32>
    %53 = vector.extract_strided_slice %52 {offsets = [0, 1], sizes = [384, 143], strides = [1, 1]} : vector<384x144xf32> to vector<384x143xf32>
    %54 = vector.extract_strided_slice %52 {offsets = [0, 0], sizes = [384, 1], strides = [1, 1]} : vector<384x144xf32> to vector<384x1xf32>
    %55 = tpu.concatenate %53, %54 in 1 : vector<384x143xf32>, vector<384x1xf32> -> vector<384x144xf32>
    %56 = arith.maximumf %52, %55 : vector<384x144xf32>
    %57 = arith.truncf %56 : vector<384x144xf32> to vector<384x144xbf16>
    %c0_7 = arith.constant 0 : index
    %c0_8 = arith.constant 0 : index
    %58 = vector.load %arg4[%c0_7, %c0_8] : memref<144x72xbf16, #tpu.memory_space<vmem>>, vector<144x72xbf16>
    %cst_9 = arith.constant dense<0.000000e+00> : vector<384x72xf32>
    %59 = tpu.matmul %57, %58, %cst_9 {dimension_numbers = #tpu.dot_dimension_numbers<[1], [0], [0], [1], [0, 0, 1, 1], [], []>} : vector<384x144xbf16>, vector<144x72xbf16>, vector<384x72xf32> -> vector<384x72xf32>
    %60 = arith.truncf %59 : vector<384x72xf32> to vector<384x72xbf16>
    %61 = vector.extract_strided_slice %60 {offsets = [0, 0], sizes = [256, 72], strides = [1, 1]} : vector<384x72xbf16> to vector<256x72xbf16>
    %62 = vector.extract_strided_slice %60 {offsets = [32, 0], sizes = [256, 72], strides = [1, 1]} : vector<384x72xbf16> to vector<256x72xbf16>
    %63 = vector.extract_strided_slice %60 {offsets = [64, 0], sizes = [256, 72], strides = [1, 1]} : vector<384x72xbf16> to vector<256x72xbf16>
    %64 = vector.extract_strided_slice %60 {offsets = [96, 0], sizes = [256, 72], strides = [1, 1]} : vector<384x72xbf16> to vector<256x72xbf16>
    %65 = vector.extract_strided_slice %60 {offsets = [128, 0], sizes = [256, 72], strides = [1, 1]} : vector<384x72xbf16> to vector<256x72xbf16>
    %66 = tpu.concatenate %61, %62, %63, %64, %65 in 1 : vector<256x72xbf16>, vector<256x72xbf16>, vector<256x72xbf16>, vector<256x72xbf16>, vector<256x72xbf16> -> vector<256x360xbf16>
    %c0_10 = arith.constant 0 : index
    %c0_11 = arith.constant 0 : index
    %67 = vector.load %arg5[%c0_10, %c0_11] : memref<360x128xbf16, #tpu.memory_space<vmem>>, vector<360x128xbf16>
    %cst_12 = arith.constant dense<0.000000e+00> : vector<256x128xf32>
    %68 = tpu.matmul %66, %67, %cst_12 {dimension_numbers = #tpu.dot_dimension_numbers<[1], [0], [0], [1], [0, 0, 1, 1], [], []>} : vector<256x360xbf16>, vector<360x128xbf16>, vector<256x128xf32> -> vector<256x128xf32>
    %c0_13 = arith.constant 0 : index
    %c0_14 = arith.constant 0 : index
    %69 = vector.load %arg6[%c0_13, %c0_14] : memref<1x128xf32, #tpu.memory_space<vmem>>, vector<1x128xf32>
    %70 = vector.broadcast %69 : vector<1x128xf32> to vector<256x128xf32>
    %71 = arith.addf %68, %70 : vector<256x128xf32>
    %cst_15 = arith.constant 0.000000e+00 : f32
    %72 = vector.broadcast %cst_15 : f32 to vector<256x128xf32>
    %73 = arith.maximumf %71, %72 : vector<256x128xf32>
    %74 = vector.extract_strided_slice %73 {offsets = [0, 0], sizes = [32, 128], strides = [1, 1]} : vector<256x128xf32> to vector<32x128xf32>
    %75 = vector.extract_strided_slice %73 {offsets = [32, 0], sizes = [32, 128], strides = [1, 1]} : vector<256x128xf32> to vector<32x128xf32>
    %76 = arith.maximumf %74, %75 : vector<32x128xf32>
    %77 = vector.extract_strided_slice %73 {offsets = [64, 0], sizes = [32, 128], strides = [1, 1]} : vector<256x128xf32> to vector<32x128xf32>
    %78 = vector.extract_strided_slice %73 {offsets = [96, 0], sizes = [32, 128], strides = [1, 1]} : vector<256x128xf32> to vector<32x128xf32>
    %79 = arith.maximumf %77, %78 : vector<32x128xf32>
    %80 = vector.extract_strided_slice %73 {offsets = [128, 0], sizes = [32, 128], strides = [1, 1]} : vector<256x128xf32> to vector<32x128xf32>
    %81 = vector.extract_strided_slice %73 {offsets = [160, 0], sizes = [32, 128], strides = [1, 1]} : vector<256x128xf32> to vector<32x128xf32>
    %82 = arith.maximumf %80, %81 : vector<32x128xf32>
    %83 = vector.extract_strided_slice %73 {offsets = [192, 0], sizes = [32, 128], strides = [1, 1]} : vector<256x128xf32> to vector<32x128xf32>
    %84 = vector.extract_strided_slice %73 {offsets = [224, 0], sizes = [32, 128], strides = [1, 1]} : vector<256x128xf32> to vector<32x128xf32>
    %85 = arith.maximumf %83, %84 : vector<32x128xf32>
    %86 = tpu.concatenate %76, %79, %82, %85 in 0 : vector<32x128xf32>, vector<32x128xf32>, vector<32x128xf32>, vector<32x128xf32> -> vector<128x128xf32>
    %87 = vector.extract_strided_slice %86 {offsets = [0, 1], sizes = [128, 127], strides = [1, 1]} : vector<128x128xf32> to vector<128x127xf32>
    %88 = vector.extract_strided_slice %86 {offsets = [0, 0], sizes = [128, 1], strides = [1, 1]} : vector<128x128xf32> to vector<128x1xf32>
    %89 = tpu.concatenate %87, %88 in 1 : vector<128x127xf32>, vector<128x1xf32> -> vector<128x128xf32>
    %90 = arith.maximumf %86, %89 : vector<128x128xf32>
    %91 = arith.truncf %90 : vector<128x128xf32> to vector<128x128xbf16>
    %c0_16 = arith.constant 0 : index
    %c0_17 = arith.constant 0 : index
    %92 = vector.load %arg7[%c0_16, %c0_17] : memref<128x64xbf16, #tpu.memory_space<vmem>>, vector<128x64xbf16>
    %cst_18 = arith.constant dense<0.000000e+00> : vector<128x64xf32>
    %93 = tpu.matmul %91, %92, %cst_18 {dimension_numbers = #tpu.dot_dimension_numbers<[1], [0], [0], [1], [0, 0, 1, 1], [], []>} : vector<128x128xbf16>, vector<128x64xbf16>, vector<128x64xf32> -> vector<128x64xf32>
    %94 = arith.truncf %93 : vector<128x64xf32> to vector<128x64xbf16>
    %95 = vector.extract_strided_slice %94 {offsets = [0, 0], sizes = [32, 64], strides = [1, 1]} : vector<128x64xbf16> to vector<32x64xbf16>
    %96 = vector.extract_strided_slice %94 {offsets = [32, 0], sizes = [32, 64], strides = [1, 1]} : vector<128x64xbf16> to vector<32x64xbf16>
    %97 = vector.extract_strided_slice %94 {offsets = [64, 0], sizes = [32, 64], strides = [1, 1]} : vector<128x64xbf16> to vector<32x64xbf16>
    %98 = vector.extract_strided_slice %94 {offsets = [96, 0], sizes = [32, 64], strides = [1, 1]} : vector<128x64xbf16> to vector<32x64xbf16>
    %99 = tpu.concatenate %95, %96, %97, %98 in 1 : vector<32x64xbf16>, vector<32x64xbf16>, vector<32x64xbf16>, vector<32x64xbf16> -> vector<32x256xbf16>
    %c0_19 = arith.constant 0 : index
    %c0_20 = arith.constant 0 : index
    %100 = vector.load %arg8[%c0_19, %c0_20] : memref<256x120xbf16, #tpu.memory_space<vmem>>, vector<256x120xbf16>
    %cst_21 = arith.constant dense<0.000000e+00> : vector<32x120xf32>
    %101 = tpu.matmul %99, %100, %cst_21 {dimension_numbers = #tpu.dot_dimension_numbers<[1], [0], [0], [1], [0, 0, 1, 1], [], []>} : vector<32x256xbf16>, vector<256x120xbf16>, vector<32x120xf32> -> vector<32x120xf32>
    %c0_22 = arith.constant 0 : index
    %c0_23 = arith.constant 0 : index
    %102 = vector.load %arg9[%c0_22, %c0_23] : memref<1x120xf32, #tpu.memory_space<vmem>>, vector<1x120xf32>
    %103 = vector.broadcast %102 : vector<1x120xf32> to vector<32x120xf32>
    %104 = arith.addf %101, %103 : vector<32x120xf32>
    %105 = arith.truncf %104 : vector<32x120xf32> to vector<32x120xbf16>
    %c0_24 = arith.constant 0 : index
    %c0_25 = arith.constant 0 : index
    %106 = vector.load %arg10[%c0_24, %c0_25] : memref<120x84xbf16, #tpu.memory_space<vmem>>, vector<120x84xbf16>
    %cst_26 = arith.constant dense<0.000000e+00> : vector<32x84xf32>
    %107 = tpu.matmul %105, %106, %cst_26 {dimension_numbers = #tpu.dot_dimension_numbers<[1], [0], [0], [1], [0, 0, 1, 1], [], []>} : vector<32x120xbf16>, vector<120x84xbf16>, vector<32x84xf32> -> vector<32x84xf32>
    %c0_27 = arith.constant 0 : index
    %c0_28 = arith.constant 0 : index
    %108 = vector.load %arg11[%c0_27, %c0_28] : memref<1x84xf32, #tpu.memory_space<vmem>>, vector<1x84xf32>
    %109 = vector.broadcast %108 : vector<1x84xf32> to vector<32x84xf32>
    %110 = arith.addf %107, %109 : vector<32x84xf32>
    %111 = arith.truncf %110 : vector<32x84xf32> to vector<32x84xbf16>
    %c0_29 = arith.constant 0 : index
    %c0_30 = arith.constant 0 : index
    %112 = vector.load %arg12[%c0_29, %c0_30] : memref<84x128xbf16, #tpu.memory_space<vmem>>, vector<84x128xbf16>
    %cst_31 = arith.constant dense<0.000000e+00> : vector<32x128xf32>
    %113 = tpu.matmul %111, %112, %cst_31 {dimension_numbers = #tpu.dot_dimension_numbers<[1], [0], [0], [1], [0, 0, 1, 1], [], []>} : vector<32x84xbf16>, vector<84x128xbf16>, vector<32x128xf32> -> vector<32x128xf32>
    %c0_32 = arith.constant 0 : index
    %c0_33 = arith.constant 0 : index
    %114 = vector.load %arg13[%c0_32, %c0_33] : memref<1x128xf32, #tpu.memory_space<vmem>>, vector<1x128xf32>
    %115 = vector.broadcast %114 : vector<1x128xf32> to vector<32x128xf32>
    %116 = arith.addf %113, %115 : vector<32x128xf32>
    %c0_34 = arith.constant 0 : index
    %c0_35 = arith.constant 0 : index
    %117 = vector.load %arg14[%c0_34, %c0_35] : memref<32x128xf32, #tpu.memory_space<vmem>>, vector<32x128xf32>
    tpu.vector_store %arg14[%c0_34, %c0_35], %116 {strides = array<i32>} : memref<32x128xf32, #tpu.memory_space<vmem>>, vector<32x128xf32>,
    return
  }
  func.func @transform_0(%arg0: i32) -> (i32, i32, i32) {
    %c0_i32 = arith.constant 0 : i32
    %c0_i32_0 = arith.constant 0 : i32
    %c0_i32_1 = arith.constant 0 : i32
    return %arg0, %c0_i32, %c0_i32_0 : i32, i32, i32
  }
  func.func @transform_1(%arg0: i32) -> (i32, i32) {
    %c0_i32 = arith.constant 0 : i32
    %c0_i32_0 = arith.constant 0 : i32
    %c0_i32_1 = arith.constant 0 : i32
    return %c0_i32, %c0_i32_0 : i32, i32
  }
  func.func @transform_2(%arg0: i32) -> (i32, i32) {
    %c0_i32 = arith.constant 0 : i32
    %c0_i32_0 = arith.constant 0 : i32
    %c0_i32_1 = arith.constant 0 : i32
    return %c0_i32, %c0_i32_0 : i32, i32
  }
  func.func @transform_3(%arg0: i32) -> (i32, i32) {
    %c0_i32 = arith.constant 0 : i32
    %c0_i32_0 = arith.constant 0 : i32
    %c0_i32_1 = arith.constant 0 : i32
    return %c0_i32, %c0_i32_0 : i32, i32
  }
  func.func @transform_4(%arg0: i32) -> (i32, i32) {
    %c0_i32 = arith.constant 0 : i32
    %c0_i32_0 = arith.constant 0 : i32
    %c0_i32_1 = arith.constant 0 : i32
    return %c0_i32, %c0_i32_0 : i32, i32
  }
  func.func @transform_5(%arg0: i32) -> (i32, i32) {
    %c0_i32 = arith.constant 0 : i32
    %c0_i32_0 = arith.constant 0 : i32
    %c0_i32_1 = arith.constant 0 : i32
    return %c0_i32, %c0_i32_0 : i32, i32
  }
  func.func @transform_6(%arg0: i32) -> (i32, i32) {
    %c0_i32 = arith.constant 0 : i32
    %c0_i32_0 = arith.constant 0 : i32
    %c0_i32_1 = arith.constant 0 : i32
    return %c0_i32, %c0_i32_0 : i32, i32
  }
  func.func @transform_7(%arg0: i32) -> (i32, i32) {
    %c0_i32 = arith.constant 0 : i32
    %c0_i32_0 = arith.constant 0 : i32
    %c0_i32_1 = arith.constant 0 : i32
    return %c0_i32, %c0_i32_0 : i32, i32
  }
  func.func @transform_8(%arg0: i32) -> (i32, i32) {
    %c0_i32 = arith.constant 0 : i32
    %c0_i32_0 = arith.constant 0 : i32
    %c0_i32_1 = arith.constant 0 : i32
    return %c0_i32, %c0_i32_0 : i32, i32
  }
  func.func @transform_9(%arg0: i32) -> (i32, i32) {
    %c0_i32 = arith.constant 0 : i32
    %c0_i32_0 = arith.constant 0 : i32
    %c0_i32_1 = arith.constant 0 : i32
    return %c0_i32, %c0_i32_0 : i32, i32
  }
  func.func @transform_10(%arg0: i32) -> (i32, i32) {
    %c0_i32 = arith.constant 0 : i32
    %c0_i32_0 = arith.constant 0 : i32
    %c0_i32_1 = arith.constant 0 : i32
    return %c0_i32, %c0_i32_0 : i32, i32
  }
  func.func @transform_11(%arg0: i32) -> (i32, i32) {
    %c0_i32 = arith.constant 0 : i32
    %c0_i32_0 = arith.constant 0 : i32
    %c0_i32_1 = arith.constant 0 : i32
    return %c0_i32, %c0_i32_0 : i32, i32
  }
  func.func @transform_12(%arg0: i32) -> (i32, i32) {
    %c0_i32 = arith.constant 0 : i32
    %c0_i32_0 = arith.constant 0 : i32
    %c0_i32_1 = arith.constant 0 : i32
    return %c0_i32, %c0_i32_0 : i32, i32
  }
  func.func @transform_13(%arg0: i32) -> (i32, i32) {
    %c0_i32 = arith.constant 0 : i32
    %c0_i32_0 = arith.constant 0 : i32
    return %arg0, %c0_i32 : i32, i32
  }
}

</mosaic_0001>

<bundles_post_ra>
// kernel: lenet5_forward.1
= control target key start
LH: loop header
LB: loop body
LE: loop exit
PB: predicated region body
PF: predicated region fallthrough
CT: control target
= control target key end

     0   :  { %s7289_s25 = smov 0   ;;  %s11298_s0 = inlined_call_operand.vmem [shape: f32[2,896,28], index: 0, kind: input, shape index: {}]   ;;  %s11299_s1 = inlined_call_operand.vmem [shape: bf16[140,144], index: 1, kind: input, shape index: {}]   ;;  %s11300_s2 = inlined_call_operand.vmem [shape: f32[1,144], index: 2, kind: input, shape index: {}]   ;;  %s11301_s3 = inlined_call_operand.vmem [shape: bf16[144,72], index: 3, kind: input, shape index: {}]   ;;  %s11302_s4 = inlined_call_operand.vmem [shape: bf16[360,128], index: 4, kind: input, shape index: {}]   ;;  %s11303_s5 = inlined_call_operand.vmem [shape: f32[1,128], index: 5, kind: input, shape index: {}]   ;;  %s11304_s6 = inlined_call_operand.vmem [shape: bf16[128,64], index: 6, kind: input, shape index: {}]   ;;  %s11305_s7 = inlined_call_operand.vmem [shape: bf16[256,120], index: 7, kind: input, shape index: {}]   ;;  %s11306_s8 = inlined_call_operand.vmem [shape: f32[1,120], index: 8, kind: input, shape index: {}]   ;;  %s11307_s9 = inlined_call_operand.vmem [shape: bf16[120,84], index: 9, kind: input, shape index: {}]   ;;  %s11308_s10 = inlined_call_operand.vmem [shape: f32[1,84], index: 10, kind: input, shape index: {}]   ;;  %s11309_s11 = inlined_call_operand.vmem [shape: bf16[84,128], index: 11, kind: input, shape index: {}]   ;;  %s11310_s12 = inlined_call_operand.vmem [shape: f32[1,128], index: 12, kind: input, shape index: {}]   ;;  %s11311_s13 = inlined_call_operand.vmem [shape: f32[64,128], index: 13, kind: output, shape index: {}]  }
   0x1 LB: > { %s7295_s26 = sadd.s32 4294967295, %s7206_s25   ;;  %p6189_p0 = scmp.ge.s32.totalorder %s7206_s25, 1  ;;  %s7206_s25 = sphi %s7289_s25, %s23_s25  }
   0x2   : > { %p387_p1 = scmp.lt.s32.totalorder %s7206_s25, 3 }
   0x4   : > { %p388_p2 = pnand %p6189_p0, %p387_p1 }
   0x6   : > { %391 = sbr.rel (%p388_p2) target bundleno = 2700 (0xa8c), region = 72 }
   0xb   : > { %p431_p3 = scmp.lt.s32.totalorder %s7295_s26, 1  ;;  %s7208_s15 = smov 112   ;;  %vm2024_vm0 = vcmask 1045504   ;;  %vm1927_vm1 = vcmask 97280   ;;  %vm1331_vm2 = vcmask 228352   ;;  %vm1476_vm3 = vcmask 457728  }
   0xc   : > { %s7209_s16 = smov 28   ;;  %s7210_s17 = smov 84   ;;  %vm1573_vm4 = vcmask 687104   ;;  %vm1670_vm5 = vcmask 916480   ;;  %vm3892_vm6 = vcmask 121856   ;;  %vm3603_vm7 = vcmask 1039360  }
   0xd   : > { %s432_s27 = scalar_select %p431_p3, %s7295_s26, 1  ;;  %vm4157_vm8 = vcmask 130048   ;;  %vm4784_vm9 = vcmask 588800   ;;  %vm5180_vm10 = vcmask 1043456   ;;  %vm4881_vm11 = vcmask 719872  }
   0xe   : > { %s7211_s18 = smov 56   ;;  %s7212_s21 = smov 15   ;;  %vm4930_vm12 = vcmask 261120   ;;  %vm5147_vm13 = vcmask 850944   ;;  %vm5764_vm14 = vcmask 523264   ;;  %vm6102_vm15 = vcmask 1041408  }
   0xf   : > { %s6776_s28 = smul.u32 896, %s432_s27  ;;  %s7213_s22 = smov 127  }
  0x10   : > { %s7214_s20 = smov 72   ;;  %s7216_s29 = smov 88  }
  0x11   : > { %s7304_s14 = scalar_lea.vmem %s11298_s0, %s6776_s28  ;;  %s7217_s30 = smov 32  }
  0x12   : > { %v463_v0 = vld [vmem:[%s7304_s14 + $0xa0] sm:$0xff]  ;;  %v464_v1 = vld [vmem:[%s7304_s14 + $0xa8] sm:$0xff]  ;;  %v465_v7 = vld [vmem:[%s7304_s14 + $0xb0] sm:$0xff]  ;;  %s6191_s19 = sshll.u32 %s7295_s26, 2 }
  0x13   : > { %v459_v2 = vld [vmem:[%s7304_s14 + $0x80] sm:$0xff]  ;;  %v575_v3 = vpack.c.bf16 %v463_v0, %v463_v0  ;;  %v576_v4 = vpack.c.bf16 %v464_v1, %v464_v1  ;;  %v460_v5 = vld [vmem:[%s7304_s14 + $0x88] sm:$0xff]  ;;  %v466_v8 = vld [vmem:[%s7304_s14 + $0xb8] sm:$0xff]  ;;  %v577_v10 = vpack.c.bf16 %v465_v7, %v465_v7  ;;  %p437_p4 = scmp.lt.s32.totalorder %s6191_s19, 7 }
  0x14   : > { %v571_v6 = vpack.c.bf16 %v459_v2, %v459_v2  ;;  %v572_v9 = vpack.c.bf16 %v460_v5, %v460_v5  ;;  %v461_v11 = vld [vmem:[%s7304_s14 + $0x90] sm:$0xff]  ;;  %v462_v12 = vld [vmem:[%s7304_s14 + $0x98] sm:$0xff]  ;;  %v578_v16 = vpack.c.bf16 %v466_v8, %v466_v8  ;;  %v467_v24 = vld [vmem:[%s7304_s14 + $0xc0] sm:$0xff] }
  0x15   : > { %v783_v13 = vunpack.c.l.b16 %v575_v3  ;;  %v784_v14 = vunpack.c.l.b16 %v576_v4  ;;  %v573_v18 = vpack.c.bf16 %v461_v11, %v461_v11  ;;  %v574_v19 = vpack.c.bf16 %v462_v12, %v462_v12  ;;  %v468_v25 = vld [vmem:[%s7304_s14 + $0xc8] sm:$0xff]  ;;  %v473_v28 = vld [vmem:[%s7304_s14 + $0xf0] sm:$0xff]  ;;  %v474_v29 = vld [vmem:[%s7304_s14 + $0xf8] sm:$0xff]  ;;  %s11837_s19 = smov (!%p437_p4, %s6191_s19), 7 }
  0x16   : > { %v779_v15 = vunpack.c.l.b16 %v571_v6  ;;  %v780_v17 = vunpack.c.l.b16 %v572_v9  ;;  %v785_v22 = vunpack.c.l.b16 %v577_v10  ;;  %v786_v23 = vunpack.c.l.b16 %v578_v16  ;;  %v471_v30 = vld [vmem:[%s7304_s14 + $0xe0] sm:$0xff]  ;;  %v472_v31 = vld [vmem:[%s7304_s14 + $0xe8] sm:$0xff]  ;;  %v469_v38 = vld [vmem:[%s7304_s14 + $0xd0] sm:$0xff]  ;;  %s6192_s23 = sshll.u32 %s11837_s19, 3 }
  0x17   : > { %v7314_v20 = vpack.c.b16 %v784_v14, %v783_v13  ;;  %v781_v26 = vunpack.c.l.b16 %v573_v18  ;;  %v782_v27 = vunpack.c.l.b16 %v574_v19  ;;  %v579_v32 = vpack.c.bf16 %v467_v24, %v467_v24  ;;  %v470_v39 = vld [vmem:[%s7304_s14 + $0xd8] sm:$0xff]  ;;  %v479_v49 = vld [vmem:[%s7304_s14 + $0x120] sm:$0xff]  ;;  %v480_v50 = vld [vmem:[%s7304_s14 + $0x128] sm:$0xff] }
  0x18   : > { %v7316_v21 = vpack.c.b16 %v780_v17, %v779_v15  ;;  %v580_v33 = vpack.c.bf16 %v468_v25, %v468_v25  ;;  %v7328_v34 = vpack.c.b16 %v786_v23, %v785_v22  ;;  %v585_v35 = vpack.c.bf16 %v473_v28, %v473_v28  ;;  %v477_v53 = vld [vmem:[%s7304_s14 + $0x110] sm:$0xff]  ;;  %v478_v54 = vld [vmem:[%s7304_s14 + $0x118] sm:$0xff]  ;;  %v475_v57 = vld [vmem:[%s7304_s14 + $0x100] sm:$0xff] }
  0x19   : > { %1239 = vrot.lane.b32.xlu1 %v7314_v20, %s7208_s15  ;;  %v586_v36 = vpack.c.bf16 %v474_v29, %v474_v29  ;;  %v583_v37 = vpack.c.bf16 %v471_v30, %v471_v30  ;;  %v7332_v40 = vpack.c.b16 %v782_v27, %v781_v26  ;;  %v584_v41 = vpack.c.bf16 %v472_v31, %v472_v31  ;;  %v476_v58 = vld [vmem:[%s7304_s14 + $0x108] sm:$0xff]  ;;  %v485_v8 = vld [vmem:[%s7304_s14 + $0x150] sm:$0xff]  ;;  %v486_v9 = vld [vmem:[%s7304_s14 + $0x158] sm:$0xff] }
  0x1a   : > { %1235 = vrot.lane.b32.xlu0 %v7316_v21, %s7208_s15  ;;  %v787_v42 = vunpack.c.l.b16 %v579_v32  ;;  %v788_v43 = vunpack.c.l.b16 %v580_v33  ;;  %v581_v45 = vpack.c.bf16 %v469_v38, %v469_v38  ;;  %v582_v46 = vpack.c.bf16 %v470_v39, %v470_v39  ;;  %v483_v10 = vld [vmem:[%s7304_s14 + $0x140] sm:$0xff]  ;;  %v484_v13 = vld [vmem:[%s7304_s14 + $0x148] sm:$0xff]  ;;  %v481_v14 = vld [vmem:[%s7304_s14 + $0x130] sm:$0xff] }
  0x1b   : > { %v793_v47 = vunpack.c.l.b16 %v585_v35  ;;  %v794_v48 = vunpack.c.l.b16 %v586_v36  ;;  %v791_v51 = vunpack.c.l.b16 %v583_v37  ;;  %v792_v52 = vunpack.c.l.b16 %v584_v41  ;;  %v482_v15 = vld [vmem:[%s7304_s14 + $0x138] sm:$0xff]  ;;  %v489_v29 = vld [vmem:[%s7304_s14 + $0x170] sm:$0xff]  ;;  %v447_v33 = vld [vmem:[%s7304_s14 + $0x20] sm:$0xff] }
  0x1c   : > { %v7334_v44 = vpack.c.b16 %v788_v43, %v787_v42  ;;  %v789_v55 = vunpack.c.l.b16 %v581_v45  ;;  %v790_v56 = vunpack.c.l.b16 %v582_v46  ;;  %v591_v59 = vpack.c.bf16 %v479_v49, %v479_v49  ;;  %v490_v30 = vld [vmem:[%s7304_s14 + $0x178] sm:$0xff]  ;;  %v448_v35 = vld [vmem:[%s7304_s14 + $0x28] sm:$0xff]  ;;  %v487_v38 = vld [vmem:[%s7304_s14 + $0x160] sm:$0xff] }
  0x1d   : > { %v7348_v60 = vpack.c.b16 %v794_v48, %v793_v47  ;;  %v592_v61 = vpack.c.bf16 %v480_v50, %v480_v50  ;;  %v589_v62 = vpack.c.bf16 %v477_v53, %v477_v53  ;;  %v590_v63 = vpack.c.bf16 %v478_v54, %v478_v54  ;;  %v488_v39 = vld [vmem:[%s7304_s14 + $0x168] sm:$0xff]  ;;  %v451_v53 = vld [vmem:[%s7304_s14 + $0x40] sm:$0xff] }
  0x1e   : > { %1243 = vrot.lane.b32.xlu2 %v7334_v44, %s7208_s15  ;;  %v7350_v0 = vpack.c.b16 %v792_v52, %v791_v51  ;;  %v7352_v1 = vpack.c.b16 %v790_v56, %v789_v55  ;;  %v587_v2 = vpack.c.bf16 %v475_v57, %v475_v57  ;;  %v588_v3 = vpack.c.bf16 %v476_v58, %v476_v58  ;;  %v452_v54 = vld [vmem:[%s7304_s14 + $0x48] sm:$0xff]  ;;  %v455_v57 = vld [vmem:[%s7304_s14 + $0x60] sm:$0xff] }
  0x1f   : > { %v799_v4 = vunpack.c.l.b16 %v591_v59  ;;  %v800_v5 = vunpack.c.l.b16 %v592_v61  ;;  %v797_v6 = vunpack.c.l.b16 %v589_v62  ;;  %v798_v7 = vunpack.c.l.b16 %v590_v63  ;;  %v456_v58 = vld [vmem:[%s7304_s14 + $0x68] sm:$0xff]  ;;  %v491_v62 = vld [vmem:[%s7304_s14 + $0x180] sm:$0xff] }
  0x20   : > { %11493 = vst [vmem:[#allocation2_spill] sm:$0xff] %v7350_v0  ;;  %v795_v11 = vunpack.c.l.b16 %v587_v2  ;;  %v796_v12 = vunpack.c.l.b16 %v588_v3  ;;  %v597_v16 = vpack.c.bf16 %v485_v8, %v485_v8  ;;  %v598_v17 = vpack.c.bf16 %v486_v9, %v486_v9  ;;  %v492_v63 = vld [vmem:[%s7304_s14 + $0x188] sm:$0xff] }
  0x21   : > { %1241 = vrot.lane.b32.xlu1 %v7328_v34, %s7208_s15  ;;  %v7366_v18 = vpack.c.b16 %v800_v5, %v799_v4  ;;  %v7368_v19 = vpack.c.b16 %v798_v7, %v797_v6  ;;  %v595_v22 = vpack.c.bf16 %v483_v10, %v483_v10  ;;  %v596_v23 = vpack.c.bf16 %v484_v13, %v484_v13 }
  0x22   : > { %1237 = vrot.lane.b32.xlu0 %v7332_v40, %s7208_s15  ;;  %v7370_v24 = vpack.c.b16 %v796_v12, %v795_v11  ;;  %v593_v25 = vpack.c.bf16 %v481_v14, %v481_v14  ;;  %v594_v26 = vpack.c.bf16 %v482_v15, %v482_v15  ;;  %v805_v27 = vunpack.c.l.b16 %v597_v16  ;;  %v493_v15 = vld [vmem:[%s7304_s14 + $0x190] sm:$0xff] }
  0x23   : > { %11494 = vst [vmem:[#allocation3_spill] sm:$0xff] %v7366_v18  ;;  %v806_v28 = vunpack.c.l.b16 %v598_v17  ;;  %v803_v31 = vunpack.c.l.b16 %v595_v22  ;;  %v804_v32 = vunpack.c.l.b16 %v596_v23  ;;  %v601_v42 = vpack.c.bf16 %v489_v29, %v489_v29  ;;  %v453_v16 = vld [vmem:[%s7304_s14 + $0x50] sm:$0xff]  ;;  %v454_v17 = vld [vmem:[%s7304_s14 + $0x58] sm:$0xff] }
  0x24   : > { %11495 = vst [vmem:[#allocation4_spill] sm:$0xff] %v7368_v19  ;;  %v801_v36 = vunpack.c.l.b16 %v593_v25  ;;  %v802_v37 = vunpack.c.l.b16 %v594_v26  ;;  %v602_v43 = vpack.c.bf16 %v490_v30, %v490_v30  ;;  %v559_v45 = vpack.c.bf16 %v447_v33, %v447_v33  ;;  %v494_v25 = vld [vmem:[%s7304_s14 + $0x198] sm:$0xff]  ;;  %v449_v26 = vld [vmem:[%s7304_s14 + $0x30] sm:$0xff] }
  0x25   : > { %v7384_v41 = vpack.c.b16 %v806_v28, %v805_v27  ;;  %v560_v46 = vpack.c.bf16 %v448_v35, %v448_v35  ;;  %v7386_v47 = vpack.c.b16 %v804_v32, %v803_v31  ;;  %v599_v49 = vpack.c.bf16 %v487_v38, %v487_v38  ;;  %v450_v27 = vld [vmem:[%s7304_s14 + $0x38] sm:$0xff] }
  0x26   : > { %1245 = vrot.lane.b32.xlu2 %v7352_v1, %s7208_s15  ;;  %v7388_v48 = vpack.c.b16 %v802_v37, %v801_v36  ;;  %v600_v50 = vpack.c.bf16 %v488_v39, %v488_v39  ;;  %v767_v51 = vunpack.c.l.b16 %v559_v45  ;;  %v809_v55 = vunpack.c.l.b16 %v601_v42  ;;  %v495_v45 = vld [vmem:[%s7304_s14 + $0x1a0] sm:$0xff] }
  0x27   : > { %11496 = vst [vmem:[#allocation5_spill] sm:$0xff] %v7384_v41  ;;  %v768_v52 = vunpack.c.l.b16 %v560_v46  ;;  %v810_v56 = vunpack.c.l.b16 %v602_v43  ;;  %v807_v59 = vunpack.c.l.b16 %v599_v49  ;;  %v563_v2 = vpack.c.bf16 %v451_v53, %v451_v53  ;;  %v496_v46 = vld [vmem:[%s7304_s14 + $0x1a8] sm:$0xff] }
  0x28   : > { %11497 = vst [vmem:[#allocation6_spill] sm:$0xff] %v7386_v47  ;;  %v808_v61 = vunpack.c.l.b16 %v600_v50  ;;  %v564_v3 = vpack.c.bf16 %v452_v54, %v452_v54  ;;  %v567_v5 = vpack.c.bf16 %v455_v57, %v455_v57  ;;  %v568_v6 = vpack.c.bf16 %v456_v58, %v456_v58 }
  0x29   : > { %1249 = vrot.lane.b32.xlu1 %v7348_v60, %s7208_s15  ;;  %11498 = vst [vmem:[#allocation7_spill] sm:$0xff] %v7388_v48  ;;  %v7402_v4 = vpack.c.b16 %v768_v52, %v767_v51  ;;  %v7404_v7 = vpack.c.b16 %v810_v56, %v809_v55  ;;  %v603_v9 = vpack.c.bf16 %v491_v62, %v491_v62  ;;  %v771_v11 = vunpack.c.l.b16 %v563_v2  ;;  %v457_v51 = vld [vmem:[%s7304_s14 + $0x70] sm:$0xff]  ;;  %v458_v52 = vld [vmem:[%s7304_s14 + $0x78] sm:$0xff] }
  0x2a   : > { %1247 = vrot.lane.b32.xlu0 %v7350_v0, %s7208_s15  ;;  %v7406_v8 = vpack.c.b16 %v808_v61, %v807_v59  ;;  %v604_v10 = vpack.c.bf16 %v492_v63, %v492_v63  ;;  %v772_v12 = vunpack.c.l.b16 %v564_v3  ;;  %v775_v13 = vunpack.c.l.b16 %v567_v5 }
  0x2b   : > { %11499 = vst [vmem:[#allocation8_spill] sm:$0xff] %v7404_v7  ;;  %v776_v14 = vunpack.c.l.b16 %v568_v6  ;;  %v811_v22 = vunpack.c.l.b16 %v603_v9  ;;  %v605_v30 = vpack.c.bf16 %v493_v15, %v493_v15  ;;  %v565_v31 = vpack.c.bf16 %v453_v16, %v453_v16  ;;  %v497_v6 = vld [vmem:[%s7304_s14 + $0x1b0] sm:$0xff]  ;;  %v498_v9 = vld [vmem:[%s7304_s14 + $0x1b8] sm:$0xff]  ;;  %v6259_v15 = vld [vmem:[%s11299_s1 + $0x80] sm:$0xf] }
  0x2c   : > { %11500 = vst [vmem:[#allocation9_spill] sm:$0xff] %v7406_v8  ;;  %v812_v23 = vunpack.c.l.b16 %v604_v10  ;;  %v7420_v28 = vpack.c.b16 %v772_v12, %v771_v11  ;;  %v566_v32 = vpack.c.bf16 %v454_v17, %v454_v17  ;;  %v606_v33 = vpack.c.bf16 %v494_v25, %v494_v25  ;;  %v499_v12 = vld [vmem:[%s7304_s14 + $0x1c0] sm:$0xff]  ;;  %v6692_v16 = vld [vmem:[%s11299_s1 + $0x84] sm:$0x30]  ;;  %v6261_v25 = vld [vmem:[%s11299_s1 + $0x88] sm:$0x30] }
  0x2d   : > { %v7422_v29 = vpack.c.b16 %v776_v14, %v775_v13  ;;  %v561_v36 = vpack.c.bf16 %v449_v26, %v449_v26  ;;  %v562_v37 = vpack.c.bf16 %v450_v27, %v450_v27  ;;  %v773_v38 = vunpack.c.l.b16 %v565_v31  ;;  %v500_v17 = vld [vmem:[%s7304_s14 + $0x1c8] sm:$0xff] }
  0x2e   : > { %1251 = vrot.lane.b32.xlu2 %v7370_v24, %s7208_s15  ;;  %v7424_v35 = vpack.c.b16 %v812_v23, %v811_v22  ;;  %v774_v39 = vunpack.c.l.b16 %v566_v32  ;;  %v813_v42 = vunpack.c.l.b16 %v605_v30  ;;  %v814_v43 = vunpack.c.l.b16 %v606_v33  ;;  %v6691_v23 = vld [vmem:[%s11299_s1 + $0x84] sm:$0xf] }
  0x2f   : > { %v769_v49 = vunpack.c.l.b16 %v561_v36  ;;  %v770_v50 = vunpack.c.l.b16 %v562_v37  ;;  %v607_v54 = vpack.c.bf16 %v495_v45, %v495_v45  ;;  %v608_v55 = vpack.c.bf16 %v496_v46, %v496_v46 }
  0x30   : > { %11501 = vst [vmem:[#allocation10_spill] sm:$0xff] %v7424_v35  ;;  %v7436_v53 = vpack.c.b16 %v774_v39, %v773_v38  ;;  %v7438_v56 = vpack.c.b16 %v814_v43, %v813_v42  ;;  %v569_v58 = vpack.c.bf16 %v457_v51, %v457_v51  ;;  %v570_v59 = vpack.c.bf16 %v458_v52, %v458_v52  ;;  %v501_v38 = vld [vmem:[%s7304_s14 + $0x1d0] sm:$0xff]  ;;  %v502_v39 = vld [vmem:[%s7304_s14 + $0x1d8] sm:$0xff]  ;;  %v6701_v42 = vld [vmem:[%s11301_s3 + $0x40] sm:$0xff] }
  0x31   : > { %1255 = vrot.lane.b32.xlu1 %v7366_v18, %s7208_s15  ;;  %v7440_v57 = vpack.c.b16 %v770_v50, %v769_v49  ;;  %v815_v61 = vunpack.c.l.b16 %v607_v54  ;;  %v816_v62 = vunpack.c.l.b16 %v608_v55  ;;  %v609_v10 = vpack.c.bf16 %v497_v6, %v497_v6  ;;  %v6700_v51 = vld [vmem:[%s11301_s3 + $0x38] sm:$0xff]  ;;  %v503_v54 = vld [vmem:[%s7304_s14 + $0x1e0] sm:$0xff]  ;;  %v504_v55 = vld [vmem:[%s7304_s14 + $0x1e8] sm:$0xff] }
  0x32   : > { %1253 = vrot.lane.b32.xlu0 %v7368_v19, %s7208_s15  ;;  %11502 = vst [vmem:[#allocation11_spill] sm:$0xff] %v7438_v56  ;;  %v777_v63 = vunpack.c.l.b16 %v569_v58  ;;  %v778_v2 = vunpack.c.l.b16 %v570_v59  ;;  %v610_v11 = vpack.c.bf16 %v498_v9, %v498_v9  ;;  %v6260_v22 = vor.u32 %v6692_v16, %v6259_v15  ;;  %v6251_v58 = vld [vmem:[%s11299_s1 + $0x70] sm:$0xf]  ;;  %v6690_v59 = vld [vmem:[%s11299_s1 + $0x74] sm:$0xf0] }
  0x33   : > { %v7448_v3 = vpack.c.b16 %v816_v62, %v815_v61  ;;  %v817_v13 = vunpack.c.l.b16 %v609_v10  ;;  %v6264_v26 = vor.u32 %v6691_v23, %v6261_v25  ;;  %v611_v30 = vpack.c.bf16 %v499_v12, %v499_v12  ;;  %v6689_v61 = vld [vmem:[%s11299_s1 + $0x74] sm:$0xf]  ;;  %v6253_v6 = vld [vmem:[%s11299_s1 + $0x78] sm:$0xf0]  ;;  %v6245_v23 = vld [vmem:[%s11299_s1 + $0x68] sm:$0xf0] }
  0x34   : > { %v7450_v5 = vpack.c.b16 %v778_v2, %v777_v63  ;;  %v818_v14 = vunpack.c.l.b16 %v610_v11  ;;  %v2026_v27 = vsel %vm2024_vm0, %v6260_v22, 0  ;;  %v612_v31 = vpack.c.bf16 %v500_v17, %v500_v17  ;;  %v505_v10 = vld [vmem:[%s7304_s14 + $0x1f0] sm:$0xff]  ;;  %v506_v16 = vld [vmem:[%s7304_s14 + $0x1f8] sm:$0xff]  ;;  %v6687_v22 = vld [vmem:[%s11299_s1 + $0x64] sm:$0xf] }
  0x35   : > { %11503 = vst [vmem:[#allocation12_spill] sm:$0xff] %v7448_v3  ;;  %2287 = vmatpush.bf16.msra.mxu1 %v2026_v27  ;;  %v2029_v33 = vsel %vm2024_vm0, %v6264_v26, 0  ;;  %v819_v36 = vunpack.c.l.b16 %v611_v30  ;;  %v613_v43 = vpack.c.bf16 %v501_v38, %v501_v38  ;;  %v614_v45 = vpack.c.bf16 %v502_v39, %v502_v39  ;;  %v6235_v26 = vld [vmem:[%s11299_s1 + $0x50] sm:$0xf]  ;;  %v6686_v27 = vld [vmem:[%s11299_s1 + $0x54] sm:$0xf0] }
  0x36   : > { %1257 = vrot.lane.b32.xlu2 %v7388_v48, %s7208_s15  ;;  %v7480_v32 = vpack.c.b16 %v818_v14, %v817_v13  ;;  %2785 = vmatpush.bf16.msra.mxu3 %v2029_v33  ;;  %v820_v37 = vunpack.c.l.b16 %v612_v31  ;;  %v615_v62 = vpack.c.bf16 %v503_v54, %v503_v54  ;;  %v616_v63 = vpack.c.bf16 %v504_v55, %v504_v55  ;;  %v6243_v13 = vld [vmem:[%s11299_s1 + $0x60] sm:$0xf]  ;;  %v6688_v14 = vld [vmem:[%s11299_s1 + $0x64] sm:$0xf0]  ;;  %v6685_v30 = vld [vmem:[%s11299_s1 + $0x54] sm:$0xf] }
  0x37   : > { %v821_v49 = vunpack.c.l.b16 %v613_v43  ;;  %v822_v50 = vunpack.c.l.b16 %v614_v45  ;;  %v6252_v2 = vor.u32 %v6690_v59, %v6251_v58  ;;  %v6256_v9 = vor.u32 %v6689_v61, %v6253_v6  ;;  %v6237_v33 = vld [vmem:[%s11299_s1 + $0x58] sm:$0xf0]  ;;  %v508_v43 = vld [vmem:[%s7304_s14 + $0x208] sm:$0xff]  ;;  %v6683_v58 = vld [vmem:[%s11299_s1 + $0x44] sm:$0xf] }
  0x38   : > { %11504 = vst [vmem:[#allocation13_spill] sm:$0xff] %v7480_v32  ;;  %v7493_v46 = vpack.c.b16 %v820_v37, %v819_v36  ;;  %v823_v11 = vunpack.c.l.b16 %v615_v62  ;;  %v824_v12 = vunpack.c.l.b16 %v616_v63  ;;  %v6244_v17 = vor.u32 %v6688_v14, %v6243_v13  ;;  %v6229_v59 = vld [vmem:[%s11299_s1 + $0x48] sm:$0xf0]  ;;  %v6221_v13 = vld [vmem:[%s11299_s1 + $0x38] sm:$0xf0] }
  0x39   : > { %1261 = vrot.lane.b32.xlu1 %v7384_v41, %s7208_s15  ;;  %4230 = vmatpush.bf16.msrb.mxu1 %v6700_v51  ;;  %v7504_v52 = vpack.c.b16 %v822_v50, %v821_v49  ;;  %v6248_v25 = vor.u32 %v6687_v22, %v6245_v23  ;;  %v6236_v31 = vor.u32 %v6686_v27, %v6235_v26  ;;  %v6227_v50 = vld [vmem:[%s11299_s1 + $0x40] sm:$0xf]  ;;  %v6684_v51 = vld [vmem:[%s11299_s1 + $0x44] sm:$0xf0]  ;;  %vm6017_vm0 = vcmask 982016  }
  0x3a   : > { %1259 = vrot.lane.b32.xlu0 %v7386_v47, %s7208_s15  ;;  %11505 = vst [vmem:[#allocation14_spill] sm:$0xff] %v7493_v46  ;;  %4366 = vmatpush.bf16.msrb.mxu3 %v6701_v42  ;;  %v617_v36 = vpack.c.bf16 %v505_v10, %v505_v10  ;;  %v618_v37 = vpack.c.bf16 %v506_v16, %v506_v16  ;;  %v507_v42 = vld [vmem:[%s7304_s14 + $0x200] sm:$0xff]  ;;  %v6682_v10 = vld [vmem:[%s11299_s1 + $0x34] sm:$0xf0] }
  0x3b   : > { %11506 = vst [vmem:[#allocation15_spill] sm:$0xff] %v7504_v52  ;;  %2031 = vmatpush.bf16.msra.mxu0 %v6252_v2  ;;  %2529 = vmatpush.bf16.msra.mxu2 %v6256_v9  ;;  %v7560_v38 = vpack.c.b16 %v824_v12, %v823_v11  ;;  %v6240_v39 = vor.u32 %v6685_v30, %v6237_v33  ;;  %v6219_v9 = vld [vmem:[%s11299_s1 + $0x30] sm:$0xf]  ;;  %v6681_v11 = vld [vmem:[%s11299_s1 + $0x34] sm:$0xf] }
  0x3c   : > { %v825_v45 = vunpack.c.l.b16 %v617_v36  ;;  %v826_v49 = vunpack.c.l.b16 %v618_v37  ;;  %v6228_v55 = vor.u32 %v6684_v51, %v6227_v50  ;;  %v6232_v62 = vor.u32 %v6683_v58, %v6229_v59  ;;  %v6211_v23 = vld [vmem:[%s11299_s1 + $0x20] sm:$0xf]  ;;  %v6679_v30 = vld [vmem:[%s11299_s1 + $0x24] sm:$0xf]  ;;  %v6203_v37 = vld [vmem:[%s11299_s1 + $0x10] sm:$0xf] }
  0x3d   : > { %v619_v2 = vpack.c.bf16 %v507_v42, %v507_v42  ;;  %v620_v6 = vpack.c.bf16 %v508_v43, %v508_v43  ;;  %v6220_v14 = vor.u32 %v6682_v10, %v6219_v9  ;;  %v6224_v16 = vor.u32 %v6681_v11, %v6221_v13  ;;  %v6678_v42 = vld [vmem:[%s11299_s1 + $0x14] sm:$0xf0]  ;;  %v6677_v43 = vld [vmem:[%s11299_s1 + $0x14] sm:$0xf]  ;;  %v6676_v58 = vld [vmem:[%s11299_s1 + $0x4] sm:$0xf0] }
  0x3e   : > { %1263 = vrot.lane.b32.xlu2 %v7406_v8, %s7208_s15  ;;  %v7601_v12 = vpack.c.b16 %v826_v49, %v825_v45  ;;  %v6205_v45 = vld [vmem:[%s11299_s1 + $0x18] sm:$0xf0]  ;;  %v6204_v50 = vor.u32 %v6678_v42, %v6203_v37  ;;  %v509_v9 = vld [vmem:[%s7304_s14 + $0x210] sm:$0xff] }
  0x3f   : > { %2032 = vmatpush.bf16.msra.mxu0 %v6244_v17  ;;  %2530 = vmatpush.bf16.msra.mxu2 %v6248_v25  ;;  %v827_v17 = vunpack.c.l.b16 %v619_v2  ;;  %v828_v22 = vunpack.c.l.b16 %v620_v6  ;;  %v6680_v25 = vld [vmem:[%s11299_s1 + $0x24] sm:$0xf0]  ;;  %v6208_v51 = vor.u32 %v6677_v43, %v6205_v45  ;;  %v6675_v2 = vld [vmem:[%s11299_s1 + $0x4] sm:$0xf]  ;;  %v6197_v6 = vld [vmem:[%s11299_s1 + $0x8] sm:$0xf0] }
  0x40   : > { %11507 = vst [vmem:[#allocation16_spill] sm:$0xff] %v7601_v12  ;;  %v6212_v27 = vor.u32 %v6680_v25, %v6211_v23  ;;  %v6200_v11 = vor.u32 %v6675_v2, %v6197_v6  ;;  %v510_v13 = vld [vmem:[%s7304_s14 + $0x218] sm:$0xff]  ;;  %v444_v2 = vld [vmem:[%s7304_s14 + $0x8] sm:$0xff] }
  0x41   : > { %917 = vrot.lane.b32.xlu1 %v7402_v4, %s7209_s16 }
  0x42   : > { %1265 = vrot.lane.b32.xlu0 %v7404_v7, %s7208_s15 }
  0x43   : > { %2033 = vmatpush.bf16.msra.mxu0 %v6236_v31  ;;  %2531 = vmatpush.bf16.msra.mxu2 %v6240_v39  ;;  %v6213_v31 = vld [vmem:[%s11299_s1 + $0x28] sm:$0xf0]  ;;  %v7631_v39 = vpack.c.b16 %v828_v22, %v827_v17 }
  0x44   : > { %v6216_v36 = vor.u32 %v6679_v30, %v6213_v31  ;;  %v512_v30 = vld [vmem:[%s7304_s14 + $0x228] sm:$0xff] }
  0x45   : > { %11508 = vst [vmem:[#allocation17_spill] sm:$0xff] %v7631_v39  ;;  %v624_v37 = vpack.c.bf16 %v512_v30, %v512_v30 }
  0x46   : > { %1267 = vrot.lane.b32.xlu2 %v7424_v35, %s7208_s15 }
  0x47   : > { %2034 = vmatpush.bf16.msra.mxu0 %v6228_v55  ;;  %2532 = vmatpush.bf16.msra.mxu2 %v6232_v62  ;;  %v6195_v55 = vld [vmem:[%s11299_s1] sm:$0xf]  ;;  %v832_v45 = vunpack.c.l.b16 %v624_v37 }
  0x48   : > { %v6196_v62 = vor.u32 %v6676_v58, %v6195_v55 }
  0x49   : > { %1129 = vrot.lane.b32.xlu1 %v7422_v29, %s7210_s17 }
  0x4a   : > { %1023 = vrot.lane.b32.xlu0 %v7420_v28, %s7211_s18 }
  0x4b   : > { %2035 = vmatpush.bf16.msra.mxu0 %v6220_v14  ;;  %2533 = vmatpush.bf16.msra.mxu2 %v6224_v16  ;;  %v621_v14 = vpack.c.bf16 %v509_v9, %v509_v9  ;;  %v622_v16 = vpack.c.bf16 %v510_v13, %v510_v13 }
  0x4d   : > { %v829_v22 = vunpack.c.l.b16 %v621_v14  ;;  %v830_v23 = vunpack.c.l.b16 %v622_v16  ;;  %v556_v16 = vpack.c.bf16 %v444_v2, %v444_v2 }
  0x4e   : > { %919 = vrot.lane.b32.xlu2 %v7440_v57, %s7209_s16 }
  0x4f   : > { %2036 = vmatpush.bf16.msra.mxu0 %v6212_v27  ;;  %2534 = vmatpush.bf16.msra.mxu2 %v6216_v36  ;;  %v511_v27 = vld [vmem:[%s7304_s14 + $0x220] sm:$0xff]  ;;  %v7686_v42 = vpack.c.b16 %v830_v23, %v829_v22  ;;  %v764_v30 = vunpack.c.l.b16 %v556_v16 }
  0x50   : > { %v623_v36 = vpack.c.bf16 %v511_v27, %v511_v27 }
  0x51   : > { %1025 = vrot.lane.b32.xlu1 %v7436_v53, %s7211_s18  ;;  %11509 = vst [vmem:[#allocation18_spill] sm:$0xff] %v7686_v42 }
  0x52   : > { %1269 = vrot.lane.b32.xlu0 %v7438_v56, %s7208_s15  ;;  %v831_v43 = vunpack.c.l.b16 %v623_v36 }
  0x53   : > { %2037 = vmatpush.bf16.msra.mxu0 %v6204_v50  ;;  %2535 = vmatpush.bf16.msra.mxu2 %v6208_v51  ;;  %v513_v50 = vld [vmem:[%s7304_s14 + $0x230] sm:$0xff]  ;;  %v514_v51 = vld [vmem:[%s7304_s14 + $0x238] sm:$0xff] }
  0x54   : > { %v625_v9 = vpack.c.bf16 %v513_v50, %v513_v50  ;;  %v7708_v13 = vpack.c.b16 %v832_v45, %v831_v43 }
  0x56   : > { %1131 = vrot.lane.b32.xlu2 %v7450_v5, %s7210_s17  ;;  %11510 = vst [vmem:[#allocation19_spill] sm:$0xff] %v7708_v13  ;;  %v833_v22 = vunpack.c.l.b16 %v625_v9 }
  0x57   : > { %2038 = vmatpush.bf16.msra.mxu0 %v6196_v62  ;;  %2536 = vmatpush.bf16.msra.mxu2 %v6200_v11  ;;  %v443_v62 = vld [vmem:[%s7304_s14] sm:$0xff]  ;;  %v626_v11 = vpack.c.bf16 %v514_v51, %v514_v51  ;;  %v445_v51 = vld [vmem:[%s7304_s14 + $0x10] sm:$0xff] }
  0x58   : > { %v555_v14 = vpack.c.bf16 %v443_v62, %v443_v62  ;;  %v446_v62 = vld [vmem:[%s7304_s14 + $0x18] sm:$0xff]  ;;  %v557_v9 = vpack.c.bf16 %v445_v51, %v445_v51 }
  0x59   : > { %1271 = vrot.lane.b32.xlu1 %v7448_v3, %s7208_s15  ;;  %v834_v23 = vunpack.c.l.b16 %v626_v11  ;;  %v558_v11 = vpack.c.bf16 %v446_v62, %v446_v62  ;;  %v517_v62 = vld [vmem:[%s7304_s14 + $0x250] sm:$0xff] }
  0x5a   : > { %921 = vrot.lane.b32.xlu0 %v7420_v28, %s7209_s16  ;;  %v763_v27 = vunpack.c.l.b16 %v555_v14 }
  0x5b   : > { %v7720_v45 = vpack.c.b16 %v834_v23, %v833_v22 }
  0x5c   : > { %v859_v50 = vpack.c.b16 %v764_v30, %v763_v27  ;;  %v765_v27 = vunpack.c.l.b16 %v557_v9  ;;  %v766_v30 = vunpack.c.l.b16 %v558_v11 }
  0x5d   : > { %11512 = vst [vmem:[#allocation21_spill] sm:$0xff] %v7720_v45 }
  0x5e   : > { %1027 = vrot.lane.b32.xlu2 %v7422_v29, %s7211_s18  ;;  %v860_v51 = vpack.c.b16 %v766_v30, %v765_v27 }
  0x61   : > { %923 = vrot.lane.b32.xlu1 %v7436_v53, %s7209_s16 }
  0x62   : > { %1133 = vrot.lane.b32.xlu0 %v7316_v21, %s7210_s17 }
  0x66   : > { %1273 = vrot.lane.b32.xlu2 %v7480_v32, %s7208_s15 }
  0x69   : > { %1135 = vrot.lane.b32.xlu1 %v7332_v40, %s7210_s17 }
  0x6a   : > { %1029 = vrot.lane.b32.xlu0 %v7450_v5, %s7211_s18 }
  0x6e   : > { %925 = vrot.lane.b32.xlu2 %v7422_v29, %s7209_s16 }
  0x71   : > { %1031 = vrot.lane.b32.xlu1 %v7316_v21, %s7211_s18 }
  0x72   : > { %1275 = vrot.lane.b32.xlu0 %v7493_v46, %s7208_s15 }
  0x76   : > { %1137 = vrot.lane.b32.xlu2 %v7314_v20, %s7210_s17 }
  0x78   : > { %v7539_v15 = vpop.permute.xlu2 %1243 }
  0x79   : > { %1277 = vrot.lane.b32.xlu1 %v7504_v52, %s7208_s15 }
  0x7a   : > { %927 = vrot.lane.b32.xlu0 %v7450_v5, %s7209_s16 }
  0x7e   : > { %1033 = vrot.lane.b32.xlu2 %v7332_v40, %s7211_s18 }
  0x80   : > { %v7590_v63 = vpop.permute.xlu2 %1245 }
  0x81   : > { %929 = vrot.lane.b32.xlu1 %v7316_v21, %s7209_s16 }
  0x82   : > { %1139 = vrot.lane.b32.xlu0 %v7328_v34, %s7210_s17 }
  0x86   : > { %1279 = vrot.lane.b32.xlu2 %v7560_v38, %s7208_s15 }
  0x88   : > { %v7642_v49 = vpop.permute.xlu2 %1251 }
  0x89   : > { %1141 = vrot.lane.b32.xlu1 %v7334_v44, %s7210_s17 }
  0x8a   : > { %1035 = vrot.lane.b32.xlu0 %v7314_v20, %s7211_s18 }
  0x8b   : > { %v7576_v54 = vpop.permute.xlu1 %1239 }
  0x8c   : > { %v7584_v61 = vpop.permute.xlu0 %1235 }
  0x8d   : > { %6265 = vmatmul.msk.bf16.vlgmr.msra.gmra.mxu1 %vm1927_vm1, %v7584_v61  ;;  %6313 = vmatmul.msk.bf16.vlgmr.msra.gmra.mxu3 %vm1927_vm1, %v7584_v61 }
  0x8e   : > { %931 = vrot.lane.b32.xlu2 %v7332_v40, %s7209_s16 }
  0x90   : > { %v7674_v17 = vpop.permute.xlu2 %1257 }
  0x91   : > { %1037 = vrot.lane.b32.xlu1 %v7328_v34, %s7211_s18 }
  0x92   : > { %1281 = vrot.lane.b32.xlu0 %v7601_v12, %s7208_s15 }
  0x93   : > { %v7618_v26 = vpop.permute.xlu1 %1241 }
  0x94   : > { %v7626_v33 = vpop.permute.xlu0 %1237 }
  0x96   : > { %1143 = vrot.lane.b32.xlu2 %v7352_v1, %s7210_s17 }
  0x98   : > { %v7698_v58 = vpop.permute.xlu2 %1263 }
  0x99   : > { %1283 = vrot.lane.b32.xlu1 %v7631_v39, %s7208_s15 }
  0x9a   : > { %933 = vrot.lane.b32.xlu0 %v7314_v20, %s7209_s16 }
  0x9b   : > { %v7656_v59 = vpop.permute.xlu1 %1249 }
  0x9c   : > { %v7665_v10 = vpop.permute.xlu0 %1247 }
  0x9d   : > { %6266 = vmatmul.msk.bf16.gmra.mxu1 %vm1927_vm1, %v7626_v33  ;;  %6314 = vmatmul.msk.bf16.gmra.mxu3 %vm1927_vm1, %v7626_v33 }
  0x9e   : > { %1039 = vrot.lane.b32.xlu2 %v7334_v44, %s7211_s18 }
  0xa0   : > { %v7718_v43 = vpop.permute.xlu2 %1267 }
  0xa1   : > { %935 = vrot.lane.b32.xlu1 %v7328_v34, %s7209_s16  ;;  %11511 = vst [vmem:[#allocation20_spill] sm:$0xff] %v7718_v43 }
  0xa2   : > { %1145 = vrot.lane.b32.xlu0 %v7350_v0, %s7210_s17 }
  0xa3   : > { %v7680_v25 = vpop.permute.xlu1 %1255 }
  0xa4   : > { %v7684_v31 = vpop.permute.xlu0 %1253 }
  0xa6   : > { %1285 = vrot.lane.b32.xlu2 %v7686_v42, %s7208_s15 }
  0xa9   : > { %1147 = vrot.lane.b32.xlu1 %v7348_v60, %s7210_s17 }
  0xaa   : > { %1041 = vrot.lane.b32.xlu0 %v7352_v1, %s7211_s18 }
  0xab   : > { %v7696_v55 = vpop.permute.xlu1 %1261 }
  0xac   : > { %v7702_v6 = vpop.permute.xlu0 %1259 }
  0xad   : > { %6267 = vmatmul.msk.bf16.gmra.mxu1 %vm1927_vm1, %v7576_v54  ;;  %6315 = vmatmul.msk.bf16.gmra.mxu3 %vm1927_vm1, %v7576_v54 }
  0xae   : > { %937 = vrot.lane.b32.xlu2 %v7334_v44, %s7209_s16 }
  0xb1   : > { %1043 = vrot.lane.b32.xlu1 %v7350_v0, %s7211_s18 }
  0xb2   : > { %1287 = vrot.lane.b32.xlu0 %v7708_v13, %s7208_s15  ;;  %v519_v13 = vld [vmem:[%s7304_s14 + $0x260] sm:$0xff] }
  0xb3   : > { %v918_v36 = vpop.permute.xlu1 %917 }
  0xb4   : > { %v7716_v37 = vpop.permute.xlu0 %1265  ;;  %v1334_v2 = vsel %vm1331_vm2, %v859_v50, %v918_v36  ;;  %v920_v36 = vpop.permute.xlu2 %919 }
  0xb6   : > { %1149 = vrot.lane.b32.xlu2 %v7370_v24, %s7210_s17 }
  0xb9   : > { %1289 = vrot.lane.b32.xlu1 %v7720_v45, %s7208_s15 }
  0xba   : > { %939 = vrot.lane.b32.xlu0 %v7352_v1, %s7209_s16 }
  0xbb   : > { %v1130_v14 = vpop.permute.xlu1 %1129 }
  0xbc   : > { %v1024_v16 = vpop.permute.xlu0 %1023  ;;  %v1132_v30 = vpop.permute.xlu2 %1131 }
  0xbd   : > { %v1478_v22 = vsel %vm1476_vm3, %v1334_v2, %v1024_v16  ;;  %6268 = vmatmul.msk.bf16.gmra.mxu1 %vm1927_vm1, %v7618_v26  ;;  %6316 = vmatmul.msk.bf16.gmra.mxu3 %vm1927_vm1, %v7618_v26  ;;  %v518_v2 = vld [vmem:[%s7304_s14 + $0x258] sm:$0xff] }
  0xbe   : > { %v1575_v23 = vsel %vm1573_vm4, %v1478_v22, %v1130_v14  ;;  %1045 = vrot.lane.b32.xlu2 %v7348_v60, %s7211_s18  ;;  %v629_v14 = vpack.c.bf16 %v517_v62, %v517_v62  ;;  %v630_v16 = vpack.c.bf16 %v518_v2, %v518_v2  ;;  %v515_v22 = vld [vmem:[%s7304_s14 + $0x240] sm:$0xff] }
  0xbf   : > { %v1672_v50 = vsel %vm1670_vm5, %v1575_v23, %v7584_v61  ;;  %v1337_v61 = vsel %vm1331_vm2, %v860_v51, %v920_v36  ;;  %v516_v23 = vld [vmem:[%s7304_s14 + $0x248] sm:$0xff] }
  0xc0   : > { %2039 = vmatmul.bf16.vlgmr.msra.gmra.mxu0 %v1672_v50  ;;  %2537 = vmatmul.bf16.vlgmr.msra.gmra.mxu2 %v1672_v50  ;;  %v627_v50 = vpack.c.bf16 %v515_v22, %v515_v22  ;;  %v838_v43 = vunpack.c.l.b16 %v630_v16  ;;  %v520_v36 = vld [vmem:[%s7304_s14 + $0x268] sm:$0xff] }
  0xc1   : > { %941 = vrot.lane.b32.xlu1 %v7350_v0, %s7209_s16  ;;  %v628_v0 = vpack.c.bf16 %v516_v23, %v516_v23 }
  0xc2   : > { %1151 = vrot.lane.b32.xlu0 %v7368_v19, %s7210_s17  ;;  %v835_v51 = vunpack.c.l.b16 %v627_v50 }
  0xc3   : > { %v1026_v11 = vpop.permute.xlu1 %1025  ;;  %v836_v62 = vunpack.c.l.b16 %v628_v0 }
  0xc4   : > { %v7747_v9 = vpop.permute.xlu0 %1269  ;;  %v1480_v27 = vsel %vm1476_vm3, %v1337_v61, %v1026_v11  ;;  %v631_v61 = vpack.c.bf16 %v519_v13, %v519_v13  ;;  %v632_v11 = vpack.c.bf16 %v520_v36, %v520_v36  ;;  %v6699_v13 = vld [vmem:[%s11301_s3 + $0x30] sm:$0xff] }
  0xc5   : > { %11513 = vst [vmem:[#allocation22_spill] sm:$0xff] %v7747_v9  ;;  %v837_v9 = vunpack.c.l.b16 %v629_v14  ;;  %v1577_v2 = vsel %vm1573_vm4, %v1480_v27, %v1132_v30  ;;  %v7764_v22 = vpack.c.b16 %v836_v62, %v835_v51  ;;  %4231 = vmatpush.bf16.msrb.mxu1 %v6699_v13  ;;  %v1028_v30 = vpop.permute.xlu2 %1027  ;;  %v522_v13 = vld [vmem:[%s7304_s14 + $0x278] sm:$0xff] }
  0xc6   : > { %v1675_v16 = vsel %vm1670_vm5, %v1577_v2, %v7626_v33  ;;  %v839_v0 = vunpack.c.l.b16 %v631_v61  ;;  %v840_v27 = vunpack.c.l.b16 %v632_v11  ;;  %v523_v2 = vld [vmem:[%s7304_s14 + $0x280] sm:$0xff]  ;;  %v524_v61 = vld [vmem:[%s7304_s14 + $0x288] sm:$0xff] }
  0xc7   : > { %11514 = vst [vmem:[#allocation23_spill] sm:$0xff] %v7764_v22  ;;  %v7766_v23 = vpack.c.b16 %v838_v43, %v837_v9  ;;  %1291 = vrot.lane.b32.xlu2 %v7764_v22, %s7208_s15 }
  0xc8   : > { %v7781_v33 = vpack.c.b16 %v840_v27, %v839_v0  ;;  %v636_v0 = vpack.c.bf16 %v524_v61, %v524_v61  ;;  %v521_v27 = vld [vmem:[%s7304_s14 + $0x270] sm:$0xff] }
  0xc9   : > { %1153 = vrot.lane.b32.xlu1 %v7366_v18, %s7210_s17  ;;  %11515 = vst [vmem:[#allocation24_spill] sm:$0xff] %v7766_v23 }
  0xca   : > { %1047 = vrot.lane.b32.xlu0 %v7370_v24, %s7211_s18  ;;  %11516 = vst [vmem:[#allocation25_spill] sm:$0xff] %v7781_v33 }
  0xcb   : > { %v7779_v43 = vpop.permute.xlu1 %1271 }
  0xcc   : > { %v922_v14 = vpop.permute.xlu0 %921 }
  0xcd   : > { %6269 = vmatmul.msk.bf16.gmra.mxu1 %vm1927_vm1, %v7539_v15  ;;  %6317 = vmatmul.msk.bf16.gmra.mxu3 %vm1927_vm1, %v7539_v15  ;;  %v1340_v9 = vsel %vm1331_vm2, %v7402_v4, %v922_v14  ;;  %v7807_v11 = vpop.permute.xlu2 %1273 }
  0xce   : > { %v1482_v50 = vsel %vm1476_vm3, %v1340_v9, %v1028_v30 }
  0xcf   : > { %943 = vrot.lane.b32.xlu2 %v7348_v60, %s7209_s16 }
  0xd0   : > { %2044 = vmatmul.bf16.gmra.mxu0 %v1675_v16  ;;  %2542 = vmatmul.bf16.gmra.mxu2 %v1675_v16  ;;  %v635_v16 = vpack.c.bf16 %v523_v2, %v523_v2 }
  0xd1   : > { %1049 = vrot.lane.b32.xlu1 %v7368_v19, %s7211_s18 }
  0xd2   : > { %1293 = vrot.lane.b32.xlu0 %v7766_v23, %s7208_s15 }
  0xd3   : > { %v924_v4 = vpop.permute.xlu1 %923 }
  0xd4   : > { %v1134_v36 = vpop.permute.xlu0 %1133  ;;  %v1343_v14 = vsel %vm1331_vm2, %v7440_v57, %v924_v4  ;;  %v843_v57 = vunpack.c.l.b16 %v635_v16  ;;  %v525_v4 = vld [vmem:[%s7304_s14 + $0x290] sm:$0xff] }
  0xd5   : > { %v1579_v51 = vsel %vm1573_vm4, %v1482_v50, %v1134_v36  ;;  %v633_v50 = vpack.c.bf16 %v521_v27, %v521_v27  ;;  %v634_v36 = vpack.c.bf16 %v522_v13, %v522_v13  ;;  %v926_v16 = vpop.permute.xlu2 %925 }
  0xd6   : > { %v1678_v62 = vsel %vm1670_vm5, %v1579_v51, %v7576_v54  ;;  %v844_v51 = vunpack.c.l.b16 %v636_v0 }
  0xd7   : > { %1155 = vrot.lane.b32.xlu2 %v7388_v48, %s7210_s17  ;;  %v841_v2 = vunpack.c.l.b16 %v633_v50  ;;  %v842_v61 = vunpack.c.l.b16 %v634_v36 }
  0xd8   : > { %v7829_v13 = vpack.c.b16 %v844_v51, %v843_v57 }
  0xd9   : > { %1295 = vrot.lane.b32.xlu1 %v7781_v33, %s7208_s15  ;;  %v7827_v27 = vpack.c.b16 %v842_v61, %v841_v2  ;;  %v529_v2 = vld [vmem:[%s7304_s14 + $0x2b0] sm:$0xff]  ;;  %v530_v61 = vld [vmem:[%s7304_s14 + $0x2b8] sm:$0xff] }
  0xda   : > { %945 = vrot.lane.b32.xlu0 %v7370_v24, %s7209_s16  ;;  %11518 = vst [vmem:[#allocation27_spill] sm:$0xff] %v7829_v13 }
  0xdb   : > { %v1136_v30 = vpop.permute.xlu1 %1135  ;;  %11517 = vst [vmem:[#allocation26_spill] sm:$0xff] %v7827_v27 }
  0xdc   : > { %v1030_v54 = vpop.permute.xlu0 %1029 }
  0xdd   : > { %6270 = vmatmul.msk.bf16.gmra.mxu1 %vm1927_vm1, %v7590_v63  ;;  %6318 = vmatmul.msk.bf16.gmra.mxu3 %vm1927_vm1, %v7590_v63  ;;  %v1484_v9 = vsel %vm1476_vm3, %v1343_v14, %v1030_v54  ;;  %v637_v14 = vpack.c.bf16 %v525_v4, %v525_v4  ;;  %v1138_v51 = vpop.permute.xlu2 %1137 }
  0xdf   : > { %1051 = vrot.lane.b32.xlu2 %v7366_v18, %s7211_s18 }
  0xe0   : > { %2049 = vmatmul.bf16.gmra.mxu0 %v1678_v62  ;;  %2547 = vmatmul.bf16.gmra.mxu2 %v1678_v62  ;;  %v526_v62 = vld [vmem:[%s7304_s14 + $0x298] sm:$0xff] }
  0xe1   : > { %947 = vrot.lane.b32.xlu1 %v7368_v19, %s7209_s16  ;;  %v1581_v19 = vsel %vm1573_vm4, %v1484_v9, %v1136_v30  ;;  %v638_v54 = vpack.c.bf16 %v526_v62, %v526_v62  ;;  %v845_v9 = vunpack.c.l.b16 %v637_v14 }
  0xe2   : > { %1157 = vrot.lane.b32.xlu0 %v7386_v47, %s7210_s17  ;;  %v1681_v0 = vsel %vm1670_vm5, %v1581_v19, %v7618_v26  ;;  %v1346_v19 = vsel %vm1331_vm2, %v7420_v28, %v926_v16  ;;  %v642_v16 = vpack.c.bf16 %v530_v61, %v530_v61 }
  0xe3   : > { %v846_v30 = vunpack.c.l.b16 %v638_v54  ;;  %v1032_v26 = vpop.permute.xlu1 %1031  ;;  %v641_v54 = vpack.c.bf16 %v529_v2, %v529_v2 }
  0xe4   : > { %v7839_v50 = vpop.permute.xlu0 %1275  ;;  %v1486_v57 = vsel %vm1476_vm3, %v1346_v19, %v1032_v26 }
  0xe5   : > { %11519 = vst [vmem:[#allocation28_spill] sm:$0xff] %v7839_v50  ;;  %v7841_v36 = vpack.c.b16 %v846_v30, %v845_v9  ;;  %v1583_v4 = vsel %vm1573_vm4, %v1486_v57, %v1138_v51  ;;  %v849_v26 = vunpack.c.l.b16 %v641_v54  ;;  %v850_v57 = vunpack.c.l.b16 %v642_v16  ;;  %v532_v51 = vld [vmem:[%s7304_s14 + $0x2c8] sm:$0xff] }
  0xe6   : > { %v1684_v62 = vsel %vm1670_vm5, %v1583_v4, %v7539_v15 }
  0xe7   : > { %1297 = vrot.lane.b32.xlu2 %v7827_v27, %s7208_s15  ;;  %11520 = vst [vmem:[#allocation29_spill] sm:$0xff] %v7841_v36  ;;  %v7887_v2 = vpack.c.b16 %v850_v57, %v849_v26 }
  0xe9   : > { %1159 = vrot.lane.b32.xlu1 %v7384_v41, %s7210_s17  ;;  %11522 = vst [vmem:[#allocation31_spill] sm:$0xff] %v7887_v2 }
  0xea   : > { %1053 = vrot.lane.b32.xlu0 %v7388_v48, %s7211_s18 }
  0xeb   : > { %v7867_v14 = vpop.permute.xlu1 %1277 }
  0xec   : > { %v928_v28 = vpop.permute.xlu0 %927  ;;  %11521 = vst [vmem:[#allocation30_spill] sm:$0xff] %v7867_v14 }
  0xed   : > { %6271 = vmatmul.msk.bf16.gmra.mxu1 %vm1927_vm1, %v7665_v10  ;;  %6319 = vmatmul.msk.bf16.gmra.mxu3 %vm1927_vm1, %v7665_v10  ;;  %v1349_v15 = vsel %vm1331_vm2, %v7436_v53, %v928_v28  ;;  %v531_v53 = vld [vmem:[%s7304_s14 + $0x2c0] sm:$0xff] }
  0xee   : > { %v643_v28 = vpack.c.bf16 %v531_v53, %v531_v53 }
  0xef   : > { %949 = vrot.lane.b32.xlu2 %v7366_v18, %s7209_s16 }
  0xf0   : > { %2054 = vmatmul.bf16.gmra.mxu0 %v1681_v0  ;;  %2552 = vmatmul.bf16.gmra.mxu2 %v1681_v0  ;;  %v1034_v0 = vpop.permute.xlu2 %1033  ;;  %v851_v16 = vunpack.c.l.b16 %v643_v28 }
  0xf1   : > { %1055 = vrot.lane.b32.xlu1 %v7386_v47, %s7211_s18  ;;  %v1488_v9 = vsel %vm1476_vm3, %v1349_v15, %v1034_v0 }
  0xf2   : > { %1299 = vrot.lane.b32.xlu0 %v7829_v13, %s7208_s15 }
  0xf3   : > { %v930_v61 = vpop.permute.xlu1 %929 }
  0xf4   : > { %v1140_v30 = vpop.permute.xlu0 %1139 }
  0xf5   : > { %v1585_v4 = vsel %vm1573_vm4, %v1488_v9, %v1140_v30 }
  0xf6   : > { %v1687_v15 = vsel %vm1670_vm5, %v1585_v4, %v7590_v63  ;;  %v1352_v63 = vsel %vm1331_vm2, %v7422_v29, %v930_v61  ;;  %v528_v4 = vld [vmem:[%s7304_s14 + $0x2a8] sm:$0xff] }
  0xf7   : > { %1161 = vrot.lane.b32.xlu2 %v7406_v8, %s7210_s17 }
  0xf8   : > { %v7899_v30 = vpop.permute.xlu2 %1279 }
  0xf9   : > { %1301 = vrot.lane.b32.xlu1 %v7841_v36, %s7208_s15  ;;  %11523 = vst [vmem:[#allocation32_spill] sm:$0xff] %v7899_v30 }
  0xfa   : > { %951 = vrot.lane.b32.xlu0 %v7388_v48, %s7209_s16  ;;  %v533_v48 = vld [vmem:[%s7304_s14 + $0x2d0] sm:$0xff] }
  0xfc   : > { %v1036_v57 = vpop.permute.xlu0 %1035 }
  0xfd   : > { %6272 = vmatmul.msk.bf16.gmra.mxu1 %vm1927_vm1, %v7656_v59  ;;  %6320 = vmatmul.msk.bf16.gmra.mxu3 %vm1927_vm1, %v7656_v59  ;;  %v1490_v28 = vsel %vm1476_vm3, %v1352_v63, %v1036_v57 }
  0xff   : > { %1057 = vrot.lane.b32.xlu2 %v7384_v41, %s7211_s18 }
 0x100   : > { %2059 = vmatmul.bf16.gmra.mxu0 %v1684_v62  ;;  %2557 = vmatmul.bf16.gmra.mxu2 %v1684_v62  ;;  %v644_v62 = vpack.c.bf16 %v532_v51, %v532_v51  ;;  %v527_v51 = vld [vmem:[%s7304_s14 + $0x2a0] sm:$0xff]  ;;  %v932_v63 = vpop.permute.xlu2 %931 }
 0x101   : > { %953 = vrot.lane.b32.xlu1 %v7386_v47, %s7209_s16 }
 0x102   : > { %1163 = vrot.lane.b32.xlu0 %v7404_v7, %s7210_s17  ;;  %v852_v0 = vunpack.c.l.b16 %v644_v62  ;;  %v1142_v62 = vpop.permute.xlu1 %1141 }
 0x104   : > { %v7901_v26 = vpack.c.b16 %v852_v0, %v851_v16  ;;  %v1587_v16 = vsel %vm1573_vm4, %v1490_v28, %v1142_v62  ;;  %v536_v28 = vld [vmem:[%s7304_s14 + $0x2e8] sm:$0xff]  ;;  %v1355_v62 = vsel %vm1331_vm2, %v7450_v5, %v932_v63 }
 0x105   : > { %v1690_v57 = vsel %vm1670_vm5, %v1587_v16, %v7665_v10  ;;  %v7937_v10 = vpop.permute.xlu0 %1281 }
 0x106   : > { %11524 = vst [vmem:[#allocation33_spill] sm:$0xff] %v7901_v26 }
 0x107   : > { %11526 = vst [vmem:[#allocation35_spill] sm:$0xff] %v7937_v10 }
 0x109   : > { %1165 = vrot.lane.b32.xlu1 %v7424_v35, %s7210_s17 }
 0x10a   : > { %v7876_v19 = vpop.f32.mrf.mxu1  ;;  %1059 = vrot.lane.b32.xlu0 %v7406_v8, %s7211_s18 }
 0x10d   : > { %6273 = vmatmul.msk.bf16.gmra.mxu1 %vm1927_vm1, %v7642_v49  ;;  %6321 = vmatmul.msk.bf16.gmra.mxu3 %vm1927_vm1, %v7642_v49 }
 0x110   : > { %2064 = vmatmul.bf16.gmra.mxu0 %v1687_v15  ;;  %2562 = vmatmul.bf16.gmra.mxu2 %v1687_v15  ;;  %v7891_v54 = vpop.f32.mrf.mxu3  ;;  %v639_v15 = vpack.c.bf16 %v527_v51, %v527_v51 }
 0x111   : > { %1061 = vrot.lane.b32.xlu1 %v7404_v7, %s7211_s18 }
 0x112   : > { %v7895_v9 = vpop.f32.mrf.mxu1  ;;  %1305 = vrot.lane.b32.xlu0 %v7887_v2, %s7208_s15  ;;  %v640_v2 = vpack.c.bf16 %v528_v4, %v528_v4  ;;  %v847_v29 = vunpack.c.l.b16 %v639_v15  ;;  %v535_v4 = vld [vmem:[%s7304_s14 + $0x2e0] sm:$0xff]  ;;  %v1038_v15 = vpop.permute.xlu1 %1037 }
 0x114   : > { %v848_v61 = vunpack.c.l.b16 %v640_v2 }
 0x116   : > { %v7921_v0 = vpack.c.b16 %v848_v61, %v847_v29  ;;  %v647_v29 = vpack.c.bf16 %v535_v4, %v535_v4  ;;  %v648_v61 = vpack.c.bf16 %v536_v28, %v536_v28  ;;  %v537_v4 = vld [vmem:[%s7304_s14 + $0x2f0] sm:$0xff]  ;;  %v538_v28 = vld [vmem:[%s7304_s14 + $0x2f8] sm:$0xff] }
 0x118   : > { %v7905_v53 = vpop.f32.mrf.mxu3  ;;  %11525 = vst [vmem:[#allocation34_spill] sm:$0xff] %v7921_v0  ;;  %1303 = vrot.lane.b32.xlu2 %v7921_v0, %s7208_s15  ;;  %v855_v5 = vunpack.c.l.b16 %v647_v29  ;;  %v856_v63 = vunpack.c.l.b16 %v648_v61 }
 0x119   : > { %1307 = vrot.lane.b32.xlu1 %v7901_v26, %s7208_s15  ;;  %v1144_v26 = vpop.permute.xlu2 %1143 }
 0x11a   : > { %v7912_v36 = vpop.f32.mrf.mxu1  ;;  %957 = vrot.lane.b32.xlu0 %v7406_v8, %s7209_s16  ;;  %v7959_v8 = vpack.c.b16 %v856_v63, %v855_v5  ;;  %v7973_v5 = vpop.permute.xlu1 %1283  ;;  %v1833_v63 = vld [vmem:[%s11300_s2] sm:$0x3] }
 0x11b   : > { %11528 = vst [vmem:[#allocation37_spill] sm:$0xff] %v7973_v5 }
 0x11c   : > { %11527 = vst [vmem:[#allocation36_spill] sm:$0xff] %v7959_v8 }
 0x11d   : > { %6274 = vmatmul.msk.bf16.gmra.mxu1 %vm1927_vm1, %v7684_v31  ;;  %6322 = vmatmul.msk.bf16.gmra.mxu3 %vm1927_vm1, %v7684_v31 }
 0x120   : > { %2069 = vmatmul.bf16.gmra.mxu0 %v1690_v57  ;;  %2567 = vmatmul.bf16.gmra.mxu2 %v1690_v57  ;;  %v7927_v2 = vpop.f32.mrf.mxu3  ;;  %v1492_v57 = vsel %vm1476_vm3, %v1355_v62, %v1038_v15  ;;  %v649_v62 = vpack.c.bf16 %v537_v4, %v537_v4  ;;  %v650_v15 = vpack.c.bf16 %v538_v28, %v538_v28  ;;  %v6698_v28 = vld [vmem:[%s11301_s3 + $0x28] sm:$0xff] }
 0x121   : > { %959 = vrot.lane.b32.xlu1 %v7404_v7, %s7209_s16  ;;  %955 = vrot.lane.b32.xlu2 %v7384_v41, %s7209_s16  ;;  %v1589_v7 = vsel %vm1573_vm4, %v1492_v57, %v1144_v26  ;;  %v934_v41 = vpop.permute.xlu0 %933 }
 0x122   : > { %v7931_v51 = vpop.f32.mrf.mxu1  ;;  %1169 = vrot.lane.b32.xlu0 %v7448_v3, %s7210_s17  ;;  %v1693_v13 = vsel %vm1670_vm5, %v1589_v7, %v7656_v59  ;;  %v857_v29 = vunpack.c.l.b16 %v649_v62  ;;  %v858_v61 = vunpack.c.l.b16 %v650_v15  ;;  %v1358_v59 = vsel %vm1331_vm2, %v7316_v21, %v934_v41  ;;  %4232 = vmatpush.bf16.msrb.mxu1 %v6698_v28 }
 0x123   : > { %v7996_v41 = vperm.slane %v1833_v63, 0 }
 0x124   : > { %v7975_v7 = vpack.c.b16 %v858_v61, %v857_v29 }
 0x126   : > { %11529 = vst [vmem:[#allocation38_spill] sm:$0xff] %v7975_v7 }
 0x128   : > { %v7943_v16 = vpop.f32.mrf.mxu3 }
 0x129   : > { %1171 = vrot.lane.b32.xlu1 %v7480_v32, %s7210_s17  ;;  %1167 = vrot.lane.b32.xlu2 %v7438_v56, %s7210_s17  ;;  %v1146_v15 = vpop.permute.xlu0 %1145 }
 0x12a   : > { %v7948_v0 = vpop.f32.mrf.mxu1  ;;  %1065 = vrot.lane.b32.xlu0 %v7438_v56, %s7211_s18 }
 0x12d   : > { %6275 = vmatmul.msk.bf16.gmra.mxu1 %vm1927_vm1, %v7680_v25  ;;  %6323 = vmatmul.msk.bf16.gmra.mxu3 %vm1927_vm1, %v7680_v25 }
 0x130   : > { %2074 = vmatmul.bf16.gmra.mxu0 %v1693_v13  ;;  %2572 = vmatmul.bf16.gmra.mxu2 %v1693_v13  ;;  %v7965_v26 = vpop.f32.mrf.mxu3  ;;  %v1040_v13 = vpop.permute.xlu2 %1039 }
 0x131   : > { %1067 = vrot.lane.b32.xlu1 %v7448_v3, %s7211_s18  ;;  %1063 = vrot.lane.b32.xlu2 %v7424_v35, %s7211_s18  ;;  %v1494_v62 = vsel %vm1476_vm3, %v1358_v59, %v1040_v13  ;;  %v936_v13 = vpop.permute.xlu1 %935 }
 0x132   : > { %v7969_v57 = vpop.f32.mrf.mxu1  ;;  %1311 = vrot.lane.b32.xlu0 %v7959_v8, %s7208_s15  ;;  %v1591_v29 = vsel %vm1573_vm4, %v1494_v62, %v1146_v15  ;;  %v8011_v62 = vperm.slane %v1833_v63, 1 }
 0x138   : > { %v7984_v4 = vpop.f32.mrf.mxu3  ;;  %v8024_v63 = vpop.permute.xlu2 %1285 }
 0x139   : > { %1313 = vrot.lane.b32.xlu1 %v7975_v7, %s7208_s15  ;;  %v1696_v7 = vsel %vm1670_vm5, %v1591_v29, %v7642_v49  ;;  %v541_v29 = vld [vmem:[%s7304_s14 + $0x310] sm:$0xff]  ;;  %11530 = vst [vmem:[#allocation39_spill] sm:$0xff] %v8024_v63  ;;  %v1148_v63 = vpop.permute.xlu1 %1147 }
 0x13a   : > { %v7992_v21 = vpop.f32.mrf.mxu1  ;;  %963 = vrot.lane.b32.xlu0 %v7438_v56, %s7209_s16  ;;  %v1042_v56 = vpop.permute.xlu0 %1041  ;;  %v653_v10 = vpack.c.bf16 %v541_v29, %v541_v29 }
 0x13c   : > { %v913_v29 = vunpack.c.l.b16 %v653_v10 }
 0x13d   : > { %v2040_v61 = vpop.f32.mrf.mxu0  ;;  %6276 = vmatmul.msk.bf16.gmra.mxu1 %vm1927_vm1, %v7674_v17  ;;  %6324 = vmatmul.msk.bf16.gmra.mxu3 %vm1927_vm1, %v7674_v17 }
 0x13e   : > { %v2041_v59 = vadd.f32 %v2040_v61, %v7996_v41 }
 0x140   : > { %v8007_v8 = vadd.f32 %v7876_v19, %v2041_v59  ;;  %2079 = vmatmul.bf16.gmra.mxu0 %v1696_v7  ;;  %2577 = vmatmul.bf16.gmra.mxu2 %v1696_v7  ;;  %v8009_v28 = vpop.f32.mrf.mxu3  ;;  %v542_v19 = vld [vmem:[%s7304_s14 + $0x318] sm:$0xff]  ;;  %v1361_v7 = vsel %vm1331_vm2, %v7332_v40, %v936_v13 }
 0x141   : > { %965 = vrot.lane.b32.xlu1 %v7448_v3, %s7209_s16  ;;  %v654_v47 = vpack.c.bf16 %v542_v19, %v542_v19  ;;  %v534_v40 = vld [vmem:[%s7304_s14 + $0x2d8] sm:$0xff]  ;;  %v1496_v13 = vsel %vm1476_vm3, %v1361_v7, %v1042_v56  ;;  %v544_v19 = vld [vmem:[%s7304_s14 + $0x328] sm:$0xff] }
 0x142   : > { %v8015_v15 = vpop.f32.mrf.mxu1  ;;  %1175 = vrot.lane.b32.xlu0 %v7504_v52, %s7210_s17  ;;  %v1593_v56 = vsel %vm1573_vm4, %v1496_v13, %v1148_v63  ;;  %v938_v63 = vpop.permute.xlu2 %937 }
 0x143   : > { %v2538_v49 = vpop.f32.mrf.mxu2 }
 0x144   : > { %v2539_v61 = vadd.f32 %v2538_v49, %v8011_v62 }
 0x145   : > { %v2042_v59 = vpop.f32.mrf.mxu0 }
 0x146   : > { %v8027_v3 = vadd.f32 %v7891_v54, %v2539_v61  ;;  %v2043_v5 = vadd.f32 %v2042_v59, %v7996_v41  ;;  %v645_v54 = vpack.c.bf16 %v533_v48, %v533_v48  ;;  %v646_v61 = vpack.c.bf16 %v534_v40, %v534_v40 }
 0x147   : > { %v656_v40 = vpack.c.bf16 %v544_v19, %v544_v19 }
 0x148   : > { %v8031_v30 = vadd.f32 %v7895_v9, %v2043_v5  ;;  %v8033_v49 = vpop.f32.mrf.mxu3  ;;  %v914_v9 = vunpack.c.l.b16 %v654_v47  ;;  %v543_v5 = vld [vmem:[%s7304_s14 + $0x320] sm:$0xff]  ;;  %v853_v18 = vunpack.c.l.b16 %v645_v54  ;;  %v854_v27 = vunpack.c.l.b16 %v646_v61 }
 0x149   : > { %1177 = vrot.lane.b32.xlu1 %v7560_v38, %s7210_s17  ;;  %v655_v48 = vpack.c.bf16 %v543_v5, %v543_v5  ;;  %v1364_v5 = vsel %vm1331_vm2, %v7314_v20, %v938_v63 }
 0x14a   : > { %v8040_v59 = vpop.f32.mrf.mxu1  ;;  %1071 = vrot.lane.b32.xlu0 %v7493_v46, %s7211_s18  ;;  %v8052_v10 = vpack.c.b16 %v854_v27, %v853_v18  ;;  %v8058_v61 = vpack.c.b16 %v914_v9, %v913_v29 }
 0x14b   : > { %v2540_v14 = vpop.f32.mrf.mxu2  ;;  %v1017_v27 = vunpack.c.l.b16 %v655_v48  ;;  %v1044_v48 = vpop.permute.xlu1 %1043 }
 0x14c   : > { %v2541_v7 = vadd.f32 %v2540_v14, %v8011_v62  ;;  %11531 = vst [vmem:[#allocation40_spill] sm:$0xff] %v8052_v10  ;;  %v1699_v14 = vsel %vm1670_vm5, %v1593_v56, %v7684_v31  ;;  %1309 = vrot.lane.b32.xlu2 %v8052_v10, %s7208_s15 }
 0x14d   : > { %v2045_v50 = vpop.f32.mrf.mxu0  ;;  %6277 = vmatmul.msk.bf16.gmra.mxu1 %vm1927_vm1, %v7702_v6  ;;  %6325 = vmatmul.msk.bf16.gmra.mxu3 %vm1927_vm1, %v7702_v6  ;;  %11532 = vst [vmem:[#allocation41_spill] sm:$0xff] %v8058_v61 }
 0x14e   : > { %v8055_v47 = vadd.f32 %v7905_v53, %v2541_v7  ;;  %v2046_v54 = vadd.f32 %v2045_v50, %v7996_v41  ;;  %v1018_v50 = vunpack.c.l.b16 %v656_v40  ;;  %v8084_v7 = vpop.permute.xlu0 %1287 }
 0x150   : > { %v8065_v13 = vadd.f32 %v7912_v36, %v2046_v54  ;;  %2084 = vmatmul.bf16.gmra.mxu0 %v1699_v14  ;;  %2582 = vmatmul.bf16.gmra.mxu2 %v1699_v14  ;;  %v8067_v18 = vpop.f32.mrf.mxu3  ;;  %v8076_v36 = vpack.c.b16 %v1018_v50, %v1017_v27  ;;  %v1498_v14 = vsel %vm1476_vm3, %v1364_v5, %v1044_v48  ;;  %v1150_v27 = vpop.permute.xlu2 %1149 }
 0x151   : > { %1073 = vrot.lane.b32.xlu1 %v7504_v52, %s7211_s18  ;;  %v1595_v63 = vsel %vm1573_vm4, %v1498_v14, %v1150_v27 }
 0x152   : > { %v8071_v53 = vpop.f32.mrf.mxu1  ;;  %1317 = vrot.lane.b32.xlu0 %v8058_v61, %s7208_s15  ;;  %11533 = vst [vmem:[#allocation42_spill] sm:$0xff] %v8076_v36 }
 0x153   : > { %v2543_v31 = vpop.f32.mrf.mxu2 }
 0x154   : > { %v2544_v29 = vadd.f32 %v2543_v31, %v8011_v62  ;;  %961 = vrot.lane.b32.xlu2 %v7424_v35, %s7209_s16 }
 0x155   : > { %v2047_v9 = vpop.f32.mrf.mxu0 }
 0x156   : > { %v8081_v19 = vadd.f32 %v7927_v2, %v2544_v29  ;;  %v2048_v56 = vadd.f32 %v2047_v9, %v7996_v41  ;;  %v1702_v9 = vsel %vm1670_vm5, %v1595_v63, %v7680_v25  ;;  %v940_v48 = vpop.permute.xlu0 %939  ;;  %v548_v63 = vld [vmem:[%s7304_s14 + $0x348] sm:$0xff] }
 0x158   : > { %v8089_v40 = vadd.f32 %v7931_v51, %v2048_v56  ;;  %v8091_v54 = vpop.f32.mrf.mxu3 }
 0x159   : > { %1319 = vrot.lane.b32.xlu1 %v8076_v36, %s7208_s15 }
 0x15a   : > { %v8096_v20 = vpop.f32.mrf.mxu1  ;;  %969 = vrot.lane.b32.xlu0 %v7493_v46, %s7209_s16 }
 0x15b   : > { %v2545_v2 = vpop.f32.mrf.mxu2 }
 0x15c   : > { %v2546_v50 = vadd.f32 %v2545_v2, %v8011_v62  ;;  %1173 = vrot.lane.b32.xlu2 %v7493_v46, %s7210_s17  ;;  %v547_v2 = vld [vmem:[%s7304_s14 + $0x340] sm:$0xff] }
 0x15d   : > { %v2050_v51 = vpop.f32.mrf.mxu0  ;;  %6278 = vmatmul.msk.bf16.gmra.mxu1 %vm1927_vm1, %v7696_v55  ;;  %6326 = vmatmul.msk.bf16.gmra.mxu3 %vm1927_vm1, %v7696_v55  ;;  %v659_v61 = vpack.c.bf16 %v547_v2, %v547_v2 }
 0x15e   : > { %v8107_v31 = vadd.f32 %v7943_v16, %v2546_v50  ;;  %v2051_v29 = vadd.f32 %v2050_v51, %v7996_v41  ;;  %v3027_v16 = vmax.f32 %v8007_v8, 0.0  ;;  %v1367_v51 = vsel %vm1331_vm2, %v7328_v34, %v940_v48  ;;  %v1046_v8 = vpop.permute.xlu2 %1045 }
 0x160   : > { %v2300_v5 = vadd.f32 %v7948_v0, %v2051_v29  ;;  %2089 = vmatmul.bf16.gmra.mxu0 %v1702_v9  ;;  %2587 = vmatmul.bf16.gmra.mxu2 %v1702_v9  ;;  %v8115_v56 = vpop.f32.mrf.mxu3  ;;  %v8131_v9 = vpop.permute.xlu1 %1289 }
 0x161   : > { %971 = vrot.lane.b32.xlu1 %v7504_v52, %s7209_s16  ;;  %11535 = vst [vmem:[#allocation44_spill] sm:$0xff] %v8131_v9  ;;  %v660_v52 = vpack.c.bf16 %v548_v63, %v548_v63 }
 0x162   : > { %v3035_v14 = vmax.f32 %v2300_v5, 0.0  ;;  %v8120_v27 = vpop.f32.mrf.mxu1  ;;  %1181 = vrot.lane.b32.xlu0 %v7631_v39, %s7210_s17 }
 0x163   : > { %v2548_v25 = vpop.f32.mrf.mxu2 }
 0x164   : > { %v8126_v0 = vmax.f32 %v3027_v16, %v3035_v14  ;;  %v2549_v50 = vadd.f32 %v2548_v25, %v8011_v62  ;;  %1069 = vrot.lane.b32.xlu2 %v7480_v32, %s7211_s18  ;;  %v3028_v16 = vmax.f32 %v8027_v3, 0.0  ;;  %v1500_v25 = vsel %vm1476_vm3, %v1367_v51, %v1046_v8 }
 0x165   : > { %v2052_v29 = vpop.f32.mrf.mxu0  ;;  %v1123_v3 = vunpack.c.l.b16 %v659_v61 }
 0x166   : > { %11534 = vst [vmem:[#allocation43_spill] sm:$0xff] %v8126_v0  ;;  %v2798_v5 = vadd.f32 %v7965_v26, %v2549_v50  ;;  %v2053_v36 = vadd.f32 %v2052_v29, %v7996_v41  ;;  %v3029_v26 = vmax.f32 %v8031_v30, 0.0  ;;  %v1124_v29 = vunpack.c.l.b16 %v660_v52 }
 0x168   : > { %v3036_v14 = vmax.f32 %v2798_v5, 0.0  ;;  %v2302_v34 = vadd.f32 %v7969_v57, %v2053_v36  ;;  %v8139_v48 = vpop.f32.mrf.mxu3  ;;  %v549_v57 = vld [vmem:[%s7304_s14 + $0x350] sm:$0xff]  ;;  %v550_v36 = vld [vmem:[%s7304_s14 + $0x358] sm:$0xff]  ;;  %v1152_v5 = vpop.permute.xlu0 %1151  ;;  %v8163_v10 = vpack.c.b16 %v1124_v29, %v1123_v3  ;;  %v3031_v3 = vmax.f32 %v8065_v13, 0.0 }
 0x169   : > { %1183 = vrot.lane.b32.xlu1 %v7686_v42, %s7210_s17  ;;  %v1597_v8 = vsel %vm1573_vm4, %v1500_v25, %v1152_v5  ;;  %v662_v61 = vpack.c.bf16 %v550_v36, %v550_v36  ;;  %v3030_v25 = vmax.f32 %v8055_v47, 0.0 }
 0x16a   : > { %v8145_v2 = vmax.f32 %v3028_v16, %v3036_v14  ;;  %v3037_v63 = vmax.f32 %v2302_v34, 0.0  ;;  %v8147_v50 = vpop.f32.mrf.mxu1  ;;  %1077 = vrot.lane.b32.xlu0 %v7601_v12, %s7211_s18  ;;  %v661_v14 = vpack.c.bf16 %v549_v57, %v549_v57  ;;  %11538 = vst [vmem:[#allocation47_spill] sm:$0xff] %v8163_v10 }
 0x16b   : > { %v2550_v46 = vpop.f32.mrf.mxu2  ;;  %v1126_v57 = vunpack.c.l.b16 %v662_v61 }
 0x16c   : > { %11536 = vst [vmem:[#allocation45_spill] sm:$0xff] %v8145_v2  ;;  %v8153_v51 = vmax.f32 %v3029_v26, %v3037_v63  ;;  %v2551_v30 = vadd.f32 %v2550_v46, %v8011_v62  ;;  %v1705_v46 = vsel %vm1670_vm5, %v1597_v8, %v7674_v17  ;;  %v942_v26 = vpop.permute.xlu1 %941 }
 0x16d   : > { %v2055_v16 = vpop.f32.mrf.mxu0  ;;  %6279 = vmatmul.msk.bf16.gmra.mxu1 %vm1927_vm1, %v7698_v58  ;;  %6327 = vmatmul.msk.bf16.gmra.mxu3 %vm1927_vm1, %v7698_v58  ;;  %v1370_v8 = vsel %vm1331_vm2, %v7334_v44, %v942_v26  ;;  %v3033_v44 = vmax.f32 %v8089_v40, 0.0  ;;  %v540_v26 = vld [vmem:[%s7304_s14 + $0x308] sm:$0xff] }
 0x16e   : > { %11537 = vst [vmem:[#allocation46_spill] sm:$0xff] %v8153_v51  ;;  %v2800_v52 = vadd.f32 %v7984_v4, %v2551_v30  ;;  %v2056_v34 = vadd.f32 %v2055_v16, %v7996_v41  ;;  %v1125_v4 = vunpack.c.l.b16 %v661_v14 }
 0x170   : > { %v3038_v63 = vmax.f32 %v2800_v52, 0.0  ;;  %v2305_v5 = vadd.f32 %v7992_v21, %v2056_v34  ;;  %2094 = vmatmul.bf16.gmra.mxu0 %v1705_v46  ;;  %2592 = vmatmul.bf16.gmra.mxu2 %v1705_v46  ;;  %v8169_v9 = vpop.f32.mrf.mxu3  ;;  %v8185_v13 = vpack.c.b16 %v1126_v57, %v1125_v4  ;;  %v1048_v52 = vpop.permute.xlu0 %1047 }
 0x171   : > { %1079 = vrot.lane.b32.xlu1 %v7631_v39, %s7211_s18  ;;  %v8189_v34 = vpop.permute.xlu2 %1291  ;;  %v1502_v46 = vsel %vm1476_vm3, %v1370_v8, %v1048_v52 }
 0x172   : > { %v3039_v29 = vmax.f32 %v2305_v5, 0.0  ;;  %v8174_v36 = vpop.f32.mrf.mxu1  ;;  %1323 = vrot.lane.b32.xlu0 %v8163_v10, %s7208_s15  ;;  %v8178_v17 = vmax.f32 %v3030_v25, %v3038_v63  ;;  %11541 = vst [vmem:[#allocation50_spill] sm:$0xff] %v8185_v13  ;;  %v3032_v25 = vmax.f32 %v8081_v19, 0.0 }
 0x173   : > { %v2553_v21 = vpop.f32.mrf.mxu2  ;;  %11542 = vst [vmem:[#allocation51_spill] sm:$0xff] %v8189_v34 }
 0x174   : > { %11539 = vst [vmem:[#allocation48_spill] sm:$0xff] %v8178_v17  ;;  %v8180_v47 = vmax.f32 %v3031_v3, %v3039_v29  ;;  %v2554_v30 = vadd.f32 %v2553_v21, %v8011_v62  ;;  %v1154_v4 = vpop.permute.xlu1 %1153 }
 0x175   : > { %v2057_v16 = vpop.f32.mrf.mxu0 }
 0x176   : > { %11540 = vst [vmem:[#allocation49_spill] sm:$0xff] %v8180_v47  ;;  %v2803_v14 = vadd.f32 %v8009_v28, %v2554_v30  ;;  %v2058_v61 = vadd.f32 %v2057_v16, %v7996_v41  ;;  %v539_v28 = vld [vmem:[%s7304_s14 + $0x300] sm:$0xff]  ;;  %v1599_v30 = vsel %vm1573_vm4, %v1502_v46, %v1154_v4 }
 0x177   : > { %v651_v19 = vpack.c.bf16 %v539_v28, %v539_v28  ;;  %v1708_v46 = vsel %vm1670_vm5, %v1599_v30, %v7702_v6 }
 0x178   : > { %v3040_v63 = vmax.f32 %v2803_v14, 0.0  ;;  %v2307_v5 = vadd.f32 %v8015_v15, %v2058_v61  ;;  %v8194_v3 = vpop.f32.mrf.mxu3  ;;  %v652_v15 = vpack.c.bf16 %v540_v26, %v540_v26 }
 0x179   : > { %1325 = vrot.lane.b32.xlu1 %v8185_v13, %s7208_s15  ;;  %v911_v14 = vunpack.c.l.b16 %v651_v19  ;;  %v944_v26 = vpop.permute.xlu2 %943 }
 0x17a   : > { %v8201_v57 = vmax.f32 %v3032_v25, %v3040_v63  ;;  %v3041_v29 = vmax.f32 %v2307_v5, 0.0  ;;  %v8203_v21 = vpop.f32.mrf.mxu1  ;;  %975 = vrot.lane.b32.xlu0 %v7601_v12, %s7209_s16  ;;  %v912_v61 = vunpack.c.l.b16 %v652_v15  ;;  %v3034_v5 = vmax.f32 %v8107_v31, 0.0  ;;  %v553_v31 = vld [vmem:[%s7304_s14 + $0x370] sm:$0xff] }
 0x17b   : > { %v2555_v8 = vpop.f32.mrf.mxu2  ;;  %v1373_v15 = vsel %vm1331_vm2, %v7352_v1, %v944_v26  ;;  %v665_v30 = vpack.c.bf16 %v553_v31, %v553_v31 }
 0x17c   : > { %11543 = vst [vmem:[#allocation52_spill] sm:$0xff] %v8201_v57  ;;  %v8208_v40 = vmax.f32 %v3033_v44, %v3041_v29  ;;  %v2556_v16 = vadd.f32 %v2555_v8, %v8011_v62  ;;  %v8216_v63 = vpack.c.b16 %v912_v61, %v911_v14  ;;  %v554_v29 = vld [vmem:[%s7304_s14 + $0x378] sm:$0xff]  ;;  %v1050_v14 = vpop.permute.xlu1 %1049 }
 0x17d   : > { %v2060_v52 = vpop.f32.mrf.mxu0  ;;  %6280 = vmatmul.msk.bf16.gmra.mxu1 %vm1927_vm1, %v7716_v37  ;;  %6328 = vmatmul.msk.bf16.gmra.mxu3 %vm1927_vm1, %v7716_v37  ;;  %v666_v8 = vpack.c.bf16 %v554_v29, %v554_v29  ;;  %v1231_v1 = vunpack.c.l.b16 %v665_v30 }
 0x17e   : > { %11544 = vst [vmem:[#allocation53_spill] sm:$0xff] %v8208_v40  ;;  %v2805_v25 = vadd.f32 %v8033_v49, %v2556_v16  ;;  %1315 = vrot.lane.b32.xlu2 %v8216_v63, %s7208_s15  ;;  %v8239_v16 = vpop.permute.xlu0 %1293 }
 0x17f   : > { %11545 = vst [vmem:[#allocation54_spill] sm:$0xff] %v8216_v63 }
 0x180   : > { %v3042_v44 = vmax.f32 %v2805_v25, 0.0  ;;  %2099 = vmatmul.bf16.gmra.mxu0 %v1708_v46  ;;  %2597 = vmatmul.bf16.gmra.mxu2 %v1708_v46  ;;  %v8221_v28 = vpop.f32.mrf.mxu3  ;;  %11547 = vst [vmem:[#allocation56_spill] sm:$0xff] %v8239_v16  ;;  %v1504_v25 = vsel %vm1476_vm3, %v1373_v15, %v1050_v14  ;;  %v11549_v15 = vld [vmem:[#allocation20_spill] sm:$0xff] }
 0x181   : > { %977 = vrot.lane.b32.xlu1 %v7631_v39, %s7209_s16  ;;  %v1156_v26 = vpop.permute.xlu2 %1155 }
 0x182   : > { %v8227_v49 = vmax.f32 %v3034_v5, %v3042_v44  ;;  %v8229_v4 = vpop.f32.mrf.mxu1  ;;  %1187 = vrot.lane.b32.xlu0 %v7720_v45, %s7210_s17  ;;  %v11548_v5 = vld [vmem:[#allocation19_spill] sm:$0xff]  ;;  %v1232_v44 = vunpack.c.l.b16 %v666_v8  ;;  %v1601_v29 = vsel %vm1573_vm4, %v1504_v25, %v1156_v26 }
 0x183   : > { %v2558_v6 = vpop.f32.mrf.mxu2  ;;  %v1711_v10 = vsel %vm1670_vm5, %v1601_v29, %v7696_v55  ;;  %v11550_v55 = vld [vmem:[#allocation2_spill] sm:$0xff]  ;;  %v6801_v29 = vpack.i.bf16 %v8153_v51, %v8126_v0 }
 0x184   : > { %11546 = vst [vmem:[#allocation55_spill] sm:$0xff] %v8227_v49  ;;  %v1234_v14 = vpack.c.b16 %v1232_v44, %v1231_v1  ;;  %v8278_v44 = vpop.permute.xlu1 %1295  ;;  %v6697_v0 = vld [vmem:[%s11301_s3 + $0x20] sm:$0xff] }
 0x185   : > { %v8235_v19 = vpop.f32.mrf.mxu0  ;;  %11551 = vst [vmem:[#allocation20_spill] sm:$0xff] %v8278_v44  ;;  %4233 = vmatpush.bf16.msrb.mxu1 %v6697_v0 }
 0x186   : > { %967 = vrot.lane.b32.xlu2 %v7480_v32, %s7209_s16  ;;  %v946_v8 = vpop.permute.xlu0 %945  ;;  %v2559_v32 = vadd.f32 %v2558_v6, %v8011_v62 }
 0x188   : > { %v8241_v61 = vpop.f32.mrf.mxu3 }
 0x189   : > { %1189 = vrot.lane.b32.xlu1 %v7764_v22, %s7210_s17  ;;  %v1052_v39 = vpop.permute.xlu2 %1051 }
 0x18a   : > { %v8248_v46 = vpop.f32.mrf.mxu1  ;;  %1083 = vrot.lane.b32.xlu0 %v11548_v5, %s7211_s18 }
 0x18b   : > { %v8252_v31 = vpop.f32.mrf.mxu2 }
 0x18d   : > { %v8255_v13 = vpop.f32.mrf.mxu0  ;;  %6281 = vmatmul.msk.bf16.gmra.mxu1 %vm1927_vm1, %v11549_v15  ;;  %6329 = vmatmul.msk.bf16.gmra.mxu3 %vm1927_vm1, %v11549_v15 }
 0x18e   : > { %1179 = vrot.lane.b32.xlu2 %v7601_v12, %s7210_s17  ;;  %v6796_v12 = vpack.i.bf16 %v8178_v17, %v8145_v2  ;;  %v1158_v51 = vpop.permute.xlu0 %1157  ;;  %v11552_v17 = vld [vmem:[#allocation22_spill] sm:$0xff] }
 0x190   : > { %2104 = vmatmul.bf16.gmra.mxu0 %v1711_v10  ;;  %2602 = vmatmul.bf16.gmra.mxu2 %v1711_v10  ;;  %v8263_v30 = vpop.f32.mrf.mxu3  ;;  %v1376_v10 = vsel %vm1331_vm2, %v11550_v55, %v946_v8  ;;  %v2061_v8 = vadd.f32 %v2060_v52, %v7996_v41 }
 0x191   : > { %1085 = vrot.lane.b32.xlu1 %v7720_v45, %s7211_s18 }
 0x192   : > { %v8269_v25 = vpop.f32.mrf.mxu1  ;;  %1329 = vrot.lane.b32.xlu0 %v1234_v14, %s7208_s15  ;;  %v1506_v14 = vsel %vm1476_vm3, %v1376_v10, %v1052_v39  ;;  %v2310_v52 = vadd.f32 %v8040_v59, %v2061_v8 }
 0x193   : > { %v8272_v26 = vpop.f32.mrf.mxu2  ;;  %v1603_v39 = vsel %vm1573_vm4, %v1506_v14, %v1158_v51  ;;  %v948_v51 = vpop.permute.xlu1 %947 }
 0x194   : > { %v1714_v44 = vsel %vm1670_vm5, %v1603_v39, %v7698_v58  ;;  %v3043_v14 = vmax.f32 %v2310_v52, 0.0  ;;  %v2808_v58 = vadd.f32 %v8067_v18, %v2559_v32 }
 0x195   : > { %v8274_v1 = vpop.f32.mrf.mxu0 }
 0x196   : > { %1075 = vrot.lane.b32.xlu2 %v7560_v38, %s7211_s18  ;;  %v1054_v32 = vpop.permute.xlu0 %1053  ;;  %v3044_v18 = vmax.f32 %v2808_v58, 0.0  ;;  %v2066_v58 = vadd.f32 %v8255_v13, %v7996_v41 }
 0x198   : > { %v8282_v63 = vpop.f32.mrf.mxu3 }
 0x199   : > { %6802 = vrot.lane.b32.xlu1 %v6801_v29, %s7212_s21 }
 0x19a   : > { %v8291_v55 = vpop.f32.mrf.mxu1  ;;  %6797 = vrot.lane.b32.xlu0 %v6796_v12, %s7213_s22 }
 0x19b   : > { %v8297_v2 = vpop.f32.mrf.mxu2 }
 0x19d   : > { %v2070_v10 = vpop.f32.mrf.mxu0  ;;  %6282 = vmatmul.msk.bf16.gmra.mxu1 %vm1927_vm1, %v11552_v17  ;;  %6330 = vmatmul.msk.bf16.gmra.mxu3 %vm1927_vm1, %v11552_v17 }
 0x19e   : > { %v2071_v12 = vadd.f32 %v2070_v10, %v7996_v41  ;;  %v6816_v10 = vpack.i.bf16 %v8208_v40, %v8180_v47 }
 0x1a0   : > { %v2320_v16 = vadd.f32 %v8147_v50, %v2071_v12  ;;  %2109 = vmatmul.bf16.gmra.mxu0 %v1714_v44  ;;  %2607 = vmatmul.bf16.gmra.mxu2 %v1714_v44  ;;  %v8310_v0 = vpop.f32.mrf.mxu3  ;;  %v8321_v44 = vpop.permute.xlu2 %1297  ;;  %v6811_v12 = vpack.i.bf16 %v8227_v49, %v8201_v57 }
 0x1a1   : > { %6807 = vrot.lane.b32.xlu1 %v6801_v29, %s7213_s22 }
 0x1a2   : > { %v3051_v34 = vmax.f32 %v2320_v16, 0.0  ;;  %v8313_v35 = vpop.f32.mrf.mxu1  ;;  %1087 = vrot.lane.b32.xlu0 %v7764_v22, %s7211_s18  ;;  %v1379_v16 = vsel %vm1331_vm2, %v7348_v60, %v948_v51  ;;  %v2063_v60 = vadd.f32 %v8235_v19, %v7996_v41  ;;  %v545_v51 = vld [vmem:[%s7304_s14 + $0x330] sm:$0xff] }
 0x1a3   : > { %v2568_v59 = vpop.f32.mrf.mxu2 }
 0x1a4   : > { %v8318_v6 = vmax.f32 %v3043_v14, %v3051_v34  ;;  %v2569_v50 = vadd.f32 %v2568_v59, %v8011_v62  ;;  %v1508_v14 = vsel %vm1476_vm3, %v1379_v16, %v1054_v32  ;;  %v546_v59 = vld [vmem:[%s7304_s14 + $0x338] sm:$0xff]  ;;  %v657_v16 = vpack.c.bf16 %v545_v51, %v545_v51  ;;  %v1160_v32 = vpop.permute.xlu1 %1159 }
 0x1a5   : > { %v2072_v8 = vpop.f32.mrf.mxu0  ;;  %v2312_v13 = vadd.f32 %v8071_v53, %v2063_v60  ;;  %v2564_v51 = vadd.f32 %v8272_v26, %v8011_v62 }
 0x1a6   : > { %11553 = vst [vmem:[#allocation2_spill] sm:$0xff] %v8318_v6  ;;  %v2818_v29 = vadd.f32 %v8169_v9, %v2569_v50  ;;  %v2073_v39 = vadd.f32 %v2072_v8, %v7996_v41  ;;  %v2561_v9 = vadd.f32 %v8252_v31, %v8011_v62  ;;  %v1605_v31 = vsel %vm1573_vm4, %v1508_v14, %v1160_v32 }
 0x1a7   : > { %v1019_v57 = vunpack.c.l.b16 %v657_v16  ;;  %v1717_v53 = vsel %vm1670_vm5, %v1605_v31, %v7716_v37 }
 0x1a8   : > { %v3052_v34 = vmax.f32 %v2818_v29, 0.0  ;;  %v8329_v52 = vpop.f32.mrf.mxu3  ;;  %v658_v29 = vpack.c.bf16 %v546_v59, %v546_v59  ;;  %v2322_v19 = vadd.f32 %v8174_v36, %v2073_v39  ;;  %v2315_v36 = vadd.f32 %v8096_v20, %v2066_v58 }
 0x1a9   : > { %6817 = vrot.lane.b32.xlu1 %v6816_v10, %s7212_s21  ;;  %v3045_v20 = vmax.f32 %v2312_v13, 0.0 }
 0x1aa   : > { %v8343_v50 = vmax.f32 %v3044_v18, %v3052_v34  ;;  %v8345_v8 = vpop.f32.mrf.mxu1  ;;  %6812 = vrot.lane.b32.xlu0 %v6811_v12, %s7213_s22  ;;  %v1020_v49 = vunpack.c.l.b16 %v658_v29  ;;  %v2810_v34 = vadd.f32 %v8091_v54, %v2561_v9  ;;  %v3053_v14 = vmax.f32 %v2322_v19, 0.0 }
 0x1ab   : > { %v2570_v40 = vpop.f32.mrf.mxu2  ;;  %v3047_v37 = vmax.f32 %v2315_v36, 0.0  ;;  %v2813_v9 = vadd.f32 %v8115_v56, %v2564_v51 }
 0x1ac   : > { %11554 = vst [vmem:[#allocation22_spill] sm:$0xff] %v8343_v50  ;;  %v2571_v47 = vadd.f32 %v2570_v40, %v8011_v62  ;;  %v950_v40 = vpop.permute.xlu2 %949  ;;  %v8362_v60 = vpack.c.b16 %v1020_v49, %v1019_v57  ;;  %v8376_v49 = vpop.permute.xlu0 %1299 }
 0x1ad   : > { %v2075_v18 = vpop.f32.mrf.mxu0  ;;  %6283 = vmatmul.msk.bf16.gmra.mxu1 %vm1927_vm1, %v7779_v43  ;;  %6331 = vmatmul.msk.bf16.gmra.mxu3 %vm1927_vm1, %v7779_v43  ;;  %v1382_v19 = vsel %vm1331_vm2, %v7370_v24, %v950_v40  ;;  %v3048_v36 = vmax.f32 %v2813_v9, 0.0  ;;  %v2068_v24 = vadd.f32 %v8274_v1, %v7996_v41 }
 0x1ae   : > { %v2820_v39 = vadd.f32 %v8194_v3, %v2571_v47  ;;  %v2076_v12 = vadd.f32 %v2075_v18, %v7996_v41  ;;  %11555 = vst [vmem:[#allocation57_spill] sm:$0xff] %v8362_v60  ;;  %1321 = vrot.lane.b32.xlu2 %v8362_v60, %s7208_s15  ;;  %v3046_v47 = vmax.f32 %v2810_v34, 0.0  ;;  %v1056_v34 = vpop.permute.xlu1 %1055 }
 0x1b0   : > { %v3054_v59 = vmax.f32 %v2820_v39, 0.0  ;;  %v2325_v16 = vadd.f32 %v8203_v21, %v2076_v12  ;;  %2114 = vmatmul.bf16.gmra.mxu0 %v1717_v53  ;;  %2612 = vmatmul.bf16.gmra.mxu2 %v1717_v53  ;;  %v8367_v54 = vpop.f32.mrf.mxu3  ;;  %v8378_v21 = vmax.f32 %v3045_v20, %v3053_v14  ;;  %v1510_v53 = vsel %vm1476_vm3, %v1382_v19, %v1056_v34 }
 0x1b1   : > { %6822 = vrot.lane.b32.xlu1 %v6816_v10, %s7213_s22 }
 0x1b2   : > { %v3055_v3 = vmax.f32 %v2325_v16, 0.0  ;;  %v8372_v57 = vpop.f32.mrf.mxu1  ;;  %1089 = vrot.lane.b32.xlu0 %v7766_v23, %s7211_s18  ;;  %11556 = vst [vmem:[#allocation58_spill] sm:$0xff] %v8378_v21  ;;  %v8381_v58 = vmax.f32 %v3046_v47, %v3054_v59  ;;  %v6831_v18 = vpack.i.bf16 %v8378_v21, %v8318_v6 }
 0x1b3   : > { %v2573_v26 = vpop.f32.mrf.mxu2 }
 0x1b4   : > { %11557 = vst [vmem:[#allocation59_spill] sm:$0xff] %v8381_v58  ;;  %v8383_v10 = vmax.f32 %v3047_v37, %v3055_v3  ;;  %v2574_v29 = vadd.f32 %v2573_v26, %v8011_v62  ;;  %v6826_v12 = vpack.i.bf16 %v8381_v58, %v8343_v50  ;;  %v1162_v14 = vpop.permute.xlu2 %1161  ;;  %v952_v47 = vpop.permute.xlu0 %951  ;;  %v2317_v37 = vadd.f32 %v8120_v27, %v2068_v24  ;;  %v11569_v50 = vld [vmem:[#allocation30_spill] sm:$0xff] }
 0x1b5   : > { %v2077_v32 = vpop.f32.mrf.mxu0  ;;  %v1607_v20 = vsel %vm1573_vm4, %v1510_v53, %v1162_v14 }
 0x1b6   : > { %11558 = vst [vmem:[#allocation60_spill] sm:$0xff] %v8383_v10  ;;  %v2823_v31 = vadd.f32 %v8221_v28, %v2574_v29  ;;  %v2078_v13 = vadd.f32 %v2077_v32, %v7996_v41  ;;  %973 = vrot.lane.b32.xlu2 %v7560_v38, %s7209_s16  ;;  %v2566_v28 = vadd.f32 %v8297_v2, %v8011_v62  ;;  %v3049_v32 = vmax.f32 %v2317_v37, 0.0 }
 0x1b7   : > { %v1720_v9 = vsel %vm1670_vm5, %v1607_v20, %v11549_v15 }
 0x1b8   : > { %v3056_v56 = vmax.f32 %v2823_v31, 0.0  ;;  %v8392_v39 = vpop.f32.mrf.mxu3  ;;  %v2327_v59 = vadd.f32 %v8229_v4, %v2078_v13  ;;  %v2815_v2 = vadd.f32 %v8139_v48, %v2566_v28  ;;  %v8438_v13 = vpop.permute.xlu1 %1301 }
 0x1b9   : > { %6832 = vrot.lane.b32.xlu1 %v6831_v18, %s7212_s21  ;;  %11562 = vst [vmem:[#allocation64_spill] sm:$0xff] %v8438_v13 }
 0x1ba   : > { %v8404_v40 = vmax.f32 %v3048_v36, %v3056_v56  ;;  %v8406_v51 = vpop.f32.mrf.mxu1  ;;  %6827 = vrot.lane.b32.xlu0 %v6826_v12, %s7213_s22  ;;  %v3057_v26 = vmax.f32 %v2327_v59, 0.0  ;;  %v3050_v19 = vmax.f32 %v2815_v2, 0.0  ;;  %v11563_v36 = vld [vmem:[#allocation4_spill] sm:$0xff] }
 0x1bb   : > { %v2575_v16 = vpop.f32.mrf.mxu2 }
 0x1bc   : > { %11559 = vst [vmem:[#allocation61_spill] sm:$0xff] %v8404_v40  ;;  %v2576_v1 = vadd.f32 %v2575_v16, %v8011_v62  ;;  %v8432_v48 = vmax.f32 %v3049_v32, %v3057_v26  ;;  %v1058_v56 = vpop.permute.xlu2 %1057  ;;  %v1164_v12 = vpop.permute.xlu0 %1163  ;;  %v11566_v32 = vld [vmem:[#allocation26_spill] sm:$0xff] }
 0x1bd   : > { %v8413_v3 = vpop.f32.mrf.mxu0  ;;  %6284 = vmatmul.msk.bf16.gmra.mxu1 %vm1927_vm1, %v7807_v11  ;;  %6332 = vmatmul.msk.bf16.gmra.mxu3 %vm1927_vm1, %v7807_v11 }
 0x1be   : > { %v2825_v4 = vadd.f32 %v8241_v61, %v2576_v1  ;;  %1185 = vrot.lane.b32.xlu2 %v11548_v5, %s7210_s17  ;;  %11560 = vst [vmem:[#allocation62_spill] sm:$0xff] %v8432_v48  ;;  %v6846_v14 = vpack.i.bf16 %v8432_v48, %v8383_v10 }
 0x1c0   : > { %v3058_v29 = vmax.f32 %v2825_v4, 0.0  ;;  %2119 = vmatmul.bf16.gmra.mxu0 %v1720_v9  ;;  %2617 = vmatmul.bf16.gmra.mxu2 %v1720_v9  ;;  %v8423_v27 = vpop.f32.mrf.mxu3  ;;  %v954_v37 = vpop.permute.xlu1 %953 }
 0x1c1   : > { %6837 = vrot.lane.b32.xlu1 %v6831_v18, %s7213_s22  ;;  %v1385_v18 = vsel %vm1331_vm2, %v11563_v36, %v952_v47  ;;  %v11564_v47 = vld [vmem:[#allocation28_spill] sm:$0xff] }
 0x1c2   : > { %v8428_v31 = vpop.f32.mrf.mxu1  ;;  %1091 = vrot.lane.b32.xlu0 %v7781_v33, %s7211_s18  ;;  %v8436_v15 = vmax.f32 %v3050_v19, %v3058_v29  ;;  %v1512_v28 = vsel %vm1476_vm3, %v1385_v18, %v1058_v56 }
 0x1c3   : > { %v8434_v61 = vpop.f32.mrf.mxu2  ;;  %v1609_v20 = vsel %vm1573_vm4, %v1512_v28, %v1164_v12  ;;  %v551_v28 = vld [vmem:[%s7304_s14 + $0x360] sm:$0xff] }
 0x1c4   : > { %11561 = vst [vmem:[#allocation63_spill] sm:$0xff] %v8436_v15  ;;  %v6841_v24 = vpack.i.bf16 %v8436_v15, %v8404_v40  ;;  %v1723_v2 = vsel %vm1670_vm5, %v1609_v20, %v11552_v17  ;;  %v8464_v4 = vpop.permute.xlu2 %1303  ;;  %v1060_v9 = vpop.permute.xlu0 %1059  ;;  %v11567_v17 = vld [vmem:[#allocation3_spill] sm:$0xff]  ;;  %v663_v48 = vpack.c.bf16 %v551_v28, %v551_v28 }
 0x1c5   : > { %v2082_v34 = vpop.f32.mrf.mxu0  ;;  %11565 = vst [vmem:[#allocation4_spill] sm:$0xff] %v8464_v4  ;;  %v1388_v18 = vsel %vm1331_vm2, %v11567_v17, %v954_v37  ;;  %v552_v20 = vld [vmem:[%s7304_s14 + $0x368] sm:$0xff] }
 0x1c6   : > { %1081 = vrot.lane.b32.xlu2 %v7686_v42, %s7211_s18  ;;  %v1514_v12 = vsel %vm1476_vm3, %v1388_v18, %v1060_v9  ;;  %v664_v10 = vpack.c.bf16 %v552_v20, %v552_v20  ;;  %v1229_v6 = vunpack.c.l.b16 %v663_v48  ;;  %v2083_v48 = vadd.f32 %v2082_v34, %v7996_v41 }
 0x1c8   : > { %v8444_v53 = vpop.f32.mrf.mxu3  ;;  %v1230_v37 = vunpack.c.l.b16 %v664_v10  ;;  %v2081_v10 = vadd.f32 %v8413_v3, %v7996_v41 }
 0x1c9   : > { %6847 = vrot.lane.b32.xlu1 %v6846_v14, %s7212_s21 }
 0x1ca   : > { %v8452_v59 = vpop.f32.mrf.mxu1  ;;  %6842 = vrot.lane.b32.xlu0 %v6841_v24, %s7213_s22  ;;  %v1166_v24 = vpop.permute.xlu1 %1165  ;;  %v1233_v9 = vpack.c.b16 %v1230_v37, %v1229_v6  ;;  %v2330_v58 = vadd.f32 %v8248_v46, %v2081_v10 }
 0x1cb   : > { %v2580_v16 = vpop.f32.mrf.mxu2  ;;  %v1611_v21 = vsel %vm1573_vm4, %v1514_v12, %v1166_v24 }
 0x1cc   : > { %v8486_v40 = vpop.permute.xlu0 %1305  ;;  %v1726_v18 = vsel %vm1670_vm5, %v1611_v21, %v7779_v43  ;;  %v11570_v21 = vld [vmem:[#allocation7_spill] sm:$0xff]  ;;  %v3059_v46 = vmax.f32 %v2330_v58, 0.0 }
 0x1cd   : > { %v8456_v1 = vpop.f32.mrf.mxu0  ;;  %6285 = vmatmul.msk.bf16.gmra.mxu1 %vm1927_vm1, %v11564_v47  ;;  %6333 = vmatmul.msk.bf16.gmra.mxu3 %vm1927_vm1, %v11564_v47  ;;  %11568 = vst [vmem:[#allocation28_spill] sm:$0xff] %v8486_v40  ;;  %v2579_v40 = vadd.f32 %v8434_v61, %v8011_v62 }
 0x1ce   : > { %1327 = vrot.lane.b32.xlu2 %v1233_v9, %s7208_s15  ;;  %v2332_v9 = vadd.f32 %v8269_v25, %v2083_v48 }
 0x1d0   : > { %2124 = vmatmul.bf16.gmra.mxu0 %v1723_v2  ;;  %2622 = vmatmul.bf16.gmra.mxu2 %v1723_v2  ;;  %v8466_v26 = vpop.f32.mrf.mxu3  ;;  %v3061_v25 = vmax.f32 %v2332_v9, 0.0 }
 0x1d1   : > { %6852 = vrot.lane.b32.xlu1 %v6846_v14, %s7213_s22  ;;  %v956_v14 = vpop.permute.xlu2 %955 }
 0x1d2   : > { %v8469_v29 = vpop.f32.mrf.mxu1  ;;  %1093 = vrot.lane.b32.xlu0 %v11566_v32, %s7211_s18  ;;  %v1062_v34 = vpop.permute.xlu1 %1061 }
 0x1d3   : > { %v8473_v19 = vpop.f32.mrf.mxu2 }
 0x1d4   : > { %v958_v43 = vpop.permute.xlu0 %957 }
 0x1d5   : > { %v8475_v36 = vpop.f32.mrf.mxu0 }
 0x1d6   : > { %979 = vrot.lane.b32.xlu2 %v7686_v42, %s7209_s16 }
 0x1d8   : > { %v8479_v56 = vpop.f32.mrf.mxu3 }
 0x1d9   : > { %v1168_v6 = vpop.permute.xlu2 %1167 }
 0x1da   : > { %v8484_v2 = vpop.f32.mrf.mxu1 }
 0x1db   : > { %v8488_v15 = vpop.f32.mrf.mxu2 }
 0x1dd   : > { %v2090_v17 = vpop.f32.mrf.mxu0  ;;  %6286 = vmatmul.msk.bf16.gmra.mxu1 %vm1927_vm1, %v11569_v50  ;;  %6334 = vmatmul.msk.bf16.gmra.mxu3 %vm1927_vm1, %v11569_v50 }
 0x1de   : > { %v2091_v28 = vadd.f32 %v2090_v17, %v7996_v41  ;;  %v1391_v17 = vsel %vm1331_vm2, %v11570_v21, %v956_v14  ;;  %1191 = vrot.lane.b32.xlu2 %v7766_v23, %s7210_s17 }
 0x1df   : > { %v1516_v4 = vsel %vm1476_vm3, %v1391_v17, %v1062_v34  ;;  %v2828_v17 = vadd.f32 %v8263_v30, %v2579_v40  ;;  %v11573_v34 = vld [vmem:[#allocation32_spill] sm:$0xff] }
 0x1e0   : > { %2129 = vmatmul.bf16.gmra.mxu0 %v1726_v18  ;;  %2627 = vmatmul.bf16.gmra.mxu2 %v1726_v18  ;;  %v8498_v20 = vpop.f32.mrf.mxu3  ;;  %v2340_v37 = vadd.f32 %v8345_v8, %v2091_v28  ;;  %v2581_v8 = vadd.f32 %v2580_v16, %v8011_v62  ;;  %v1613_v61 = vsel %vm1573_vm4, %v1516_v4, %v1168_v6 }
 0x1e1   : > { %v1729_v40 = vsel %vm1670_vm5, %v1613_v61, %v7807_v11  ;;  %v3060_v4 = vmax.f32 %v2828_v17, 0.0  ;;  %v2088_v11 = vadd.f32 %v8475_v36, %v7996_v41 }
 0x1e2   : > { %v8504_v12 = vpop.f32.mrf.mxu1  ;;  %v3067_v28 = vmax.f32 %v2340_v37, 0.0  ;;  %v1064_v37 = vpop.permute.xlu2 %1063 }
 0x1e3   : > { %v2588_v24 = vpop.f32.mrf.mxu2 }
 0x1e4   : > { %v2589_v60 = vadd.f32 %v2588_v24, %v8011_v62 }
 0x1e5   : > { %v2092_v18 = vpop.f32.mrf.mxu0 }
 0x1e6   : > { %v2093_v3 = vadd.f32 %v2092_v18, %v7996_v41  ;;  %v2838_v10 = vadd.f32 %v8367_v54, %v2589_v60  ;;  %v8528_v18 = vmax.f32 %v3059_v46, %v3067_v28  ;;  %981 = vrot.lane.b32.xlu2 %v11548_v5, %s7209_s16 }
 0x1e8   : > { %v2342_v14 = vadd.f32 %v8372_v57, %v2093_v3  ;;  %v8518_v21 = vpop.f32.mrf.mxu3  ;;  %v2830_v57 = vadd.f32 %v8282_v63, %v2581_v8  ;;  %11571 = vst [vmem:[#allocation3_spill] sm:$0xff] %v8528_v18  ;;  %v3068_v60 = vmax.f32 %v2838_v10, 0.0  ;;  %v1170_v63 = vpop.permute.xlu0 %1169 }
 0x1ea   : > { %v3069_v48 = vmax.f32 %v2342_v14, 0.0  ;;  %v8523_v24 = vpop.f32.mrf.mxu1  ;;  %v3062_v6 = vmax.f32 %v2830_v57, 0.0  ;;  %v8552_v46 = vmax.f32 %v3060_v4, %v3068_v60  ;;  %v8558_v61 = vpop.permute.xlu2 %1309  ;;  %v11577_v57 = vld [vmem:[#allocation6_spill] sm:$0xff] }
 0x1eb   : > { %v2590_v16 = vpop.f32.mrf.mxu2  ;;  %11576 = vst [vmem:[#allocation65_spill] sm:$0xff] %v8558_v61 }
 0x1ec   : > { %v8530_v3 = vmax.f32 %v3061_v25, %v3069_v48  ;;  %v2591_v58 = vadd.f32 %v2590_v16, %v8011_v62  ;;  %11574 = vst [vmem:[#allocation7_spill] sm:$0xff] %v8552_v46 }
 0x1ed   : > { %v2095_v9 = vpop.f32.mrf.mxu0  ;;  %6287 = vmatmul.msk.bf16.gmra.mxu1 %vm1927_vm1, %v11573_v34  ;;  %6335 = vmatmul.msk.bf16.gmra.mxu3 %vm1927_vm1, %v11573_v34 }
 0x1ee   : > { %11572 = vst [vmem:[#allocation30_spill] sm:$0xff] %v8530_v3  ;;  %v2840_v30 = vadd.f32 %v8392_v39, %v2591_v58  ;;  %v6861_v54 = vpack.i.bf16 %v8530_v3, %v8528_v18  ;;  %v2096_v28 = vadd.f32 %v2095_v9, %v7996_v41  ;;  %v2086_v39 = vadd.f32 %v8456_v1, %v7996_v41 }
 0x1ef   : > { %v1394_v1 = vsel %vm1331_vm2, %v11577_v57, %v958_v43  ;;  %v2337_v9 = vadd.f32 %v8313_v35, %v2088_v11  ;;  %v2586_v43 = vadd.f32 %v8488_v15, %v8011_v62  ;;  %1193 = vrot.lane.b32.xlu2 %v7781_v33, %s7210_s17 }
 0x1f0   : > { %v3070_v8 = vmax.f32 %v2840_v30, 0.0  ;;  %2134 = vmatmul.bf16.gmra.mxu0 %v1729_v40  ;;  %2632 = vmatmul.bf16.gmra.mxu2 %v1729_v40  ;;  %v8543_v14 = vpop.f32.mrf.mxu3  ;;  %v2345_v17 = vadd.f32 %v8406_v51, %v2096_v28  ;;  %v2335_v36 = vadd.f32 %v8291_v55, %v2086_v39  ;;  %v8570_v40 = vpop.permute.xlu1 %1307  ;;  %v2584_v51 = vadd.f32 %v8473_v19, %v8011_v62 }
 0x1f1   : > { %6862 = vrot.lane.b32.xlu1 %v6861_v54, %s7212_s21  ;;  %11578 = vst [vmem:[#allocation6_spill] sm:$0xff] %v8570_v40  ;;  %v1518_v4 = vsel %vm1476_vm3, %v1394_v1, %v1064_v37  ;;  %v1066_v28 = vpop.permute.xlu0 %1065  ;;  %v3065_v37 = vmax.f32 %v2337_v9, 0.0 }
 0x1f2   : > { %v8554_v25 = vmax.f32 %v3062_v6, %v3070_v8  ;;  %v8556_v10 = vpop.f32.mrf.mxu1  ;;  %v3071_v6 = vmax.f32 %v2345_v17, 0.0  ;;  %v6696_v8 = vld [vmem:[%s11301_s3 + $0x18] sm:$0xff]  ;;  %v3063_v19 = vmax.f32 %v2335_v36, 0.0  ;;  %v1615_v17 = vsel %vm1573_vm4, %v1518_v4, %v1170_v63 }
 0x1f3   : > { %v2593_v48 = vpop.f32.mrf.mxu2  ;;  %4234 = vmatpush.bf16.msrb.mxu1 %v6696_v8 }
 0x1f4   : > { %11575 = vst [vmem:[#allocation32_spill] sm:$0xff] %v8554_v25  ;;  %v6856_v16 = vpack.i.bf16 %v8554_v25, %v8552_v46  ;;  %v2594_v60 = vadd.f32 %v2593_v48, %v8011_v62  ;;  %v8592_v57 = vmax.f32 %v3063_v19, %v3071_v6  ;;  %v11591_v46 = vld [vmem:[#allocation39_spill] sm:$0xff] }
 0x1f5   : > { %v2097_v58 = vpop.f32.mrf.mxu0 }
 0x1f6   : > { %v2098_v30 = vadd.f32 %v2097_v58, %v7996_v41  ;;  %6857 = vrot.lane.b32.xlu0 %v6856_v16, %s7213_s22  ;;  %v2843_v39 = vadd.f32 %v8423_v27, %v2594_v60  ;;  %v2835_v16 = vadd.f32 %v8329_v52, %v2586_v43  ;;  %11579 = vst [vmem:[#allocation66_spill] sm:$0xff] %v8592_v57  ;;  %v11581_v27 = vld [vmem:[#allocation35_spill] sm:$0xff] }
 0x1f7   : > { %v11582_v52 = vld [vmem:[#allocation27_spill] sm:$0xff]  ;;  %v1732_v60 = vsel %vm1670_vm5, %v1615_v17, %v11564_v47  ;;  %983 = vrot.lane.b32.xlu2 %v7720_v45, %s7209_s16 }
 0x1f8   : > { %v2347_v55 = vadd.f32 %v8428_v31, %v2098_v30  ;;  %v8578_v35 = vpop.f32.mrf.mxu3  ;;  %v2833_v31 = vadd.f32 %v8310_v0, %v2584_v51  ;;  %v962_v0 = vpop.permute.xlu2 %961  ;;  %v3072_v36 = vmax.f32 %v2843_v39, 0.0  ;;  %v3066_v51 = vmax.f32 %v2835_v16, 0.0 }
 0x1f9   : > { %6867 = vrot.lane.b32.xlu1 %v6861_v54, %s7213_s22  ;;  %v960_v6 = vpop.permute.xlu1 %959  ;;  %v8621_v47 = vpop.permute.xlu0 %1311 }
 0x1fa   : > { %v3073_v15 = vmax.f32 %v2347_v55, 0.0  ;;  %v8587_v11 = vpop.f32.mrf.mxu1  ;;  %v3064_v30 = vmax.f32 %v2833_v31, 0.0  ;;  %11585 = vst [vmem:[#allocation69_spill] sm:$0xff] %v8621_v47 }
 0x1fb   : > { %v2595_v48 = vpop.f32.mrf.mxu2 }
 0x1fc   : > { %v8594_v54 = vmax.f32 %v3065_v37, %v3073_v15  ;;  %v2596_v1 = vadd.f32 %v2595_v48, %v8011_v62  ;;  %v11586_v15 = vld [vmem:[#allocation5_spill] sm:$0xff] }
 0x1fd   : > { %v8597_v58 = vpop.f32.mrf.mxu0  ;;  %6288 = vmatmul.msk.bf16.gmra.mxu1 %vm1927_vm1, %v11581_v27  ;;  %6336 = vmatmul.msk.bf16.gmra.mxu3 %vm1927_vm1, %v11581_v27  ;;  %v1397_v31 = vsel %vm1331_vm2, %v11586_v15, %v960_v6  ;;  %v11587_v6 = vld [vmem:[#allocation37_spill] sm:$0xff] }
 0x1fe   : > { %11580 = vst [vmem:[#allocation67_spill] sm:$0xff] %v8594_v54  ;;  %v2845_v63 = vadd.f32 %v8444_v53, %v2596_v1  ;;  %1095 = vrot.lane.b32.xlu0 %v11582_v52, %s7211_s18  ;;  %v6876_v9 = vpack.i.bf16 %v8594_v54, %v8592_v57  ;;  %v8615_v53 = vmax.f32 %v3064_v30, %v3072_v36  ;;  %v6709_v30 = vld [vmem:[%s11302_s4 + $0x38] sm:$0xff] }
 0x1ff   : > { %v1520_v16 = vsel %vm1476_vm3, %v1397_v31, %v1066_v28  ;;  %5184 = vmatpush.bf16.msrb.mxu0 %v6709_v30  ;;  %v11588_v28 = vld [vmem:[#allocation29_spill] sm:$0xff]  ;;  %6760 = vmatpush.bf16.msrb.mxu2 %v6709_v30 }
 0x200   : > { %v3074_v4 = vmax.f32 %v2845_v63, 0.0  ;;  %2139 = vmatmul.bf16.gmra.mxu0 %v1732_v60  ;;  %2637 = vmatmul.bf16.gmra.mxu2 %v1732_v60  ;;  %v8610_v43 = vpop.f32.mrf.mxu3  ;;  %11583 = vst [vmem:[#allocation35_spill] sm:$0xff] %v8615_v53  ;;  %v1174_v48 = vpop.permute.xlu2 %1173  ;;  %v11589_v54 = vld [vmem:[#allocation9_spill] sm:$0xff] }
 0x201   : > { %6877 = vrot.lane.b32.xlu1 %v6876_v9, %s7212_s21  ;;  %v1172_v36 = vpop.permute.xlu1 %1171  ;;  %6761 = vmatpush.bf16.msra.mxu3 %v6709_v30  ;;  %v1400_v57 = vsel %vm1331_vm2, %v11589_v54, %v962_v0 }
 0x202   : > { %v8617_v55 = vmax.f32 %v3066_v51, %v3074_v4  ;;  %v8619_v8 = vpop.f32.mrf.mxu1  ;;  %v1617_v60 = vsel %vm1573_vm4, %v1520_v16, %v1172_v36  ;;  %v964_v51 = vpop.permute.xlu0 %963  ;;  %1195 = vrot.lane.b32.xlu2 %v11566_v32, %s7210_s17 }
 0x203   : > { %v8623_v19 = vpop.f32.mrf.mxu2 }
 0x204   : > { %11584 = vst [vmem:[#allocation68_spill] sm:$0xff] %v8617_v55  ;;  %v6871_v37 = vpack.i.bf16 %v8617_v55, %v8615_v53 }
 0x205   : > { %v2102_v39 = vpop.f32.mrf.mxu0 }
 0x206   : > { %6872 = vrot.lane.b32.xlu0 %v6871_v37, %s7213_s22 }
 0x208   : > { %v8630_v17 = vpop.f32.mrf.mxu3  ;;  %v1070_v37 = vpop.permute.xlu2 %1069 }
 0x209   : > { %6882 = vrot.lane.b32.xlu1 %v6876_v9, %s7213_s22  ;;  %v1735_v9 = vsel %vm1670_vm5, %v1617_v60, %v11569_v50  ;;  %v1068_v50 = vpop.permute.xlu1 %1067 }
 0x20a   : > { %v8636_v1 = vpop.f32.mrf.mxu1  ;;  %v1176_v60 = vpop.permute.xlu0 %1175  ;;  %985 = vrot.lane.b32.xlu2 %v7764_v22, %s7209_s16 }
 0x20b   : > { %v2600_v63 = vpop.f32.mrf.mxu2 }
 0x20c   : > { %v2601_v42 = vadd.f32 %v2600_v63, %v8011_v62 }
 0x20d   : > { %v8642_v4 = vpop.f32.mrf.mxu0  ;;  %6289 = vmatmul.msk.bf16.gmra.mxu1 %vm1927_vm1, %v11587_v6  ;;  %6337 = vmatmul.msk.bf16.gmra.mxu3 %vm1927_vm1, %v11587_v6 }
 0x20e   : > { %1097 = vrot.lane.b32.xlu0 %v11588_v28, %s7211_s18 }
 0x210   : > { %2144 = vmatmul.bf16.gmra.mxu0 %v1735_v9  ;;  %2642 = vmatmul.bf16.gmra.mxu2 %v1735_v9  ;;  %v8652_v15 = vpop.f32.mrf.mxu3  ;;  %v8664_v30 = vpop.permute.xlu2 %1315  ;;  %v1522_v9 = vsel %vm1476_vm3, %v1400_v57, %v1068_v50 }
 0x211   : > { %11590 = vst [vmem:[#allocation5_spill] sm:$0xff] %v8664_v30  ;;  %v1619_v18 = vsel %vm1573_vm4, %v1522_v9, %v1174_v48  ;;  %v2101_v48 = vadd.f32 %v8597_v58, %v7996_v41  ;;  %v2103_v30 = vadd.f32 %v2102_v39, %v7996_v41  ;;  %v8699_v45 = vpop.permute.xlu1 %1313 }
 0x212   : > { %v8656_v31 = vpop.f32.mrf.mxu1  ;;  %v1738_v54 = vsel %vm1670_vm5, %v1619_v18, %v11573_v34  ;;  %v8685_v50 = vpop.permute.xlu0 %1071  ;;  %1197 = vrot.lane.b32.xlu2 %v11582_v52, %s7210_s17 }
 0x213   : > { %v8658_v16 = vpop.f32.mrf.mxu2  ;;  %v2350_v61 = vadd.f32 %v8452_v59, %v2101_v48  ;;  %v2352_v5 = vadd.f32 %v8469_v29, %v2103_v30 }
 0x215   : > { %v8660_v36 = vpop.f32.mrf.mxu0  ;;  %v3075_v59 = vmax.f32 %v2350_v61, 0.0  ;;  %v3077_v29 = vmax.f32 %v2352_v5, 0.0 }
 0x218   : > { %v8666_v55 = vpop.f32.mrf.mxu3  ;;  %v8691_v9 = vpop.permute.xlu2 %967 }
 0x21a   : > { %v8671_v53 = vpop.f32.mrf.mxu1  ;;  %987 = vrot.lane.b32.xlu2 %v7766_v23, %s7209_s16  ;;  %v8716_v48 = vpop.permute.xlu0 %1317 }
 0x21b   : > { %v8673_v3 = vpop.f32.mrf.mxu2  ;;  %11593 = vst [vmem:[#allocation37_spill] sm:$0xff] %v8716_v48 }
 0x21d   : > { %v2110_v25 = vpop.f32.mrf.mxu0  ;;  %6290 = vmatmul.msk.bf16.gmra.mxu1 %vm1927_vm1, %v11591_v46  ;;  %6338 = vmatmul.msk.bf16.gmra.mxu3 %vm1927_vm1, %v11591_v46 }
 0x21e   : > { %v2111_v57 = vadd.f32 %v2110_v25, %v7996_v41  ;;  %v11592_v25 = vld [vmem:[#allocation8_spill] sm:$0xff] }
 0x220   : > { %2149 = vmatmul.bf16.gmra.mxu0 %v1738_v54  ;;  %2647 = vmatmul.bf16.gmra.mxu2 %v1738_v54  ;;  %v8683_v0 = vpop.f32.mrf.mxu3  ;;  %v2360_v34 = vadd.f32 %v8523_v24, %v2111_v57  ;;  %v1403_v54 = vsel %vm1331_vm2, %v11592_v25, %v964_v51  ;;  %v2599_v51 = vadd.f32 %v8623_v19, %v8011_v62 }
 0x221   : > { %v1524_v39 = vsel %vm1476_vm3, %v1403_v54, %v1070_v37 }
 0x222   : > { %v8694_v22 = vpop.f32.mrf.mxu1  ;;  %v3083_v13 = vmax.f32 %v2360_v34, 0.0  ;;  %v2850_v34 = vadd.f32 %v8479_v56, %v2601_v42  ;;  %v2848_v61 = vadd.f32 %v8466_v26, %v2599_v51  ;;  %1199 = vrot.lane.b32.xlu2 %v11588_v28, %s7210_s17 }
 0x223   : > { %v2608_v18 = vpop.f32.mrf.mxu2 }
 0x224   : > { %v2609_v40 = vadd.f32 %v2608_v18, %v8011_v62  ;;  %v8720_v18 = vpop.permute.xlu2 %1179  ;;  %v8723_v19 = vmax.f32 %v3075_v59, %v3083_v13 }
 0x225   : > { %v2112_v47 = vpop.f32.mrf.mxu0 }
 0x226   : > { %v2113_v58 = vadd.f32 %v2112_v47, %v7996_v41  ;;  %v2858_v63 = vadd.f32 %v8543_v14, %v2609_v40  ;;  %11594 = vst [vmem:[#allocation29_spill] sm:$0xff] %v8723_v19  ;;  %v966_v40 = vpop.permute.xlu1 %965 }
 0x228   : > { %v2362_v24 = vadd.f32 %v8556_v10, %v2113_v58  ;;  %v8708_v57 = vpop.f32.mrf.mxu3  ;;  %v1621_v10 = vsel %vm1573_vm4, %v1524_v39, %v1176_v60  ;;  %v3084_v13 = vmax.f32 %v2858_v63, 0.0  ;;  %v3078_v60 = vmax.f32 %v2850_v34, 0.0 }
 0x229   : > { %v1741_v56 = vsel %vm1670_vm5, %v1621_v10, %v11581_v27  ;;  %v2108_v27 = vadd.f32 %v8660_v36, %v7996_v41  ;;  %v11598_v10 = vld [vmem:[#allocation10_spill] sm:$0xff] }
 0x22a   : > { %v3085_v47 = vmax.f32 %v2362_v24, 0.0  ;;  %v8714_v30 = vpop.f32.mrf.mxu1  ;;  %v3076_v24 = vmax.f32 %v2848_v61, 0.0  ;;  %v1406_v34 = vsel %vm1331_vm2, %v11598_v10, %v966_v40  ;;  %v2606_v40 = vadd.f32 %v8673_v3, %v8011_v62  ;;  %989 = vrot.lane.b32.xlu2 %v7781_v33, %s7209_s16 }
 0x22b   : > { %v2610_v37 = vpop.f32.mrf.mxu2 }
 0x22c   : > { %v8725_v25 = vmax.f32 %v3077_v29, %v3085_v47  ;;  %v2611_v5 = vadd.f32 %v2610_v37, %v8011_v62  ;;  %v8752_v29 = vmax.f32 %v3076_v24, %v3084_v13  ;;  %v8754_v63 = vpop.permute.xlu2 %1075 }
 0x22d   : > { %v2115_v54 = vpop.f32.mrf.mxu0  ;;  %6291 = vmatmul.msk.bf16.gmra.mxu1 %vm1927_vm1, %v8084_v7  ;;  %6339 = vmatmul.msk.bf16.gmra.mxu3 %vm1927_vm1, %v8084_v7 }
 0x22e   : > { %11595 = vst [vmem:[#allocation9_spill] sm:$0xff] %v8725_v25  ;;  %v2860_v14 = vadd.f32 %v8578_v35, %v2611_v5  ;;  %v6886_v42 = vpack.i.bf16 %v8725_v25, %v8723_v19  ;;  %v2116_v26 = vadd.f32 %v2115_v54, %v7996_v41  ;;  %v2106_v35 = vadd.f32 %v8642_v4, %v7996_v41  ;;  %v8759_v5 = vpop.permute.xlu0 %969  ;;  %v11612_v19 = vld [vmem:[#allocation56_spill] sm:$0xff] }
 0x22f   : > { %11597 = vst [vmem:[#allocation8_spill] sm:$0xff] %v8752_v29  ;;  %v2357_v54 = vadd.f32 %v8504_v12, %v2108_v27  ;;  %v1178_v12 = vpop.permute.xlu1 %1177 }
 0x230   : > { %v3086_v58 = vmax.f32 %v2860_v14, 0.0  ;;  %2154 = vmatmul.bf16.gmra.mxu0 %v1741_v56  ;;  %2652 = vmatmul.bf16.gmra.mxu2 %v1741_v56  ;;  %v8739_v39 = vpop.f32.mrf.mxu3  ;;  %v2365_v37 = vadd.f32 %v8587_v11, %v2116_v26  ;;  %v2355_v61 = vadd.f32 %v8484_v2, %v2106_v35  ;;  %v2604_v11 = vadd.f32 %v8658_v16, %v8011_v62 }
 0x231   : > { %6887 = vrot.lane.b32.xlu1 %v6886_v42, %s7212_s21  ;;  %v1526_v56 = vsel %vm1476_vm3, %v1406_v34, %v8685_v50  ;;  %v3081_v26 = vmax.f32 %v2357_v54, 0.0  ;;  %v11603_v54 = vld [vmem:[#allocation34_spill] sm:$0xff] }
 0x232   : > { %v8748_v51 = vmax.f32 %v3078_v60, %v3086_v58  ;;  %v8750_v59 = vpop.f32.mrf.mxu1  ;;  %v3087_v60 = vmax.f32 %v2365_v37, 0.0  ;;  %v3079_v16 = vmax.f32 %v2355_v61, 0.0  ;;  %v1623_v3 = vsel %vm1573_vm4, %v1526_v56, %v1178_v12  ;;  %1201 = vrot.lane.b32.xlu2 %v11603_v54, %s7210_s17 }
 0x233   : > { %v2613_v47 = vpop.f32.mrf.mxu2  ;;  %v2853_v27 = vadd.f32 %v8498_v20, %v2604_v11 }
 0x234   : > { %11596 = vst [vmem:[#allocation39_spill] sm:$0xff] %v8748_v51  ;;  %v6891_v36 = vpack.i.bf16 %v8748_v51, %v8752_v29  ;;  %v2614_v14 = vadd.f32 %v2613_v47, %v8011_v62  ;;  %v2855_v47 = vadd.f32 %v8518_v21, %v2606_v40  ;;  %v8786_v37 = vpop.permute.xlu2 %1321 }
 0x235   : > { %v2117_v4 = vpop.f32.mrf.mxu0  ;;  %11599 = vst [vmem:[#allocation10_spill] sm:$0xff] %v8786_v37 }
 0x236   : > { %v2118_v13 = vadd.f32 %v2117_v4, %v7996_v41  ;;  %6892 = vrot.lane.b32.xlu0 %v6891_v36, %s7213_s22  ;;  %v2863_v24 = vadd.f32 %v8610_v43, %v2614_v14  ;;  %v11602_v43 = vld [vmem:[#allocation44_spill] sm:$0xff]  ;;  %v1182_v61 = vpop.permute.xlu0 %1181  ;;  %v1744_v14 = vsel %vm1670_vm5, %v1623_v3, %v11587_v6  ;;  %v3082_v11 = vmax.f32 %v2855_v47, 0.0 }
 0x237   : > { %v1074_v3 = vpop.permute.xlu1 %1073 }
 0x238   : > { %v2367_v2 = vadd.f32 %v8619_v8, %v2118_v13  ;;  %v8775_v58 = vpop.f32.mrf.mxu3  ;;  %v3088_v20 = vmax.f32 %v2863_v24, 0.0  ;;  %v3080_v13 = vmax.f32 %v2853_v27, 0.0 }
 0x239   : > { %6897 = vrot.lane.b32.xlu1 %v6886_v42, %s7213_s22  ;;  %v8788_v42 = vmax.f32 %v3079_v16, %v3087_v60 }
 0x23a   : > { %v3089_v35 = vmax.f32 %v2367_v2, 0.0  ;;  %v8781_v50 = vpop.f32.mrf.mxu1  ;;  %991 = vrot.lane.b32.xlu2 %v11566_v32, %s7209_s16 }
 0x23b   : > { %v2615_v8 = vpop.f32.mrf.mxu2  ;;  %11600 = vst [vmem:[#allocation70_spill] sm:$0xff] %v8788_v42 }
 0x23c   : > { %v8790_v10 = vmax.f32 %v3081_v26, %v3089_v35  ;;  %v2616_v34 = vadd.f32 %v2615_v8, %v8011_v62  ;;  %v11606_v26 = vld [vmem:[#allocation11_spill] sm:$0xff]  ;;  %v8824_v35 = vpop.permute.xlu2 %973 }
 0x23d   : > { %v8793_v4 = vpop.f32.mrf.mxu0  ;;  %6292 = vmatmul.msk.bf16.gmra.mxu1 %vm1927_vm1, %v11602_v43  ;;  %6340 = vmatmul.msk.bf16.gmra.mxu3 %vm1927_vm1, %v11602_v43  ;;  %v1409_v24 = vsel %vm1331_vm2, %v11606_v26, %v8691_v9 }
 0x23e   : > { %11601 = vst [vmem:[#allocation71_spill] sm:$0xff] %v8790_v10  ;;  %v2865_v36 = vadd.f32 %v8630_v17, %v2616_v34  ;;  %v6901_v21 = vpack.i.bf16 %v8790_v10, %v8788_v42  ;;  %1099 = vrot.lane.b32.xlu0 %v11603_v54, %s7211_s18  ;;  %v8811_v17 = vmax.f32 %v3080_v13, %v3088_v20  ;;  %v1078_v8 = vpop.permute.xlu0 %1077  ;;  %v11608_v13 = vld [vmem:[#allocation31_spill] sm:$0xff] }
 0x23f   : > { %v1528_v47 = vsel %vm1476_vm3, %v1409_v24, %v1074_v3 }
 0x240   : > { %v3090_v56 = vmax.f32 %v2865_v36, 0.0  ;;  %2159 = vmatmul.bf16.gmra.mxu0 %v1744_v14  ;;  %2657 = vmatmul.bf16.gmra.mxu2 %v1744_v14  ;;  %v8806_v40 = vpop.f32.mrf.mxu3  ;;  %11604 = vst [vmem:[#allocation44_spill] sm:$0xff] %v8811_v17  ;;  %v1625_v9 = vsel %vm1573_vm4, %v1528_v47, %v8720_v18  ;;  %v11607_v14 = vld [vmem:[#allocation51_spill] sm:$0xff]  ;;  %v8864_v47 = vpop.permute.xlu1 %1319 }
 0x241   : > { %6902 = vrot.lane.b32.xlu1 %v6901_v21, %s7212_s21  ;;  %11611 = vst [vmem:[#allocation51_spill] sm:$0xff] %v8864_v47 }
 0x242   : > { %v8813_v60 = vmax.f32 %v3082_v11, %v3090_v56  ;;  %v8815_v2 = vpop.f32.mrf.mxu1  ;;  %1203 = vrot.lane.b32.xlu2 %v11608_v13, %s7210_s17 }
 0x243   : > { %v8817_v12 = vpop.f32.mrf.mxu2 }
 0x244   : > { %11605 = vst [vmem:[#allocation72_spill] sm:$0xff] %v8813_v60  ;;  %v6906_v6 = vpack.i.bf16 %v8813_v60, %v8811_v17  ;;  %v8847_v11 = vpop.permute.xlu2 %1185  ;;  %v6695_v60 = vld [vmem:[%s11301_s3 + $0x10] sm:$0xff] }
 0x245   : > { %v2122_v16 = vpop.f32.mrf.mxu0  ;;  %4235 = vmatpush.bf16.msrb.mxu1 %v6695_v60  ;;  %v2121_v60 = vadd.f32 %v8793_v4, %v7996_v41 }
 0x246   : > { %6907 = vrot.lane.b32.xlu0 %v6906_v6, %s7213_s22  ;;  %v8855_v6 = vpop.permute.xlu0 %1323 }
 0x247   : > { %11609 = vst [vmem:[#allocation11_spill] sm:$0xff] %v8855_v6  ;;  %v2123_v6 = vadd.f32 %v2122_v16, %v7996_v41 }
 0x248   : > { %v8827_v27 = vpop.f32.mrf.mxu3 }
 0x249   : > { %6912 = vrot.lane.b32.xlu1 %v6901_v21, %s7213_s22  ;;  %v1747_v21 = vsel %vm1670_vm5, %v1625_v9, %v11591_v46  ;;  %v11610_v46 = vld [vmem:[#allocation12_spill] sm:$0xff]  ;;  %v2372_v47 = vadd.f32 %v8656_v31, %v2123_v6 }
 0x24a   : > { %v8833_v34 = vpop.f32.mrf.mxu1  ;;  %v1412_v3 = vsel %vm1331_vm2, %v11610_v46, %v8759_v5  ;;  %993 = vrot.lane.b32.xlu2 %v11582_v52, %s7209_s16 }
 0x24b   : > { %v2620_v20 = vpop.f32.mrf.mxu2  ;;  %v1530_v10 = vsel %vm1476_vm3, %v1412_v3, %v8754_v63  ;;  %v3093_v6 = vmax.f32 %v2372_v47, 0.0 }
 0x24c   : > { %v8866_v9 = vpop.permute.xlu2 %1081  ;;  %v1627_v5 = vsel %vm1573_vm4, %v1530_v10, %v1182_v61  ;;  %v972_v10 = vpop.permute.xlu1 %971  ;;  %v11614_v61 = vld [vmem:[#allocation33_spill] sm:$0xff] }
 0x24d   : > { %v8837_v36 = vpop.f32.mrf.mxu0  ;;  %6293 = vmatmul.msk.bf16.gmra.mxu1 %vm1927_vm1, %v11607_v14  ;;  %6341 = vmatmul.msk.bf16.gmra.mxu3 %vm1927_vm1, %v11607_v14  ;;  %v1750_v63 = vsel %vm1670_vm5, %v1627_v5, %v8084_v7 }
 0x24e   : > { %1101 = vrot.lane.b32.xlu0 %v11608_v13, %s7211_s18  ;;  %v8882_v46 = vpop.permute.xlu0 %975 }
 0x250   : > { %2164 = vmatmul.bf16.gmra.mxu0 %v1747_v21  ;;  %2662 = vmatmul.bf16.gmra.mxu2 %v1747_v21  ;;  %v8849_v56 = vpop.f32.mrf.mxu3 }
 0x252   : > { %v8853_v18 = vpop.f32.mrf.mxu1  ;;  %1205 = vrot.lane.b32.xlu2 %v11614_v61, %s7210_s17 }
 0x253   : > { %v8857_v26 = vpop.f32.mrf.mxu2 }
 0x254   : > { %v8890_v3 = vpop.permute.xlu2 %1327 }
 0x255   : > { %v8859_v24 = vpop.f32.mrf.mxu0  ;;  %11613 = vst [vmem:[#allocation12_spill] sm:$0xff] %v8890_v3 }
 0x256   : > { %v8908_v48 = vpop.permute.xlu0 %1187 }
 0x258   : > { %v8868_v21 = vpop.f32.mrf.mxu3 }
 0x25a   : > { %v8874_v42 = vpop.f32.mrf.mxu1  ;;  %995 = vrot.lane.b32.xlu2 %v11588_v28, %s7209_s16 }
 0x25b   : > { %v8879_v17 = vpop.f32.mrf.mxu2 }
 0x25d   : > { %v2130_v25 = vpop.f32.mrf.mxu0  ;;  %6294 = vmatmul.msk.bf16.gmra.mxu1 %vm1927_vm1, %v11612_v19  ;;  %6342 = vmatmul.msk.bf16.gmra.mxu3 %vm1927_vm1, %v11612_v19 }
 0x25e   : > { %v2131_v51 = vadd.f32 %v2130_v25, %v7996_v41  ;;  %v11615_v25 = vld [vmem:[#allocation13_spill] sm:$0xff] }
 0x25f   : > { %v1415_v52 = vsel %vm1331_vm2, %v11615_v25, %v972_v10 }
 0x260   : > { %2667 = vmatmul.bf16.gmra.mxu2 %v1750_v63  ;;  %v8893_v29 = vpop.f32.mrf.mxu3  ;;  %2169 = vmatmul.bf16.gmra.mxu0 %v1750_v63  ;;  %v2380_v5 = vadd.f32 %v8714_v30, %v2131_v51  ;;  %v2370_v63 = vadd.f32 %v8636_v1, %v2121_v60  ;;  %v1532_v30 = vsel %vm1476_vm3, %v1415_v52, %v1078_v8  ;;  %v1184_v52 = vpop.permute.xlu1 %1183 }
 0x261   : > { %v2619_v51 = vadd.f32 %v8817_v12, %v8011_v62  ;;  %v2621_v1 = vadd.f32 %v2620_v20, %v8011_v62  ;;  %v1629_v8 = vsel %vm1573_vm4, %v1532_v30, %v1184_v52 }
 0x262   : > { %v8900_v37 = vpop.f32.mrf.mxu1  ;;  %v3099_v16 = vmax.f32 %v2380_v5, 0.0  ;;  %v3091_v31 = vmax.f32 %v2370_v63, 0.0  ;;  %v11618_v63 = vld [vmem:[#allocation20_spill] sm:$0xff] }
 0x263   : > { %v2628_v7 = vpop.f32.mrf.mxu2  ;;  %v2870_v47 = vadd.f32 %v8666_v55, %v2621_v1 }
 0x264   : > { %v2629_v4 = vadd.f32 %v2628_v7, %v8011_v62  ;;  %v8929_v20 = vmax.f32 %v3091_v31, %v3099_v16 }
 0x265   : > { %v2132_v3 = vpop.f32.mrf.mxu0  ;;  %v3094_v31 = vmax.f32 %v2870_v47, 0.0 }
 0x266   : > { %v2133_v32 = vadd.f32 %v2132_v3, %v7996_v41  ;;  %v8920_v3 = vpop.permute.xlu2 %979  ;;  %11616 = vst [vmem:[#allocation56_spill] sm:$0xff] %v8929_v20 }
 0x268   : > { %v2382_v33 = vadd.f32 %v8750_v59, %v2133_v32  ;;  %v8912_v23 = vpop.f32.mrf.mxu3  ;;  %v6708_v32 = vld [vmem:[%s11302_s4 + $0x30] sm:$0xff]  ;;  %v2878_v59 = vadd.f32 %v8739_v39, %v2629_v4 }
 0x269   : > { %5185 = vmatpush.bf16.msrb.mxu0 %v6708_v32  ;;  %6762 = vmatpush.bf16.msrb.mxu2 %v6708_v32 }
 0x26a   : > { %v3101_v10 = vmax.f32 %v2382_v33, 0.0  ;;  %v8922_v60 = vpop.f32.mrf.mxu1  ;;  %v2868_v33 = vadd.f32 %v8652_v15, %v2619_v51  ;;  %6763 = vmatpush.bf16.msra.mxu3 %v6708_v32  ;;  %v3100_v4 = vmax.f32 %v2878_v59, 0.0  ;;  %v1753_v15 = vsel %vm1670_vm5, %v1629_v8, %v11602_v43  ;;  %v8948_v51 = vpop.permute.xlu0 %1083 }
 0x26b   : > { %v2630_v12 = vpop.f32.mrf.mxu2  ;;  %v2128_v43 = vadd.f32 %v8859_v24, %v7996_v41 }
 0x26c   : > { %v8931_v7 = vmax.f32 %v3093_v6, %v3101_v10  ;;  %v2631_v5 = vadd.f32 %v2630_v12, %v8011_v62  ;;  %v3092_v1 = vmax.f32 %v2868_v33, 0.0  ;;  %v11619_v10 = vld [vmem:[#allocation40_spill] sm:$0xff] }
 0x26d   : > { %v2135_v25 = vpop.f32.mrf.mxu0  ;;  %6295 = vmatmul.msk.bf16.gmra.mxu1 %vm1927_vm1, %v11618_v63  ;;  %6343 = vmatmul.msk.bf16.gmra.mxu3 %vm1927_vm1, %v11618_v63 }
 0x26e   : > { %11617 = vst [vmem:[#allocation13_spill] sm:$0xff] %v8931_v7  ;;  %v6916_v39 = vpack.i.bf16 %v8931_v7, %v8929_v20  ;;  %v2880_v16 = vadd.f32 %v8775_v58, %v2631_v5  ;;  %v2136_v55 = vadd.f32 %v2135_v25, %v7996_v41  ;;  %1207 = vrot.lane.b32.xlu2 %v11619_v10, %s7210_s17  ;;  %v8963_v8 = vpop.permute.xlu2 %1191 }
 0x26f   : > { %v2126_v58 = vadd.f32 %v8837_v36, %v7996_v41  ;;  %v8959_v52 = vmax.f32 %v3092_v1, %v3100_v4  ;;  %v11622_v36 = vld [vmem:[#allocation14_spill] sm:$0xff]  ;;  %v2377_v4 = vadd.f32 %v8694_v22, %v2128_v43  ;;  %v1080_v1 = vpop.permute.xlu1 %1079  ;;  %v2626_v22 = vadd.f32 %v8879_v17, %v8011_v62 }
 0x270   : > { %2672 = vmatmul.bf16.gmra.mxu2 %v1753_v15  ;;  %v8946_v30 = vpop.f32.mrf.mxu3  ;;  %2174 = vmatmul.bf16.gmra.mxu0 %v1753_v15  ;;  %v3102_v6 = vmax.f32 %v2880_v16, 0.0  ;;  %v2385_v33 = vadd.f32 %v8781_v50, %v2136_v55  ;;  %v1418_v25 = vsel %vm1331_vm2, %v11622_v36, %v8824_v35  ;;  %v2624_v35 = vadd.f32 %v8857_v26, %v8011_v62 }
 0x271   : > { %6917 = vrot.lane.b32.xlu1 %v6916_v39, %s7212_s21  ;;  %11620 = vst [vmem:[#allocation20_spill] sm:$0xff] %v8959_v52  ;;  %v2375_v24 = vadd.f32 %v8671_v53, %v2126_v58  ;;  %v3097_v58 = vmax.f32 %v2377_v4, 0.0  ;;  %v2875_v36 = vadd.f32 %v8708_v57, %v2626_v22 }
 0x272   : > { %v8957_v32 = vpop.f32.mrf.mxu1  ;;  %v8961_v59 = vmax.f32 %v3094_v31, %v3102_v6  ;;  %v3103_v50 = vmax.f32 %v2385_v33, 0.0  ;;  %v1534_v6 = vsel %vm1476_vm3, %v1418_v25, %v1080_v1 }
 0x273   : > { %v2633_v12 = vpop.f32.mrf.mxu2  ;;  %v3095_v53 = vmax.f32 %v2375_v24, 0.0  ;;  %v1631_v26 = vsel %vm1573_vm4, %v1534_v6, %v8847_v11  ;;  %v3098_v1 = vmax.f32 %v2875_v36, 0.0 }
 0x274   : > { %11621 = vst [vmem:[#allocation40_spill] sm:$0xff] %v8961_v59  ;;  %v6921_v5 = vpack.i.bf16 %v8961_v59, %v8959_v52  ;;  %v2634_v15 = vadd.f32 %v2633_v12, %v8011_v62  ;;  %v1756_v57 = vsel %vm1670_vm5, %v1631_v26, %v11607_v14 }
 0x275   : > { %v2137_v47 = vpop.f32.mrf.mxu0 }
 0x276   : > { %v2138_v16 = vadd.f32 %v2137_v47, %v7996_v41  ;;  %6922 = vrot.lane.b32.xlu0 %v6921_v5, %s7213_s22  ;;  %997 = vrot.lane.b32.xlu2 %v11603_v54, %s7209_s16  ;;  %v2883_v33 = vadd.f32 %v8806_v40, %v2634_v15  ;;  %v8994_v5 = vmax.f32 %v3095_v53, %v3103_v50  ;;  %v9007_v40 = vpop.permute.xlu2 %981 }
 0x278   : > { %v2387_v55 = vadd.f32 %v8815_v2, %v2138_v16  ;;  %v8977_v31 = vpop.f32.mrf.mxu3  ;;  %v8989_v2 = vpop.permute.xlu0 %1329  ;;  %11624 = vst [vmem:[#allocation73_spill] sm:$0xff] %v8994_v5  ;;  %v3104_v4 = vmax.f32 %v2883_v33, 0.0 }
 0x279   : > { %6927 = vrot.lane.b32.xlu1 %v6916_v39, %s7213_s22  ;;  %11623 = vst [vmem:[#allocation14_spill] sm:$0xff] %v8989_v2  ;;  %v2873_v39 = vadd.f32 %v8683_v0, %v2624_v35 }
 0x27a   : > { %v3105_v43 = vmax.f32 %v2387_v55, 0.0  ;;  %v8987_v12 = vpop.f32.mrf.mxu1  ;;  %v11626_v55 = vld [vmem:[#allocation36_spill] sm:$0xff] }
 0x27b   : > { %v2635_v47 = vpop.f32.mrf.mxu2  ;;  %v3096_v15 = vmax.f32 %v2873_v39, 0.0 }
 0x27c   : > { %v8996_v17 = vmax.f32 %v3097_v58, %v3105_v43  ;;  %v2636_v25 = vadd.f32 %v2635_v47, %v8011_v62  ;;  %v11630_v43 = vld [vmem:[#allocation15_spill] sm:$0xff]  ;;  %v9036_v47 = vpop.permute.xlu1 %1325 }
 0x27d   : > { %v9001_v24 = vpop.f32.mrf.mxu0  ;;  %6296 = vmatmul.msk.bf16.gmra.mxu1 %vm1927_vm1, %v8321_v44  ;;  %6344 = vmatmul.msk.bf16.gmra.mxu3 %vm1927_vm1, %v8321_v44  ;;  %v1421_v33 = vsel %vm1331_vm2, %v11630_v43, %v8882_v46  ;;  %11631 = vst [vmem:[#allocation15_spill] sm:$0xff] %v9036_v47 }
 0x27e   : > { %11625 = vst [vmem:[#allocation74_spill] sm:$0xff] %v8996_v17  ;;  %v6931_v11 = vpack.i.bf16 %v8996_v17, %v8994_v5  ;;  %v2885_v0 = vadd.f32 %v8827_v27, %v2636_v25  ;;  %1103 = vrot.lane.b32.xlu0 %v11614_v61, %s7211_s18  ;;  %1209 = vrot.lane.b32.xlu2 %v11626_v55, %s7210_s17  ;;  %v9039_v26 = vpop.permute.xlu2 %1193 }
 0x27f   : > { %v9023_v27 = vmax.f32 %v3096_v15, %v3104_v4  ;;  %v1536_v36 = vsel %vm1476_vm3, %v1421_v33, %v8866_v9  ;;  %v11632_v15 = vld [vmem:[#allocation38_spill] sm:$0xff] }
 0x280   : > { %2179 = vmatmul.bf16.gmra.mxu0 %v1756_v57  ;;  %2677 = vmatmul.bf16.gmra.mxu2 %v1756_v57  ;;  %v9016_v16 = vpop.f32.mrf.mxu3  ;;  %v3106_v50 = vmax.f32 %v2885_v0, 0.0  ;;  %v9029_v14 = vpop.permute.xlu0 %6797  ;;  %v1633_v46 = vsel %vm1573_vm4, %v1536_v36, %v8908_v48 }
 0x281   : > { %6932 = vrot.lane.b32.xlu1 %v6931_v11, %s7212_s21  ;;  %11627 = vst [vmem:[#allocation75_spill] sm:$0xff] %v9023_v27 }
 0x282   : > { %v9021_v6 = vpop.f32.mrf.mxu1  ;;  %v9025_v35 = vmax.f32 %v3098_v1, %v3106_v50  ;;  %11629 = vst [vmem:[#allocation77_spill] sm:$0xff] %v9029_v14 }
 0x283   : > { %v9027_v22 = vpop.f32.mrf.mxu2 }
 0x284   : > { %11628 = vst [vmem:[#allocation76_spill] sm:$0xff] %v9025_v35  ;;  %v6936_v58 = vpack.i.bf16 %v9025_v35, %v9023_v27  ;;  %v978_v48 = vpop.permute.xlu1 %977 }
 0x285   : > { %v2142_v53 = vpop.f32.mrf.mxu0 }
 0x286   : > { %6937 = vrot.lane.b32.xlu0 %v6936_v58, %s7213_s22  ;;  %999 = vrot.lane.b32.xlu2 %v11608_v13, %s7209_s16  ;;  %v9068_v1 = vpop.permute.xlu2 %983  ;;  %v2143_v20 = vadd.f32 %v2142_v53, %v7996_v41 }
 0x288   : > { %v9041_v39 = vpop.f32.mrf.mxu3  ;;  %v9058_v9 = vpop.permute.xlu0 %1087  ;;  %v2392_v2 = vadd.f32 %v8853_v18, %v2143_v20 }
 0x289   : > { %6942 = vrot.lane.b32.xlu1 %v6931_v11, %s7213_s22  ;;  %v1759_v11 = vsel %vm1670_vm5, %v1633_v46, %v11612_v19  ;;  %v1424_v19 = vsel %vm1331_vm2, %v7560_v38, %v978_v48  ;;  %v11634_v48 = vld [vmem:[#allocation64_spill] sm:$0xff] }
 0x28a   : > { %v9048_v25 = vpop.f32.mrf.mxu1  ;;  %v1538_v36 = vsel %vm1476_vm3, %v1424_v19, %v8948_v51  ;;  %v3109_v20 = vmax.f32 %v2392_v2, 0.0 }
 0x28b   : > { %v2640_v4 = vpop.f32.mrf.mxu2 }
 0x28c   : > { %v1190_v17 = vpop.permute.xlu1 %1189 }
 0x28d   : > { %v9052_v0 = vpop.f32.mrf.mxu0  ;;  %6297 = vmatmul.msk.bf16.gmra.mxu1 %vm1927_vm1, %v8376_v49  ;;  %6345 = vmatmul.msk.bf16.gmra.mxu3 %vm1927_vm1, %v8376_v49  ;;  %v1635_v35 = vsel %vm1573_vm4, %v1538_v36, %v1190_v17  ;;  %v11635_v17 = vld [vmem:[#allocation54_spill] sm:$0xff]  ;;  %v2141_v36 = vadd.f32 %v9001_v24, %v7996_v41 }
 0x28e   : > { %1105 = vrot.lane.b32.xlu0 %v11619_v10, %s7211_s18  ;;  %1211 = vrot.lane.b32.xlu2 %v11632_v15, %s7210_s17  ;;  %v9091_v27 = vpop.permute.xlu2 %1195  ;;  %v1762_v51 = vsel %vm1670_vm5, %v1635_v35, %v11618_v63 }
 0x28f   : > { %v2390_v14 = vadd.f32 %v8833_v34, %v2141_v36  ;;  %v2641_v34 = vadd.f32 %v2640_v4, %v8011_v62 }
 0x290   : > { %2184 = vmatmul.bf16.gmra.mxu0 %v1759_v11  ;;  %2682 = vmatmul.bf16.gmra.mxu2 %v1759_v11  ;;  %v9064_v57 = vpop.f32.mrf.mxu3  ;;  %v9082_v46 = vpop.permute.xlu0 %6812 }
 0x291   : > { %11633 = vst [vmem:[#allocation78_spill] sm:$0xff] %v9082_v46  ;;  %v3107_v18 = vmax.f32 %v2390_v14, 0.0  ;;  %v2890_v14 = vadd.f32 %v8868_v21, %v2641_v34 }
 0x292   : > { %v9070_v50 = vpop.f32.mrf.mxu1 }
 0x293   : > { %v9072_v58 = vpop.f32.mrf.mxu2 }
 0x294   : > { %v1086_v13 = vpop.permute.xlu1 %1085 }
 0x295   : > { %v9074_v43 = vpop.f32.mrf.mxu0 }
 0x296   : > { %1001 = vrot.lane.b32.xlu2 %v11614_v61, %s7209_s16  ;;  %v9117_v61 = vpop.permute.xlu2 %985 }
 0x298   : > { %v9078_v33 = vpop.f32.mrf.mxu3  ;;  %v9109_v52 = vpop.permute.xlu0 %1089 }
 0x29a   : > { %v9086_v11 = vpop.f32.mrf.mxu1 }
 0x29b   : > { %v9088_v5 = vpop.f32.mrf.mxu2 }
 0x29d   : > { %v2150_v38 = vpop.f32.mrf.mxu0  ;;  %6298 = vmatmul.msk.bf16.gmra.mxu1 %vm1927_vm1, %v11634_v48  ;;  %6346 = vmatmul.msk.bf16.gmra.mxu3 %vm1927_vm1, %v11634_v48 }
 0x29e   : > { %v2151_v19 = vadd.f32 %v2150_v38, %v7996_v41  ;;  %1213 = vrot.lane.b32.xlu2 %v11635_v17, %s7210_s17  ;;  %v11636_v38 = vld [vmem:[#allocation16_spill] sm:$0xff] }
 0x2a0   : > { %2687 = vmatmul.bf16.gmra.mxu2 %v1762_v51  ;;  %v9100_v7 = vpop.f32.mrf.mxu3  ;;  %2189 = vmatmul.bf16.gmra.mxu0 %v1762_v51  ;;  %v2400_v63 = vadd.f32 %v8922_v60, %v2151_v19  ;;  %v1427_v51 = vsel %vm1331_vm2, %v11636_v38, %v8920_v3  ;;  %v2639_v3 = vadd.f32 %v9027_v22, %v8011_v62  ;;  %v9139_v22 = vpop.permute.xlu0 %6827 }
 0x2a1   : > { %v1540_v19 = vsel %vm1476_vm3, %v1427_v51, %v1086_v13  ;;  %11639 = vst [vmem:[#allocation16_spill] sm:$0xff] %v9139_v22  ;;  %v11640_v51 = vld [vmem:[#allocation4_spill] sm:$0xff] }
 0x2a2   : > { %v9107_v59 = vpop.f32.mrf.mxu1  ;;  %v3115_v47 = vmax.f32 %v2400_v63, 0.0  ;;  %v2888_v4 = vadd.f32 %v8849_v56, %v2639_v3  ;;  %v3110_v3 = vmax.f32 %v2890_v14, 0.0 }
 0x2a3   : > { %v2648_v46 = vpop.f32.mrf.mxu2 }
 0x2a4   : > { %v2649_v53 = vadd.f32 %v2648_v46, %v8011_v62  ;;  %v9135_v13 = vmax.f32 %v3107_v18, %v3115_v47  ;;  %v11641_v18 = vld [vmem:[#allocation41_spill] sm:$0xff] }
 0x2a5   : > { %v2152_v35 = vpop.f32.mrf.mxu0 }
 0x2a6   : > { %v2153_v24 = vadd.f32 %v2152_v35, %v7996_v41  ;;  %1003 = vrot.lane.b32.xlu2 %v11619_v10, %s7209_s16  ;;  %v2898_v63 = vadd.f32 %v8946_v30, %v2649_v53  ;;  %v1637_v35 = vsel %vm1573_vm4, %v1540_v19, %v8963_v8  ;;  %11637 = vst [vmem:[#allocation64_spill] sm:$0xff] %v9135_v13  ;;  %v3108_v19 = vmax.f32 %v2888_v4, 0.0 }
 0x2a7   : > { %v1765_v56 = vsel %vm1670_vm5, %v1637_v35, %v8321_v44  ;;  %v2148_v44 = vadd.f32 %v9074_v43, %v7996_v41 }
 0x2a8   : > { %v2402_v54 = vadd.f32 %v8957_v32, %v2153_v24  ;;  %v9122_v60 = vpop.f32.mrf.mxu3  ;;  %v3116_v8 = vmax.f32 %v2898_v63, 0.0  ;;  %v9153_v24 = vpop.permute.xlu2 %1197 }
 0x2a9   : > { %v2397_v43 = vadd.f32 %v8900_v37, %v2148_v44 }
 0x2aa   : > { %v3117_v36 = vmax.f32 %v2402_v54, 0.0  ;;  %v9130_v46 = vpop.f32.mrf.mxu1 }
 0x2ab   : > { %v2650_v32 = vpop.f32.mrf.mxu2 }
 0x2ac   : > { %v9137_v38 = vmax.f32 %v3109_v20, %v3117_v36  ;;  %v2651_v54 = vadd.f32 %v2650_v32, %v8011_v62  ;;  %v9167_v36 = vmax.f32 %v3108_v19, %v3116_v8 }
 0x2ad   : > { %v2155_v2 = vpop.f32.mrf.mxu0  ;;  %6299 = vmatmul.msk.bf16.gmra.mxu1 %vm1927_vm1, %v11640_v51  ;;  %6347 = vmatmul.msk.bf16.gmra.mxu3 %vm1927_vm1, %v11640_v51 }
 0x2ae   : > { %11638 = vst [vmem:[#allocation54_spill] sm:$0xff] %v9137_v38  ;;  %v6946_v30 = vpack.i.bf16 %v9137_v38, %v9135_v13  ;;  %v2900_v47 = vadd.f32 %v8977_v31, %v2651_v54  ;;  %v2156_v21 = vadd.f32 %v2155_v2, %v7996_v41  ;;  %1215 = vrot.lane.b32.xlu2 %v11641_v18, %s7210_s17  ;;  %v11644_v54 = vld [vmem:[#allocation17_spill] sm:$0xff] }
 0x2af   : > { %v2146_v31 = vadd.f32 %v9052_v0, %v7996_v41  ;;  %11642 = vst [vmem:[#allocation4_spill] sm:$0xff] %v9167_v36  ;;  %v1430_v0 = vsel %vm1331_vm2, %v11644_v54, %v9007_v40  ;;  %v6694_v40 = vld [vmem:[%s11301_s3 + $0x8] sm:$0xff] }
 0x2b0   : > { %2692 = vmatmul.bf16.gmra.mxu2 %v1765_v56  ;;  %v9156_v53 = vpop.f32.mrf.mxu3  ;;  %2194 = vmatmul.bf16.gmra.mxu0 %v1765_v56  ;;  %v3118_v34 = vmax.f32 %v2900_v47, 0.0  ;;  %v2405_v35 = vadd.f32 %v8987_v12, %v2156_v21  ;;  %v9180_v47 = vpop.permute.xlu0 %1091  ;;  %v1542_v37 = vsel %vm1476_vm3, %v1430_v0, %v9058_v9 }
 0x2b1   : > { %6947 = vrot.lane.b32.xlu1 %v6946_v30, %s7212_s21  ;;  %v2395_v2 = vadd.f32 %v8874_v42, %v2146_v31  ;;  %v2644_v42 = vadd.f32 %v9072_v58, %v8011_v62  ;;  %v9199_v31 = vpop.permute.xlu2 %987  ;;  %4236 = vmatpush.bf16.msrb.mxu1 %v6694_v40  ;;  %v1639_v58 = vsel %vm1573_vm4, %v1542_v37, %v9039_v26  ;;  %v11649_v40 = vld [vmem:[#allocation42_spill] sm:$0xff] }
 0x2b2   : > { %v9165_v20 = vpop.f32.mrf.mxu1  ;;  %v9169_v63 = vmax.f32 %v3110_v3, %v3118_v34  ;;  %v3119_v12 = vmax.f32 %v2405_v35, 0.0  ;;  %v2646_v3 = vadd.f32 %v9088_v5, %v8011_v62  ;;  %v3113_v34 = vmax.f32 %v2397_v43, 0.0 }
 0x2b3   : > { %v2653_v32 = vpop.f32.mrf.mxu2 }
 0x2b4   : > { %11643 = vst [vmem:[#allocation41_spill] sm:$0xff] %v9169_v63  ;;  %v6951_v14 = vpack.i.bf16 %v9169_v63, %v9167_v36  ;;  %v2654_v56 = vadd.f32 %v2653_v32, %v8011_v62 }
 0x2b5   : > { %v2157_v4 = vpop.f32.mrf.mxu0 }
 0x2b6   : > { %v2158_v8 = vadd.f32 %v2157_v4, %v7996_v41  ;;  %6952 = vrot.lane.b32.xlu0 %v6951_v14, %s7213_s22  ;;  %1005 = vrot.lane.b32.xlu2 %v11626_v55, %s7209_s16  ;;  %v2903_v9 = vadd.f32 %v9016_v16, %v2654_v56  ;;  %v2893_v4 = vadd.f32 %v8893_v29, %v2644_v42 }
 0x2b7   : > { %v2895_v14 = vadd.f32 %v8912_v23, %v2646_v3  ;;  %v1768_v23 = vsel %vm1670_vm5, %v1639_v58, %v8376_v49 }
 0x2b8   : > { %v2407_v21 = vadd.f32 %v9021_v6, %v2158_v8  ;;  %v9185_v19 = vpop.f32.mrf.mxu3  ;;  %v3111_v6 = vmax.f32 %v2395_v2, 0.0  ;;  %v11647_v2 = vld [vmem:[#allocation28_spill] sm:$0xff]  ;;  %v3120_v26 = vmax.f32 %v2903_v9, 0.0  ;;  %v9228_v8 = vpop.permute.xlu0 %6842  ;;  %v3112_v56 = vmax.f32 %v2893_v4, 0.0 }
 0x2b9   : > { %6957 = vrot.lane.b32.xlu1 %v6946_v30, %s7213_s22  ;;  %11648 = vst [vmem:[#allocation28_spill] sm:$0xff] %v9228_v8  ;;  %v9241_v3 = vpop.permute.xlu2 %1199 }
 0x2ba   : > { %v3121_v44 = vmax.f32 %v2407_v21, 0.0  ;;  %v9201_v32 = vpop.f32.mrf.mxu1  ;;  %v9206_v5 = vmax.f32 %v3111_v6, %v3119_v12  ;;  %v3114_v12 = vmax.f32 %v2895_v14, 0.0  ;;  %v9235_v37 = vmax.f32 %v3112_v56, %v3120_v26  ;;  %v11654_v56 = vld [vmem:[#allocation57_spill] sm:$0xff] }
 0x2bb   : > { %v2655_v35 = vpop.f32.mrf.mxu2 }
 0x2bc   : > { %11645 = vst [vmem:[#allocation17_spill] sm:$0xff] %v9206_v5  ;;  %v9208_v30 = vmax.f32 %v3113_v34, %v3121_v44  ;;  %v2656_v54 = vadd.f32 %v2655_v35, %v8011_v62  ;;  %v11652_v44 = vld [vmem:[#allocation18_spill] sm:$0xff] }
 0x2bd   : > { %v9213_v0 = vpop.f32.mrf.mxu0  ;;  %6300 = vmatmul.msk.bf16.gmra.mxu1 %vm1927_vm1, %v11647_v2  ;;  %6348 = vmatmul.msk.bf16.gmra.mxu3 %vm1927_vm1, %v11647_v2  ;;  %11650 = vst [vmem:[#allocation42_spill] sm:$0xff] %v9235_v37  ;;  %v1433_v9 = vsel %vm1331_vm2, %v11652_v44, %v9068_v1  ;;  %v6707_v1 = vld [vmem:[%s11302_s4 + $0x28] sm:$0xff] }
 0x2be   : > { %11646 = vst [vmem:[#allocation79_spill] sm:$0xff] %v9208_v30  ;;  %v6961_v16 = vpack.i.bf16 %v9208_v30, %v9206_v5  ;;  %v2905_v43 = vadd.f32 %v9041_v39, %v2656_v54  ;;  %1107 = vrot.lane.b32.xlu0 %v11626_v55, %s7211_s18  ;;  %1217 = vrot.lane.b32.xlu2 %v11649_v40, %s7210_s17 }
 0x2bf   : > { %v1544_v4 = vsel %vm1476_vm3, %v1433_v9, %v9109_v52  ;;  %5186 = vmatpush.bf16.msrb.mxu0 %v6707_v1  ;;  %6764 = vmatpush.bf16.msrb.mxu2 %v6707_v1  ;;  %v11656_v9 = vld [vmem:[#allocation19_spill] sm:$0xff] }
 0x2c0   : > { %2199 = vmatmul.bf16.gmra.mxu0 %v1768_v23  ;;  %2697 = vmatmul.bf16.gmra.mxu2 %v1768_v23  ;;  %v9226_v29 = vpop.f32.mrf.mxu3  ;;  %v3122_v21 = vmax.f32 %v2905_v43, 0.0  ;;  %v1094_v58 = vpop.permute.xlu0 %1093  ;;  %v1641_v26 = vsel %vm1573_vm4, %v1544_v4, %v9091_v27  ;;  %v11653_v23 = vld [vmem:[#allocation6_spill] sm:$0xff] }
 0x2c1   : > { %6962 = vrot.lane.b32.xlu1 %v6961_v16, %s7212_s21  ;;  %v9269_v52 = vpop.permute.xlu2 %989  ;;  %v1771_v27 = vsel %vm1670_vm5, %v1641_v26, %v11634_v48  ;;  %6765 = vmatpush.bf16.msra.mxu3 %v6707_v1  ;;  %v1436_v48 = vsel %vm1331_vm2, %v11656_v9, %v9117_v61  ;;  %v11657_v9 = vld [vmem:[#allocation65_spill] sm:$0xff] }
 0x2c2   : > { %v9233_v39 = vpop.f32.mrf.mxu1  ;;  %v9237_v42 = vmax.f32 %v3114_v12, %v3122_v21  ;;  %v1546_v1 = vsel %vm1476_vm3, %v1436_v48, %v9180_v47 }
 0x2c3   : > { %v9239_v49 = vpop.f32.mrf.mxu2  ;;  %v1643_v5 = vsel %vm1573_vm4, %v1546_v1, %v9153_v24  ;;  %v11658_v24 = vld [vmem:[#allocation47_spill] sm:$0xff]  ;;  %v2161_v1 = vadd.f32 %v9213_v0, %v7996_v41 }
 0x2c4   : > { %11651 = vst [vmem:[#allocation80_spill] sm:$0xff] %v9237_v42  ;;  %v6966_v34 = vpack.i.bf16 %v9237_v42, %v9235_v37  ;;  %v1774_v47 = vsel %vm1670_vm5, %v1643_v5, %v11640_v51 }
 0x2c5   : > { %v2162_v6 = vpop.f32.mrf.mxu0 }
 0x2c6   : > { %6967 = vrot.lane.b32.xlu0 %v6966_v34, %s7213_s22  ;;  %1007 = vrot.lane.b32.xlu2 %v11632_v15, %s7209_s16  ;;  %v2163_v13 = vadd.f32 %v2162_v6, %v7996_v41 }
 0x2c8   : > { %v9249_v35 = vpop.f32.mrf.mxu3  ;;  %v9281_v21 = vpop.permute.xlu0 %6857 }
 0x2c9   : > { %6972 = vrot.lane.b32.xlu1 %v6961_v16, %s7213_s22  ;;  %11655 = vst [vmem:[#allocation18_spill] sm:$0xff] %v9281_v21  ;;  %v9290_v4 = vpop.permute.xlu2 %1201 }
 0x2ca   : > { %v9256_v14 = vpop.f32.mrf.mxu1 }
 0x2cb   : > { %v2660_v54 = vpop.f32.mrf.mxu2 }
 0x2cd   : > { %v9263_v43 = vpop.f32.mrf.mxu0  ;;  %6301 = vmatmul.msk.bf16.gmra.mxu1 %vm1927_vm1, %v11653_v23  ;;  %6349 = vmatmul.msk.bf16.gmra.mxu3 %vm1927_vm1, %v11653_v23 }
 0x2ce   : > { %1109 = vrot.lane.b32.xlu0 %v11632_v15, %s7211_s18  ;;  %1219 = vrot.lane.b32.xlu2 %v11654_v56, %s7210_s17  ;;  %v2410_v15 = vadd.f32 %v9048_v25, %v2161_v1  ;;  %v2661_v25 = vadd.f32 %v2660_v54, %v8011_v62 }
 0x2d0   : > { %2204 = vmatmul.bf16.gmra.mxu0 %v1771_v27  ;;  %2702 = vmatmul.bf16.gmra.mxu2 %v1771_v27  ;;  %v9275_v16 = vpop.f32.mrf.mxu3  ;;  %v9304_v42 = vpop.permute.xlu0 %1095 }
 0x2d1   : > { %v9319_v38 = vpop.permute.xlu2 %991 }
 0x2d2   : > { %v9279_v12 = vpop.f32.mrf.mxu1 }
 0x2d3   : > { %v9283_v34 = vpop.f32.mrf.mxu2 }
 0x2d5   : > { %v9285_v44 = vpop.f32.mrf.mxu0 }
 0x2d6   : > { %1009 = vrot.lane.b32.xlu2 %v11635_v17, %s7209_s16 }
 0x2d8   : > { %v9292_v26 = vpop.f32.mrf.mxu3  ;;  %v9331_v21 = vpop.permute.xlu0 %6872 }
 0x2da   : > { %v9298_v27 = vpop.f32.mrf.mxu1 }
 0x2db   : > { %v9300_v30 = vpop.f32.mrf.mxu2 }
 0x2dd   : > { %v2170_v61 = vpop.f32.mrf.mxu0  ;;  %6302 = vmatmul.msk.bf16.gmra.mxu1 %vm1927_vm1, %v11657_v9  ;;  %6350 = vmatmul.msk.bf16.gmra.mxu3 %vm1927_vm1, %v11657_v9 }
 0x2de   : > { %v2171_v48 = vadd.f32 %v2170_v61, %v7996_v41  ;;  %1221 = vrot.lane.b32.xlu2 %v11658_v24, %s7210_s17  ;;  %v11659_v61 = vld [vmem:[#allocation21_spill] sm:$0xff]  ;;  %v2412_v24 = vadd.f32 %v9070_v50, %v2163_v13  ;;  %v3123_v50 = vmax.f32 %v2410_v15, 0.0  ;;  %v2910_v15 = vadd.f32 %v9078_v33, %v2661_v25  ;;  %v11663_v25 = vld [vmem:[#allocation50_spill] sm:$0xff] }
 0x2e0   : > { %2707 = vmatmul.bf16.gmra.mxu2 %v1774_v47  ;;  %v9313_v37 = vpop.f32.mrf.mxu3  ;;  %2209 = vmatmul.bf16.gmra.mxu0 %v1774_v47  ;;  %v2420_v51 = vadd.f32 %v9130_v46, %v2171_v48  ;;  %v1439_v47 = vsel %vm1331_vm2, %v11659_v61, %v9199_v31  ;;  %v2659_v31 = vadd.f32 %v9239_v49, %v8011_v62  ;;  %v3125_v13 = vmax.f32 %v2412_v24, 0.0 }
 0x2e1   : > { %v1548_v46 = vsel %vm1476_vm3, %v1439_v47, %v1094_v58  ;;  %v9348_v58 = vpop.permute.xlu2 %1203  ;;  %v11662_v47 = vld [vmem:[#allocation69_spill] sm:$0xff] }
 0x2e2   : > { %v9322_v63 = vpop.f32.mrf.mxu1  ;;  %v3131_v55 = vmax.f32 %v2420_v51, 0.0  ;;  %v1645_v51 = vsel %vm1573_vm4, %v1548_v46, %v9241_v3  ;;  %v2908_v54 = vadd.f32 %v9064_v57, %v2659_v31  ;;  %v3126_v46 = vmax.f32 %v2910_v15, 0.0  ;;  %v11666_v15 = vld [vmem:[#allocation23_spill] sm:$0xff] }
 0x2e3   : > { %v2668_v36 = vpop.f32.mrf.mxu2  ;;  %v1777_v57 = vsel %vm1670_vm5, %v1645_v51, %v11647_v2  ;;  %v2168_v2 = vadd.f32 %v9285_v44, %v7996_v41 }
 0x2e4   : > { %v2669_v6 = vadd.f32 %v2668_v36, %v8011_v62 }
 0x2e5   : > { %v2172_v5 = vpop.f32.mrf.mxu0 }
 0x2e6   : > { %v2173_v0 = vadd.f32 %v2172_v5, %v7996_v41  ;;  %1011 = vrot.lane.b32.xlu2 %v11641_v18, %s7209_s16  ;;  %v2918_v36 = vadd.f32 %v9156_v53, %v2669_v6  ;;  %v9350_v5 = vmax.f32 %v3123_v50, %v3131_v55  ;;  %v9363_v55 = vpop.permute.xlu0 %1097  ;;  %v3124_v6 = vmax.f32 %v2908_v54, 0.0  ;;  %s7215_s16 = smov 16  }
 0x2e8   : > { %v2422_v8 = vadd.f32 %v9165_v20, %v2173_v0  ;;  %v9335_v22 = vpop.f32.mrf.mxu3  ;;  %11660 = vst [vmem:[#allocation6_spill] sm:$0xff] %v9350_v5  ;;  %v3132_v3 = vmax.f32 %v2918_v36, 0.0 }
 0x2e9   : > { %v9391_v44 = vpop.permute.xlu2 %993 }
 0x2ea   : > { %v3133_v48 = vmax.f32 %v2422_v8, 0.0  ;;  %v9343_v1 = vpop.f32.mrf.mxu1 }
 0x2eb   : > { %v2670_v20 = vpop.f32.mrf.mxu2 }
 0x2ec   : > { %v9352_v49 = vmax.f32 %v3125_v13, %v3133_v48  ;;  %v2671_v8 = vadd.f32 %v2670_v20, %v8011_v62  ;;  %v9380_v13 = vmax.f32 %v3124_v6, %v3132_v3 }
 0x2ed   : > { %v2175_v61 = vpop.f32.mrf.mxu0  ;;  %6303 = vmatmul.msk.bf16.gmra.mxu1 %vm1927_vm1, %v11662_v47  ;;  %6351 = vmatmul.msk.bf16.gmra.mxu3 %vm1927_vm1, %v11662_v47 }
 0x2ee   : > { %11661 = vst [vmem:[#allocation57_spill] sm:$0xff] %v9352_v49  ;;  %v6976_v53 = vpack.i.bf16 %v9352_v49, %v9350_v5  ;;  %v2920_v24 = vadd.f32 %v9185_v19, %v2671_v8  ;;  %v2176_v33 = vadd.f32 %v2175_v61, %v7996_v41  ;;  %1223 = vrot.lane.b32.xlu2 %v11663_v25, %s7210_s17  ;;  %v9400_v6 = vpop.permute.xlu0 %6892  ;;  %s440_s17 = scalar_lea.vmem %s11311_s13, %s6192_s23 }
 0x2ef   : > { %v2166_v19 = vadd.f32 %v9263_v43, %v7996_v41  ;;  %11664 = vst [vmem:[#allocation19_spill] sm:$0xff] %v9380_v13  ;;  %v1442_v43 = vsel %vm1331_vm2, %v11666_v15, %v9269_v52  ;;  %v2417_v61 = vadd.f32 %v9107_v59, %v2168_v2  ;;  %v2664_v52 = vadd.f32 %v9283_v34, %v8011_v62 }
 0x2f0   : > { %2712 = vmatmul.bf16.gmra.mxu2 %v1777_v57  ;;  %v9369_v0 = vpop.f32.mrf.mxu3  ;;  %2214 = vmatmul.bf16.gmra.mxu0 %v1777_v57  ;;  %v3134_v31 = vmax.f32 %v2920_v24, 0.0  ;;  %v2425_v20 = vadd.f32 %v9201_v32, %v2176_v33  ;;  %v2666_v59 = vadd.f32 %v9300_v30, %v8011_v62 }
 0x2f1   : > { %6977 = vrot.lane.b32.xlu1 %v6976_v53, %s7212_s21  ;;  %v2415_v8 = vadd.f32 %v9086_v11, %v2166_v19  ;;  %v1550_v11 = vsel %vm1476_vm3, %v1442_v43, %v9304_v42  ;;  %v2913_v34 = vadd.f32 %v9100_v7, %v2664_v52 }
 0x2f2   : > { %v9378_v50 = vpop.f32.mrf.mxu1  ;;  %v9382_v48 = vmax.f32 %v3126_v46, %v3134_v31  ;;  %v3135_v32 = vmax.f32 %v2425_v20, 0.0  ;;  %v3129_v31 = vmax.f32 %v2417_v61, 0.0  ;;  %v2915_v30 = vadd.f32 %v9122_v60, %v2666_v59  ;;  %v1206_v60 = vpop.permute.xlu2 %1205 }
 0x2f3   : > { %v2673_v36 = vpop.f32.mrf.mxu2  ;;  %v3127_v46 = vmax.f32 %v2415_v8, 0.0  ;;  %v3128_v43 = vmax.f32 %v2913_v34, 0.0 }
 0x2f4   : > { %11665 = vst [vmem:[#allocation65_spill] sm:$0xff] %v9382_v48  ;;  %v6981_v54 = vpack.i.bf16 %v9382_v48, %v9380_v13  ;;  %v2674_v24 = vadd.f32 %v2673_v36, %v8011_v62  ;;  %v1647_v36 = vsel %vm1573_vm4, %v1550_v11, %v9290_v4  ;;  %v3130_v8 = vmax.f32 %v2915_v30, 0.0  ;;  %v11671_v11 = vld [vmem:[#allocation24_spill] sm:$0xff]  ;;  %v11716_v48 = vld [vmem:[#allocation22_spill] sm:$0xff] }
 0x2f5   : > { %v2177_v51 = vpop.f32.mrf.mxu0  ;;  %v9414_v42 = vmax.f32 %v3127_v46, %v3135_v32  ;;  %v1780_v7 = vsel %vm1670_vm5, %v1647_v36, %v11653_v23  ;;  %v1445_v52 = vsel %vm1331_vm2, %v11671_v11, %v9319_v38  ;;  %v11672_v38 = vld [vmem:[#allocation5_spill] sm:$0xff] }
 0x2f6   : > { %v2178_v3 = vadd.f32 %v2177_v51, %v7996_v41  ;;  %6982 = vrot.lane.b32.xlu0 %v6981_v54, %s7213_s22  ;;  %v1552_v46 = vsel %vm1476_vm3, %v1445_v52, %v9363_v55 }
 0x2f7   : > { %11667 = vst [vmem:[#allocation47_spill] sm:$0xff] %v9414_v42 }
 0x2f8   : > { %v2427_v57 = vadd.f32 %v9233_v39, %v2178_v3  ;;  %v9398_v33 = vpop.f32.mrf.mxu3  ;;  %v2923_v39 = vadd.f32 %v9226_v29, %v2674_v24  ;;  %v1100_v24 = vpop.permute.xlu0 %1099 }
 0x2f9   : > { %6987 = vrot.lane.b32.xlu1 %v6976_v53, %s7213_s22 }
 0x2fa   : > { %v3137_v25 = vmax.f32 %v2427_v57, 0.0  ;;  %v9409_v19 = vpop.f32.mrf.mxu1  ;;  %v3136_v4 = vmax.f32 %v2923_v39, 0.0 }
 0x2fb   : > { %v2675_v2 = vpop.f32.mrf.mxu2 }
 0x2fc   : > { %v9416_v20 = vmax.f32 %v3129_v31, %v3137_v25  ;;  %v2676_v53 = vadd.f32 %v2675_v2, %v8011_v62  ;;  %v996_v31 = vpop.permute.xlu2 %995  ;;  %v1649_v2 = vsel %vm1573_vm4, %v1552_v46, %v9348_v58  ;;  %v11674_v46 = vld [vmem:[#allocation37_spill] sm:$0xff] }
 0x2fd   : > { %v9421_v51 = vpop.f32.mrf.mxu0  ;;  %6304 = vmatmul.msk.bf16.gmra.mxu1 %vm1927_vm1, %v8699_v45  ;;  %6352 = vmatmul.msk.bf16.gmra.mxu3 %vm1927_vm1, %v8699_v45  ;;  %v1783_v55 = vsel %vm1670_vm5, %v1649_v2, %v11657_v9 }
 0x2fe   : > { %11668 = vst [vmem:[#allocation21_spill] sm:$0xff] %v9416_v20  ;;  %v6991_v29 = vpack.i.bf16 %v9416_v20, %v9414_v42  ;;  %v2925_v54 = vadd.f32 %v9249_v35, %v2676_v53  ;;  %1111 = vrot.lane.b32.xlu0 %v11635_v17, %s7211_s18  ;;  %v9439_v35 = vmax.f32 %v3128_v43, %v3136_v4 }
 0x300   : > { %2219 = vmatmul.bf16.gmra.mxu0 %v1780_v7  ;;  %2717 = vmatmul.bf16.gmra.mxu2 %v1780_v7  ;;  %v9434_v15 = vpop.f32.mrf.mxu3  ;;  %v3138_v61 = vmax.f32 %v2925_v54, 0.0  ;;  %11669 = vst [vmem:[#allocation69_spill] sm:$0xff] %v9439_v35  ;;  %v9458_v36 = vpop.permute.xlu0 %6907  ;;  %v11673_v7 = vld [vmem:[#allocation25_spill] sm:$0xff] }
 0x301   : > { %6992 = vrot.lane.b32.xlu1 %v6991_v29, %s7212_s21  ;;  %v1448_v43 = vsel %vm1331_vm2, %v11673_v7, %v9391_v44  ;;  %v2181_v7 = vadd.f32 %v9421_v51, %v7996_v41 }
 0x302   : > { %v9437_v3 = vpop.f32.mrf.mxu1  ;;  %v9441_v32 = vmax.f32 %v3130_v8, %v3138_v61  ;;  %v1554_v9 = vsel %vm1476_vm3, %v1448_v43, %v1100_v24  ;;  %v6693_v61 = vld [vmem:[%s11301_s3] sm:$0xff] }
 0x303   : > { %v2678_v17 = vpop.f32.mrf.mxu2  ;;  %v1651_v11 = vsel %vm1573_vm4, %v1554_v9, %v1206_v60  ;;  %4237 = vmatpush.bf16.msrb.mxu1 %v6693_v61 }
 0x304   : > { %11670 = vst [vmem:[#allocation50_spill] sm:$0xff] %v9441_v32  ;;  %v6996_v23 = vpack.i.bf16 %v9441_v32, %v9439_v35  ;;  %v1786_v2 = vsel %vm1670_vm5, %v1651_v11, %v11662_v47  ;;  %v11675_v32 = vld [vmem:[#allocation26_spill] sm:$0xff]  ;;  %v2430_v11 = vadd.f32 %v9256_v14, %v2181_v7 }
 0x305   : > { %v2182_v57 = vpop.f32.mrf.mxu0  ;;  %v1451_v47 = vsel %vm1331_vm2, %v11675_v32, %v996_v31  ;;  %v2679_v32 = vadd.f32 %v2678_v17, %v8011_v62 }
 0x306   : > { %6997 = vrot.lane.b32.xlu0 %v6996_v23, %s7213_s22  ;;  %v2183_v43 = vadd.f32 %v2182_v57, %v7996_v41  ;;  %v3139_v31 = vmax.f32 %v2430_v11, 0.0 }
 0x307   : > { %v2928_v17 = vadd.f32 %v9275_v16, %v2679_v32 }
 0x308   : > { %v9449_v59 = vpop.f32.mrf.mxu3  ;;  %v1102_v4 = vpop.permute.xlu0 %1101 }
 0x309   : > { %7002 = vrot.lane.b32.xlu1 %v6991_v29, %s7213_s22  ;;  %v1208_v29 = vpop.permute.xlu2 %1207 }
 0x30a   : > { %v9454_v25 = vpop.f32.mrf.mxu1 }
 0x30b   : > { %v2680_v39 = vpop.f32.mrf.mxu2 }
 0x30c   : > { %v2681_v14 = vadd.f32 %v2680_v39, %v8011_v62 }
 0x30d   : > { %v9460_v34 = vpop.f32.mrf.mxu0  ;;  %6305 = vmatmul.msk.bf16.gmra.mxu1 %vm1927_vm1, %v11672_v38  ;;  %6353 = vmatmul.msk.bf16.gmra.mxu3 %vm1927_vm1, %v11672_v38 }
 0x30e   : > { %1113 = vrot.lane.b32.xlu0 %v11641_v18, %s7211_s18 }
 0x310   : > { %2224 = vmatmul.bf16.gmra.mxu0 %v1783_v55  ;;  %2722 = vmatmul.bf16.gmra.mxu2 %v1783_v55  ;;  %v9470_v30 = vpop.f32.mrf.mxu3  ;;  %v9498_v24 = vpop.permute.xlu0 %6922 }
 0x311   : > { %v9496_v44 = vpop.permute.xlu2 %997 }
 0x312   : > { %v9472_v58 = vpop.f32.mrf.mxu1 }
 0x313   : > { %v9474_v53 = vpop.f32.mrf.mxu2 }
 0x315   : > { %v9476_v54 = vpop.f32.mrf.mxu0 }
 0x318   : > { %v9481_v18 = vpop.f32.mrf.mxu3 }
 0x319   : > { %v9517_v51 = vpop.permute.xlu2 %1209 }
 0x31a   : > { %v9484_v8 = vpop.f32.mrf.mxu1 }
 0x31b   : > { %v9489_v23 = vpop.f32.mrf.mxu2 }
 0x31d   : > { %v2190_v52 = vpop.f32.mrf.mxu0  ;;  %6306 = vmatmul.msk.bf16.gmra.mxu1 %vm1927_vm1, %v11674_v46  ;;  %6354 = vmatmul.msk.bf16.gmra.mxu3 %vm1927_vm1, %v11674_v46 }
 0x31e   : > { %v2191_v55 = vadd.f32 %v2190_v52, %v7996_v41  ;;  %v2432_v52 = vadd.f32 %v9279_v12, %v2183_v43 }
 0x320   : > { %2229 = vmatmul.bf16.gmra.mxu0 %v1786_v2  ;;  %2727 = vmatmul.bf16.gmra.mxu2 %v1786_v2  ;;  %v9503_v60 = vpop.f32.mrf.mxu3  ;;  %v2440_v20 = vadd.f32 %v9343_v1, %v2191_v55  ;;  %v1556_v1 = vsel %vm1476_vm3, %v1451_v47, %v1102_v4  ;;  %v1104_v55 = vpop.permute.xlu0 %1103  ;;  %v3141_v12 = vmax.f32 %v2432_v52, 0.0  ;;  %v11678_v52 = vld [vmem:[#allocation51_spill] sm:$0xff] }
 0x322   : > { %v9508_v9 = vpop.f32.mrf.mxu1  ;;  %v3147_v57 = vmax.f32 %v2440_v20, 0.0  ;;  %v6706_v20 = vld [vmem:[%s11302_s4 + $0x20] sm:$0xff] }
 0x323   : > { %v2688_v61 = vpop.f32.mrf.mxu2  ;;  %5187 = vmatpush.bf16.msrb.mxu0 %v6706_v20  ;;  %6766 = vmatpush.bf16.msrb.mxu2 %v6706_v20 }
 0x324   : > { %v2689_v35 = vadd.f32 %v2688_v61, %v8011_v62  ;;  %v1653_v61 = vsel %vm1573_vm4, %v1556_v1, %v1208_v29  ;;  %v9532_v4 = vmax.f32 %v3139_v31, %v3147_v57  ;;  %6767 = vmatpush.bf16.msra.mxu3 %v6706_v20  ;;  %v3140_v57 = vmax.f32 %v2928_v17, 0.0 }
 0x325   : > { %v2192_v42 = vpop.f32.mrf.mxu0  ;;  %v1789_v16 = vsel %vm1670_vm5, %v1653_v61, %v8699_v45  ;;  %v2186_v31 = vadd.f32 %v9460_v34, %v7996_v41  ;;  %v11681_v34 = vld [vmem:[#allocation27_spill] sm:$0xff] }
 0x326   : > { %v2193_v2 = vadd.f32 %v2192_v42, %v7996_v41  ;;  %11676 = vst [vmem:[#allocation23_spill] sm:$0xff] %v9532_v4 }
 0x328   : > { %v2442_v49 = vadd.f32 %v9378_v50, %v2193_v2  ;;  %v9520_v5 = vpop.f32.mrf.mxu3  ;;  %v2938_v50 = vadd.f32 %v9369_v0, %v2689_v35 }
 0x32a   : > { %v3149_v7 = vmax.f32 %v2442_v49, 0.0  ;;  %v9525_v42 = vpop.f32.mrf.mxu1  ;;  %v2930_v49 = vadd.f32 %v9292_v26, %v2681_v14  ;;  %v3148_v35 = vmax.f32 %v2938_v50, 0.0  ;;  %v9552_v14 = vpop.permute.xlu2 %999 }
 0x32b   : > { %v2690_v43 = vpop.f32.mrf.mxu2 }
 0x32c   : > { %v9534_v47 = vmax.f32 %v3141_v12, %v3149_v7  ;;  %v2691_v39 = vadd.f32 %v2690_v43, %v8011_v62  ;;  %v3142_v1 = vmax.f32 %v2930_v49, 0.0  ;;  %v9560_v12 = vpop.permute.xlu0 %6937  ;;  %v9562_v7 = vmax.f32 %v3140_v57, %v3148_v35 }
 0x32d   : > { %v2195_v11 = vpop.f32.mrf.mxu0  ;;  %6307 = vmatmul.msk.bf16.gmra.mxu1 %vm1927_vm1, %v11678_v52  ;;  %6355 = vmatmul.msk.bf16.gmra.mxu3 %vm1927_vm1, %v11678_v52  ;;  %v1454_v49 = vsel %vm1331_vm2, %v11681_v34, %v9496_v44  ;;  %v2684_v44 = vadd.f32 %v9474_v53, %v8011_v62  ;;  %v11684_v34 = vld [vmem:[#allocation10_spill] sm:$0xff] }
 0x32e   : > { %11677 = vst [vmem:[#allocation24_spill] sm:$0xff] %v9534_v47  ;;  %v7006_v0 = vpack.i.bf16 %v9534_v47, %v9532_v4  ;;  %v2940_v29 = vadd.f32 %v9398_v33, %v2691_v39  ;;  %v2196_v26 = vadd.f32 %v2195_v11, %v7996_v41  ;;  %v2188_v33 = vadd.f32 %v9476_v54, %v7996_v41  ;;  %v11712_v47 = vld [vmem:[#allocation53_spill] sm:$0xff] }
 0x32f   : > { %11679 = vst [vmem:[#allocation5_spill] sm:$0xff] %v9562_v7  ;;  %v2435_v54 = vadd.f32 %v9298_v27, %v2186_v31  ;;  %v2686_v27 = vadd.f32 %v9489_v23, %v8011_v62  ;;  %v2933_v23 = vadd.f32 %v9313_v37, %v2684_v44 }
 0x330   : > { %2732 = vmatmul.bf16.gmra.mxu2 %v1789_v16  ;;  %v9549_v2 = vpop.f32.mrf.mxu3  ;;  %2234 = vmatmul.bf16.gmra.mxu0 %v1789_v16  ;;  %v3150_v32 = vmax.f32 %v2940_v29, 0.0  ;;  %v2445_v43 = vadd.f32 %v9409_v19, %v2196_v26  ;;  %v2437_v39 = vadd.f32 %v9322_v63, %v2188_v33  ;;  %v1558_v26 = vsel %vm1476_vm3, %v1454_v49, %v1104_v55 }
 0x331   : > { %7007 = vrot.lane.b32.xlu1 %v7006_v0, %s7212_s21  ;;  %v3143_v63 = vmax.f32 %v2435_v54, 0.0  ;;  %v1655_v55 = vsel %vm1573_vm4, %v1558_v26, %v9517_v51 }
 0x332   : > { %v9558_v45 = vpop.f32.mrf.mxu1  ;;  %v9564_v20 = vmax.f32 %v3142_v1, %v3150_v32  ;;  %v3151_v29 = vmax.f32 %v2445_v43, 0.0  ;;  %v3145_v57 = vmax.f32 %v2437_v39, 0.0  ;;  %v1212_v43 = vpop.permute.xlu2 %1211 }
 0x333   : > { %v2693_v50 = vpop.f32.mrf.mxu2 }
 0x334   : > { %11680 = vst [vmem:[#allocation25_spill] sm:$0xff] %v9564_v20  ;;  %v7011_v17 = vpack.i.bf16 %v9564_v20, %v9562_v7  ;;  %v2694_v35 = vadd.f32 %v2693_v50, %v8011_v62  ;;  %v1106_v31 = vpop.permute.xlu0 %1105  ;;  %v9591_v50 = vmax.f32 %v3143_v63, %v3151_v29 }
 0x335   : > { %v2197_v61 = vpop.f32.mrf.mxu0 }
 0x336   : > { %v2198_v11 = vadd.f32 %v2197_v61, %v7996_v41  ;;  %7012 = vrot.lane.b32.xlu0 %v7011_v17, %s7213_s22  ;;  %11682 = vst [vmem:[#allocation37_spill] sm:$0xff] %v9591_v50 }
 0x338   : > { %v2447_v19 = vadd.f32 %v9437_v3, %v2198_v11  ;;  %v9578_v16 = vpop.f32.mrf.mxu3  ;;  %v2943_v3 = vadd.f32 %v9434_v15, %v2694_v35  ;;  %v3144_v11 = vmax.f32 %v2933_v23, 0.0 }
 0x339   : > { %7017 = vrot.lane.b32.xlu1 %v7006_v0, %s7213_s22  ;;  %v2935_v0 = vadd.f32 %v9335_v22, %v2686_v27  ;;  %v1792_v22 = vsel %vm1670_vm5, %v1655_v55, %v11672_v38 }
 0x33a   : > { %v3153_v1 = vmax.f32 %v2447_v19, 0.0  ;;  %v9586_v32 = vpop.f32.mrf.mxu1  ;;  %v3152_v49 = vmax.f32 %v2943_v3, 0.0  ;;  %v9616_v19 = vpop.permute.xlu1 %6802 }
 0x33b   : > { %v2695_v33 = vpop.f32.mrf.mxu2  ;;  %v3146_v35 = vmax.f32 %v2935_v0, 0.0  ;;  %v1002_v27 = vpop.permute.xlu2 %1001 }
 0x33c   : > { %v9593_v53 = vmax.f32 %v3145_v57, %v3153_v1  ;;  %v2696_v61 = vadd.f32 %v2695_v33, %v8011_v62  ;;  %v9622_v26 = vmax.f32 %v3144_v11, %v3152_v49  ;;  %v1457_v1 = vsel %vm1331_vm2, %v11588_v28, %v9552_v14 }
 0x33d   : > { %v2200_v17 = vpop.f32.mrf.mxu0  ;;  %6308 = vmatmul.msk.bf16.gmra.mxu1 %vm1927_vm1, %v11684_v34  ;;  %6356 = vmatmul.msk.bf16.gmra.mxu3 %vm1927_vm1, %v11684_v34  ;;  %v1560_v0 = vsel %vm1476_vm3, %v1457_v1, %v1106_v31 }
 0x33e   : > { %11683 = vst [vmem:[#allocation26_spill] sm:$0xff] %v9593_v53  ;;  %v2201_v15 = vadd.f32 %v2200_v17, %v7996_v41  ;;  %v7021_v51 = vpack.i.bf16 %v9593_v53, %v9591_v50  ;;  %v2945_v54 = vadd.f32 %v9449_v59, %v2696_v61  ;;  %1115 = vrot.lane.b32.xlu0 %v11649_v40, %s7211_s18  ;;  %v9620_v40 = vpop.permute.xlu0 %6952 }
 0x33f   : > { %11685 = vst [vmem:[#allocation51_spill] sm:$0xff] %v9622_v26 }
 0x340   : > { %v9611_v37 = vadd.f32 %v9454_v25, %v2201_v15  ;;  %2737 = vmatmul.bf16.gmra.mxu2 %v1792_v22  ;;  %v9613_v39 = vpop.f32.mrf.mxu3  ;;  %2239 = vmatmul.bf16.gmra.mxu0 %v1792_v22  ;;  %v3154_v29 = vmax.f32 %v2945_v54, 0.0  ;;  %v11687_v54 = vld [vmem:[#allocation11_spill] sm:$0xff] }
 0x341   : > { %7022 = vrot.lane.b32.xlu1 %v7021_v51, %s7212_s21 }
 0x342   : > { %v9618_v59 = vpop.f32.mrf.mxu1  ;;  %v9624_v38 = vmax.f32 %v3146_v35, %v3154_v29  ;;  %v9646_v28 = vpop.permute.xlu1 %6807 }
 0x343   : > { %v2698_v25 = vpop.f32.mrf.mxu2 }
 0x344   : > { %11686 = vst [vmem:[#allocation27_spill] sm:$0xff] %v9624_v38  ;;  %v2699_v44 = vadd.f32 %v2698_v25, %v8011_v62  ;;  %v7026_v57 = vpack.i.bf16 %v9624_v38, %v9622_v26  ;;  %v11711_v26 = vld [vmem:[#allocation49_spill] sm:$0xff] }
 0x345   : > { %v2202_v63 = vpop.f32.mrf.mxu0 }
 0x346   : > { %v9633_v3 = vadd.f32 %v9470_v30, %v2699_v44  ;;  %v2203_v33 = vadd.f32 %v2202_v63, %v7996_v41  ;;  %7027 = vrot.lane.b32.xlu0 %v7026_v57, %s7213_s22  ;;  %v1657_v30 = vsel %vm1573_vm4, %v1560_v0, %v1212_v43  ;;  %v1108_v15 = vpop.permute.xlu0 %1107  ;;  %v11688_v63 = vld [vmem:[#allocation34_spill] sm:$0xff] }
 0x347   : > { %v1795_v43 = vsel %vm1670_vm5, %v1657_v30, %v11674_v46 }
 0x348   : > { %v9638_v55 = vadd.f32 %v9472_v58, %v2203_v33  ;;  %v9640_v23 = vpop.f32.mrf.mxu3 }
 0x349   : > { %7032 = vrot.lane.b32.xlu1 %v7021_v51, %s7213_s22  ;;  %v1214_v51 = vpop.permute.xlu2 %1213 }
 0x34a   : > { %v9644_v61 = vpop.f32.mrf.mxu1  ;;  %v9670_v44 = vpop.permute.xlu1 %6817 }
 0x34b   : > { %v2700_v17 = vpop.f32.mrf.mxu2 }
 0x34c   : > { %v2701_v14 = vadd.f32 %v2700_v17, %v8011_v62 }
 0x34d   : > { %v2205_v49 = vpop.f32.mrf.mxu0  ;;  %6309 = vmatmul.msk.bf16.gmra.mxu1 %vm1927_vm1, %v11687_v54  ;;  %6357 = vmatmul.msk.bf16.gmra.mxu3 %vm1927_vm1, %v11687_v54 }
 0x34e   : > { %v9655_v58 = vadd.f32 %v9481_v18, %v2701_v14  ;;  %v2206_v31 = vadd.f32 %v2205_v49, %v7996_v41  ;;  %1117 = vrot.lane.b32.xlu0 %v11654_v56, %s7211_s18  ;;  %v1460_v56 = vsel %vm1331_vm2, %v11688_v63, %v1002_v27  ;;  %v9678_v57 = vpop.permute.xlu0 %6967  ;;  %v3155_v63 = vmax.f32 %v9611_v37, 0.0 }
 0x34f   : > { %v1562_v0 = vsel %vm1476_vm3, %v1460_v56, %v1108_v15 }
 0x350   : > { %v9663_v22 = vadd.f32 %v9484_v8, %v2206_v31  ;;  %2244 = vmatmul.bf16.gmra.mxu0 %v1795_v43  ;;  %2742 = vmatmul.bf16.gmra.mxu2 %v1795_v43  ;;  %v9665_v11 = vpop.f32.mrf.mxu3  ;;  %v1659_v27 = vsel %vm1573_vm4, %v1562_v0, %v1214_v51  ;;  %v11689_v31 = vld [vmem:[#allocation15_spill] sm:$0xff] }
 0x351   : > { %v1004_v17 = vpop.permute.xlu2 %1003  ;;  %v1798_v43 = vsel %vm1670_vm5, %v1659_v27, %v11678_v52 }
 0x352   : > { %v9667_v35 = vpop.f32.mrf.mxu1 }
 0x353   : > { %v2703_v18 = vpop.f32.mrf.mxu2 }
 0x354   : > { %v2704_v29 = vadd.f32 %v2703_v18, %v8011_v62  ;;  %v9700_v18 = vpop.permute.xlu1 %6822 }
 0x355   : > { %v2207_v25 = vpop.f32.mrf.mxu0 }
 0x356   : > { %v9675_v46 = vadd.f32 %v9503_v60, %v2704_v29  ;;  %v2208_v8 = vadd.f32 %v2207_v25, %v7996_v41  ;;  %v1110_v25 = vpop.permute.xlu0 %1109 }
 0x358   : > { %v9681_v1 = vadd.f32 %v9508_v9, %v2208_v8  ;;  %v9683_v33 = vpop.f32.mrf.mxu3 }
 0x35a   : > { %v9686_v30 = vpop.f32.mrf.mxu1 }
 0x35b   : > { %v2705_v14 = vpop.f32.mrf.mxu2 }
 0x35c   : > { %v2706_v60 = vadd.f32 %v2705_v14, %v8011_v62 }
 0x35d   : > { %v2210_v49 = vpop.f32.mrf.mxu0  ;;  %6310 = vmatmul.msk.bf16.gmra.mxu1 %vm1927_vm1, %v11689_v31  ;;  %6358 = vmatmul.msk.bf16.gmra.mxu3 %vm1927_vm1, %v11689_v31 }
 0x35e   : > { %v9695_v9 = vadd.f32 %v9520_v5, %v2706_v60  ;;  %v2211_v15 = vadd.f32 %v2210_v49, %v7996_v41  ;;  %v1216_v5 = vpop.permute.xlu2 %1215  ;;  %v11691_v60 = vld [vmem:[#allocation31_spill] sm:$0xff] }
 0x360   : > { %v2460_v51 = vadd.f32 %v9525_v42, %v2211_v15  ;;  %2249 = vmatmul.bf16.gmra.mxu0 %v1798_v43  ;;  %2747 = vmatmul.bf16.gmra.mxu2 %v1798_v43  ;;  %v9703_v29 = vpop.f32.mrf.mxu3  ;;  %v1463_v42 = vsel %vm1331_vm2, %v11691_v60, %v1004_v17  ;;  %v3156_v43 = vmax.f32 %v9633_v3, 0.0 }
 0x362   : > { %v3163_v56 = vmax.f32 %v2460_v51, 0.0  ;;  %v9706_v8 = vpop.f32.mrf.mxu1 }
 0x363   : > { %v2708_v0 = vpop.f32.mrf.mxu2 }
 0x364   : > { %v9708_v14 = vmax.f32 %v3155_v63, %v3163_v56  ;;  %v2709_v52 = vadd.f32 %v2708_v0, %v8011_v62  ;;  %v1564_v63 = vsel %vm1476_vm3, %v1463_v42, %v1110_v25  ;;  %v9722_v0 = vpop.permute.xlu1 %6832  ;;  %v11694_v42 = vld [vmem:[#allocation12_spill] sm:$0xff] }
 0x365   : > { %v2212_v27 = vpop.f32.mrf.mxu0  ;;  %v1661_v60 = vsel %vm1573_vm4, %v1564_v63, %v1216_v5  ;;  %v3159_v63 = vmax.f32 %v9663_v22, 0.0 }
 0x366   : > { %11690 = vst [vmem:[#allocation10_spill] sm:$0xff] %v9708_v14  ;;  %v2958_v49 = vadd.f32 %v9549_v2, %v2709_v52  ;;  %v2213_v15 = vadd.f32 %v2212_v27, %v7996_v41  ;;  %v3157_v14 = vmax.f32 %v9638_v55, 0.0  ;;  %v1006_v27 = vpop.permute.xlu2 %1005 }
 0x368   : > { %v3164_v37 = vmax.f32 %v2958_v49, 0.0  ;;  %v2462_v51 = vadd.f32 %v9558_v45, %v2213_v15  ;;  %v9717_v53 = vpop.f32.mrf.mxu3  ;;  %v9720_v56 = vpop.permute.xlu0 %6982 }
 0x36a   : > { %v9725_v17 = vmax.f32 %v3156_v43, %v3164_v37  ;;  %v3165_v2 = vmax.f32 %v2462_v51, 0.0  ;;  %v9727_v52 = vpop.f32.mrf.mxu1  ;;  %v1801_v43 = vsel %vm1670_vm5, %v1661_v60, %v11684_v34  ;;  %v3158_v37 = vmax.f32 %v9655_v58, 0.0 }
 0x36b   : > { %v2710_v3 = vpop.f32.mrf.mxu2 }
 0x36c   : > { %11692 = vst [vmem:[#allocation11_spill] sm:$0xff] %v9725_v17  ;;  %v9730_v45 = vmax.f32 %v3157_v14, %v3165_v2  ;;  %v2711_v49 = vadd.f32 %v2710_v3, %v8011_v62 }
 0x36d   : > { %v2215_v25 = vpop.f32.mrf.mxu0  ;;  %6311 = vmatmul.msk.bf16.gmra.mxu1 %vm1927_vm1, %v11694_v42  ;;  %6359 = vmatmul.msk.bf16.gmra.mxu3 %vm1927_vm1, %v11694_v42 }
 0x36e   : > { %11693 = vst [vmem:[#allocation34_spill] sm:$0xff] %v9730_v45  ;;  %v2216_v55 = vadd.f32 %v2215_v25, %v7996_v41  ;;  %v2960_v15 = vadd.f32 %v9578_v16, %v2711_v49  ;;  %v9750_v49 = vpop.permute.xlu1 %6837  ;;  %v1218_v60 = vpop.permute.xlu2 %1217 }
 0x370   : > { %v2465_v5 = vadd.f32 %v9586_v32, %v2216_v55  ;;  %2752 = vmatmul.bf16.gmra.mxu2 %v1801_v43  ;;  %v9742_v14 = vpop.f32.mrf.mxu3  ;;  %2254 = vmatmul.bf16.gmra.mxu0 %v1801_v43  ;;  %v3166_v51 = vmax.f32 %v2960_v15, 0.0  ;;  %v1112_v3 = vpop.permute.xlu0 %1111  ;;  %v11697_v43 = vld [vmem:[#allocation33_spill] sm:$0xff] }
 0x371   : > { %v1466_v58 = vsel %vm1331_vm2, %v11697_v43, %v1006_v27  ;;  %v11701_v43 = vld [vmem:[#allocation14_spill] sm:$0xff] }
 0x372   : > { %v3167_v2 = vmax.f32 %v2465_v5, 0.0  ;;  %v9746_v45 = vpop.f32.mrf.mxu1  ;;  %v9748_v25 = vmax.f32 %v3158_v37, %v3166_v51  ;;  %v3160_v5 = vmax.f32 %v9675_v46, 0.0 }
 0x373   : > { %v2713_v16 = vpop.f32.mrf.mxu2 }
 0x374   : > { %11695 = vst [vmem:[#allocation15_spill] sm:$0xff] %v9748_v25  ;;  %v9752_v34 = vmax.f32 %v3159_v63, %v3167_v2  ;;  %v2714_v32 = vadd.f32 %v2713_v16, %v8011_v62  ;;  %v1566_v63 = vsel %vm1476_vm3, %v1466_v58, %v1112_v3  ;;  %v3161_v2 = vmax.f32 %v9681_v1, 0.0  ;;  %v11702_v58 = vld [vmem:[#allocation77_spill] sm:$0xff] }
 0x375   : > { %v2217_v55 = vpop.f32.mrf.mxu0  ;;  %v6805_v1 = vunpack.i.h.bf16 %v9616_v19 }
 0x376   : > { %11696 = vst [vmem:[#allocation31_spill] sm:$0xff] %v9752_v34  ;;  %v2963_v22 = vadd.f32 %v9613_v39, %v2714_v32  ;;  %v2218_v15 = vadd.f32 %v2217_v55, %v7996_v41  ;;  %v1663_v39 = vsel %vm1573_vm4, %v1566_v63, %v1218_v60  ;;  %v6800_v60 = vunpack.i.h.bf16 %v11702_v58 }
 0x377   : > { %v6810_v63 = vunpack.i.h.bf16 %v9646_v28 }
 0x378   : > { %v3168_v37 = vmax.f32 %v2963_v22, 0.0  ;;  %v2467_v51 = vadd.f32 %v9618_v59, %v2218_v15  ;;  %v9761_v25 = vpop.f32.mrf.mxu3  ;;  %v9772_v46 = vpop.permute.xlu0 %6997 }
 0x379   : > { %11700 = vst [vmem:[#allocation81_spill] sm:$0xff] %v9772_v46  ;;  %v9783_v22 = vpop.permute.xlu1 %6847  ;;  %v1008_v15 = vpop.permute.xlu2 %1007  ;;  %v11715_v46 = vld [vmem:[#allocation59_spill] sm:$0xff] }
 0x37a   : > { %v9765_v16 = vmax.f32 %v3160_v5, %v3168_v37  ;;  %v3169_v34 = vmax.f32 %v2467_v51, 0.0  ;;  %v9767_v17 = vpop.f32.mrf.mxu1  ;;  %v1804_v37 = vsel %vm1670_vm5, %v1663_v39, %v11687_v54  ;;  %v6799_v51 = vunpack.i.l.bf16 %v11702_v58 }
 0x37b   : > { %v2715_v27 = vpop.f32.mrf.mxu2  ;;  %v3894_v54 = vsel %vm3892_vm6, %v6800_v60, %v6805_v1  ;;  %v11704_v1 = vld [vmem:[#allocation48_spill] sm:$0xff] }
 0x37c   : > { %11698 = vst [vmem:[#allocation12_spill] sm:$0xff] %v9765_v16  ;;  %v9770_v32 = vmax.f32 %v3161_v2, %v3169_v34  ;;  %v2716_v59 = vadd.f32 %v2715_v27, %v8011_v62  ;;  %v6804_v34 = vunpack.i.l.bf16 %v9616_v19  ;;  %v6809_v2 = vunpack.i.l.bf16 %v9646_v28 }
 0x37d   : > { %v2220_v55 = vpop.f32.mrf.mxu0  ;;  %6312 = vmatmul.msk.bf16.gmra.mxu1 %vm1927_vm1, %v11701_v43  ;;  %6360 = vmatmul.msk.bf16.gmra.mxu3 %vm1927_vm1, %v11701_v43  ;;  %v3162_v19 = vmax.f32 %v9695_v9, 0.0  ;;  %v1469_v9 = vsel %vm1331_vm2, %v11619_v10, %v1008_v15 }
 0x37e   : > { %11699 = vst [vmem:[#allocation33_spill] sm:$0xff] %v9770_v32  ;;  %v2221_v3 = vadd.f32 %v2220_v55, %v7996_v41  ;;  %v2965_v5 = vadd.f32 %v9640_v23, %v2716_v59  ;;  %v3893_v28 = vsel %vm3892_vm6, %v6799_v51, %v6804_v34  ;;  %v11706_v34 = vld [vmem:[#allocation46_spill] sm:$0xff] }
 0x380   : > { %v9792_v27 = vadd.f32 %v9644_v61, %v2221_v3  ;;  %2757 = vmatmul.bf16.gmra.mxu2 %v1804_v37  ;;  %v9794_v55 = vpop.f32.mrf.mxu3  ;;  %2259 = vmatmul.bf16.gmra.mxu0 %v1804_v37  ;;  %v3170_v23 = vmax.f32 %v2965_v5, 0.0  ;;  %v3605_v61 = vsel %vm3603_vm7, %v6810_v63, %v6800_v60  ;;  %v3604_v3 = vsel %vm3603_vm7, %v6809_v2, %v6799_v51  ;;  %v1114_v5 = vpop.permute.xlu0 %1113  ;;  %v11707_v60 = vld [vmem:[#allocation43_spill] sm:$0xff] }
 0x381   : > { %v3943_v50 = vmax.f32 %v11706_v34, %v3605_v61  ;;  %v3941_v63 = vmax.f32 %v11707_v60, %v3604_v3  ;;  %v9819_v2 = vpop.permute.xlu1 %6852  ;;  %v1220_v38 = vpop.permute.xlu2 %1219 }
 0x382   : > { %v9797_v59 = vpop.f32.mrf.mxu1  ;;  %v9800_v39 = vmax.f32 %v3162_v19, %v3170_v23  ;;  %v3944_v19 = vmax.f32 %v11704_v1, %v3894_v54  ;;  %v11705_v23 = vld [vmem:[#allocation45_spill] sm:$0xff] }
 0x383   : > { %v2718_v58 = vpop.f32.mrf.mxu2  ;;  %v4037_v15 = vpack.c.bf16 %v3943_v50, %v3941_v63  ;;  %v6819_v50 = vunpack.i.l.bf16 %v9670_v44 }
 0x384   : > { %11703 = vst [vmem:[#allocation14_spill] sm:$0xff] %v9800_v39  ;;  %v2719_v32 = vadd.f32 %v2718_v58, %v8011_v62  ;;  %v3942_v39 = vmax.f32 %v11705_v23, %v3893_v28  ;;  %v1568_v58 = vsel %vm1476_vm3, %v1469_v9, %v1114_v5  ;;  %v6705_v28 = vld [vmem:[%s11302_s4 + $0x18] sm:$0xff]  ;;  %v11708_v9 = vld [vmem:[#allocation78_spill] sm:$0xff]  ;;  %v6824_v23 = vunpack.i.l.bf16 %v9700_v18 }
 0x385   : > { %v9806_v37 = vpop.f32.mrf.mxu0  ;;  %v1665_v54 = vsel %vm1573_vm4, %v1568_v58, %v1220_v38  ;;  %5188 = vmatpush.bf16.msrb.mxu0 %v6705_v28  ;;  %6768 = vmatpush.bf16.msrb.mxu2 %v6705_v28  ;;  %v6815_v5 = vunpack.i.h.bf16 %v11708_v9  ;;  %v6814_v1 = vunpack.i.l.bf16 %v11708_v9  ;;  %v11710_v9 = vld [vmem:[#allocation52_spill] sm:$0xff] }
 0x386   : > { %v9811_v16 = vadd.f32 %v9665_v11, %v2719_v32  ;;  %v4038_v11 = vpack.c.bf16 %v3944_v19, %v3942_v39  ;;  %v6820_v39 = vunpack.i.h.bf16 %v9670_v44  ;;  %v1807_v38 = vsel %vm1670_vm5, %v1665_v54, %v11689_v31  ;;  %6769 = vmatpush.bf16.msra.mxu3 %v6705_v28 }
 0x387   : > { %v6825_v19 = vunpack.i.h.bf16 %v9700_v18  ;;  %v3606_v18 = vsel %vm3603_vm7, %v6824_v23, %v6814_v1 }
 0x388   : > { %v9817_v51 = vpop.f32.mrf.mxu3  ;;  %v3896_v31 = vsel %vm3892_vm6, %v6815_v5, %v6820_v39  ;;  %v3945_v39 = vmax.f32 %v11711_v26, %v3606_v18  ;;  %v6834_v18 = vunpack.i.l.bf16 %v9722_v0 }
 0x389   : > { %v9845_v63 = vpop.permute.xlu1 %6862 }
 0x38a   : > { %v9822_v10 = vpop.f32.mrf.mxu1 }
 0x38b   : > { %v9824_v32 = vpop.f32.mrf.mxu2 }
 0x38d   : > { %v2225_v61 = vpop.f32.mrf.mxu0  ;;  %4238 = vmatmul.bf16.vlgmr.msrb.gmra.mxu1 %v4037_v15  ;;  %6397 = vmatmul.msk.bf16.vlgmr.msrb.gmra.mxu3 %vm4157_vm8, %v4038_v11  ;;  %v3895_v11 = vsel %vm3892_vm6, %v6814_v1, %v6819_v50 }
 0x38e   : > { %v2226_v3 = vadd.f32 %v2225_v61, %v7996_v41  ;;  %v11709_v61 = vld [vmem:[#allocation55_spill] sm:$0xff] }
 0x390   : > { %v9841_v34 = vadd.f32 %v9686_v30, %v2226_v3  ;;  %2264 = vmatmul.bf16.gmra.mxu0 %v1807_v38  ;;  %2762 = vmatmul.bf16.gmra.mxu2 %v1807_v38  ;;  %v9843_v60 = vpop.f32.mrf.mxu3  ;;  %v3607_v30 = vsel %vm3603_vm7, %v6825_v19, %v6815_v5  ;;  %v3948_v3 = vmax.f32 %v11709_v61, %v3896_v31  ;;  %v6839_v61 = vunpack.i.l.bf16 %v9750_v49 }
 0x391   : > { %v3946_v38 = vmax.f32 %v11710_v9, %v3895_v11  ;;  %v3947_v4 = vmax.f32 %v11712_v47, %v3607_v30  ;;  %v9867_v1 = vpop.permute.xlu1 %6867  ;;  %v11713_v11 = vld [vmem:[#allocation16_spill] sm:$0xff]  ;;  %v6840_v30 = vunpack.i.h.bf16 %v9750_v49  ;;  %v3171_v9 = vmax.f32 %v9792_v27, 0.0 }
 0x392   : > { %v9847_v44 = vpop.f32.mrf.mxu1  ;;  %v6830_v26 = vunpack.i.h.bf16 %v11713_v11  ;;  %v6829_v47 = vunpack.i.l.bf16 %v11713_v11 }
 0x393   : > { %v2723_v58 = vpop.f32.mrf.mxu2  ;;  %v4039_v19 = vpack.c.bf16 %v3947_v4, %v3945_v39  ;;  %v4040_v23 = vpack.c.bf16 %v3948_v3, %v3946_v38  ;;  %v2223_v38 = vadd.f32 %v9806_v37, %v7996_v41 }
 0x394   : > { %v2724_v15 = vadd.f32 %v2723_v58, %v8011_v62  ;;  %v3608_v49 = vsel %vm3603_vm7, %v6839_v61, %v6829_v47  ;;  %v3609_v27 = vsel %vm3603_vm7, %v6840_v30, %v6830_v26 }
 0x395   : > { %v9854_v54 = vpop.f32.mrf.mxu0 }
 0x396   : > { %v9857_v28 = vadd.f32 %v9703_v29, %v2724_v15  ;;  %v6835_v15 = vunpack.i.h.bf16 %v9722_v0  ;;  %v3897_v0 = vsel %vm3892_vm6, %v6829_v47, %v6834_v18  ;;  %v3172_v47 = vmax.f32 %v9811_v16, 0.0 }
 0x398   : > { %v9863_v50 = vpop.f32.mrf.mxu3 }
 0x39a   : > { %v9865_v58 = vpop.f32.mrf.mxu1 }
 0x39b   : > { %v9869_v5 = vpop.f32.mrf.mxu2 }
 0x39d   : > { %v2230_v29 = vpop.f32.mrf.mxu0  ;;  %4243 = vmatmul.bf16.gmra.mxu1 %v4039_v19  ;;  %6398 = vmatmul.msk.bf16.gmra.mxu3 %vm4157_vm8, %v4040_v23  ;;  %v1010_v23 = vpop.permute.xlu2 %1009 }
 0x39e   : > { %v2231_v31 = vadd.f32 %v2230_v29, %v7996_v41  ;;  %v3898_v29 = vsel %vm3892_vm6, %v6830_v26, %v6835_v15 }
 0x39f   : > { %v3952_v18 = vmax.f32 %v11715_v46, %v3898_v29 }
 0x3a0   : > { %v2480_v4 = vadd.f32 %v9727_v52, %v2231_v31  ;;  %v9880_v3 = vpop.f32.mrf.mxu3  ;;  %v9894_v31 = vpop.permute.xlu1 %6877 }
 0x3a2   : > { %v3179_v39 = vmax.f32 %v2480_v4, 0.0  ;;  %v9885_v19 = vpop.f32.mrf.mxu1  ;;  %v2472_v4 = vadd.f32 %v9667_v35, %v2223_v38  ;;  %v2721_v35 = vadd.f32 %v9824_v32, %v8011_v62  ;;  %v6850_v32 = vunpack.i.h.bf16 %v9783_v22 }
 0x3a3   : > { %v2728_v11 = vpop.f32.mrf.mxu2 }
 0x3a4   : > { %v9889_v20 = vmax.f32 %v3171_v9, %v3179_v39  ;;  %v2729_v52 = vadd.f32 %v2728_v11, %v8011_v62  ;;  %v3950_v9 = vmax.f32 %v11716_v48, %v3897_v0  ;;  %v11717_v39 = vld [vmem:[#allocation2_spill] sm:$0xff]  ;;  %v3173_v38 = vmax.f32 %v2472_v4, 0.0 }
 0x3a5   : > { %v2232_v37 = vpop.f32.mrf.mxu0  ;;  %v11718_v11 = vld [vmem:[#allocation58_spill] sm:$0xff]  ;;  %v6849_v4 = vunpack.i.l.bf16 %v9783_v22 }
 0x3a6   : > { %11714 = vst [vmem:[#allocation77_spill] sm:$0xff] %v9889_v20  ;;  %v2978_v7 = vadd.f32 %v9742_v14, %v2729_v52  ;;  %v2233_v15 = vadd.f32 %v2232_v37, %v7996_v41  ;;  %v3949_v20 = vmax.f32 %v11717_v39, %v3608_v49  ;;  %v3951_v13 = vmax.f32 %v11718_v11, %v3609_v27  ;;  %v11721_v39 = vld [vmem:[#allocation28_spill] sm:$0xff] }
 0x3a7   : > { %v4042_v49 = vpack.c.bf16 %v3952_v18, %v3950_v9  ;;  %v11722_v9 = vld [vmem:[#allocation36_spill] sm:$0xff] }
 0x3a8   : > { %v3180_v26 = vmax.f32 %v2978_v7, 0.0  ;;  %v2482_v30 = vadd.f32 %v9746_v45, %v2233_v15  ;;  %v9905_v61 = vpop.f32.mrf.mxu3  ;;  %v9909_v14 = vpop.permute.xlu0 %7012  ;;  %v4041_v52 = vpack.c.bf16 %v3951_v13, %v3949_v20  ;;  %v2970_v45 = vadd.f32 %v9683_v33, %v2721_v35 }
 0x3a9   : > { %v1222_v7 = vpop.permute.xlu2 %1221  ;;  %v6845_v13 = vunpack.i.h.bf16 %v11721_v39  ;;  %v6844_v20 = vunpack.i.l.bf16 %v11721_v39  ;;  %v9925_v18 = vpop.permute.xlu1 %6882  ;;  %v1472_v33 = vsel %vm1331_vm2, %v11722_v9, %v1010_v23 }
 0x3aa   : > { %v9911_v46 = vmax.f32 %v3172_v47, %v3180_v26  ;;  %v3181_v48 = vmax.f32 %v2482_v30, 0.0  ;;  %v9913_v29 = vpop.f32.mrf.mxu1  ;;  %v6855_v47 = vunpack.i.h.bf16 %v9819_v2  ;;  %v6854_v26 = vunpack.i.l.bf16 %v9819_v2 }
 0x3ab   : > { %v2730_v0 = vpop.f32.mrf.mxu2  ;;  %v3174_v35 = vmax.f32 %v2970_v45, 0.0  ;;  %v3899_v2 = vsel %vm3892_vm6, %v6844_v20, %v6849_v4 }
 0x3ac   : > { %11719 = vst [vmem:[#allocation48_spill] sm:$0xff] %v9911_v46  ;;  %v9915_v16 = vmax.f32 %v3173_v38, %v3181_v48  ;;  %v2731_v27 = vadd.f32 %v2730_v0, %v8011_v62  ;;  %v3175_v0 = vmax.f32 %v9841_v34, 0.0  ;;  %v3611_v39 = vsel %vm3603_vm7, %v6855_v47, %v6845_v13 }
 0x3ad   : > { %v2235_v37 = vpop.f32.mrf.mxu0  ;;  %4248 = vmatmul.bf16.gmra.mxu1 %v4041_v52  ;;  %6399 = vmatmul.msk.bf16.gmra.mxu3 %vm4157_vm8, %v4042_v49  ;;  %v2228_v52 = vadd.f32 %v9854_v54, %v7996_v41  ;;  %v3610_v54 = vsel %vm3603_vm7, %v6854_v26, %v6844_v20  ;;  %v11728_v26 = vld [vmem:[#allocation62_spill] sm:$0xff] }
 0x3ae   : > { %11720 = vst [vmem:[#allocation45_spill] sm:$0xff] %v9915_v16  ;;  %v2236_v15 = vadd.f32 %v2235_v37, %v7996_v41  ;;  %v2980_v11 = vadd.f32 %v9761_v25, %v2731_v27  ;;  %v3900_v27 = vsel %vm3892_vm6, %v6845_v13, %v6850_v32  ;;  %v11727_v13 = vld [vmem:[#allocation60_spill] sm:$0xff] }
 0x3af   : > { %v2477_v32 = vadd.f32 %v9706_v8, %v2228_v52  ;;  %v3953_v47 = vmax.f32 %v11727_v13, %v3610_v54 }
 0x3b0   : > { %v2485_v30 = vadd.f32 %v9767_v17, %v2236_v15  ;;  %v9933_v22 = vpop.f32.mrf.mxu3  ;;  %v3182_v38 = vmax.f32 %v2980_v11, 0.0  ;;  %v1116_v48 = vpop.permute.xlu0 %1115 }
 0x3b1   : > { %v1570_v23 = vsel %vm1476_vm3, %v1472_v33, %v1116_v48  ;;  %v1012_v11 = vpop.permute.xlu2 %1011  ;;  %v9958_v20 = vpop.permute.xlu1 %6887 }
 0x3b2   : > { %v3183_v49 = vmax.f32 %v2485_v30, 0.0  ;;  %v9939_v25 = vpop.f32.mrf.mxu1  ;;  %v9943_v17 = vmax.f32 %v3174_v35, %v3182_v38  ;;  %v1667_v45 = vsel %vm1573_vm4, %v1570_v23, %v1222_v7  ;;  %v11725_v30 = vld [vmem:[#allocation63_spill] sm:$0xff]  ;;  %v11726_v38 = vld [vmem:[#allocation61_spill] sm:$0xff] }
 0x3b3   : > { %v2733_v37 = vpop.f32.mrf.mxu2  ;;  %v1810_v9 = vsel %vm1670_vm5, %v1667_v45, %v11694_v42  ;;  %v3956_v35 = vmax.f32 %v11725_v30, %v3900_v27  ;;  %v3954_v48 = vmax.f32 %v11726_v38, %v3899_v2  ;;  %v3955_v42 = vmax.f32 %v11728_v26, %v3611_v39  ;;  %v11731_v30 = vld [vmem:[#allocation38_spill] sm:$0xff] }
 0x3b4   : > { %11723 = vst [vmem:[#allocation46_spill] sm:$0xff] %v9943_v17  ;;  %v9946_v15 = vmax.f32 %v3175_v0, %v3183_v49  ;;  %v2734_v34 = vadd.f32 %v2733_v37, %v8011_v62  ;;  %2269 = vmatmul.bf16.gmra.mxu0 %v1810_v9  ;;  %2767 = vmatmul.bf16.gmra.mxu2 %v1810_v9  ;;  %v3176_v0 = vmax.f32 %v9857_v28, 0.0  ;;  %v3177_v27 = vmax.f32 %v2477_v32, 0.0  ;;  %v11730_v32 = vld [vmem:[#allocation18_spill] sm:$0xff] }
 0x3b5   : > { %v2237_v33 = vpop.f32.mrf.mxu0  ;;  %v2726_v49 = vadd.f32 %v9869_v5, %v8011_v62  ;;  %v4043_v54 = vpack.c.bf16 %v3955_v42, %v3953_v47  ;;  %v4044_v39 = vpack.c.bf16 %v3956_v35, %v3954_v48  ;;  %v1475_v38 = vsel %vm1331_vm2, %v11731_v30, %v1012_v11  ;;  %v11732_v30 = vld [vmem:[#allocation7_spill] sm:$0xff] }
 0x3b6   : > { %11724 = vst [vmem:[#allocation43_spill] sm:$0xff] %v9946_v15  ;;  %v2983_v4 = vadd.f32 %v9794_v55, %v2734_v34  ;;  %v2238_v7 = vadd.f32 %v2237_v33, %v7996_v41  ;;  %v6870_v48 = vunpack.i.h.bf16 %v9867_v1  ;;  %v6865_v42 = vunpack.i.h.bf16 %v9845_v63 }
 0x3b8   : > { %v3184_v8 = vmax.f32 %v2983_v4, 0.0  ;;  %v2487_v55 = vadd.f32 %v9797_v59, %v2238_v7  ;;  %v9964_v52 = vpop.f32.mrf.mxu3  ;;  %v9968_v23 = vpop.permute.xlu0 %7027  ;;  %v2975_v59 = vadd.f32 %v9717_v53, %v2726_v49  ;;  %v6860_v4 = vunpack.i.h.bf16 %v11730_v32 }
 0x3b9   : > { %v6859_v7 = vunpack.i.l.bf16 %v11730_v32  ;;  %v6869_v53 = vunpack.i.l.bf16 %v9867_v1  ;;  %v1224_v26 = vpop.permute.xlu2 %1223 }
 0x3ba   : > { %v9970_v2 = vmax.f32 %v3176_v0, %v3184_v8  ;;  %v3185_v45 = vmax.f32 %v2487_v55, 0.0  ;;  %v9972_v37 = vpop.f32.mrf.mxu1  ;;  %v6864_v0 = vunpack.i.l.bf16 %v9845_v63  ;;  %v9994_v8 = vpop.permute.xlu1 %6897  ;;  %v3178_v55 = vmax.f32 %v2975_v59, 0.0 }
 0x3bb   : > { %v2735_v34 = vpop.f32.mrf.mxu2  ;;  %v3612_v59 = vsel %vm3603_vm7, %v6869_v53, %v6859_v7 }
 0x3bc   : > { %v9974_v28 = vmax.f32 %v3177_v27, %v3185_v45  ;;  %v2736_v9 = vadd.f32 %v2735_v34, %v8011_v62  ;;  %v3901_v1 = vsel %vm3892_vm6, %v6859_v7, %v6864_v0 }
 0x3bd   : > { %v2240_v33 = vpop.f32.mrf.mxu0  ;;  %4253 = vmatmul.bf16.gmra.mxu1 %v4043_v54  ;;  %6400 = vmatmul.msk.bf16.gmra.mxu3 %vm4157_vm8, %v4044_v39 }
 0x3be   : > { %11729 = vst [vmem:[#allocation78_spill] sm:$0xff] %v9974_v28  ;;  %v2241_v5 = vadd.f32 %v2240_v33, %v7996_v41  ;;  %v2985_v35 = vadd.f32 %v9817_v51, %v2736_v9  ;;  %v3613_v9 = vsel %vm3603_vm7, %v6870_v48, %v6860_v4 }
 0x3c0   : > { %v9988_v13 = vadd.f32 %v9822_v10, %v2241_v5  ;;  %v9990_v47 = vpop.f32.mrf.mxu3  ;;  %v3186_v11 = vmax.f32 %v2985_v35, 0.0  ;;  %v1118_v49 = vpop.permute.xlu0 %1117  ;;  %v3902_v10 = vsel %vm3892_vm6, %v6860_v4, %v6865_v42  ;;  %v11733_v35 = vld [vmem:[#allocation32_spill] sm:$0xff]  ;;  %v11734_v42 = vld [vmem:[#allocation3_spill] sm:$0xff] }
 0x3c1   : > { %v1572_v51 = vsel %vm1476_vm3, %v1475_v38, %v1118_v49  ;;  %v3958_v38 = vmax.f32 %v11732_v30, %v3901_v1  ;;  %v3957_v0 = vmax.f32 %v11734_v42, %v3612_v59  ;;  %v6879_v59 = vunpack.i.l.bf16 %v9894_v31 }
 0x3c2   : > { %v9997_v27 = vpop.f32.mrf.mxu1  ;;  %v10001_v45 = vmax.f32 %v3178_v55, %v3186_v11  ;;  %v1669_v34 = vsel %vm1573_vm4, %v1572_v51, %v1224_v26  ;;  %v3960_v26 = vmax.f32 %v11733_v35, %v3902_v10  ;;  %v11735_v55 = vld [vmem:[#allocation30_spill] sm:$0xff]  ;;  %v6874_v10 = vunpack.i.l.bf16 %v9331_v21 }
 0x3c3   : > { %v2738_v54 = vpop.f32.mrf.mxu2  ;;  %v1813_v39 = vsel %vm1670_vm5, %v1669_v34, %v11701_v43  ;;  %v3959_v43 = vmax.f32 %v11735_v55, %v3613_v9  ;;  %v6885_v34 = vunpack.i.h.bf16 %v9925_v18  ;;  %v6880_v9 = vunpack.i.h.bf16 %v9894_v31 }
 0x3c4   : > { %v2739_v63 = vadd.f32 %v2738_v54, %v8011_v62  ;;  %2274 = vmatmul.bf16.gmra.mxu0 %v1813_v39  ;;  %2772 = vmatmul.bf16.gmra.mxu2 %v1813_v39  ;;  %v4046_v49 = vpack.c.bf16 %v3960_v26, %v3958_v38  ;;  %v6884_v54 = vunpack.i.l.bf16 %v9925_v18 }
 0x3c5   : > { %v2242_v33 = vpop.f32.mrf.mxu0  ;;  %v4045_v11 = vpack.c.bf16 %v3959_v43, %v3957_v0  ;;  %v11737_v0 = vld [vmem:[#allocation35_spill] sm:$0xff]  ;;  %v11738_v43 = vld [vmem:[#allocation68_spill] sm:$0xff] }
 0x3c6   : > { %v10010_v5 = vadd.f32 %v9843_v60, %v2739_v63  ;;  %v2243_v32 = vadd.f32 %v2242_v33, %v7996_v41  ;;  %v10024_v60 = vpop.permute.xlu1 %6902  ;;  %v3614_v18 = vsel %vm3603_vm7, %v6884_v54, %v6874_v10 }
 0x3c8   : > { %v10018_v7 = vadd.f32 %v9847_v44, %v2243_v32  ;;  %v10020_v4 = vpop.f32.mrf.mxu3  ;;  %v6875_v44 = vunpack.i.h.bf16 %v9331_v21  ;;  %v3903_v32 = vsel %vm3892_vm6, %v6874_v10, %v6879_v59 }
 0x3c9   : > { %v3962_v55 = vmax.f32 %v11737_v0, %v3903_v32  ;;  %v6890_v0 = vunpack.i.h.bf16 %v9958_v20 }
 0x3ca   : > { %v10022_v48 = vpop.f32.mrf.mxu1  ;;  %v3904_v21 = vsel %vm3892_vm6, %v6875_v44, %v6880_v9 }
 0x3cb   : > { %v10026_v53 = vpop.f32.mrf.mxu2 }
 0x3cd   : > { %v2245_v51 = vpop.f32.mrf.mxu0  ;;  %4258 = vmatmul.bf16.gmra.mxu1 %v4045_v11  ;;  %6401 = vmatmul.msk.bf16.gmra.mxu3 %vm4157_vm8, %v4046_v49  ;;  %v3964_v11 = vmax.f32 %v11738_v43, %v3904_v21  ;;  %v11739_v49 = vld [vmem:[#allocation66_spill] sm:$0xff]  ;;  %v3187_v43 = vmax.f32 %v9988_v13, 0.0 }
 0x3ce   : > { %v2246_v1 = vadd.f32 %v2245_v51, %v7996_v41  ;;  %v10048_v35 = vpop.permute.xlu1 %6912  ;;  %v3961_v51 = vmax.f32 %v11739_v49, %v3614_v18  ;;  %v6900_v18 = vunpack.i.h.bf16 %v9994_v8 }
 0x3cf   : > { %v4048_v9 = vpack.c.bf16 %v3964_v11, %v3962_v55  ;;  %v6889_v55 = vunpack.i.l.bf16 %v9958_v20 }
 0x3d0   : > { %v10035_v63 = vadd.f32 %v9865_v58, %v2246_v1  ;;  %v10037_v39 = vpop.f32.mrf.mxu3  ;;  %v3615_v58 = vsel %vm3603_vm7, %v6885_v34, %v6875_v44  ;;  %v11740_v1 = vld [vmem:[#allocation67_spill] sm:$0xff] }
 0x3d1   : > { %11736 = vst [vmem:[#allocation55_spill] sm:$0xff] %v10037_v39  ;;  %v3963_v59 = vmax.f32 %v11740_v1, %v3615_v58  ;;  %v6899_v58 = vunpack.i.l.bf16 %v9994_v8 }
 0x3d2   : > { %v10041_v33 = vpop.f32.mrf.mxu1 }
 0x3d3   : > { %v2743_v30 = vpop.f32.mrf.mxu2 }
 0x3d4   : > { %v2744_v38 = vadd.f32 %v2743_v30, %v8011_v62 }
 0x3d5   : > { %v2247_v26 = vpop.f32.mrf.mxu0 }
 0x3d6   : > { %v10051_v42 = vadd.f32 %v9880_v3, %v2744_v38  ;;  %v2248_v31 = vadd.f32 %v2247_v26, %v7996_v41  ;;  %v4047_v3 = vpack.c.bf16 %v3963_v59, %v3961_v51  ;;  %v10067_v30 = vpop.permute.xlu1 %6917  ;;  %v6895_v38 = vunpack.i.h.bf16 %v9400_v6 }
 0x3d8   : > { %v10059_v10 = vadd.f32 %v9885_v19, %v2248_v31  ;;  %v10061_v44 = vpop.f32.mrf.mxu3  ;;  %v6894_v19 = vunpack.i.l.bf16 %v9400_v6  ;;  %v3906_v6 = vsel %vm3892_vm6, %v6895_v38, %v6890_v0  ;;  %v11745_v0 = vld [vmem:[#allocation29_spill] sm:$0xff] }
 0x3d9   : > { %11741 = vst [vmem:[#allocation52_spill] sm:$0xff] %v10061_v44 }
 0x3da   : > { %v10063_v34 = vpop.f32.mrf.mxu1  ;;  %v3905_v51 = vsel %vm3892_vm6, %v6894_v19, %v6889_v55  ;;  %v3616_v8 = vsel %vm3603_vm7, %v6899_v58, %v6894_v19  ;;  %v3189_v58 = vmax.f32 %v10018_v7, 0.0 }
 0x3db   : > { %v10065_v54 = vpop.f32.mrf.mxu2 }
 0x3dd   : > { %v2250_v32 = vpop.f32.mrf.mxu0  ;;  %4263 = vmatmul.bf16.gmra.mxu1 %v4047_v3  ;;  %6402 = vmatmul.msk.bf16.gmra.mxu3 %vm4157_vm8, %v4048_v9  ;;  %v3617_v3 = vsel %vm3603_vm7, %v6900_v18, %v6895_v38  ;;  %v2741_v38 = vadd.f32 %v10026_v53, %v8011_v62 }
 0x3de   : > { %v2251_v21 = vadd.f32 %v2250_v32, %v7996_v41  ;;  %v11743_v32 = vld [vmem:[#allocation8_spill] sm:$0xff] }
 0x3df   : > { %v2990_v53 = vadd.f32 %v9863_v50, %v2741_v38  ;;  %v6915_v50 = vunpack.i.h.bf16 %v10048_v35 }
 0x3e0   : > { %v2500_v26 = vadd.f32 %v9913_v29, %v2251_v21  ;;  %v10076_v31 = vpop.f32.mrf.mxu3  ;;  %v3966_v21 = vmax.f32 %v11743_v32, %v3905_v51 }
 0x3e1   : > { %11742 = vst [vmem:[#allocation49_spill] sm:$0xff] %v10076_v31  ;;  %v10094_v31 = vpop.permute.xlu1 %6927 }
 0x3e2   : > { %v3195_v11 = vmax.f32 %v2500_v26, 0.0  ;;  %v10081_v49 = vpop.f32.mrf.mxu1  ;;  %v11744_v26 = vld [vmem:[#allocation39_spill] sm:$0xff] }
 0x3e3   : > { %v2748_v1 = vpop.f32.mrf.mxu2  ;;  %v3968_v55 = vmax.f32 %v11744_v26, %v3906_v6  ;;  %v6914_v26 = vunpack.i.l.bf16 %v10048_v35 }
 0x3e4   : > { %v10085_v59 = vmax.f32 %v3187_v43, %v3195_v11  ;;  %v2749_v29 = vadd.f32 %v2748_v1, %v8011_v62  ;;  %v3965_v43 = vmax.f32 %v11745_v0, %v3616_v8  ;;  %v11746_v11 = vld [vmem:[#allocation9_spill] sm:$0xff]  ;;  %v3188_v1 = vmax.f32 %v10010_v5, 0.0  ;;  %v6704_v8 = vld [vmem:[%s11302_s4 + $0x10] sm:$0xff] }
 0x3e5   : > { %v2252_v9 = vpop.f32.mrf.mxu0  ;;  %v3967_v39 = vmax.f32 %v11746_v11, %v3617_v3  ;;  %5189 = vmatpush.bf16.msrb.mxu0 %v6704_v8  ;;  %6770 = vmatpush.bf16.msrb.mxu2 %v6704_v8 }
 0x3e6   : > { %v2998_v20 = vadd.f32 %v9933_v22, %v2749_v29  ;;  %v2253_v13 = vadd.f32 %v2252_v9, %v7996_v41  ;;  %v4050_v9 = vpack.c.bf16 %v3968_v55, %v3966_v21  ;;  %6771 = vmatpush.bf16.msra.mxu3 %v6704_v8  ;;  %v6909_v21 = vunpack.i.l.bf16 %v9458_v36 }
 0x3e7   : > { %v4049_v3 = vpack.c.bf16 %v3967_v39, %v3965_v43  ;;  %v6910_v39 = vunpack.i.h.bf16 %v9458_v36  ;;  %v3190_v55 = vmax.f32 %v2990_v53, 0.0 }
 0x3e8   : > { %v3196_v19 = vmax.f32 %v2998_v20, 0.0  ;;  %v2502_v22 = vadd.f32 %v9939_v25, %v2253_v13  ;;  %v10102_v18 = vpop.f32.mrf.mxu3 }
 0x3e9   : > { %11747 = vst [vmem:[#allocation53_spill] sm:$0xff] %v10102_v18  ;;  %v10128_v38 = vpop.permute.xlu1 %6932 }
 0x3ea   : > { %v10105_v51 = vmax.f32 %v3188_v1, %v3196_v19  ;;  %v3197_v6 = vmax.f32 %v2502_v22, 0.0  ;;  %v10107_v29 = vpop.f32.mrf.mxu1  ;;  %v6905_v1 = vunpack.i.h.bf16 %v10024_v60  ;;  %v3191_v19 = vmax.f32 %v10035_v63, 0.0 }
 0x3eb   : > { %v2750_v5 = vpop.f32.mrf.mxu2 }
 0x3ec   : > { %v10113_v20 = vmax.f32 %v3189_v58, %v3197_v6  ;;  %v2751_v25 = vadd.f32 %v2750_v5, %v8011_v62  ;;  %v3908_v6 = vsel %vm3892_vm6, %v6910_v39, %v6905_v1 }
 0x3ed   : > { %v2255_v7 = vpop.f32.mrf.mxu0  ;;  %4268 = vmatmul.bf16.gmra.mxu1 %v4049_v3  ;;  %6403 = vmatmul.msk.bf16.gmra.mxu3 %vm4157_vm8, %v4050_v9  ;;  %v3619_v3 = vsel %vm3603_vm7, %v6915_v50, %v6910_v39 }
 0x3ee   : > { %11748 = vst [vmem:[#allocation16_spill] sm:$0xff] %v10113_v20  ;;  %v3000_v13 = vadd.f32 %v9964_v52, %v2751_v25  ;;  %v2256_v32 = vadd.f32 %v2255_v7, %v7996_v41  ;;  %v6904_v52 = vunpack.i.l.bf16 %v10024_v60  ;;  %v3618_v60 = vsel %vm3603_vm7, %v6914_v26, %v6909_v21  ;;  %v11750_v25 = vld [vmem:[#allocation44_spill] sm:$0xff] }
 0x3f0   : > { %v3198_v0 = vmax.f32 %v3000_v13, 0.0  ;;  %v2505_v43 = vadd.f32 %v9972_v37, %v2256_v32  ;;  %v10124_v11 = vpop.f32.mrf.mxu3  ;;  %v3907_v35 = vsel %vm3892_vm6, %v6909_v21, %v6904_v52  ;;  %v11751_v13 = vld [vmem:[#allocation72_spill] sm:$0xff]  ;;  %v3192_v52 = vmax.f32 %v10051_v42, 0.0 }
 0x3f1   : > { %11749 = vst [vmem:[#allocation59_spill] sm:$0xff] %v10124_v11  ;;  %v3970_v7 = vmax.f32 %v11750_v25, %v3907_v35  ;;  %v3972_v32 = vmax.f32 %v11751_v13, %v3908_v6  ;;  %v2746_v21 = vadd.f32 %v10065_v54, %v8011_v62  ;;  %v6943_v6 = vpop.permute.xlu1 %6942  ;;  %v6920_v13 = vunpack.i.h.bf16 %v10067_v30 }
 0x3f2   : > { %v10131_v22 = vmax.f32 %v3190_v55, %v3198_v0  ;;  %v3199_v36 = vmax.f32 %v2505_v43, 0.0  ;;  %v10133_v58 = vpop.f32.mrf.mxu1  ;;  %v11752_v55 = vld [vmem:[#allocation70_spill] sm:$0xff]  ;;  %v11753_v43 = vld [vmem:[#allocation71_spill] sm:$0xff] }
 0x3f3   : > { %v2753_v37 = vpop.f32.mrf.mxu2  ;;  %v3969_v0 = vmax.f32 %v11752_v55, %v3618_v60  ;;  %v3971_v1 = vmax.f32 %v11753_v43, %v3619_v3  ;;  %v4052_v60 = vpack.c.bf16 %v3972_v32, %v3970_v7  ;;  %v2995_v42 = vadd.f32 %v9905_v61, %v2746_v21 }
 0x3f4   : > { %v10137_v8 = vmax.f32 %v3191_v19, %v3199_v36  ;;  %v2754_v5 = vadd.f32 %v2753_v37, %v8011_v62  ;;  %v6919_v32 = vunpack.i.l.bf16 %v10067_v30  ;;  %v11758_v30 = vld [vmem:[#allocation13_spill] sm:$0xff] }
 0x3f5   : > { %v2257_v9 = vpop.f32.mrf.mxu0  ;;  %v3194_v25 = vmax.f32 %v2995_v42, 0.0 }
 0x3f6   : > { %v3003_v63 = vadd.f32 %v9990_v47, %v2754_v5  ;;  %v2258_v53 = vadd.f32 %v2257_v9, %v7996_v41  ;;  %v3193_v47 = vmax.f32 %v10059_v10, 0.0  ;;  %v4051_v5 = vpack.c.bf16 %v3971_v1, %v3969_v0 }
 0x3f7   : > { %v6925_v10 = vunpack.i.h.bf16 %v9498_v24  ;;  %v6924_v9 = vunpack.i.l.bf16 %v9498_v24 }
 0x3f8   : > { %v3200_v26 = vmax.f32 %v3003_v63, 0.0  ;;  %v2507_v39 = vadd.f32 %v9997_v27, %v2258_v53  ;;  %v10152_v50 = vpop.f32.mrf.mxu3  ;;  %v6930_v63 = vunpack.i.h.bf16 %v10094_v31  ;;  %v6929_v53 = vunpack.i.l.bf16 %v10094_v31 }
 0x3f9   : > { %v3909_v43 = vsel %vm3892_vm6, %v6924_v9, %v6919_v32  ;;  %v3910_v24 = vsel %vm3892_vm6, %v6925_v10, %v6920_v13  ;;  %v6935_v13 = vunpack.i.h.bf16 %v10128_v38  ;;  %v6934_v32 = vunpack.i.l.bf16 %v10128_v38 }
 0x3fa   : > { %v10155_v19 = vmax.f32 %v3192_v52, %v3200_v26  ;;  %v3201_v36 = vmax.f32 %v2507_v39, 0.0  ;;  %v10157_v35 = vpop.f32.mrf.mxu1  ;;  %v3621_v1 = vsel %vm3603_vm7, %v6930_v63, %v6925_v10  ;;  %v3620_v31 = vsel %vm3603_vm7, %v6929_v53, %v6924_v9  ;;  %v11755_v52 = vld [vmem:[#allocation20_spill] sm:$0xff] }
 0x3fb   : > { %v2755_v37 = vpop.f32.mrf.mxu2  ;;  %v3974_v21 = vmax.f32 %v11755_v52, %v3909_v43  ;;  %v11756_v26 = vld [vmem:[#allocation40_spill] sm:$0xff]  ;;  %v6940_v10 = vunpack.i.h.bf16 %v9560_v12  ;;  %v6939_v9 = vunpack.i.l.bf16 %v9560_v12  ;;  %v6945_v63 = vunpack.i.h.bf16 %v6943_v6 }
 0x3fc   : > { %v10160_v3 = vmax.f32 %v3193_v47, %v3201_v36  ;;  %v2756_v54 = vadd.f32 %v2755_v37, %v8011_v62  ;;  %v3976_v39 = vmax.f32 %v11756_v26, %v3910_v24  ;;  %v11757_v47 = vld [vmem:[#allocation56_spill] sm:$0xff]  ;;  %v3975_v37 = vmax.f32 %v11758_v30, %v3621_v1  ;;  %v11763_v30 = vld [vmem:[#allocation74_spill] sm:$0xff] }
 0x3fd   : > { %4273 = vmatmul.bf16.gmra.mxu1 %v4051_v5  ;;  %6404 = vmatmul.msk.bf16.gmra.mxu3 %vm4157_vm8, %v4052_v60  ;;  %v3973_v36 = vmax.f32 %v11757_v47, %v3620_v31  ;;  %v6944_v53 = vunpack.i.l.bf16 %v6943_v6  ;;  %v3911_v24 = vsel %vm3892_vm6, %v6939_v9, %v6934_v32  ;;  %v3912_v1 = vsel %vm3892_vm6, %v6940_v10, %v6935_v13  ;;  %v11761_v12 = vld [vmem:[#allocation76_spill] sm:$0xff]  ;;  %v11762_v47 = vld [vmem:[#allocation73_spill] sm:$0xff] }
 0x3fe   : > { %v3005_v27 = vadd.f32 %v10020_v4, %v2756_v54  ;;  %v6948_v4 = vpop.permute.xlu1 %6947  ;;  %v4054_v54 = vpack.c.bf16 %v3976_v39, %v3974_v21  ;;  %v3623_v31 = vsel %vm3603_vm7, %v6945_v63, %v6940_v10  ;;  %v11760_v21 = vld [vmem:[#allocation75_spill] sm:$0xff]  ;;  %v3980_v39 = vmax.f32 %v11761_v12, %v3912_v1 }
 0x3ff   : > { %v4053_v42 = vpack.c.bf16 %v3975_v37, %v3973_v36  ;;  %v3622_v52 = vsel %vm3603_vm7, %v6944_v53, %v6939_v9  ;;  %v3978_v26 = vmax.f32 %v11760_v21, %v3911_v24  ;;  %v3979_v37 = vmax.f32 %v11763_v30, %v3623_v31  ;;  %v11764_v30 = vld [vmem:[#allocation4_spill] sm:$0xff] }
 0x400   : > { %v3202_v7 = vmax.f32 %v3005_v27, 0.0  ;;  %v10169_v61 = vpop.f32.mrf.mxu3  ;;  %v3977_v36 = vmax.f32 %v11762_v47, %v3622_v52  ;;  %v6955_v63 = vunpack.i.h.bf16 %v9620_v40  ;;  %v6954_v53 = vunpack.i.l.bf16 %v9620_v40 }
 0x401   : > { %11754 = vst [vmem:[#allocation22_spill] sm:$0xff] %v10169_v61  ;;  %v4056_v13 = vpack.c.bf16 %v3980_v39, %v3978_v26  ;;  %v6950_v52 = vunpack.i.h.bf16 %v6948_v4  ;;  %v6949_v21 = vunpack.i.l.bf16 %v6948_v4 }
 0x402   : > { %v10173_v55 = vmax.f32 %v3194_v25, %v3202_v7  ;;  %v10175_v0 = vpop.f32.mrf.mxu1  ;;  %v4055_v32 = vpack.c.bf16 %v3979_v37, %v3977_v36 }
 0x403   : > { %v3913_v12 = vsel %vm3892_vm6, %v6954_v53, %v6949_v21  ;;  %v3914_v39 = vsel %vm3892_vm6, %v6955_v63, %v6950_v52 }
 0x404   : > { %v3982_v37 = vmax.f32 %v11764_v30, %v3913_v12 }
 0x406   : > { %v6958_v27 = vpop.permute.xlu1 %6957 }
 0x408   : > { %v10185_v5 = vpop.f32.mrf.mxu3 }
 0x409   : > { %11759 = vst [vmem:[#allocation2_spill] sm:$0xff] %v10185_v5 }
 0x40a   : > { %v4239_v60 = vpop.f32.mrf.mxu1 }
 0x40d   : > { %4278 = vmatmul.bf16.gmra.mxu1 %v4053_v42  ;;  %6405 = vmatmul.msk.bf16.gmra.mxu3 %vm4157_vm8, %v4054_v54 }
 0x40e   : > { %v6963_v6 = vpop.permute.xlu1 %6962 }
 0x410   : > { %v4368_v25 = vpop.f32.mrf.mxu3 }
 0x411   : > { %v4369_v7 = vadd.f32 %v4368_v25, %v4239_v60 }
 0x412   : > { %v4241_v43 = vpop.f32.mrf.mxu1 }
 0x413   : > { %v4488_v38 = vpack.c.bf16 %v4369_v7, %v4369_v7  ;;  %v6960_v7 = vunpack.i.h.bf16 %v6958_v27 }
 0x415   : > { %v10200_v61 = vunpack.c.l.b16 %v4488_v38  ;;  %v3625_v47 = vsel %vm3603_vm7, %v6960_v7, %v6955_v63  ;;  %v11766_v38 = vld [vmem:[#allocation64_spill] sm:$0xff]  ;;  %v6970_v7 = vunpack.i.h.bf16 %v9678_v57 }
 0x416   : > { %v6973_v1 = vpop.permute.xlu1 %6972 }
 0x418   : > { %v4370_v60 = vpop.f32.mrf.mxu3 }
 0x419   : > { %v4371_v42 = vadd.f32 %v4370_v60, %v4241_v43  ;;  %v6959_v43 = vunpack.i.l.bf16 %v6958_v27  ;;  %v11765_v60 = vld [vmem:[#allocation41_spill] sm:$0xff] }
 0x41a   : > { %v4244_v54 = vpop.f32.mrf.mxu1  ;;  %v3984_v40 = vmax.f32 %v11765_v60, %v3914_v39  ;;  %v6965_v39 = vunpack.i.h.bf16 %v6963_v6 }
 0x41b   : > { %v4489_v25 = vpack.c.bf16 %v4371_v42, %v4371_v42  ;;  %v3624_v36 = vsel %vm3603_vm7, %v6959_v43, %v6954_v53  ;;  %v11767_v42 = vld [vmem:[#allocation54_spill] sm:$0xff]  ;;  %v6969_v43 = vunpack.i.l.bf16 %v9678_v57 }
 0x41c   : > { %v3981_v27 = vmax.f32 %v11766_v38, %v3624_v36  ;;  %v4058_v52 = vpack.c.bf16 %v3984_v40, %v3982_v37 }
 0x41d   : > { %v10202_v10 = vunpack.c.l.b16 %v4489_v25  ;;  %4283 = vmatmul.bf16.gmra.mxu1 %v4055_v32  ;;  %6406 = vmatmul.msk.bf16.gmra.mxu3 %vm4157_vm8, %v4056_v13  ;;  %v3983_v25 = vmax.f32 %v11767_v42, %v3625_v47  ;;  %v6964_v47 = vunpack.i.l.bf16 %v6963_v6 }
 0x41e   : > { %v6978_v32 = vpop.permute.xlu1 %6977 }
 0x41f   : > { %v4057_v9 = vpack.c.bf16 %v3983_v25, %v3981_v27  ;;  %v3915_v37 = vsel %vm3892_vm6, %v6969_v43, %v6964_v47  ;;  %v11768_v27 = vld [vmem:[#allocation42_spill] sm:$0xff]  ;;  %v11769_v25 = vld [vmem:[#allocation80_spill] sm:$0xff] }
 0x420   : > { %v4373_v24 = vpop.f32.mrf.mxu3  ;;  %v3986_v42 = vmax.f32 %v11768_v27, %v3915_v37 }
 0x421   : > { %v4374_v31 = vadd.f32 %v4373_v24, %v4244_v54 }
 0x422   : > { %v4246_v26 = vpop.f32.mrf.mxu1 }
 0x423   : > { %v4490_v4 = vpack.c.bf16 %v4374_v31, %v4374_v31  ;;  %v6975_v31 = vunpack.i.h.bf16 %v6973_v1 }
 0x425   : > { %v10217_v18 = vunpack.c.l.b16 %v4490_v4  ;;  %v3627_v60 = vsel %vm3603_vm7, %v6975_v31, %v6970_v7  ;;  %v11771_v4 = vld [vmem:[#allocation79_spill] sm:$0xff] }
 0x426   : > { %v6988_v30 = vpop.permute.xlu1 %6987 }
 0x427   : > { %v6989_v37 = vunpack.i.l.bf16 %v6988_v30 }
 0x428   : > { %v4375_v54 = vpop.f32.mrf.mxu3 }
 0x429   : > { %v4376_v13 = vadd.f32 %v4375_v54, %v4246_v26  ;;  %v6974_v26 = vunpack.i.l.bf16 %v6973_v1  ;;  %v11770_v54 = vld [vmem:[#allocation17_spill] sm:$0xff] }
 0x42a   : > { %v4249_v24 = vpop.f32.mrf.mxu1 }
 0x42b   : > { %v4491_v21 = vpack.c.bf16 %v4376_v13, %v4376_v13  ;;  %v3626_v40 = vsel %vm3603_vm7, %v6974_v26, %v6969_v43  ;;  %v3987_v13 = vmax.f32 %v11771_v4, %v3627_v60  ;;  %v6985_v26 = vunpack.i.h.bf16 %v9720_v56 }
 0x42c   : > { %v3985_v1 = vmax.f32 %v11770_v54, %v3626_v40  ;;  %v6980_v60 = vunpack.i.h.bf16 %v6978_v32  ;;  %v11773_v54 = vld [vmem:[#allocation65_spill] sm:$0xff] }
 0x42d   : > { %v10219_v63 = vunpack.c.l.b16 %v4491_v21  ;;  %4288 = vmatmul.bf16.gmra.mxu1 %v4057_v9  ;;  %6407 = vmatmul.msk.bf16.gmra.mxu3 %vm4157_vm8, %v4058_v52  ;;  %v3916_v9 = vsel %vm3892_vm6, %v6970_v7, %v6965_v39 }
 0x42e   : > { %v3988_v57 = vmax.f32 %v11769_v25, %v3916_v9  ;;  %v4059_v5 = vpack.c.bf16 %v3987_v13, %v3985_v1  ;;  %v6993_v11 = vpop.permute.xlu1 %6992 }
 0x430   : > { %v4378_v12 = vpop.f32.mrf.mxu3  ;;  %v4060_v39 = vpack.c.bf16 %v3988_v57, %v3986_v42 }
 0x431   : > { %v4379_v38 = vadd.f32 %v4378_v12, %v4249_v24  ;;  %v6984_v24 = vunpack.i.l.bf16 %v9720_v56  ;;  %v6990_v12 = vunpack.i.h.bf16 %v6988_v30  ;;  %v6703_v56 = vld [vmem:[%s11302_s4 + $0x8] sm:$0xff] }
 0x432   : > { %v4251_v36 = vpop.f32.mrf.mxu1  ;;  %v11772_v30 = vld [vmem:[#allocation19_spill] sm:$0xff]  ;;  %5190 = vmatpush.bf16.msrb.mxu0 %v6703_v56  ;;  %6772 = vmatpush.bf16.msrb.mxu2 %v6703_v56 }
 0x433   : > { %v4492_v21 = vpack.c.bf16 %v4379_v38, %v4379_v38  ;;  %v3918_v38 = vsel %vm3892_vm6, %v6985_v26, %v6980_v60  ;;  %v3629_v27 = vsel %vm3603_vm7, %v6990_v12, %v6985_v26  ;;  %v3628_v42 = vsel %vm3603_vm7, %v6989_v37, %v6984_v24  ;;  %6773 = vmatpush.bf16.msra.mxu3 %v6703_v56 }
 0x434   : > { %v3992_v1 = vmax.f32 %v11773_v54, %v3918_v38 }
 0x435   : > { %v4572_v7 = vunpack.c.l.b16 %v4492_v21 }
 0x436   : > { %v7003_v4 = vpop.permute.xlu1 %7002 }
 0x437   : > { %v7005_v38 = vunpack.i.h.bf16 %v7003_v4 }
 0x438   : > { %v4380_v6 = vpop.f32.mrf.mxu3 }
 0x439   : > { %v4381_v52 = vadd.f32 %v4380_v6, %v4251_v36  ;;  %v6979_v36 = vunpack.i.l.bf16 %v6978_v32  ;;  %v11774_v32 = vld [vmem:[#allocation6_spill] sm:$0xff]  ;;  %v11775_v6 = vld [vmem:[#allocation57_spill] sm:$0xff] }
 0x43a   : > { %v4254_v53 = vpop.f32.mrf.mxu1  ;;  %v3989_v13 = vmax.f32 %v11774_v32, %v3628_v42  ;;  %v3991_v21 = vmax.f32 %v11775_v6, %v3629_v27  ;;  %v7004_v27 = vunpack.i.l.bf16 %v7003_v4 }
 0x43b   : > { %v4493_v47 = vpack.c.bf16 %v4381_v52, %v4381_v52 }
 0x43d   : > { %v4573_v31 = vunpack.c.l.b16 %v4493_v47  ;;  %4293 = vmatmul.bf16.gmra.mxu1 %v4059_v5  ;;  %6408 = vmatmul.msk.bf16.gmra.mxu3 %vm4157_vm8, %v4060_v39  ;;  %v3917_v5 = vsel %vm3892_vm6, %v6984_v24, %v6979_v36  ;;  %v11776_v36 = vld [vmem:[#allocation81_spill] sm:$0xff] }
 0x43e   : > { %v3990_v57 = vmax.f32 %v11772_v30, %v3917_v5  ;;  %v7008_v37 = vpop.permute.xlu1 %7007  ;;  %v7000_v60 = vunpack.i.h.bf16 %v11776_v36  ;;  %v6999_v5 = vunpack.i.l.bf16 %v11776_v36 }
 0x43f   : > { %v10236_v43 = vpack.c.b16 %v4573_v31, %v4572_v7  ;;  %v4061_v31 = vpack.c.bf16 %v3991_v21, %v3989_v13  ;;  %v11777_v13 = vld [vmem:[#allocation69_spill] sm:$0xff]  ;;  %v11778_v21 = vld [vmem:[#allocation50_spill] sm:$0xff] }
 0x440   : > { %v4383_v9 = vpop.f32.mrf.mxu3  ;;  %v4062_v24 = vpack.c.bf16 %v3992_v1, %v3990_v57  ;;  %v3631_v54 = vsel %vm3603_vm7, %v7005_v38, %v7000_v60  ;;  %v3630_v1 = vsel %vm3603_vm7, %v7004_v27, %v6999_v5  ;;  %v7014_v27 = vunpack.i.l.bf16 %v9909_v14 }
 0x441   : > { %4626 = vrot.lane.b32.xlu0 %v10236_v43, %s7214_s20  ;;  %v4384_v25 = vadd.f32 %v4383_v9, %v4254_v53 }
 0x442   : > { %v4256_v40 = vpop.f32.mrf.mxu1 }
 0x443   : > { %v4494_v47 = vpack.c.bf16 %v4384_v25, %v4384_v25  ;;  %v6994_v25 = vunpack.i.l.bf16 %v6993_v11 }
 0x445   : > { %v4574_v26 = vunpack.c.l.b16 %v4494_v47  ;;  %v3919_v30 = vsel %vm3892_vm6, %v6999_v5, %v6994_v25  ;;  %v7015_v5 = vunpack.i.h.bf16 %v9909_v14  ;;  %v11781_v14 = vld [vmem:[#allocation5_spill] sm:$0xff] }
 0x446   : > { %v3994_v6 = vmax.f32 %v11777_v13, %v3919_v30 }
 0x448   : > { %v4385_v52 = vpop.f32.mrf.mxu3 }
 0x449   : > { %v4386_v39 = vadd.f32 %v4385_v52, %v4256_v40  ;;  %v6995_v40 = vunpack.i.h.bf16 %v6993_v11  ;;  %v11779_v52 = vld [vmem:[#allocation47_spill] sm:$0xff]  ;;  %v7018_v11 = vpop.permute.xlu1 %7017 }
 0x44a   : > { %v4259_v53 = vpop.f32.mrf.mxu1  ;;  %v3993_v47 = vmax.f32 %v11779_v52, %v3630_v1  ;;  %v7019_v30 = vunpack.i.l.bf16 %v7018_v11 }
 0x44b   : > { %v4495_v7 = vpack.c.bf16 %v4386_v39, %v4386_v39  ;;  %v3920_v57 = vsel %vm3892_vm6, %v7000_v60, %v6995_v40  ;;  %v11780_v39 = vld [vmem:[#allocation21_spill] sm:$0xff] }
 0x44c   : > { %v3996_v4 = vmax.f32 %v11778_v21, %v3920_v57 }
 0x44d   : > { %v4575_v12 = vunpack.c.l.b16 %v4495_v7  ;;  %4298 = vmatmul.bf16.gmra.mxu1 %v4061_v31  ;;  %6409 = vmatmul.msk.bf16.gmra.mxu3 %vm4157_vm8, %v4062_v24  ;;  %v3995_v7 = vmax.f32 %v11780_v39, %v3631_v54  ;;  %v7009_v54 = vunpack.i.l.bf16 %v7008_v37  ;;  %v11782_v39 = vld [vmem:[#allocation25_spill] sm:$0xff] }
 0x44e   : > { %v4064_v25 = vpack.c.bf16 %v3996_v4, %v3994_v6  ;;  %v3632_v4 = vsel %vm3603_vm7, %v7019_v30, %v7014_v27  ;;  %v7029_v30 = vunpack.i.l.bf16 %v9968_v23 }
 0x44f   : > { %v10253_v9 = vpack.c.b16 %v4575_v12, %v4574_v26  ;;  %v4063_v40 = vpack.c.bf16 %v3995_v7, %v3993_v47  ;;  %v3921_v13 = vsel %vm3892_vm6, %v7014_v27, %v7009_v54  ;;  %v7030_v27 = vunpack.i.h.bf16 %v9968_v23 }
 0x450   : > { %v4388_v42 = vpop.f32.mrf.mxu3  ;;  %v3998_v47 = vmax.f32 %v11781_v14, %v3921_v13 }
 0x451   : > { %4628 = vrot.lane.b32.xlu1 %v10253_v9, %s7214_s20  ;;  %v4389_v32 = vadd.f32 %v4388_v42, %v4259_v53  ;;  %v7020_v42 = vunpack.i.h.bf16 %v7018_v11 }
 0x452   : > { %v4261_v56 = vpop.f32.mrf.mxu1 }
 0x453   : > { %v4496_v24 = vpack.c.bf16 %v4389_v32, %v4389_v32  ;;  %v7023_v32 = vpop.permute.xlu1 %7022  ;;  %v3633_v21 = vsel %vm3603_vm7, %v7020_v42, %v7015_v5 }
 0x455   : > { %v4576_v60 = vunpack.c.l.b16 %v4496_v24  ;;  %v11784_v24 = vld [vmem:[#allocation24_spill] sm:$0xff] }
 0x458   : > { %v4390_v31 = vpop.f32.mrf.mxu3 }
 0x459   : > { %v4391_v26 = vadd.f32 %v4390_v31, %v4261_v56  ;;  %v7010_v56 = vunpack.i.h.bf16 %v7008_v37  ;;  %v11783_v31 = vld [vmem:[#allocation23_spill] sm:$0xff] }
 0x45a   : > { %v4264_v12 = vpop.f32.mrf.mxu1  ;;  %v3997_v11 = vmax.f32 %v11783_v31, %v3632_v4  ;;  %v11785_v31 = vld [vmem:[#allocation51_spill] sm:$0xff] }
 0x45b   : > { %v4497_v36 = vpack.c.bf16 %v4391_v26, %v4391_v26  ;;  %v3922_v6 = vsel %vm3892_vm6, %v7015_v5, %v7010_v56  ;;  %v3999_v26 = vmax.f32 %v11784_v24, %v3633_v21  ;;  %v7033_v54 = vpop.permute.xlu1 %7032  ;;  %v7024_v21 = vunpack.i.l.bf16 %v7023_v32 }
 0x45c   : > { %v4000_v7 = vmax.f32 %v11782_v39, %v3922_v6  ;;  %v7034_v13 = vunpack.i.l.bf16 %v7033_v54 }
 0x45d   : > { %v4577_v38 = vunpack.c.l.b16 %v4497_v36  ;;  %4303 = vmatmul.bf16.gmra.mxu1 %v4063_v40  ;;  %6410 = vmatmul.msk.bf16.gmra.mxu3 %vm4157_vm8, %v4064_v25 }
 0x45e   : > { %v4066_v56 = vpack.c.bf16 %v4000_v7, %v3998_v47  ;;  %v3634_v39 = vsel %vm3603_vm7, %v7034_v13, %v7029_v30 }
 0x45f   : > { %v10268_v53 = vpack.c.b16 %v4577_v38, %v4576_v60  ;;  %v4065_v38 = vpack.c.bf16 %v3999_v26, %v3997_v11  ;;  %v11786_v11 = vld [vmem:[#allocation27_spill] sm:$0xff]  ;;  %v11787_v26 = vld [vmem:[#allocation37_spill] sm:$0xff] }
 0x460   : > { %v4393_v57 = vpop.f32.mrf.mxu3 }
 0x461   : > { %4630 = vrot.lane.b32.xlu2 %v10268_v53, %s7214_s20  ;;  %v4394_v52 = vadd.f32 %v4393_v57, %v4264_v12  ;;  %v7035_v57 = vunpack.i.h.bf16 %v7033_v54 }
 0x462   : > { %v4266_v1 = vpop.f32.mrf.mxu1 }
 0x463   : > { %v4498_v36 = vpack.c.bf16 %v4394_v52, %v4394_v52  ;;  %v3923_v52 = vsel %vm3892_vm6, %v7029_v30, %v7024_v21  ;;  %v3635_v47 = vsel %vm3603_vm7, %v7035_v57, %v7030_v27 }
 0x464   : > { %v4002_v23 = vmax.f32 %v11785_v31, %v3923_v52 }
 0x465   : > { %v4578_v5 = vunpack.c.l.b16 %v4498_v36  ;;  %v11788_v36 = vld [vmem:[#allocation26_spill] sm:$0xff] }
 0x468   : > { %v4395_v37 = vpop.f32.mrf.mxu3 }
 0x469   : > { %v4396_v40 = vadd.f32 %v4395_v37, %v4266_v1  ;;  %v7025_v1 = vunpack.i.h.bf16 %v7023_v32  ;;  %v4001_v37 = vmax.f32 %v11787_v26, %v3634_v39  ;;  %v11789_v26 = vld [vmem:[#allocation11_spill] sm:$0xff] }
 0x46a   : > { %v4269_v25 = vpop.f32.mrf.mxu1 }
 0x46b   : > { %v4499_v60 = vpack.c.bf16 %v4396_v40, %v4396_v40  ;;  %v3924_v14 = vsel %vm3892_vm6, %v7030_v27, %v7025_v1  ;;  %v4003_v40 = vmax.f32 %v11788_v36, %v3635_v47 }
 0x46c   : > { %v4004_v24 = vmax.f32 %v11786_v11, %v3924_v14  ;;  %v6702_v11 = vld [vmem:[%s11302_s4] sm:$0xff] }
 0x46d   : > { %v4579_v42 = vunpack.c.l.b16 %v4499_v60  ;;  %4308 = vmatmul.bf16.gmra.mxu1 %v4065_v38  ;;  %6411 = vmatmul.msk.bf16.gmra.mxu3 %vm4157_vm8, %v4066_v56 }
 0x46e   : > { %5191 = vmatpush.bf16.msrb.mxu0 %v6702_v11  ;;  %6774 = vmatpush.bf16.msrb.mxu2 %v6702_v11 }
 0x46f   : > { %v10283_v12 = vpack.c.b16 %v4579_v42, %v4578_v5  ;;  %v4067_v5 = vpack.c.bf16 %v4003_v40, %v4001_v37  ;;  %v4068_v42 = vpack.c.bf16 %v4004_v24, %v4002_v23  ;;  %6775 = vmatpush.bf16.msra.mxu3 %v6702_v11  ;;  %v11790_v37 = vld [vmem:[#allocation15_spill] sm:$0xff]  ;;  %v11794_v11 = vld [vmem:[#allocation12_spill] sm:$0xff] }
 0x470   : > { %v4398_v6 = vpop.f32.mrf.mxu3  ;;  %v7036_v36 = vpack.i.bf16 %v11790_v37, %v11789_v26 }
 0x471   : > { %4632 = vrot.lane.b32.xlu0 %v10283_v12, %s7214_s20  ;;  %v4399_v7 = vadd.f32 %v4398_v6, %v4269_v25 }
 0x472   : > { %v4271_v4 = vpop.f32.mrf.mxu1 }
 0x473   : > { %v4500_v32 = vpack.c.bf16 %v4399_v7, %v4399_v7 }
 0x475   : > { %v4580_v1 = vunpack.c.l.b16 %v4500_v32 }
 0x478   : > { %v4400_v60 = vpop.f32.mrf.mxu3 }
 0x479   : > { %v4401_v38 = vadd.f32 %v4400_v60, %v4271_v4 }
 0x47a   : > { %v4274_v56 = vpop.f32.mrf.mxu1 }
 0x47b   : > { %v4501_v54 = vpack.c.bf16 %v4401_v38, %v4401_v38 }
 0x47d   : > { %v4581_v27 = vunpack.c.l.b16 %v4501_v54  ;;  %4313 = vmatmul.bf16.gmra.mxu1 %v4067_v5  ;;  %6412 = vmatmul.msk.bf16.gmra.mxu3 %vm4157_vm8, %v4068_v42 }
 0x47f   : > { %v10298_v25 = vpack.c.b16 %v4581_v27, %v4580_v1  ;;  %v11791_v1 = vld [vmem:[#allocation10_spill] sm:$0xff] }
 0x480   : > { %v4403_v30 = vpop.f32.mrf.mxu3  ;;  %v11792_v27 = vld [vmem:[#allocation34_spill] sm:$0xff] }
 0x481   : > { %4634 = vrot.lane.b32.xlu1 %v10298_v25, %s7214_s20  ;;  %v4404_v13 = vadd.f32 %v4403_v30, %v4274_v56  ;;  %v7046_v30 = vpack.i.bf16 %v11792_v27, %v11791_v1 }
 0x482   : > { %v4276_v57 = vpop.f32.mrf.mxu1 }
 0x483   : > { %v4502_v21 = vpack.c.bf16 %v4404_v13, %v4404_v13 }
 0x485   : > { %v4582_v47 = vunpack.c.l.b16 %v4502_v21 }
 0x488   : > { %v4405_v6 = vpop.f32.mrf.mxu3 }
 0x489   : > { %v4406_v4 = vadd.f32 %v4405_v6, %v4276_v57 }
 0x48a   : > { %v4279_v52 = vpop.f32.mrf.mxu1 }
 0x48b   : > { %v4503_v14 = vpack.c.bf16 %v4406_v4, %v4406_v4 }
 0x48d   : > { %v4583_v39 = vunpack.c.l.b16 %v4503_v14 }
 0x48f   : > { %v10302_v7 = vpack.c.b16 %v4583_v39, %v4582_v47 }
 0x490   : > { %v4408_v31 = vpop.f32.mrf.mxu3 }
 0x491   : > { %4636 = vrot.lane.b32.xlu2 %v10302_v7, %s7214_s20  ;;  %v4409_v24 = vadd.f32 %v4408_v31, %v4279_v52 }
 0x492   : > { %v4281_v23 = vpop.f32.mrf.mxu1 }
 0x493   : > { %v4504_v60 = vpack.c.bf16 %v4409_v24, %v4409_v24  ;;  %v11795_v24 = vld [vmem:[#allocation14_spill] sm:$0xff] }
 0x495   : > { %v4584_v54 = vunpack.c.l.b16 %v4504_v60 }
 0x498   : > { %v4410_v40 = vpop.f32.mrf.mxu3 }
 0x499   : > { %v4411_v32 = vadd.f32 %v4410_v40, %v4281_v23  ;;  %7037 = vrot.lane.b32.xlu2 %v7036_v36, %s7213_s22  ;;  %v7051_v36 = vpack.i.bf16 %v11795_v24, %v11794_v11 }
 0x49a   : > { %v4284_v38 = vpop.f32.mrf.mxu1 }
 0x49b   : > { %v4505_v56 = vpack.c.bf16 %v4411_v32, %v4411_v32 }
 0x49d   : > { %v4585_v5 = vunpack.c.l.b16 %v4505_v56 }
 0x49f   : > { %v10312_v42 = vpack.c.b16 %v4585_v5, %v4584_v54  ;;  %v11798_v5 = vld [vmem:[#allocation31_spill] sm:$0xff] }
 0x4a0   : > { %v4413_v57 = vpop.f32.mrf.mxu3 }
 0x4a1   : > { %7047 = vrot.lane.b32.xlu2 %v7046_v30, %s7213_s22  ;;  %4638 = vrot.lane.b32.xlu0 %v10312_v42, %s7214_s20  ;;  %v4414_v6 = vadd.f32 %v4413_v57, %v4284_v38  ;;  %v11797_v38 = vpack.c.b16 %v10202_v10, %v10200_v61 }
 0x4a2   : > { %v4286_v13 = vpop.f32.mrf.mxu1 }
 0x4a3   : > { %v4506_v4 = vpack.c.bf16 %v4414_v6, %v4414_v6 }
 0x4a5   : > { %v4586_v39 = vunpack.c.l.b16 %v4506_v4 }
 0x4a8   : > { %v4415_v21 = vpop.f32.mrf.mxu3 }
 0x4a9   : > { %v4416_v52 = vadd.f32 %v4415_v21, %v4286_v13  ;;  %7042 = vrot.lane.b32.xlu0 %v7046_v30, %s7212_s21  ;;  %v11799_v30 = vld [vmem:[#allocation33_spill] sm:$0xff] }
 0x4aa   : > { %v4289_v14 = vpop.f32.mrf.mxu1  ;;  %v7061_v57 = vpack.i.bf16 %v11799_v30, %v11798_v5 }
 0x4ab   : > { %v4507_v47 = vpack.c.bf16 %v4416_v52, %v4416_v52 }
 0x4ad   : > { %v4587_v31 = vunpack.c.l.b16 %v4507_v47 }
 0x4af   : > { %v10320_v23 = vpack.c.b16 %v4587_v31, %v4586_v39 }
 0x4b0   : > { %v4418_v40 = vpop.f32.mrf.mxu3 }
 0x4b1   : > { %11793 = vst [vmem:[#allocation58_spill] sm:$0xff] %v10320_v23  ;;  %4640 = vrot.lane.b32.xlu1 %v10320_v23, %s7214_s20  ;;  %7052 = vrot.lane.b32.xlu0 %v7051_v36, %s7213_s22  ;;  %v4419_v54 = vadd.f32 %v4418_v40, %v4289_v14  ;;  %v11801_v36 = vld [vmem:[#allocation77_spill] sm:$0xff] }
 0x4b2   : > { %v4291_v60 = vpop.f32.mrf.mxu1  ;;  %v7071_v61 = vpack.i.bf16 %v9915_v16, %v11801_v36 }
 0x4b3   : > { %v10327_v32 = vpop.permute.xlu0 %4626  ;;  %v4508_v6 = vpack.c.bf16 %v4419_v54, %v4419_v54 }
 0x4b4   : > { %11796 = vst [vmem:[#allocation28_spill] sm:$0xff] %v10327_v32  ;;  %v4787_v56 = vsel %vm4784_vm9, %v11797_v38, %v10327_v32 }
 0x4b5   : > { %5192 = vmatmul.bf16.vlgmr.msrb.gmra.mxu0 %v4787_v56  ;;  %v4588_v47 = vunpack.c.l.b16 %v4508_v6 }
 0x4b8   : > { %v4420_v13 = vpop.f32.mrf.mxu3 }
 0x4b9   : > { %v4421_v21 = vadd.f32 %v4420_v13, %v4291_v60  ;;  %7062 = vrot.lane.b32.xlu0 %v7061_v57, %s7213_s22  ;;  %v11803_v60 = vpack.c.b16 %v10219_v63, %v10217_v18 }
 0x4ba   : > { %v4294_v4 = vpop.f32.mrf.mxu1 }
 0x4bb   : > { %v4509_v52 = vpack.c.bf16 %v4421_v21, %v4421_v21  ;;  %v10356_v36 = vpop.permute.xlu2 %4630 }
 0x4bc   : > { %11805 = vst [vmem:[#allocation60_spill] sm:$0xff] %v10356_v36  ;;  %v4795_v63 = vsel %vm4784_vm9, %v10236_v43, %v10356_v36 }
 0x4bd   : > { %v4589_v39 = vunpack.c.l.b16 %v4509_v52 }
 0x4bf   : > { %v10337_v31 = vpack.c.b16 %v4589_v39, %v4588_v47 }
 0x4c0   : > { %v4423_v10 = vpop.f32.mrf.mxu3 }
 0x4c1   : > { %11800 = vst [vmem:[#allocation36_spill] sm:$0xff] %v10337_v31  ;;  %4642 = vrot.lane.b32.xlu1 %v10337_v31, %s7214_s20  ;;  %7072 = vrot.lane.b32.xlu0 %v7071_v61, %s7212_s21  ;;  %v4424_v56 = vadd.f32 %v4423_v10, %v4294_v4  ;;  %v10354_v31 = vpop.f32.mrf.mxu0 }
 0x4c2   : > { %v4296_v14 = vpop.f32.mrf.mxu1 }
 0x4c3   : > { %v10344_v40 = vpop.permute.xlu1 %4628  ;;  %v4510_v13 = vpack.c.bf16 %v4424_v56, %v4424_v56 }
 0x4c4   : > { %11802 = vst [vmem:[#allocation63_spill] sm:$0xff] %v10344_v40  ;;  %v4791_v38 = vsel %vm4784_vm9, %v11803_v60, %v10344_v40 }
 0x4c5   : > { %5197 = vmatmul.bf16.gmra.mxu0 %v4791_v38  ;;  %v4590_v47 = vunpack.c.l.b16 %v4510_v13  ;;  %v10384_v13 = vpack.i.bf16 %v9974_v28, %v9946_v15  ;;  %v10407_v28 = vpack.i.bf16 %v10113_v20, %v10085_v59 }
 0x4c8   : > { %v4425_v54 = vpop.f32.mrf.mxu3 }
 0x4c9   : > { %v4426_v6 = vadd.f32 %v4425_v54, %v4296_v14  ;;  %7057 = vrot.lane.b32.xlu1 %v7061_v57, %s7212_s21  ;;  %v7066_v57 = vpack.i.bf16 %v9943_v17, %v9911_v46  ;;  %v10366_v10 = vpop.f32.mrf.mxu0 }
 0x4ca   : > { %v4299_v21 = vpop.f32.mrf.mxu1 }
 0x4cb   : > { %v4511_v52 = vpack.c.bf16 %v4426_v6, %v4426_v6 }
 0x4cd   : > { %v4591_v39 = vunpack.c.l.b16 %v4511_v52 }
 0x4cf   : > { %v10352_v32 = vpack.c.b16 %v4591_v39, %v4590_v47 }
 0x4d0   : > { %v4428_v16 = vpop.f32.mrf.mxu3 }
 0x4d1   : > { %11804 = vst [vmem:[#allocation61_spill] sm:$0xff] %v10352_v32  ;;  %4644 = vrot.lane.b32.xlu2 %v10352_v32, %s7214_s20  ;;  %v10377_v43 = vpop.f32.mrf.mxu0 }
 0x4d2   : > { %v4301_v18 = vpop.f32.mrf.mxu1 }
 0x4d5   : > { %5202 = vmatmul.bf16.gmra.mxu0 %v4795_v63 }
 0x4d8   : > { %v4430_v4 = vpop.f32.mrf.mxu3 }
 0x4d9   : > { %7067 = vrot.lane.b32.xlu2 %v7066_v57, %s7213_s22  ;;  %v10392_v47 = vpop.f32.mrf.mxu0  ;;  %v4431_v32 = vadd.f32 %v4430_v4, %v4301_v18 }
 0x4da   : > { %v10368_v14 = vpop.f32.mrf.mxu1 }
 0x4db   : > { %v4513_v18 = vpack.c.bf16 %v4431_v32, %v4431_v32 }
 0x4e0   : > { %v10370_v60 = vpop.f32.mrf.mxu3 }
 0x4e1   : > { %7077 = vrot.lane.b32.xlu2 %v7071_v61, %s7213_s22  ;;  %v2270_v40 = vpop.f32.mrf.mxu0 }
 0x4e2   : > { %v10373_v38 = vpop.f32.mrf.mxu1 }
 0x4e3   : > { %v10375_v56 = vpop.permute.xlu0 %4632 }
 0x4e4   : > { %11806 = vst [vmem:[#allocation62_spill] sm:$0xff] %v10375_v56  ;;  %v4799_v54 = vsel %vm4784_vm9, %v10253_v9, %v10375_v56  ;;  %v10403_v56 = vpop.f32.mrf.mxu2 }
 0x4e5   : > { %5207 = vmatmul.bf16.gmra.mxu0 %v4799_v54 }
 0x4e8   : > { %v10386_v6 = vpop.f32.mrf.mxu3 }
 0x4e9   : > { %7087 = vrot.lane.b32.xlu2 %v10384_v13, %s7212_s21 }
 0x4ea   : > { %v4309_v61 = vpop.f32.mrf.mxu1 }
 0x4eb   : > { %v10390_v52 = vpop.permute.xlu2 %4636 }
 0x4f0   : > { %v4438_v39 = vpop.f32.mrf.mxu3 }
 0x4f1   : > { %4668 = vrot.lane.b32.xlu2 %v10268_v53, %s7215_s16  ;;  %v4439_v36 = vadd.f32 %v4438_v39, %v4309_v61 }
 0x4f2   : > { %v4311_v57 = vpop.f32.mrf.mxu1 }
 0x4f3   : > { %v10396_v9 = vpop.permute.xlu2 %7037  ;;  %v10398_v63 = vpop.permute.xlu1 %4634  ;;  %v4516_v46 = vpack.c.bf16 %v4439_v36, %v4439_v36 }
 0x4f4   : > { %11807 = vst [vmem:[#allocation18_spill] sm:$0xff] %v10398_v63  ;;  %v4803_v54 = vsel %vm4784_vm9, %v10268_v53, %v10398_v63  ;;  %v7040_v53 = vunpack.i.h.bf16 %v10396_v9  ;;  %v7039_v63 = vunpack.i.l.bf16 %v10396_v9 }
 0x4f5   : > { %5212 = vmatmul.bf16.gmra.mxu0 %v4803_v54  ;;  %v4429_v54 = vadd.f32 %v4428_v16, %v4299_v21  ;;  %v4596_v23 = vunpack.c.l.b16 %v4516_v46  ;;  %v2272_v46 = vpop.f32.mrf.mxu0 }
 0x4f8   : > { %v4440_v15 = vpop.f32.mrf.mxu3 }
 0x4f9   : > { %v4441_v17 = vadd.f32 %v4440_v15, %v4311_v57  ;;  %7102 = vrot.lane.b32.xlu2 %v10407_v28, %s7212_s21 }
 0x4fa   : > { %v4314_v20 = vpop.f32.mrf.mxu1 }
 0x4fb   : > { %v4517_v24 = vpack.c.bf16 %v4441_v17, %v4441_v17  ;;  %v7048_v11 = vpop.permute.xlu2 %7047  ;;  %v10419_v17 = vpop.f32.mrf.mxu2 }
 0x4fc   : > { %v7050_v61 = vunpack.i.h.bf16 %v7048_v11  ;;  %v7049_v39 = vunpack.i.l.bf16 %v7048_v11 }
 0x4fd   : > { %v4597_v44 = vunpack.c.l.b16 %v4517_v24  ;;  %v4512_v24 = vpack.c.bf16 %v4429_v54, %v4429_v54 }
 0x4fe   : > { %v3636_v15 = vsel %vm3603_vm7, %v7049_v39, %v7039_v63  ;;  %v3637_v36 = vsel %vm3603_vm7, %v7050_v61, %v7040_v53  ;;  %v4593_v61 = vunpack.c.l.b16 %v4513_v18  ;;  %v2273_v39 = vadd.f32 %v2272_v46, %v7996_v41 }
 0x4ff   : > { %v10421_v4 = vpack.c.b16 %v4597_v44, %v4596_v23  ;;  %v4005_v57 = vmax.f32 %v11791_v1, %v3636_v15  ;;  %v4007_v16 = vmax.f32 %v11792_v27, %v3637_v36  ;;  %v4807_v44 = vsel %vm4784_vm9, %v10283_v12, %v10390_v52  ;;  %v5007_v27 = vld [vmem:[%s11302_s4 + $0xb0] sm:$0xf] }
 0x500   : > { %v4443_v11 = vpop.f32.mrf.mxu3  ;;  %v4592_v23 = vunpack.c.l.b16 %v4512_v24  ;;  %v5101_v32 = vunpack.c.l.b16 %v5007_v27  ;;  %v10440_v15 = vpack.i.bf16 %v10160_v3, %v10137_v8  ;;  %v2275_v24 = vpop.f32.mrf.mxu0 }
 0x501   : > { %4670 = vrot.lane.b32.xlu2 %v10283_v12, %s7215_s16  ;;  %4650 = vrot.lane.b32.xlu1 %v10421_v4, %s7214_s20  ;;  %v4069_v21 = vpack.c.bf16 %v4007_v16, %v4005_v57  ;;  %v4444_v1 = vadd.f32 %v4443_v11, %v4314_v20  ;;  %v2263_v12 = vadd.f32 %v10366_v10, %v7996_v41 }
 0x502   : > { %v10436_v54 = vpack.c.b16 %v4593_v61, %v4592_v23  ;;  %v4316_v36 = vpop.f32.mrf.mxu1  ;;  %v5124_v18 = vpack.c.b16 %v5101_v32, %v5101_v32  ;;  %v2271_v57 = vadd.f32 %v2270_v40, %v7996_v41  ;;  %v2261_v10 = vadd.f32 %v10354_v31, %v7996_v41 }
 0x503   : > { %4318 = vmatmul.bf16.gmra.mxu1 %v4069_v21  ;;  %v4518_v16 = vpack.c.bf16 %v4444_v1, %v4444_v1  ;;  %v10449_v46 = vpop.f32.mrf.mxu2  ;;  %v2522_v61 = vadd.f32 %v10133_v58, %v2273_v39  ;;  %v4436_v40 = vadd.f32 %v10386_v6, %v10373_v38  ;;  %v2512_v23 = vadd.f32 %v10041_v33, %v2263_v12 }
 0x504   : > { %v5182_v21 = vsel %vm5180_vm10, %v5124_v18, 0  ;;  %v2520_v1 = vadd.f32 %v10107_v29, %v2271_v57  ;;  %v7081_v58 = vpack.i.bf16 %v10001_v45, %v9970_v2 }
 0x505   : > { %5217 = vmatmul.bf16.gmra.mxu0 %v4807_v44  ;;  %v4598_v27 = vunpack.c.l.b16 %v4518_v16  ;;  %v3213_v18 = vmax.f32 %v2522_v61, 0.0  ;;  %v4515_v39 = vpack.c.bf16 %v4436_v40, %v4436_v40  ;;  %v2268_v40 = vadd.f32 %v10392_v47, %v7996_v41 }
 0x506   : > { %5363 = vmatpush.bf16.msra.mxu0 %v5182_v21  ;;  %v3211_v38 = vmax.f32 %v2520_v1, 0.0  ;;  %v2266_v1 = vadd.f32 %v10377_v43, %v7996_v41 }
 0x507   : > { %v4595_v12 = vunpack.c.l.b16 %v4515_v39 }
 0x508   : > { %v4445_v20 = vpop.f32.mrf.mxu3  ;;  %v2277_v6 = vpop.f32.mrf.mxu0 }
 0x509   : > { %v4446_v11 = vadd.f32 %v4445_v20, %v4316_v36  ;;  %7117 = vrot.lane.b32.xlu2 %v10440_v15, %s7212_s21  ;;  %4646 = vrot.lane.b32.xlu1 %v10436_v54, %s7214_s20  ;;  %v4434_v36 = vadd.f32 %v10370_v60, %v10368_v14  ;;  %v2510_v20 = vadd.f32 %v10022_v48, %v2261_v10 }
 0x50a   : > { %v2278_v10 = vadd.f32 %v2277_v6, %v7996_v41 }
 0x50b   : > { %v4519_v44 = vpack.c.bf16 %v4446_v11, %v4446_v11  ;;  %v3205_v11 = vmax.f32 %v2512_v23, 0.0  ;;  %v4514_v33 = vpack.c.bf16 %v4434_v36, %v4434_v36  ;;  %v3203_v29 = vmax.f32 %v2510_v20, 0.0  ;;  %v10475_v60 = vpop.f32.mrf.mxu2 }
 0x50c   : > { %v2276_v23 = vadd.f32 %v2275_v24, %v7996_v41  ;;  %v2517_v24 = vadd.f32 %v10081_v49, %v2268_v40  ;;  %v7096_v41 = vpack.i.bf16 %v10131_v22, %v10105_v51 }
 0x50d   : > { %v4599_v32 = vunpack.c.l.b16 %v4519_v44  ;;  %v10471_v48 = vmax.f32 %v3205_v11, %v3213_v18  ;;  %v10480_v16 = vmax.f32 %v3203_v29, %v3211_v38  ;;  %v4594_v21 = vunpack.c.l.b16 %v4514_v33 }
 0x50e   : > { %v2525_v18 = vadd.f32 %v10157_v35, %v2276_v23  ;;  %v6723_v35 = vld [vmem:[%s11302_s4 + $0xa8] sm:$0xff]  ;;  %v3209_v11 = vmax.f32 %v2517_v24, 0.0 }
 0x50f   : > { %v10462_v31 = vpack.c.b16 %v4599_v32, %v4598_v27  ;;  %v10485_v61 = vpack.i.bf16 %v10471_v48, %v10480_v16  ;;  %v10487_v44 = vpack.c.b16 %v4595_v12, %v4594_v21  ;;  %v2527_v27 = vadd.f32 %v10175_v0, %v2278_v10  ;;  %5364 = vmatpush.bf16.msra.mxu0 %v6723_v35 }
 0x510   : > { %v2515_v0 = vadd.f32 %v10063_v34, %v2266_v1 }
 0x511   : > { %4672 = vrot.lane.b32.xlu2 %v10298_v25, %s7215_s16  ;;  %7082 = vrot.lane.b32.xlu1 %v7081_v58, %s7213_s22  ;;  %v3217_v43 = vmax.f32 %v2527_v27, 0.0 }
 0x512   : > { %4652 = vrot.lane.b32.xlu0 %v10462_v31, %s7214_s20  ;;  %v3207_v34 = vmax.f32 %v2515_v0, 0.0 }
 0x513   : > { %v10473_v14 = vpop.permute.xlu0 %4638  ;;  %v2768_v36 = vpop.f32.mrf.mxu2 }
 0x514   : > { %v4811_v57 = vsel %vm4784_vm9, %v10298_v25, %v10473_v14 }
 0x515   : > { %5222 = vmatmul.bf16.gmra.mxu0 %v4811_v57 }
 0x519   : > { %7132 = vrot.lane.b32.xlu2 %v10485_v61, %s7212_s21  ;;  %7092 = vrot.lane.b32.xlu1 %v10384_v13, %s7213_s22 }
 0x51a   : > { %4648 = vrot.lane.b32.xlu0 %v10487_v44, %s7214_s20 }
 0x51b   : > { %v7043_v32 = vpop.permute.xlu0 %7042  ;;  %v2770_v29 = vpop.f32.mrf.mxu2 }
 0x51c   : > { %v7045_v20 = vunpack.i.h.bf16 %v7043_v32  ;;  %v7044_v47 = vunpack.i.l.bf16 %v7043_v32  ;;  %v2771_v23 = vadd.f32 %v2770_v29, %v8011_v62  ;;  %v2761_v32 = vadd.f32 %v10419_v17, %v8011_v62 }
 0x51e   : > { %v3926_v13 = vsel %vm3892_vm6, %v7040_v53, %v7045_v20  ;;  %v3925_v58 = vsel %vm3892_vm6, %v7039_v63, %v7044_v47  ;;  %v3215_v53 = vmax.f32 %v2525_v18, 0.0  ;;  %v2769_v20 = vadd.f32 %v2768_v36, %v8011_v62 }
 0x51f   : > { %v4008_v39 = vmax.f32 %v11790_v37, %v3926_v13  ;;  %v4006_v49 = vmax.f32 %v11789_v26, %v3925_v58  ;;  %v10522_v37 = vmax.f32 %v3209_v11, %v3217_v43  ;;  %v2759_v13 = vadd.f32 %v10403_v56, %v8011_v62 }
 0x520   : > { %v10532_v33 = vmax.f32 %v3207_v34, %v3215_v53  ;;  %v3020_v58 = vadd.f32 %v10152_v50, %v2771_v23  ;;  %v11811_v34 = vld [vmem:[#allocation58_spill] sm:$0xff] }
 0x521   : > { %4674 = vrot.lane.b32.xlu2 %v10302_v7, %s7215_s16  ;;  %7097 = vrot.lane.b32.xlu1 %v7096_v41, %s7213_s22  ;;  %v4070_v9 = vpack.c.bf16 %v4008_v39, %v4006_v49  ;;  %v11810_v39 = vld [vmem:[#allocation55_spill] sm:$0xff] }
 0x522   : > { %4710 = vrot.lane.b32.xlu0 %v10298_v25, %s7216_s29  ;;  %v10536_v25 = vpack.i.bf16 %v10522_v37, %v10532_v33  ;;  %v3008_v49 = vadd.f32 %v11810_v39, %v2759_v13  ;;  %v3214_v35 = vmax.f32 %v3020_v58, 0.0  ;;  %v11815_v39 = vld [vmem:[#allocation45_spill] sm:$0xff] }
 0x523   : > { %v10524_v26 = vpop.permute.xlu1 %4640  ;;  %v10526_v63 = vpop.permute.xlu0 %7052  ;;  %6413 = vmatmul.msk.bf16.gmra.mxu3 %vm4157_vm8, %v4070_v9 }
 0x524   : > { %v4815_v38 = vsel %vm4784_vm9, %v10302_v7, %v10524_v26  ;;  %v7055_v57 = vunpack.i.h.bf16 %v10526_v63  ;;  %v7054_v21 = vunpack.i.l.bf16 %v10526_v63  ;;  %v2773_v18 = vpop.f32.mrf.mxu2  ;;  %v3204_v53 = vmax.f32 %v3008_v49, 0.0 }
 0x525   : > { %5227 = vmatmul.bf16.gmra.mxu0 %v4815_v38 }
 0x529   : > { %7147 = vrot.lane.b32.xlu2 %v10536_v25, %s7212_s21  ;;  %7107 = vrot.lane.b32.xlu1 %v10407_v28, %s7213_s22  ;;  %v7111_v28 = vpack.i.bf16 %v10173_v55, %v10155_v19 }
 0x52a   : > { %4752 = vrot.lane.b32.xlu0 %v10312_v42, %s7217_s30 }
 0x52b   : > { %v10544_v6 = vpop.permute.xlu2 %4644  ;;  %v7063_v12 = vpop.permute.xlu0 %7062 }
 0x52c   : > { %v7065_v10 = vunpack.i.h.bf16 %v7063_v12  ;;  %v7064_v40 = vunpack.i.l.bf16 %v7063_v12  ;;  %v2775_v63 = vpop.f32.mrf.mxu2 }
 0x52e   : > { %v3638_v1 = vsel %vm3603_vm7, %v7064_v40, %v7054_v21  ;;  %v3639_v27 = vsel %vm3603_vm7, %v7065_v10, %v7055_v57 }
 0x52f   : > { %v4009_v47 = vmax.f32 %v11798_v5, %v3638_v1  ;;  %v4011_v24 = vmax.f32 %v11799_v30, %v3639_v27  ;;  %v11808_v5 = vld [vmem:[#allocation52_spill] sm:$0xff]  ;;  %v11809_v30 = vld [vmem:[#allocation59_spill] sm:$0xff] }
 0x530   : > { %v3010_v36 = vadd.f32 %v11808_v5, %v2761_v32  ;;  %v3018_v0 = vadd.f32 %v11809_v30, %v2769_v20  ;;  %v2776_v32 = vadd.f32 %v2775_v63, %v8011_v62  ;;  %v11812_v5 = vld [vmem:[#allocation12_spill] sm:$0xff]  ;;  %v11813_v30 = vld [vmem:[#allocation14_spill] sm:$0xff] }
 0x531   : > { %4676 = vrot.lane.b32.xlu2 %v10312_v42, %s7215_s16  ;;  %7112 = vrot.lane.b32.xlu1 %v7111_v28, %s7213_s22  ;;  %v4071_v41 = vpack.c.bf16 %v4011_v24, %v4009_v47  ;;  %v11817_v63 = vld [vmem:[#allocation2_spill] sm:$0xff] }
 0x532   : > { %4712 = vrot.lane.b32.xlu0 %v10302_v7, %s7216_s29  ;;  %v10566_v17 = vpop.f32.mrf.mxu0  ;;  %v3206_v7 = vmax.f32 %v3010_v36, 0.0  ;;  %v3212_v11 = vmax.f32 %v3018_v0, 0.0 }
 0x533   : > { %v10570_v43 = vpop.permute.xlu2 %7067  ;;  %v10572_v56 = vpop.permute.xlu1 %4642  ;;  %4323 = vmatmul.bf16.gmra.mxu1 %v4071_v41 }
 0x534   : > { %v4819_v50 = vsel %vm4784_vm9, %v10312_v42, %v10572_v56  ;;  %v10578_v9 = vmax.f32 %v3206_v7, %v3214_v35  ;;  %v10586_v38 = vmax.f32 %v3204_v53, %v3212_v11  ;;  %v7070_v29 = vunpack.i.h.bf16 %v10570_v43  ;;  %v11816_v11 = vld [vmem:[#allocation36_spill] sm:$0xff] }
 0x535   : > { %5232 = vmatmul.bf16.gmra.mxu0 %v4819_v50  ;;  %v7069_v12 = vunpack.i.l.bf16 %v10570_v43  ;;  %v11814_v43 = vld [vmem:[#allocation77_spill] sm:$0xff]  ;;  %v2766_v35 = vadd.f32 %v10475_v60, %v8011_v62  ;;  %v2774_v7 = vadd.f32 %v2773_v18, %v8011_v62  ;;  %v2764_v53 = vadd.f32 %v10449_v46, %v8011_v62 }
 0x536   : > { %v7126_v47 = vpack.i.bf16 %v10578_v9, %v10586_v38  ;;  %v4823_v60 = vsel %vm4784_vm9, %v11811_v34, %v10544_v6  ;;  %v11818_v18 = vld [vmem:[#allocation53_spill] sm:$0xff] }
 0x539   : > { %4678 = vrot.lane.b32.xlu2 %v11811_v34, %s7215_s16  ;;  %7122 = vrot.lane.b32.xlu1 %v10440_v15, %s7213_s22  ;;  %v6722_v15 = vld [vmem:[%s11302_s4 + $0xa0] sm:$0xff] }
 0x53a   : > { %4754 = vrot.lane.b32.xlu0 %v11811_v34, %s7217_s30  ;;  %v10594_v20 = vpop.f32.mrf.mxu0  ;;  %5365 = vmatpush.bf16.msra.mxu0 %v6722_v15  ;;  %v11820_v15 = vld [vmem:[#allocation49_spill] sm:$0xff] }
 0x53b   : > { %v7078_v10 = vpop.permute.xlu2 %7077  ;;  %v7058_v40 = vpop.permute.xlu1 %7057 }
 0x53c   : > { %v7080_v23 = vunpack.i.h.bf16 %v7078_v10  ;;  %v7079_v1 = vunpack.i.l.bf16 %v7078_v10  ;;  %v7060_v27 = vunpack.i.h.bf16 %v7058_v40  ;;  %v7059_v28 = vunpack.i.l.bf16 %v7058_v40  ;;  %v7073_v40 = vpop.permute.xlu0 %7072 }
 0x53d   : > { %v3025_v10 = vadd.f32 %v11817_v63, %v2776_v32  ;;  %v6712_v63 = vld [vmem:[%s11302_s4 + $0x50] sm:$0xff] }
 0x53e   : > { %v3640_v24 = vsel %vm3603_vm7, %v7079_v1, %v7069_v12  ;;  %v3641_v13 = vsel %vm3603_vm7, %v7080_v23, %v7070_v29  ;;  %v3927_v58 = vsel %vm3892_vm6, %v7054_v21, %v7059_v28  ;;  %v3928_v41 = vsel %vm3892_vm6, %v7055_v57, %v7060_v27  ;;  %v11819_v1 = vld [vmem:[#allocation22_spill] sm:$0xff] }
 0x53f   : > { %v4010_v36 = vmax.f32 %v11812_v5, %v3927_v58  ;;  %v4012_v0 = vmax.f32 %v11813_v30, %v3928_v41  ;;  %v4013_v50 = vmax.f32 %v11814_v43, %v3640_v24  ;;  %v4015_v49 = vmax.f32 %v11815_v39, %v3641_v13  ;;  %v11821_v13 = vld [vmem:[#allocation61_spill] sm:$0xff] }
 0x540   : > { %v3015_v23 = vadd.f32 %v11818_v18, %v2766_v35  ;;  %v3023_v27 = vadd.f32 %v11819_v1, %v2774_v7  ;;  %v7075_v28 = vunpack.i.h.bf16 %v7073_v40  ;;  %v3218_v62 = vmax.f32 %v3025_v10, 0.0  ;;  %v6721_v35 = vld [vmem:[%s11302_s4 + $0x98] sm:$0xff]  ;;  %v6716_v7 = vld [vmem:[%s11302_s4 + $0x70] sm:$0xff]  ;;  %v6711_v10 = vld [vmem:[%s11302_s4 + $0x48] sm:$0xff] }
 0x541   : > { %4680 = vrot.lane.b32.xlu2 %v11816_v11, %s7215_s16  ;;  %7127 = vrot.lane.b32.xlu1 %v7126_v47, %s7213_s22  ;;  %v4073_v57 = vpack.c.bf16 %v4015_v49, %v4013_v50  ;;  %v4072_v21 = vpack.c.bf16 %v4012_v0, %v4010_v36  ;;  %v3013_v47 = vadd.f32 %v11820_v15, %v2764_v53  ;;  %v11822_v0 = vld [vmem:[#allocation46_spill] sm:$0xff]  ;;  %v11823_v50 = vld [vmem:[#allocation48_spill] sm:$0xff]  ;;  %v6713_v53 = vld [vmem:[%s11302_s4 + $0x58] sm:$0xff] }
 0x542   : > { %4714 = vrot.lane.b32.xlu0 %v10312_v42, %s7216_s29  ;;  %v7074_v42 = vunpack.i.l.bf16 %v7073_v40  ;;  %v10624_v46 = vpop.f32.mrf.mxu0  ;;  %v3210_v32 = vmax.f32 %v3015_v23, 0.0  ;;  %v3216_v24 = vmax.f32 %v3023_v27, 0.0  ;;  %v3930_v58 = vsel %vm3892_vm6, %v7070_v29, %v7075_v28  ;;  %5366 = vmatpush.bf16.msra.mxu0 %v6721_v35  ;;  %v6710_v23 = vld [vmem:[%s11302_s4 + $0x40] sm:$0xff]  ;;  %v6720_v1 = vld [vmem:[%s11302_s4 + $0x90] sm:$0xff]  ;;  %v6719_v28 = vld [vmem:[%s11302_s4 + $0x88] sm:$0xff] }
 0x543   : > { %4328 = vmatmul.bf16.gmra.mxu1 %v4073_v57  ;;  %6414 = vmatmul.msk.bf16.gmra.mxu3 %vm4157_vm8, %v4072_v21  ;;  %v3208_v5 = vmax.f32 %v3013_v47, 0.0  ;;  %v4016_v43 = vmax.f32 %v11822_v0, %v3930_v58  ;;  %v6715_v57 = vld [vmem:[%s11302_s4 + $0x68] sm:$0xff] }
 0x544   : > { %v3929_v41 = vsel %vm3892_vm6, %v7069_v12, %v7074_v42  ;;  %v10634_v36 = vmax.f32 %v3210_v32, %v3218_v62  ;;  %v6717_v12 = vld [vmem:[%s11302_s4 + $0x78] sm:$0xff] }
 0x545   : > { %5237 = vmatmul.bf16.gmra.mxu0 %v4823_v60  ;;  %v10636_v30 = vmax.f32 %v3208_v5, %v3216_v24  ;;  %v4014_v39 = vmax.f32 %v11823_v50, %v3929_v41  ;;  %5273 = vmatpush.bf16.msra.mxu2 %v6717_v12  ;;  %v7088_v60 = vpop.permute.xlu2 %7087 }
 0x546   : > { %5367 = vmatpush.bf16.msra.mxu0 %v6720_v1  ;;  %v7090_v58 = vunpack.i.h.bf16 %v7088_v60  ;;  %v7089_v41 = vunpack.i.l.bf16 %v7088_v60  ;;  %v11824_v60 = vld [vmem:[#allocation43_spill] sm:$0xff]  ;;  %v11825_v1 = vld [vmem:[#allocation78_spill] sm:$0xff] }
 0x547   : > { %v7141_v49 = vpack.i.bf16 %v10634_v36, %v10636_v30  ;;  %v4074_v29 = vpack.c.bf16 %v4016_v43, %v4014_v39 }
 0x549   : > { %4682 = vrot.lane.b32.xlu2 %v11821_v13, %s7215_s16  ;;  %7137 = vrot.lane.b32.xlu1 %v10485_v61, %s7213_s22 }
 0x54a   : > { %4756 = vrot.lane.b32.xlu0 %v11816_v11, %s7217_s30  ;;  %v10642_v61 = vpop.f32.mrf.mxu0  ;;  %5274 = vmatpush.bf16.msra.mxu2 %v6716_v7 }
 0x54b   : > { %5368 = vmatpush.bf16.msra.mxu0 %v6719_v28 }
 0x54d   : > { %v4669_v15 = vpop.permute.xlu2 %4668 }
 0x54e   : > { %5275 = vmatpush.bf16.msra.mxu2 %v6715_v57 }
 0x551   : > { %4684 = vrot.lane.b32.xlu2 %v10436_v54, %s7215_s16  ;;  %7142 = vrot.lane.b32.xlu1 %v7141_v49, %s7213_s22 }
 0x552   : > { %4716 = vrot.lane.b32.xlu0 %v11811_v34, %s7216_s29  ;;  %v10662_v34 = vpop.f32.mrf.mxu0 }
 0x553   : > { %6415 = vmatmul.msk.bf16.gmra.mxu3 %vm4157_vm8, %v4074_v29 }
 0x555   : > { %v7103_v50 = vpop.permute.xlu2 %7102 }
 0x559   : > { %4686 = vrot.lane.b32.xlu2 %v10487_v44, %s7215_s16  ;;  %7152 = vrot.lane.b32.xlu1 %v10536_v25, %s7213_s22  ;;  %v6714_v25 = vld [vmem:[%s11302_s4 + $0x60] sm:$0xff] }
 0x55a   : > { %4758 = vrot.lane.b32.xlu0 %v11821_v13, %s7217_s30  ;;  %v10679_v21 = vpop.f32.mrf.mxu0  ;;  %5276 = vmatpush.bf16.msra.mxu2 %v6714_v25 }
 0x55e   : > { %5277 = vmatpush.bf16.msra.mxu2 %v6713_v53 }
 0x561   : > { %4688 = vrot.lane.b32.xlu2 %v10421_v4, %s7215_s16  ;;  %4760 = vrot.lane.b32.xlu1 %v10436_v54, %s7217_s30 }
 0x562   : > { %4718 = vrot.lane.b32.xlu0 %v11816_v11, %s7216_s29  ;;  %5278 = vmatpush.bf16.msra.mxu2 %v6712_v63  ;;  %v10696_v40 = vpop.f32.mrf.mxu0 }
 0x566   : > { %5279 = vmatpush.bf16.msra.mxu2 %v6711_v10  ;;  %v4671_v10 = vpop.permute.xlu2 %4670 }
 0x569   : > { %4690 = vrot.lane.b32.xlu2 %v10462_v31, %s7215_s16  ;;  %4762 = vrot.lane.b32.xlu1 %v10487_v44, %s7217_s30 }
 0x56a   : > { %4720 = vrot.lane.b32.xlu0 %v11821_v13, %s7216_s29  ;;  %5280 = vmatpush.bf16.msra.mxu2 %v6710_v23  ;;  %v10716_v42 = vpop.f32.mrf.mxu0 }
 0x571   : > { %4764 = vrot.lane.b32.xlu1 %v10421_v4, %s7217_s30 }
 0x572   : > { %4722 = vrot.lane.b32.xlu0 %v10436_v54, %s7216_s29  ;;  %v10732_v32 = vpop.f32.mrf.mxu0 }
 0x573   : > { %v10702_v18 = vpop.permute.xlu1 %4650 }
 0x574   : > { %v4835_v27 = vsel %vm4784_vm9, %v10436_v54, %v10702_v18  ;;  %v6718_v54 = vld [vmem:[%s11302_s4 + $0x80] sm:$0xff] }
 0x575   : > { %5252 = vmatmul.bf16.vlgmr.msrb.gmra.mxu2 %v4835_v27  ;;  %5369 = vmatpush.bf16.msra.mxu0 %v6718_v54  ;;  %v11826_v54 = vld [vmem:[#allocation28_spill] sm:$0xff] }
 0x579   : > { %4766 = vrot.lane.b32.xlu1 %v10462_v31, %s7217_s30 }
 0x57a   : > { %4724 = vrot.lane.b32.xlu0 %v10487_v44, %s7216_s29 }
 0x57b   : > { %v10722_v47 = vpop.permute.xlu1 %4646 }
 0x57c   : > { %v4827_v62 = vsel %vm4784_vm9, %v11816_v11, %v10722_v47 }
 0x57d   : > { %5242 = vmatmul.bf16.gmra.mxu0 %v4827_v62  ;;  %v4850_v62 = vsel %vm4157_vm8, %v11826_v54, %v4669_v15 }
 0x582   : > { %4726 = vrot.lane.b32.xlu0 %v10421_v4, %s7216_s29 }
 0x583   : > { %v7083_v24 = vpop.permute.xlu1 %7082 }
 0x584   : > { %v7085_v5 = vunpack.i.h.bf16 %v7083_v24  ;;  %v7084_v0 = vunpack.i.l.bf16 %v7083_v24  ;;  %v10734_v43 = vpop.permute.xlu0 %4652 }
 0x585   : > { %v4839_v39 = vsel %vm4784_vm9, %v10487_v44, %v10734_v43  ;;  %v10748_v44 = vpop.f32.mrf.mxu0 }
 0x586   : > { %v3932_v11 = vsel %vm3892_vm6, %v7085_v5, %v7090_v58  ;;  %v3931_v49 = vsel %vm3892_vm6, %v7084_v0, %v7089_v41  ;;  %5257 = vmatmul.bf16.gmra.mxu2 %v4839_v39  ;;  %v7105_v58 = vunpack.i.h.bf16 %v7103_v50  ;;  %v7104_v41 = vunpack.i.l.bf16 %v7103_v50 }
 0x587   : > { %v4020_v29 = vmax.f32 %v10001_v45, %v3932_v11  ;;  %v4018_v12 = vmax.f32 %v9970_v2, %v3931_v49 }
 0x589   : > { %v4076_v35 = vpack.c.bf16 %v4020_v29, %v4018_v12 }
 0x58a   : > { %4728 = vrot.lane.b32.xlu0 %v10462_v31, %s7216_s29 }
 0x58b   : > { %v7093_v7 = vpop.permute.xlu1 %7092  ;;  %6416 = vmatmul.msk.bf16.gmra.mxu3 %vm4157_vm8, %v4076_v35  ;;  %v7118_v35 = vpop.permute.xlu2 %7117 }
 0x58c   : > { %v7095_v57 = vunpack.i.h.bf16 %v7093_v7  ;;  %v7094_v25 = vunpack.i.l.bf16 %v7093_v7  ;;  %v10746_v53 = vpop.permute.xlu0 %4648 }
 0x58d   : > { %v4831_v63 = vsel %vm4784_vm9, %v11821_v13, %v10746_v53  ;;  %v10762_v29 = vpop.f32.mrf.mxu0 }
 0x58e   : > { %v3642_v45 = vsel %vm3603_vm7, %v7094_v25, %v7084_v0  ;;  %v3643_v2 = vsel %vm3603_vm7, %v7095_v57, %v7085_v5  ;;  %5247 = vmatmul.bf16.gmra.mxu0 %v4831_v63 }
 0x58f   : > { %v4017_v23 = vmax.f32 %v11824_v60, %v3642_v45  ;;  %v4019_v27 = vmax.f32 %v11825_v1, %v3643_v2 }
 0x591   : > { %v4075_v28 = vpack.c.bf16 %v4019_v27, %v4017_v23 }
 0x593   : > { %v7098_v24 = vpop.permute.xlu1 %7097  ;;  %4333 = vmatmul.bf16.gmra.mxu1 %v4075_v28  ;;  %v11828_v28 = vld [vmem:[#allocation63_spill] sm:$0xff] }
 0x594   : > { %v7100_v13 = vunpack.i.h.bf16 %v7098_v24  ;;  %v7099_v39 = vunpack.i.l.bf16 %v7098_v24  ;;  %v4711_v0 = vpop.permute.xlu0 %4710  ;;  %v4852_v54 = vsel %vm4157_vm8, %v11828_v28, %v4671_v10 }
 0x595   : > { %v4883_v5 = vsel %vm4881_vm11, %v4850_v62, %v4711_v0  ;;  %v10773_v1 = vpop.f32.mrf.mxu0  ;;  %v4673_v62 = vpop.permute.xlu2 %4672 }
 0x596   : > { %v3934_v11 = vsel %vm3892_vm6, %v7100_v13, %v7105_v58  ;;  %v3933_v49 = vsel %vm3892_vm6, %v7099_v39, %v7104_v41  ;;  %5281 = vmatmul.bf16.vlgmr.msra.gmra.mxu2 %v4883_v5  ;;  %v7120_v58 = vunpack.i.h.bf16 %v7118_v35  ;;  %v7119_v41 = vunpack.i.l.bf16 %v7118_v35 }
 0x597   : > { %v4024_v12 = vmax.f32 %v10131_v22, %v3934_v11  ;;  %v4022_v15 = vmax.f32 %v10105_v51, %v3933_v49  ;;  %v11827_v22 = vld [vmem:[#allocation16_spill] sm:$0xff] }
 0x599   : > { %v4078_v7 = vpack.c.bf16 %v4024_v12, %v4022_v15 }
 0x59b   : > { %v7108_v50 = vpop.permute.xlu1 %7107  ;;  %6417 = vmatmul.msk.bf16.gmra.mxu3 %vm4157_vm8, %v4078_v7 }
 0x59c   : > { %v7110_v57 = vunpack.i.h.bf16 %v7108_v50  ;;  %v7109_v25 = vunpack.i.l.bf16 %v7108_v50  ;;  %v4753_v63 = vpop.permute.xlu0 %4752 }
 0x59d   : > { %v4932_v45 = vsel %vm4930_vm12, %v4711_v0, %v4753_v63  ;;  %v10782_v50 = vpop.f32.mrf.mxu0 }
 0x59e   : > { %v3644_v2 = vsel %vm3603_vm7, %v7109_v25, %v7099_v39  ;;  %v3645_v60 = vsel %vm3603_vm7, %v7110_v57, %v7100_v13  ;;  %6509 = vmatmul.msk.bf16.vlgmr.msra.gmra.mxu0 %vm5147_vm13, %v4932_v45  ;;  %v4319_v39 = vpop.f32.mrf.mxu1 }
 0x59f   : > { %v4021_v51 = vmax.f32 %v10085_v59, %v3644_v2  ;;  %v4023_v23 = vmax.f32 %v11827_v22, %v3645_v60  ;;  %v7133_v2 = vpop.permute.xlu2 %7132 }
 0x5a1   : > { %v4077_v27 = vpack.c.bf16 %v4023_v23, %v4021_v51 }
 0x5a3   : > { %v7113_v24 = vpop.permute.xlu1 %7112  ;;  %4338 = vmatmul.bf16.gmra.mxu1 %v4077_v27 }
 0x5a4   : > { %v7115_v0 = vunpack.i.h.bf16 %v7113_v24  ;;  %v7114_v13 = vunpack.i.l.bf16 %v7113_v24  ;;  %v4713_v5 = vpop.permute.xlu0 %4712 }
 0x5a5   : > { %v4886_v11 = vsel %vm4881_vm11, %v4852_v54, %v4713_v5 }
 0x5a6   : > { %v3936_v59 = vsel %vm3892_vm6, %v7115_v0, %v7120_v58  ;;  %v3935_v49 = vsel %vm3892_vm6, %v7114_v13, %v7119_v41  ;;  %5286 = vmatmul.bf16.gmra.mxu2 %v4886_v11  ;;  %v4448_v12 = vpop.f32.mrf.mxu3  ;;  %v4321_v51 = vpop.f32.mrf.mxu1  ;;  %v11829_v41 = vld [vmem:[#allocation60_spill] sm:$0xff] }
 0x5a7   : > { %v4028_v15 = vmax.f32 %v10173_v55, %v3936_v59  ;;  %v4026_v10 = vmax.f32 %v10155_v19, %v3935_v49  ;;  %v4449_v35 = vadd.f32 %v4448_v12, %v4319_v39  ;;  %v4854_v39 = vsel %vm4157_vm8, %v11829_v41, %v4673_v62  ;;  %v4675_v62 = vpop.permute.xlu2 %4674 }
 0x5a9   : > { %v4080_v7 = vpack.c.bf16 %v4028_v15, %v4026_v10  ;;  %v4520_v23 = vpack.c.bf16 %v4449_v35, %v4449_v35  ;;  %v10793_v10 = vpop.f32.mrf.mxu0 }
 0x5ab   : > { %v7123_v57 = vpop.permute.xlu1 %7122  ;;  %6418 = vmatmul.msk.bf16.gmra.mxu3 %vm4157_vm8, %v4080_v7 }
 0x5ac   : > { %v7125_v25 = vunpack.i.h.bf16 %v7123_v57  ;;  %v7124_v63 = vunpack.i.l.bf16 %v7123_v57  ;;  %v4755_v45 = vpop.permute.xlu0 %4754 }
 0x5ad   : > { %v4934_v60 = vsel %vm4930_vm12, %v4713_v5, %v4755_v45  ;;  %v4620_v5 = vunpack.c.l.b16 %v4520_v23 }
 0x5ae   : > { %v3646_v22 = vsel %vm3603_vm7, %v7124_v63, %v7114_v13  ;;  %v3647_v55 = vsel %vm3603_vm7, %v7125_v25, %v7115_v0  ;;  %6510 = vmatmul.msk.bf16.gmra.mxu0 %vm5147_vm13, %v4934_v60  ;;  %v4450_v19 = vpop.f32.mrf.mxu3  ;;  %v7135_v13 = vunpack.i.h.bf16 %v7133_v2  ;;  %v7134_v0 = vunpack.i.l.bf16 %v7133_v2 }
 0x5af   : > { %v4451_v27 = vadd.f32 %v4450_v19, %v4321_v51  ;;  %v4025_v28 = vmax.f32 %v10137_v8, %v3646_v22  ;;  %v4027_v54 = vmax.f32 %v10160_v3, %v3647_v55 }
 0x5b1   : > { %v4521_v24 = vpack.c.bf16 %v4451_v27, %v4451_v27  ;;  %v4079_v58 = vpack.c.bf16 %v4027_v54, %v4025_v28  ;;  %v10813_v55 = vpop.f32.mrf.mxu0  ;;  %v4324_v27 = vpop.f32.mrf.mxu1 }
 0x5b2   : > { %v7148_v28 = vpop.permute.xlu2 %7147 }
 0x5b3   : > { %v4621_v11 = vunpack.c.l.b16 %v4521_v24  ;;  %v7128_v59 = vpop.permute.xlu1 %7127  ;;  %4343 = vmatmul.bf16.gmra.mxu1 %v4079_v58  ;;  %v11830_v24 = vld [vmem:[#allocation62_spill] sm:$0xff] }
 0x5b4   : > { %v7130_v49 = vunpack.i.h.bf16 %v7128_v59  ;;  %v7129_v12 = vunpack.i.l.bf16 %v7128_v59  ;;  %v4715_v15 = vpop.permute.xlu0 %4714  ;;  %v4856_v58 = vsel %vm4157_vm8, %v11830_v24, %v4675_v62 }
 0x5b5   : > { %v10795_v7 = vpack.c.b16 %v4621_v11, %v4620_v5  ;;  %v4889_v8 = vsel %vm4881_vm11, %v4854_v39, %v4715_v15  ;;  %v7150_v39 = vunpack.i.h.bf16 %v7148_v28  ;;  %v7149_v5 = vunpack.i.l.bf16 %v7148_v28 }
 0x5b6   : > { %v3938_v3 = vsel %vm3892_vm6, %v7130_v49, %v7135_v13  ;;  %v3937_v35 = vsel %vm3892_vm6, %v7129_v12, %v7134_v0  ;;  %5291 = vmatmul.bf16.gmra.mxu2 %v4889_v8 }
 0x5b7   : > { %v4032_v57 = vmax.f32 %v10578_v9, %v3938_v3  ;;  %v4030_v25 = vmax.f32 %v10586_v38, %v3937_v35  ;;  %4692 = vrot.lane.b32.xlu2 %v10795_v7, %s7215_s16  ;;  %4730 = vrot.lane.b32.xlu0 %v10795_v7, %s7216_s29 }
 0x5b8   : > { %4768 = vrot.lane.b32.xlu1 %v10795_v7, %s7217_s30 }
 0x5b9   : > { %v4082_v63 = vpack.c.bf16 %v4032_v57, %v4030_v25  ;;  %v10824_v8 = vpop.f32.mrf.mxu0  ;;  %v4326_v35 = vpop.f32.mrf.mxu1 }
 0x5bb   : > { %v7138_v45 = vpop.permute.xlu1 %7137  ;;  %6419 = vmatmul.msk.bf16.gmra.mxu3 %vm4157_vm8, %v4082_v63 }
 0x5bc   : > { %v7140_v2 = vunpack.i.h.bf16 %v7138_v45  ;;  %v7139_v60 = vunpack.i.l.bf16 %v7138_v45  ;;  %v4757_v51 = vpop.permute.xlu0 %4756 }
 0x5bd   : > { %v4936_v9 = vsel %vm4930_vm12, %v4715_v15, %v4757_v51 }
 0x5be   : > { %v3648_v38 = vsel %vm3603_vm7, %v7139_v60, %v7129_v12  ;;  %v3649_v22 = vsel %vm3603_vm7, %v7140_v2, %v7130_v49  ;;  %6511 = vmatmul.msk.bf16.gmra.mxu0 %vm5147_vm13, %v4936_v9 }
 0x5bf   : > { %v4029_v19 = vmax.f32 %v10480_v16, %v3648_v38  ;;  %v4031_v23 = vmax.f32 %v10471_v48, %v3649_v22 }
 0x5c1   : > { %v4081_v54 = vpack.c.bf16 %v4031_v23, %v4029_v19  ;;  %v4677_v19 = vpop.permute.xlu2 %4676  ;;  %v10833_v28 = vpop.f32.mrf.mxu0 }
 0x5c3   : > { %v7143_v41 = vpop.permute.xlu1 %7142  ;;  %4348 = vmatmul.bf16.gmra.mxu1 %v4081_v54 }
 0x5c4   : > { %v7145_v11 = vunpack.i.h.bf16 %v7143_v41  ;;  %v7144_v59 = vunpack.i.l.bf16 %v7143_v41  ;;  %v4717_v13 = vpop.permute.xlu0 %4716 }
 0x5c5   : > { %v4892_v0 = vsel %vm4881_vm11, %v4856_v58, %v4717_v13  ;;  %v11831_v58 = vld [vmem:[#allocation18_spill] sm:$0xff] }
 0x5c6   : > { %v3940_v49 = vsel %vm3892_vm6, %v7145_v11, %v7150_v39  ;;  %v3939_v16 = vsel %vm3892_vm6, %v7144_v59, %v7149_v5  ;;  %5296 = vmatmul.bf16.gmra.mxu2 %v4892_v0  ;;  %v4453_v48 = vpop.f32.mrf.mxu3  ;;  %v4858_v41 = vsel %vm4157_vm8, %v11831_v58, %v4677_v19  ;;  %v4329_v39 = vpop.f32.mrf.mxu1 }
 0x5c7   : > { %v4036_v12 = vmax.f32 %v10634_v36, %v3940_v49  ;;  %v4034_v15 = vmax.f32 %v10636_v30, %v3939_v16  ;;  %v4454_v62 = vadd.f32 %v4453_v48, %v4324_v27 }
 0x5c9   : > { %v4084_v3 = vpack.c.bf16 %v4036_v12, %v4034_v15  ;;  %v4522_v30 = vpack.c.bf16 %v4454_v62, %v4454_v62  ;;  %v10846_v0 = vpop.f32.mrf.mxu0 }
 0x5cb   : > { %v7153_v57 = vpop.permute.xlu1 %7152  ;;  %6420 = vmatmul.msk.bf16.gmra.mxu3 %vm4157_vm8, %v4084_v3  ;;  %v4622_v54 = vunpack.c.l.b16 %v4522_v30  ;;  %v4679_v3 = vpop.permute.xlu2 %4678 }
 0x5cc   : > { %v7155_v25 = vunpack.i.h.bf16 %v7153_v57  ;;  %v7154_v63 = vunpack.i.l.bf16 %v7153_v57  ;;  %v4759_v45 = vpop.permute.xlu0 %4758 }
 0x5cd   : > { %v4938_v2 = vsel %vm4930_vm12, %v4717_v13, %v4759_v45 }
 0x5ce   : > { %v3650_v60 = vsel %vm3603_vm7, %v7154_v63, %v7144_v59  ;;  %v3651_v51 = vsel %vm3603_vm7, %v7155_v25, %v7145_v11  ;;  %6512 = vmatmul.msk.bf16.gmra.mxu0 %vm5147_vm13, %v4938_v2  ;;  %v4455_v36 = vpop.f32.mrf.mxu3  ;;  %v4331_v16 = vpop.f32.mrf.mxu1  ;;  %v4860_v63 = vsel %vm4157_vm8, %v10390_v52, %v4679_v3 }
 0x5cf   : > { %v4456_v9 = vadd.f32 %v4455_v36, %v4326_v35  ;;  %v4033_v38 = vmax.f32 %v10532_v33, %v3650_v60  ;;  %v4035_v22 = vmax.f32 %v10522_v37, %v3651_v51 }
 0x5d1   : > { %v4523_v23 = vpack.c.bf16 %v4456_v9, %v4456_v9  ;;  %v4083_v27 = vpack.c.bf16 %v4035_v22, %v4033_v38 }
 0x5d3   : > { %v4623_v24 = vunpack.c.l.b16 %v4523_v23  ;;  %4353 = vmatmul.bf16.gmra.mxu1 %v4083_v27  ;;  %v4761_v37 = vpop.permute.xlu1 %4760  ;;  %v4681_v36 = vpop.permute.xlu2 %4680 }
 0x5d4   : > { %v4719_v5 = vpop.permute.xlu0 %4718  ;;  %v4862_v9 = vsel %vm4157_vm8, %v10473_v14, %v4681_v36 }
 0x5d5   : > { %v10837_v11 = vpack.c.b16 %v4623_v24, %v4622_v54  ;;  %v4895_v59 = vsel %vm4881_vm11, %v4858_v41, %v4719_v5  ;;  %v4940_v49 = vsel %vm4930_vm12, %v4719_v5, %v4761_v37 }
 0x5d6   : > { %5301 = vmatmul.bf16.gmra.mxu2 %v4895_v59  ;;  %v4458_v33 = vpop.f32.mrf.mxu3 }
 0x5d7   : > { %4694 = vrot.lane.b32.xlu2 %v10837_v11, %s7215_s16  ;;  %4732 = vrot.lane.b32.xlu0 %v10837_v11, %s7216_s29  ;;  %v4459_v13 = vadd.f32 %v4458_v33, %v4329_v39 }
 0x5d8   : > { %4770 = vrot.lane.b32.xlu1 %v10837_v11, %s7217_s30 }
 0x5d9   : > { %v4524_v12 = vpack.c.bf16 %v4459_v13, %v4459_v13 }
 0x5db   : > { %v4662_v57 = vunpack.c.l.b16 %v4524_v12  ;;  %v4763_v60 = vpop.permute.xlu1 %4762  ;;  %v4683_v19 = vpop.permute.xlu2 %4682 }
 0x5dc   : > { %v4721_v62 = vpop.permute.xlu0 %4720  ;;  %v4864_v14 = vsel %vm4157_vm8, %v10524_v26, %v4683_v19 }
 0x5dd   : > { %v4898_v2 = vsel %vm4881_vm11, %v4860_v63, %v4721_v62  ;;  %v4942_v51 = vsel %vm4930_vm12, %v4721_v62, %v4763_v60 }
 0x5de   : > { %6513 = vmatmul.msk.bf16.gmra.mxu0 %vm5147_vm13, %v4940_v49  ;;  %v4460_v48 = vpop.f32.mrf.mxu3 }
 0x5df   : > { %v4461_v15 = vadd.f32 %v4460_v48, %v4331_v16  ;;  %4654 = vrot.lane.b32.xlu2 %v10795_v7, %s7214_s20  ;;  %v10861_v7 = vpop.f32.mrf.mxu0 }
 0x5e1   : > { %v4525_v35 = vpack.c.bf16 %v4461_v15, %v4461_v15 }
 0x5e3   : > { %v4663_v25 = vunpack.c.l.b16 %v4525_v35  ;;  %v4765_v23 = vpop.permute.xlu1 %4764  ;;  %v4685_v39 = vpop.permute.xlu2 %4684 }
 0x5e4   : > { %v4723_v30 = vpop.permute.xlu0 %4722  ;;  %v4866_v26 = vsel %vm4157_vm8, %v10572_v56, %v4685_v39 }
 0x5e5   : > { %v10854_v45 = vpack.c.b16 %v4663_v25, %v4662_v57  ;;  %v4901_v38 = vsel %vm4881_vm11, %v4862_v9, %v4723_v30  ;;  %v4944_v54 = vsel %vm4930_vm12, %v4723_v30, %v4765_v23 }
 0x5e6   : > { %5306 = vmatmul.bf16.gmra.mxu2 %v4898_v2 }
 0x5e7   : > { %4734 = vrot.lane.b32.xlu0 %v10854_v45, %s7216_s29  ;;  %4772 = vrot.lane.b32.xlu1 %v10854_v45, %s7217_s30  ;;  %v10865_v52 = vpop.f32.mrf.mxu0 }
 0x5eb   : > { %v4767_v33 = vpop.permute.xlu1 %4766  ;;  %v4687_v13 = vpop.permute.xlu2 %4686 }
 0x5ec   : > { %v4725_v58 = vpop.permute.xlu0 %4724 }
 0x5ed   : > { %v4904_v5 = vsel %vm4881_vm11, %v4864_v14, %v4725_v58  ;;  %v4946_v49 = vsel %vm4930_vm12, %v4725_v58, %v4767_v33 }
 0x5ee   : > { %6514 = vmatmul.msk.bf16.gmra.mxu0 %vm5147_vm13, %v4942_v51 }
 0x5f3   : > { %v4689_v25 = vpop.permute.xlu2 %4688 }
 0x5f4   : > { %v4727_v15 = vpop.permute.xlu0 %4726 }
 0x5f5   : > { %v4907_v62 = vsel %vm4881_vm11, %v4866_v26, %v4727_v15 }
 0x5f6   : > { %5311 = vmatmul.bf16.gmra.mxu2 %v4901_v38 }
 0x5f8   : > { %v10870_v22 = vpop.f32.mrf.mxu2 }
 0x5fa   : > { %v10872_v27 = vpop.f32.mrf.mxu0 }
 0x5fb   : > { %v10898_v58 = vpop.permute.xlu2 %4690 }
 0x5fc   : > { %v10906_v39 = vpop.permute.xlu0 %4728 }
 0x5fe   : > { %6515 = vmatmul.msk.bf16.gmra.mxu0 %vm5147_vm13, %v4944_v54 }
 0x600   : > { %v10876_v24 = vpop.f32.mrf.mxu2 }
 0x602   : > { %v10878_v41 = vpop.f32.mrf.mxu0 }
 0x606   : > { %5316 = vmatmul.bf16.gmra.mxu2 %v4904_v5  ;;  %v4868_v5 = vsel %vm4157_vm8, %v10544_v6, %v4687_v13 }
 0x609   : > { %v10883_v59 = vpop.f32.mrf.mxu2 }
 0x60a   : > { %11832 = vst [vmem:[#allocation38_spill] sm:$0xff] %v10883_v59 }
 0x60b   : > { %v10885_v37 = vpop.f32.mrf.mxu0 }
 0x60e   : > { %6516 = vmatmul.msk.bf16.gmra.mxu0 %vm5147_vm13, %v4946_v49  ;;  %v4463_v16 = vpop.f32.mrf.mxu3  ;;  %v4910_v49 = vsel %vm4881_vm11, %v4868_v5, %v10906_v39 }
 0x610   : > { %v4334_v48 = vpop.f32.mrf.mxu1 }
 0x611   : > { %v10889_v12 = vpop.f32.mrf.mxu2  ;;  %v4464_v35 = vadd.f32 %v4463_v16, %v4334_v48  ;;  %v10914_v26 = vpop.permute.xlu2 %4692 }
 0x612   : > { %11833 = vst [vmem:[#allocation7_spill] sm:$0xff] %v10889_v12 }
 0x613   : > { %v10891_v3 = vpop.f32.mrf.mxu0  ;;  %v4526_v2 = vpack.c.bf16 %v4464_v35, %v4464_v35 }
 0x615   : > { %v4664_v9 = vunpack.c.l.b16 %v4526_v2 }
 0x616   : > { %5321 = vmatmul.bf16.gmra.mxu2 %v4907_v62  ;;  %v4465_v57 = vpop.f32.mrf.mxu3 }
 0x618   : > { %v4336_v63 = vpop.f32.mrf.mxu1 }
 0x619   : > { %v4466_v60 = vadd.f32 %v4465_v57, %v4336_v63  ;;  %v5282_v51 = vpop.f32.mrf.mxu2 }
 0x61b   : > { %v4527_v36 = vpack.c.bf16 %v4466_v60, %v4466_v60  ;;  %v5371_v30 = vpop.f32.mrf.mxu0 }
 0x61d   : > { %v4665_v38 = vunpack.c.l.b16 %v4527_v36 }
 0x61e   : > { %v4468_v19 = vpop.f32.mrf.mxu3 }
 0x61f   : > { %v10896_v23 = vpack.c.b16 %v4665_v38, %v4664_v9 }
 0x620   : > { %v4339_v54 = vpop.f32.mrf.mxu1 }
 0x621   : > { %v10900_v56 = vpop.f32.mrf.mxu2  ;;  %4736 = vrot.lane.b32.xlu0 %v10896_v23, %s7216_s29  ;;  %4774 = vrot.lane.b32.xlu1 %v10896_v23, %s7217_s30  ;;  %v4469_v33 = vadd.f32 %v4468_v19, %v4339_v54  ;;  %v10923_v19 = vld [vmem:[%s11303_s5] ss:$0 sm:$0xff] }
 0x623   : > { %v10908_v14 = vpop.f32.mrf.mxu0  ;;  %v4528_v35 = vpack.c.bf16 %v4469_v33, %v4469_v33 }
 0x625   : > { %v4704_v13 = vunpack.c.l.b16 %v4528_v35 }
 0x626   : > { %5326 = vmatmul.bf16.gmra.mxu2 %v4910_v49  ;;  %v4470_v16 = vpop.f32.mrf.mxu3  ;;  %v5194_v49 = vadd.f32 %v10923_v19, %v10566_v17 }
 0x628   : > { %v4341_v48 = vpop.f32.mrf.mxu1 }
 0x629   : > { %v4471_v62 = vadd.f32 %v4470_v16, %v4341_v48  ;;  %v5287_v57 = vpop.f32.mrf.mxu2  ;;  %4696 = vrot.lane.b32.xlu0 %v10854_v45, %s7215_s16  ;;  %v4870_v16 = vsel %vm4157_vm8, %v10722_v47, %v4689_v25 }
 0x62a   : > { %v4769_v63 = vpop.permute.xlu1 %4768 }
 0x62b   : > { %v4529_v2 = vpack.c.bf16 %v4471_v62, %v4471_v62  ;;  %v4948_v60 = vsel %vm4930_vm12, %v4727_v15, %v4769_v63  ;;  %v5376_v6 = vpop.f32.mrf.mxu0  ;;  %v10932_v15 = vpop.permute.xlu0 %4730  ;;  %v5283_v62 = vadd.f32 %v5282_v51, %v5194_v49 }
 0x62c   : > { %6517 = vmatmul.msk.bf16.gmra.mxu0 %vm5147_vm13, %v4948_v60  ;;  %v4913_v35 = vsel %vm4881_vm11, %v4870_v16, %v10932_v15 }
 0x62d   : > { %v4705_v36 = vunpack.c.l.b16 %v4529_v2  ;;  %v5372_v17 = vadd.f32 %v5371_v30, %v5283_v62 }
 0x62e   : > { %v4473_v9 = vpop.f32.mrf.mxu3 }
 0x62f   : > { %v4708_v38 = vpack.c.b16 %v4705_v36, %v4704_v13  ;;  %v5451_v16 = vmax.f32 %v5372_v17, 0.0 }
 0x630   : > { %v4344_v54 = vpop.f32.mrf.mxu1 }
 0x631   : > { %v10925_v5 = vpop.f32.mrf.mxu2  ;;  %v10927_v45 = vpop.permute.xlu2 %4694  ;;  %4656 = vrot.lane.b32.xlu0 %v10837_v11, %s7214_s20  ;;  %4776 = vrot.lane.b32.xlu1 %v4708_v38, %s7217_s30  ;;  %v4474_v48 = vadd.f32 %v4473_v9, %v4344_v54  ;;  %v5204_v11 = vadd.f32 %v10923_v19, %v10662_v34 }
 0x633   : > { %v10934_v33 = vpop.f32.mrf.mxu0  ;;  %v4530_v60 = vpack.c.bf16 %v4474_v48, %v4474_v48 }
 0x635   : > { %v4706_v54 = vunpack.c.l.b16 %v4530_v60 }
 0x636   : > { %5331 = vmatmul.bf16.gmra.mxu2 %v4913_v35  ;;  %v4475_v63 = vpop.f32.mrf.mxu3 }
 0x638   : > { %v4346_v2 = vpop.f32.mrf.mxu1 }
 0x639   : > { %v4476_v13 = vadd.f32 %v4475_v63, %v4346_v2  ;;  %v5292_v36 = vpop.f32.mrf.mxu2  ;;  %v10944_v12 = vpop.permute.xlu2 %4654 }
 0x63a   : > { %v5293_v59 = vadd.f32 %v5292_v36, %v5204_v11  ;;  %v4843_v47 = vsel %vm4784_vm9, %v10421_v4, %v10944_v12  ;;  %v5199_v4 = vadd.f32 %v10923_v19, %v10624_v46  ;;  %v5196_v36 = vadd.f32 %v10923_v19, %v10594_v20 }
 0x63b   : > { %v4531_v25 = vpack.c.bf16 %v4476_v13, %v4476_v13  ;;  %v5381_v9 = vpop.f32.mrf.mxu0  ;;  %5262 = vmatmul.bf16.vlgmr.msra.gmra.mxu3 %v4843_v47  ;;  %v5209_v47 = vadd.f32 %v10923_v19, %v10696_v40 }
 0x63c   : > { %v5382_v51 = vadd.f32 %v5381_v9, %v5293_v59  ;;  %v5206_v59 = vadd.f32 %v10923_v19, %v10679_v21  ;;  %v5288_v60 = vadd.f32 %v5287_v57, %v5199_v4  ;;  %v4872_v9 = vsel %vm4157_vm8, %v10746_v53, %v10898_v58 }
 0x63d   : > { %v4707_v49 = vunpack.c.l.b16 %v4531_v25  ;;  %v5285_v46 = vadd.f32 %v10900_v56, %v5196_v36 }
 0x63e   : > { %v5455_v34 = vmax.f32 %v5382_v51, 0.0  ;;  %v4478_v35 = vpop.f32.mrf.mxu3  ;;  %v5377_v57 = vadd.f32 %v5376_v6, %v5288_v60 }
 0x63f   : > { %v10949_v48 = vpack.c.b16 %v4707_v49, %v4706_v54 }
 0x640   : > { %v10951_v63 = vmax.f32 %v5451_v16, %v5455_v34  ;;  %v4349_v2 = vpop.f32.mrf.mxu1  ;;  %v5453_v6 = vmax.f32 %v5377_v57, 0.0 }
 0x641   : > { %v5294_v30 = vpop.f32.mrf.mxu2  ;;  %4778 = vrot.lane.b32.xlu1 %v10949_v48, %s7217_s30  ;;  %v4479_v11 = vadd.f32 %v4478_v35, %v4349_v2  ;;  %v5374_v2 = vadd.f32 %v10908_v14, %v5285_v46 }
 0x642   : > { %v5295_v17 = vadd.f32 %v5294_v30, %v5206_v59 }
 0x643   : > { %v5383_v62 = vpop.f32.mrf.mxu0  ;;  %v4532_v51 = vpack.c.bf16 %v4479_v11, %v4479_v11  ;;  %v5201_v11 = vadd.f32 %v10923_v19, %v10642_v61 }
 0x644   : > { %v5384_v34 = vadd.f32 %v5383_v62, %v5295_v17  ;;  %v6731_v62 = vld [vmem:[%s11304_s6 + $0x38] sm:$0xff]  ;;  %v5452_v17 = vmax.f32 %v5374_v2, 0.0 }
 0x645   : > { %v4746_v30 = vunpack.c.l.b16 %v4532_v51  ;;  %5651 = vmatpush.bf16.msrb.mxu2 %v6731_v62 }
 0x646   : > { %v4480_v13 = vpop.f32.mrf.mxu3 }
 0x648   : > { %v4351_v25 = vpop.f32.mrf.mxu1 }
 0x649   : > { %v4481_v54 = vadd.f32 %v4480_v13, %v4351_v25  ;;  %v5297_v21 = vpop.f32.mrf.mxu2  ;;  %v10967_v49 = vpop.permute.xlu0 %4732  ;;  %4738 = vrot.lane.b32.xlu1 %v4708_v38, %s7216_s29  ;;  %v5211_v13 = vadd.f32 %v10923_v19, %v10716_v42 }
 0x64a   : > { %v5298_v20 = vadd.f32 %v5297_v21, %v5209_v47  ;;  %v4771_v16 = vpop.permute.xlu1 %4770  ;;  %v4916_v40 = vsel %vm4881_vm11, %v4872_v9, %v10967_v49  ;;  %v5290_v47 = vadd.f32 %v10925_v5, %v5201_v11 }
 0x64b   : > { %v4533_v35 = vpack.c.bf16 %v4481_v54, %v4481_v54  ;;  %v4950_v53 = vsel %vm4930_vm12, %v10906_v39, %v4771_v16  ;;  %v5386_v58 = vpop.f32.mrf.mxu0  ;;  %5336 = vmatmul.bf16.gmra.mxu2 %v4916_v40  ;;  %v5456_v39 = vmax.f32 %v5384_v34, 0.0  ;;  %v4874_v16 = vsel %vm4157_vm8, %v10702_v18, %v10914_v26 }
 0x64c   : > { %v5387_v56 = vadd.f32 %v5386_v58, %v5298_v20  ;;  %6518 = vmatmul.msk.bf16.gmra.mxu0 %vm5147_vm13, %v4950_v53  ;;  %v5379_v42 = vadd.f32 %v10934_v33, %v5290_v47 }
 0x64d   : > { %v4747_v38 = vunpack.c.l.b16 %v4533_v35  ;;  %v10989_v61 = vmax.f32 %v5452_v17, %v5456_v39  ;;  %v5224_v17 = vadd.f32 %v10923_v19, %v10782_v50 }
 0x64e   : > { %v5457_v4 = vmax.f32 %v5387_v56, 0.0  ;;  %v4483_v59 = vpop.f32.mrf.mxu3  ;;  %v5454_v40 = vmax.f32 %v5379_v42, 0.0 }
 0x64f   : > { %v4750_v60 = vpack.c.b16 %v4747_v38, %v4746_v30  ;;  %v7156_v21 = vpack.i.bf16 %v10989_v61, %v10951_v63 }
 0x650   : > { %v10983_v36 = vmax.f32 %v5453_v6, %v5457_v4  ;;  %v4354_v14 = vpop.f32.mrf.mxu1 }
 0x651   : > { %v5299_v25 = vpop.f32.mrf.mxu2  ;;  %4780 = vrot.lane.b32.xlu2 %v4750_v60, %s7217_s30  ;;  %4698 = vrot.lane.b32.xlu1 %v10896_v23, %s7215_s16  ;;  %v4484_v54 = vadd.f32 %v4483_v59, %v4354_v14 }
 0x652   : > { %v5300_v9 = vadd.f32 %v5299_v25, %v5211_v13  ;;  %v5214_v13 = vadd.f32 %v10923_v19, %v10732_v32 }
 0x653   : > { %v5388_v46 = vpop.f32.mrf.mxu0  ;;  %v4534_v23 = vpack.c.bf16 %v4484_v54, %v4484_v54 }
 0x654   : > { %v5389_v51 = vadd.f32 %v5388_v46, %v5300_v9 }
 0x655   : > { %v4748_v30 = vunpack.c.l.b16 %v4534_v23  ;;  %v5219_v23 = vadd.f32 %v10923_v19, %v10762_v29 }
 0x656   : > { %v5458_v57 = vmax.f32 %v5389_v51, 0.0  ;;  %v4485_v20 = vpop.f32.mrf.mxu3  ;;  %v5216_v51 = vadd.f32 %v10923_v19, %v10748_v44 }
 0x658   : > { %v4356_v5 = vpop.f32.mrf.mxu1  ;;  %v11004_v56 = vmax.f32 %v5454_v40, %v5458_v57 }
 0x659   : > { %v4486_v34 = vadd.f32 %v4485_v20, %v4356_v5  ;;  %v5302_v35 = vpop.f32.mrf.mxu2  ;;  %4740 = vrot.lane.b32.xlu2 %v10949_v48, %s7216_s29  ;;  %v10999_v53 = vpop.permute.xlu0 %4734  ;;  %7157 = vrot.lane.b32.xlu1 %v7156_v21, %s7213_s22  ;;  %v5226_v20 = vadd.f32 %v10923_v19, %v10793_v10 }
 0x65a   : > { %v4773_v33 = vpop.permute.xlu1 %4772  ;;  %v4919_v58 = vsel %vm4881_vm11, %v4874_v16, %v10999_v53  ;;  %v7161_v38 = vpack.i.bf16 %v11004_v56, %v10983_v36  ;;  %v5303_v14 = vadd.f32 %v5302_v35, %v5214_v13 }
 0x65b   : > { %v4535_v2 = vpack.c.bf16 %v4486_v34, %v4486_v34  ;;  %v4952_v18 = vsel %vm4930_vm12, %v10932_v15, %v4773_v33  ;;  %v5391_v26 = vpop.f32.mrf.mxu0  ;;  %5341 = vmatmul.bf16.gmra.mxu2 %v4919_v58  ;;  %v6730_v15 = vld [vmem:[%s11304_s6 + $0x30] sm:$0xff]  ;;  %v5229_v58 = vadd.f32 %v10923_v19, %v10813_v55 }
 0x65c   : > { %6519 = vmatmul.msk.bf16.gmra.mxu0 %vm5147_vm13, %v4952_v18  ;;  %5652 = vmatpush.bf16.msrb.mxu2 %v6730_v15  ;;  %v5392_v25 = vadd.f32 %v5391_v26, %v5303_v14 }
 0x65d   : > { %v4749_v48 = vunpack.c.l.b16 %v4535_v2 }
 0x65e   : > { %v5459_v54 = vmax.f32 %v5392_v25, 0.0 }
 0x65f   : > { %v4751_v6 = vpack.c.b16 %v4749_v48, %v4748_v30 }
 0x661   : > { %v5304_v4 = vpop.f32.mrf.mxu2  ;;  %4782 = vrot.lane.b32.xlu0 %v4751_v6, %s7217_s30  ;;  %7162 = vrot.lane.b32.xlu2 %v7161_v38, %s7213_s22  ;;  %v5221_v38 = vadd.f32 %v10923_v19, %v10773_v1  ;;  %v6729_v6 = vld [vmem:[%s11304_s6 + $0x28] sm:$0xff]  ;;  %v4876_v1 = vsel %vm4157_vm8, %v10734_v43, %v10927_v45 }
 0x662   : > { %v5305_v21 = vadd.f32 %v5304_v4, %v5216_v51  ;;  %5653 = vmatpush.bf16.msrb.mxu2 %v6729_v6 }
 0x663   : > { %v5393_v59 = vpop.f32.mrf.mxu0 }
 0x664   : > { %v5394_v16 = vadd.f32 %v5393_v59, %v5305_v21 }
 0x666   : > { %v5460_v35 = vmax.f32 %v5394_v16, 0.0 }
 0x669   : > { %v5307_v62 = vpop.f32.mrf.mxu2 }
 0x66a   : > { %v5308_v33 = vadd.f32 %v5307_v62, %v5219_v23  ;;  %v5231_v62 = vadd.f32 %v10923_v19, %v10824_v8 }
 0x66b   : > { %v5396_v11 = vpop.f32.mrf.mxu0 }
 0x66c   : > { %v5397_v10 = vadd.f32 %v5396_v11, %v5308_v33 }
 0x66e   : > { %v5461_v55 = vmax.f32 %v5397_v10, 0.0 }
 0x671   : > { %v5309_v39 = vpop.f32.mrf.mxu2 }
 0x672   : > { %v5310_v4 = vadd.f32 %v5309_v39, %v5221_v38 }
 0x673   : > { %v5398_v60 = vpop.f32.mrf.mxu0 }
 0x674   : > { %v5399_v13 = vadd.f32 %v5398_v60, %v5310_v4 }
 0x676   : > { %v5462_v8 = vmax.f32 %v5399_v13, 0.0 }
 0x679   : > { %v5312_v47 = vpop.f32.mrf.mxu2 }
 0x67a   : > { %v5313_v9 = vadd.f32 %v5312_v47, %v5224_v17 }
 0x67b   : > { %v5401_v46 = vpop.f32.mrf.mxu0 }
 0x67c   : > { %v5402_v42 = vadd.f32 %v5401_v46, %v5313_v9 }
 0x67e   : > { %v5463_v57 = vmax.f32 %v5402_v42, 0.0 }
 0x680   : > { %v11024_v5 = vmax.f32 %v5459_v54, %v5463_v57 }
 0x681   : > { %v5314_v32 = vpop.f32.mrf.mxu2 }
 0x682   : > { %v5315_v40 = vadd.f32 %v5314_v32, %v5226_v20  ;;  %v5239_v32 = vadd.f32 %v10923_v19, %v10861_v7 }
 0x683   : > { %v5403_v50 = vpop.f32.mrf.mxu0 }
 0x684   : > { %v5404_v34 = vadd.f32 %v5403_v50, %v5315_v40  ;;  %v6728_v50 = vld [vmem:[%s11304_s6 + $0x20] sm:$0xff] }
 0x685   : > { %5654 = vmatpush.bf16.msrb.mxu2 %v6728_v50 }
 0x686   : > { %v5464_v44 = vmax.f32 %v5404_v34, 0.0 }
 0x688   : > { %v11030_v2 = vmax.f32 %v5460_v35, %v5464_v44  ;;  %v6725_v35 = vld [vmem:[%s11304_s6 + $0x8] sm:$0xff] }
 0x689   : > { %v5317_v18 = vpop.f32.mrf.mxu2 }
 0x68a   : > { %v7166_v26 = vpack.i.bf16 %v11030_v2, %v11024_v5  ;;  %v5318_v30 = vadd.f32 %v5317_v18, %v5229_v58  ;;  %v6724_v58 = vld [vmem:[%s11304_s6] sm:$0xff] }
 0x68b   : > { %v5406_v48 = vpop.f32.mrf.mxu0 }
 0x68c   : > { %v5407_v29 = vadd.f32 %v5406_v48, %v5318_v30  ;;  %7167 = vrot.lane.b32.xlu0 %v7166_v26, %s7213_s22 }
 0x68e   : > { %v5465_v59 = vmax.f32 %v5407_v29, 0.0 }
 0x690   : > { %v11042_v11 = vmax.f32 %v5461_v55, %v5465_v59 }
 0x691   : > { %v5319_v15 = vpop.f32.mrf.mxu2 }
 0x692   : > { %v5320_v14 = vadd.f32 %v5319_v15, %v5231_v62 }
 0x693   : > { %v5408_v17 = vpop.f32.mrf.mxu0  ;;  %v4737_v47 = vpop.permute.xlu0 %4736 }
 0x694   : > { %v5409_v25 = vadd.f32 %v5408_v17, %v5320_v14  ;;  %v4775_v9 = vpop.permute.xlu1 %4774  ;;  %v4922_v39 = vsel %vm4881_vm11, %v4876_v1, %v4737_v47  ;;  %v5234_v17 = vadd.f32 %v10923_v19, %v10833_v28  ;;  %v5236_v28 = vadd.f32 %v10923_v19, %v10846_v0 }
 0x695   : > { %v4954_v46 = vsel %vm4930_vm12, %v10967_v49, %v4775_v9  ;;  %5346 = vmatmul.bf16.gmra.mxu2 %v4922_v39 }
 0x696   : > { %v5466_v51 = vmax.f32 %v5409_v25, 0.0  ;;  %6520 = vmatmul.msk.bf16.gmra.mxu0 %vm5147_vm13, %v4954_v46  ;;  %v5244_v25 = vadd.f32 %v10923_v19, %v10872_v27  ;;  %v5246_v27 = vadd.f32 %v10923_v19, %v10878_v41 }
 0x698   : > { %v11051_v60 = vmax.f32 %v5462_v8, %v5466_v51 }
 0x699   : > { %v5322_v42 = vpop.f32.mrf.mxu2 }
 0x69a   : > { %v7171_v43 = vpack.i.bf16 %v11051_v60, %v11042_v11  ;;  %v5323_v9 = vadd.f32 %v5322_v42, %v5234_v17  ;;  %v5251_v17 = vadd.f32 %v10923_v19, %v10891_v3 }
 0x69b   : > { %v4697_v45 = vpop.permute.xlu0 %4696 }
 0x69c   : > { %7172 = vrot.lane.b32.xlu1 %v7171_v43, %s7213_s22  ;;  %v4878_v33 = vsel %vm4157_vm8, %v10944_v12, %v4697_v45 }
 0x6a1   : > { %v11056_v54 = vpop.f32.mrf.mxu2 }
 0x6a2   : > { %v5325_v42 = vadd.f32 %v11056_v54, %v5236_v28  ;;  %v6739_v28 = vld [vmem:[%s11305_s7 + $0x38] sm:$0xff] }
 0x6a3   : > { %v4657_v21 = vpop.permute.xlu0 %4656  ;;  %v4777_v57 = vpop.permute.xlu1 %4776  ;;  %5913 = vmatpush.bf16.msra.mxu1 %v6739_v28 }
 0x6a4   : > { %v4956_v49 = vsel %vm4930_vm12, %v10999_v53, %v4777_v57  ;;  %v4847_v20 = vsel %vm4784_vm9, %v10462_v31, %v4657_v21  ;;  %v6727_v53 = vld [vmem:[%s11304_s6 + $0x18] sm:$0xff]  ;;  %v6726_v31 = vld [vmem:[%s11304_s6 + $0x10] sm:$0xff] }
 0x6a5   : > { %5267 = vmatmul.bf16.gmra.mxu3 %v4847_v20  ;;  %5655 = vmatpush.bf16.msrb.mxu2 %v6727_v53 }
 0x6a6   : > { %6521 = vmatmul.msk.bf16.gmra.mxu0 %vm5147_vm13, %v4956_v49 }
 0x6a9   : > { %v5327_v16 = vpop.f32.mrf.mxu2  ;;  %5656 = vmatpush.bf16.msrb.mxu2 %v6726_v31  ;;  %v5411_v7 = vpop.f32.mrf.mxu0 }
 0x6aa   : > { %v5328_v40 = vadd.f32 %v5327_v16, %v5239_v32  ;;  %v5412_v8 = vadd.f32 %v5411_v7, %v5323_v9 }
 0x6ab   : > { %v4781_v10 = vpop.permute.xlu2 %4780 }
 0x6ac   : > { %v5467_v57 = vmax.f32 %v5412_v8, 0.0 }
 0x6ad   : > { %5657 = vmatpush.bf16.msrb.mxu2 %v6725_v35 }
 0x6b1   : > { %5658 = vmatpush.bf16.msrb.mxu2 %v6724_v58  ;;  %v5413_v26 = vpop.f32.mrf.mxu0  ;;  %v11087_v38 = vpop.f32.mrf.mxu2 }
 0x6b3   : > { %v4779_v23 = vpop.permute.xlu1 %4778  ;;  %v4741_v55 = vpop.permute.xlu2 %4740 }
 0x6b4   : > { %v4958_v34 = vsel %vm4930_vm12, %v4737_v47, %v4779_v23 }
 0x6b6   : > { %6522 = vmatmul.msk.bf16.gmra.mxu0 %vm5147_vm13, %v4958_v34 }
 0x6b9   : > { %v5332_v15 = vpop.f32.mrf.mxu2 }
 0x6ba   : > { %v5333_v51 = vadd.f32 %v5332_v15, %v5244_v25 }
 0x6bb   : > { %v4739_v44 = vpop.permute.xlu1 %4738  ;;  %v7163_v32 = vpop.permute.xlu2 %7162 }
 0x6bc   : > { %v4925_v18 = vsel %vm4881_vm11, %v4878_v33, %v4739_v44  ;;  %v4960_v30 = vsel %vm4930_vm12, %v4739_v44, %v4781_v10  ;;  %v7165_v53 = vunpack.i.h.bf16 %v7163_v32  ;;  %v7164_v23 = vunpack.i.l.bf16 %v7163_v32 }
 0x6bd   : > { %5351 = vmatmul.bf16.gmra.mxu2 %v4925_v18 }
 0x6be   : > { %v5566_v7 = vmax.f32 %v11004_v56, %v7165_v53  ;;  %v5565_v35 = vmax.f32 %v10983_v36, %v7164_v23  ;;  %v5256_v53 = vadd.f32 %v10923_v19, %v10876_v24 }
 0x6c0   : > { %v5580_v54 = vpack.c.bf16 %v5566_v7, %v5565_v35 }
 0x6c1   : > { %v5334_v20 = vpop.f32.mrf.mxu2 }
 0x6c2   : > { %v5335_v16 = vadd.f32 %v5334_v20, %v5246_v27 }
 0x6c3   : > { %v4699_v48 = vpop.permute.xlu1 %4698 }
 0x6c4   : > { %v4880_v12 = vsel %vm4157_vm8, %v4657_v21, %v4699_v48 }
 0x6c5   : > { %v4928_v4 = vsel %vm4881_vm11, %v4880_v12, %v4741_v55  ;;  %v5249_v12 = vadd.f32 %v10923_v19, %v10885_v37 }
 0x6c6   : > { %6523 = vmatmul.msk.bf16.gmra.mxu0 %vm5147_vm13, %v4960_v30 }
 0x6c9   : > { %v5416_v29 = vpop.f32.mrf.mxu0 }
 0x6ca   : > { %v11090_v6 = vadd.f32 %v5416_v29, %v5328_v40 }
 0x6cb   : > { %v7158_v59 = vpop.permute.xlu1 %7157 }
 0x6cc   : > { %v7160_v13 = vunpack.i.h.bf16 %v7158_v59  ;;  %v7159_v14 = vunpack.i.l.bf16 %v7158_v59 }
 0x6cd   : > { %5356 = vmatmul.bf16.gmra.mxu2 %v4928_v4 }
 0x6ce   : > { %v5564_v39 = vmax.f32 %v10989_v61, %v7160_v13  ;;  %v5563_v46 = vmax.f32 %v10951_v63, %v7159_v14  ;;  %v5414_v63 = vadd.f32 %v5413_v26, %v5325_v42  ;;  %v5337_v30 = vpop.f32.mrf.mxu2  ;;  %v5469_v14 = vmax.f32 %v11090_v6, 0.0 }
 0x6cf   : > { %v5338_v4 = vadd.f32 %v5337_v30, %v5249_v12 }
 0x6d0   : > { %v5579_v21 = vpack.c.bf16 %v5564_v39, %v5563_v46  ;;  %v5468_v31 = vmax.f32 %v5414_v63, 0.0 }
 0x6d1   : > { %v11093_v62 = vpop.f32.mrf.mxu0 }
 0x6d3   : > { %v4783_v1 = vpop.permute.xlu0 %4782 }
 0x6d4   : > { %v4962_v47 = vsel %vm4930_vm12, %v4741_v55, %v4783_v1 }
 0x6d6   : > { %6524 = vmatmul.msk.bf16.gmra.mxu0 %vm5147_vm13, %v4962_v47  ;;  %v5339_v59 = vpop.f32.mrf.mxu2 }
 0x6d7   : > { %v5340_v47 = vadd.f32 %v5339_v59, %v5251_v17 }
 0x6d9   : > { %v5421_v43 = vpop.f32.mrf.mxu0 }
 0x6da   : > { %v5422_v45 = vadd.f32 %v5421_v43, %v5333_v51 }
 0x6dc   : > { %v5471_v49 = vmax.f32 %v5422_v45, 0.0 }
 0x6dd   : > { %5659 = vmatmul.bf16.vlgmr.msrb.gmra.mxu2 %v5579_v21  ;;  %v5263_v21 = vpop.f32.mrf.mxu3 }
 0x6de   : > { %v11108_v61 = vmax.f32 %v5467_v57, %v5471_v49  ;;  %v5342_v9 = vpop.f32.mrf.mxu2  ;;  %v5264_v20 = vadd.f32 %v10923_v19, %v5263_v21 }
 0x6e1   : > { %v5423_v40 = vpop.f32.mrf.mxu0 }
 0x6e2   : > { %v5424_v50 = vadd.f32 %v5423_v40, %v5335_v16 }
 0x6e4   : > { %v5472_v0 = vmax.f32 %v5424_v50, 0.0  ;;  %v5254_v50 = vadd.f32 %v10923_v19, %v10870_v22 }
 0x6e5   : > { %v5265_v27 = vpop.f32.mrf.mxu3 }
 0x6e6   : > { %v11110_v34 = vmax.f32 %v5468_v31, %v5472_v0  ;;  %v5344_v3 = vpop.f32.mrf.mxu2  ;;  %v5266_v23 = vadd.f32 %v10923_v19, %v5265_v27  ;;  %v5343_v7 = vadd.f32 %v5342_v9, %v5254_v50 }
 0x6e7   : > { %v5345_v35 = vadd.f32 %v5344_v3, %v5256_v53 }
 0x6e8   : > { %v7176_v41 = vpack.i.bf16 %v11110_v34, %v11108_v61 }
 0x6ea   : > { %7177 = vrot.lane.b32.xlu2 %v7176_v41, %s7213_s22 }
 0x6ed   : > { %5664 = vmatmul.bf16.gmra.mxu2 %v5580_v54 }
 0x6fe   : > { %v7168_v33 = vpop.permute.xlu0 %7167 }
 0x6ff   : > { %v7170_v44 = vunpack.i.h.bf16 %v7168_v33  ;;  %v7169_v58 = vunpack.i.l.bf16 %v7168_v33 }
 0x701   : > { %v5568_v18 = vmax.f32 %v11030_v2, %v7170_v44  ;;  %v5567_v10 = vmax.f32 %v11024_v5, %v7169_v58  ;;  %v5241_v5 = vadd.f32 %v10923_v19, %v10865_v52 }
 0x703   : > { %v5581_v26 = vpack.c.bf16 %v5568_v18, %v5567_v10  ;;  %v5330_v37 = vadd.f32 %v11087_v38, %v5241_v5 }
 0x705   : > { %5669 = vmatmul.bf16.gmra.mxu2 %v5581_v26 }
 0x70e   : > { %v7173_v56 = vpop.permute.xlu1 %7172 }
 0x70f   : > { %v7175_v48 = vunpack.i.h.bf16 %v7173_v56  ;;  %v7174_v36 = vunpack.i.l.bf16 %v7173_v56 }
 0x711   : > { %v5570_v29 = vmax.f32 %v11051_v60, %v7175_v48  ;;  %v5569_v55 = vmax.f32 %v11042_v11, %v7174_v36  ;;  %v5419_v11 = vadd.f32 %v11093_v62, %v5330_v37 }
 0x713   : > { %v5426_v15 = vpop.f32.mrf.mxu0  ;;  %v5582_v13 = vpack.c.bf16 %v5570_v29, %v5569_v55  ;;  %v5470_v46 = vmax.f32 %v5419_v11, 0.0 }
 0x714   : > { %v5427_v2 = vadd.f32 %v5426_v15, %v5338_v4  ;;  %v11834_v15 = vld [vmem:[#allocation38_spill] sm:$0xff] }
 0x715   : > { %5674 = vmatmul.bf16.gmra.mxu2 %v5582_v13  ;;  %v5259_v13 = vadd.f32 %v10923_v19, %v11834_v15 }
 0x716   : > { %v5473_v1 = vmax.f32 %v5427_v2, 0.0  ;;  %v11835_v2 = vld [vmem:[#allocation7_spill] sm:$0xff] }
 0x717   : > { %v5261_v5 = vadd.f32 %v10923_v19, %v11835_v2 }
 0x718   : > { %v11129_v60 = vmax.f32 %v5469_v14, %v5473_v1  ;;  %v5347_v43 = vpop.f32.mrf.mxu2 }
 0x719   : > { %v5348_v1 = vadd.f32 %v5347_v43, %v5259_v13 }
 0x71b   : > { %v5428_v25 = vpop.f32.mrf.mxu0 }
 0x71c   : > { %v5429_v39 = vadd.f32 %v5428_v25, %v5340_v47 }
 0x71e   : > { %v5474_v8 = vmax.f32 %v5429_v39, 0.0 }
 0x720   : > { %v11132_v51 = vmax.f32 %v5470_v46, %v5474_v8  ;;  %v5349_v62 = vpop.f32.mrf.mxu2 }
 0x721   : > { %v5350_v17 = vadd.f32 %v5349_v62, %v5261_v5 }
 0x722   : > { %v7181_v52 = vpack.i.bf16 %v11132_v51, %v11129_v60 }
 0x723   : > { %v5431_v6 = vpop.f32.mrf.mxu0 }
 0x724   : > { %7182 = vrot.lane.b32.xlu0 %v7181_v52, %s7213_s22  ;;  %v5432_v58 = vadd.f32 %v5431_v6, %v5343_v7  ;;  %v6738_v52 = vld [vmem:[%s11305_s7 + $0x30] sm:$0xff] }
 0x725   : > { %5914 = vmatpush.bf16.msra.mxu1 %v6738_v52 }
 0x726   : > { %v5475_v24 = vmax.f32 %v5432_v58, 0.0 }
 0x728   : > { %v5268_v18 = vpop.f32.mrf.mxu3 }
 0x729   : > { %v5269_v12 = vadd.f32 %v10923_v19, %v5268_v18 }
 0x72b   : > { %v5433_v38 = vpop.f32.mrf.mxu0 }
 0x72c   : > { %v5434_v10 = vadd.f32 %v5433_v38, %v5345_v35 }
 0x72e   : > { %v5476_v56 = vmax.f32 %v5434_v10, 0.0 }
 0x730   : > { %v5270_v4 = vpop.f32.mrf.mxu3 }
 0x731   : > { %v5271_v14 = vadd.f32 %v10923_v19, %v5270_v4  ;;  %v6732_v4 = vld [vmem:[%s11305_s7] sm:$0xff] }
 0x733   : > { %v5436_v45 = vpop.f32.mrf.mxu0 }
 0x734   : > { %v5437_v25 = vadd.f32 %v5436_v45, %v5348_v1 }
 0x736   : > { %v5477_v6 = vmax.f32 %v5437_v25, 0.0 }
 0x73b   : > { %v5438_v57 = vpop.f32.mrf.mxu0 }
 0x73c   : > { %v5439_v9 = vadd.f32 %v5438_v57, %v5350_v17 }
 0x73e   : > { %v5478_v3 = vmax.f32 %v5439_v9, 0.0 }
 0x740   : > { %v5352_v49 = vpop.f32.mrf.mxu2 }
 0x741   : > { %v5353_v63 = vadd.f32 %v5352_v49, %v5264_v20 }
 0x743   : > { %v5441_v42 = vpop.f32.mrf.mxu0 }
 0x744   : > { %v7178_v32 = vpop.permute.xlu2 %7177  ;;  %v5442_v41 = vadd.f32 %v5441_v42, %v5353_v63 }
 0x745   : > { %v7180_v16 = vunpack.i.h.bf16 %v7178_v32  ;;  %v7179_v40 = vunpack.i.l.bf16 %v7178_v32 }
 0x746   : > { %v5479_v22 = vmax.f32 %v5442_v41, 0.0 }
 0x747   : > { %v5572_v31 = vmax.f32 %v11110_v34, %v7180_v16  ;;  %v5571_v0 = vmax.f32 %v11108_v61, %v7179_v40 }
 0x748   : > { %v5354_v54 = vpop.f32.mrf.mxu2  ;;  %v11148_v36 = vmax.f32 %v5475_v24, %v5479_v22  ;;  %v6735_v24 = vld [vmem:[%s11305_s7 + $0x18] sm:$0xff] }
 0x749   : > { %v5355_v33 = vadd.f32 %v5354_v54, %v5266_v23  ;;  %v5583_v44 = vpack.c.bf16 %v5572_v31, %v5571_v0  ;;  %v6737_v23 = vld [vmem:[%s11305_s7 + $0x28] sm:$0xff] }
 0x74a   : > { %5915 = vmatpush.bf16.msra.mxu1 %v6737_v23 }
 0x74b   : > { %v5443_v26 = vpop.f32.mrf.mxu0  ;;  %5679 = vmatmul.bf16.gmra.mxu2 %v5583_v44 }
 0x74c   : > { %v5444_v30 = vadd.f32 %v5443_v26, %v5355_v33 }
 0x74e   : > { %v5480_v48 = vmax.f32 %v5444_v30, 0.0  ;;  %v6736_v30 = vld [vmem:[%s11305_s7 + $0x20] sm:$0xff] }
 0x74f   : > { %5916 = vmatpush.bf16.msra.mxu1 %v6736_v30 }
 0x750   : > { %v11150_v34 = vmax.f32 %v5476_v56, %v5480_v48  ;;  %v5357_v61 = vpop.f32.mrf.mxu2  ;;  %v6734_v56 = vld [vmem:[%s11305_s7 + $0x10] sm:$0xff] }
 0x751   : > { %v5358_v59 = vadd.f32 %v5357_v61, %v5269_v12 }
 0x752   : > { %v7186_v29 = vpack.i.bf16 %v11150_v34, %v11148_v36 }
 0x753   : > { %v5446_v55 = vpop.f32.mrf.mxu0  ;;  %5917 = vmatpush.bf16.msra.mxu1 %v6735_v24  ;;  %v6754_v24 = vld [vmem:[%s11307_s9 + $0x30] sm:$0xff] }
 0x754   : > { %7187 = vrot.lane.b32.xlu1 %v7186_v29, %s7213_s22  ;;  %v5447_v37 = vadd.f32 %v5446_v55, %v5358_v59 }
 0x756   : > { %v5481_v46 = vmax.f32 %v5447_v37, 0.0 }
 0x757   : > { %5918 = vmatpush.bf16.msra.mxu1 %v6734_v56 }
 0x758   : > { %v5359_v11 = vpop.f32.mrf.mxu2  ;;  %v5497_v21 = vmax.f32 %v5477_v6, %v5481_v46 }
 0x759   : > { %v5360_v47 = vadd.f32 %v5359_v11, %v5271_v14 }
 0x75b   : > { %v5448_v39 = vpop.f32.mrf.mxu0 }
 0x75c   : > { %v5449_v8 = vadd.f32 %v5448_v39, %v5360_v47 }
 0x75e   : > { %v5482_v38 = vmax.f32 %v5449_v8, 0.0 }
 0x760   : > { %v5498_v19 = vmax.f32 %v5478_v3, %v5482_v38  ;;  %v5660_v43 = vpop.f32.mrf.mxu2 }
 0x761   : > { %v5700_v28 = vpack.c.bf16 %v5660_v43, %v5660_v43 }
 0x762   : > { %v7191_v62 = vpack.i.bf16 %v5498_v19, %v5497_v21 }
 0x763   : > { %v5720_v49 = vunpack.c.l.b16 %v5700_v28 }
 0x764   : > { %7192 = vrot.lane.b32.xlu2 %v7191_v62, %s7213_s22  ;;  %s7218_s22 = smov 64  }
 0x768   : > { %v5662_v45 = vpop.f32.mrf.mxu2 }
 0x769   : > { %v5701_v57 = vpack.c.bf16 %v5662_v45, %v5662_v45 }
 0x76b   : > { %v5721_v20 = vunpack.c.l.b16 %v5701_v57 }
 0x76d   : > { %v5724_v27 = vpack.c.b16 %v5721_v20, %v5720_v49 }
 0x770   : > { %v5665_v42 = vpop.f32.mrf.mxu2 }
 0x771   : > { %v5702_v63 = vpack.c.bf16 %v5665_v42, %v5665_v42 }
 0x773   : > { %v11165_v40 = vunpack.c.l.b16 %v5702_v63 }
 0x778   : > { %v5667_v32 = vpop.f32.mrf.mxu2 }
 0x779   : > { %v5703_v16 = vpack.c.bf16 %v5667_v32, %v5667_v32 }
 0x77b   : > { %v11167_v50 = vunpack.c.l.b16 %v5703_v16 }
 0x77d   : > { %v5725_v53 = vpack.c.b16 %v11167_v50, %v11165_v40  ;;  %v6058_v50 = vld [vmem:[%s11309_s11 + $0x28] sm:$0x3] }
 0x788   : > { %v5670_v31 = vpop.f32.mrf.mxu2 }
 0x789   : > { %v5704_v0 = vpack.c.bf16 %v5670_v31, %v5670_v31 }
 0x78b   : > { %v5730_v41 = vunpack.c.l.b16 %v5704_v0  ;;  %v6747_v0 = vld [vmem:[%s11305_s7 + $0x78] sm:$0xff] }
 0x78c   : > { %5932 = vmatpush.bf16.msrb.mxu3 %v6747_v0 }
 0x790   : > { %v5672_v7 = vpop.f32.mrf.mxu2 }
 0x791   : > { %v5705_v35 = vpack.c.bf16 %v5672_v7, %v5672_v7  ;;  %v6746_v7 = vld [vmem:[%s11305_s7 + $0x70] sm:$0xff] }
 0x792   : > { %5933 = vmatpush.bf16.msrb.mxu3 %v6746_v7 }
 0x793   : > { %v5731_v54 = vunpack.c.l.b16 %v5705_v35  ;;  %v6745_v35 = vld [vmem:[%s11305_s7 + $0x68] sm:$0xff] }
 0x795   : > { %v5734_v33 = vpack.c.b16 %v5731_v54, %v5730_v41  ;;  %v6744_v41 = vld [vmem:[%s11305_s7 + $0x60] sm:$0xff]  ;;  %v6743_v54 = vld [vmem:[%s11305_s7 + $0x58] sm:$0xff] }
 0x796   : > { %v7183_v44 = vpop.permute.xlu0 %7182  ;;  %5934 = vmatpush.bf16.msrb.mxu3 %v6745_v35 }
 0x797   : > { %v7185_v58 = vunpack.i.h.bf16 %v7183_v44  ;;  %v7184_v18 = vunpack.i.l.bf16 %v7183_v44  ;;  %5736 = vrot.lane.b32.xlu1 %v5734_v33, %s7218_s22  ;;  %v6742_v33 = vld [vmem:[%s11305_s7 + $0x50] sm:$0xff]  ;;  %v6741_v44 = vld [vmem:[%s11305_s7 + $0x48] sm:$0xff] }
 0x798   : > { %v5675_v1 = vpop.f32.mrf.mxu2 }
 0x799   : > { %v5574_v10 = vmax.f32 %v11132_v51, %v7185_v58  ;;  %v5573_v26 = vmax.f32 %v11129_v60, %v7184_v18  ;;  %v6733_v60 = vld [vmem:[%s11305_s7 + $0x8] sm:$0xff]  ;;  %v5706_v45 = vpack.c.bf16 %v5675_v1, %v5675_v1  ;;  %v6740_v58 = vld [vmem:[%s11305_s7 + $0x40] sm:$0xff]  ;;  %v5967_v18 = vld [vmem:[%s11307_s9 + $0x38] sm:$0xf] }
 0x79a   : > { %5919 = vmatpush.bf16.msra.mxu1 %v6733_v60  ;;  %5935 = vmatpush.bf16.msrb.mxu3 %v6744_v41 }
 0x79b   : > { %v5584_v22 = vpack.c.bf16 %v5574_v10, %v5573_v26  ;;  %v5732_v20 = vunpack.c.l.b16 %v5706_v45  ;;  %v6001_v10 = vunpack.c.l.b16 %v5967_v18 }
 0x79d   : > { %5684 = vmatmul.bf16.gmra.mxu2 %v5584_v22  ;;  %v6009_v26 = vpack.c.b16 %v6001_v10, %v6001_v10 }
 0x79e   : > { %5920 = vmatpush.bf16.msra.mxu1 %v6732_v4  ;;  %5936 = vmatpush.bf16.msrb.mxu3 %v6743_v54  ;;  %v6751_v4 = vld [vmem:[%s11307_s9 + $0x18] sm:$0xff] }
 0x79f   : > { %v6025_v30 = vsel %vm5180_vm10, %v6009_v26, 0 }
 0x7a0   : > { %v5677_v17 = vpop.f32.mrf.mxu2  ;;  %6027 = vmatpush.bf16.msra.mxu2 %v6025_v30 }
 0x7a1   : > { %v5707_v62 = vpack.c.bf16 %v5677_v17, %v5677_v17 }
 0x7a2   : > { %5937 = vmatpush.bf16.msrb.mxu3 %v6742_v33  ;;  %v7199_v33 = vld [vmem:[%s11310_s12] ss:$0 sm:$0xff] }
 0x7a3   : > { %v5733_v49 = vunpack.c.l.b16 %v5707_v62 }
 0x7a4   : > { %6028 = vmatpush.bf16.msra.mxu2 %v6754_v24 }
 0x7a6   : > { %5938 = vmatpush.bf16.msrb.mxu3 %v6741_v44 }
 0x7aa   : > { %5939 = vmatpush.bf16.msrb.mxu3 %v6740_v58 }
 0x7be   : > { %v7193_v59 = vpop.permute.xlu2 %7192 }
 0x7bf   : > { %v7195_v15 = vunpack.i.h.bf16 %v7193_v59  ;;  %v7194_v13 = vunpack.i.l.bf16 %v7193_v59 }
 0x7c1   : > { %v5578_v2 = vmax.f32 %v5498_v19, %v7195_v15  ;;  %v5577_v5 = vmax.f32 %v5497_v21, %v7194_v13  ;;  %v6750_v15 = vld [vmem:[%s11307_s9 + $0x10] sm:$0xff] }
 0x7c3   : > { %v5586_v14 = vpack.c.bf16 %v5578_v2, %v5577_v5  ;;  %v6749_v2 = vld [vmem:[%s11307_s9 + $0x8] sm:$0xff] }
 0x7c6   : > { %v7188_v48 = vpop.permute.xlu1 %7187 }
 0x7c7   : > { %v7190_v51 = vunpack.i.h.bf16 %v7188_v48  ;;  %v7189_v61 = vunpack.i.l.bf16 %v7188_v48 }
 0x7c9   : > { %v5576_v12 = vmax.f32 %v11150_v34, %v7190_v51  ;;  %v5575_v29 = vmax.f32 %v11148_v36, %v7189_v61  ;;  %v6753_v51 = vld [vmem:[%s11307_s9 + $0x28] sm:$0xff] }
 0x7ca   : > { %6029 = vmatpush.bf16.msra.mxu2 %v6753_v51 }
 0x7cb   : > { %v5585_v55 = vpack.c.bf16 %v5576_v12, %v5575_v29  ;;  %v6752_v29 = vld [vmem:[%s11307_s9 + $0x20] sm:$0xff] }
 0x7cd   : > { %5689 = vmatmul.bf16.gmra.mxu2 %v5585_v55 }
 0x7ce   : > { %v5680_v37 = vpop.f32.mrf.mxu2  ;;  %6030 = vmatpush.bf16.msra.mxu2 %v6752_v29 }
 0x7cf   : > { %v5708_v56 = vpack.c.bf16 %v5680_v37, %v5680_v37 }
 0x7d1   : > { %v5744_v61 = vunpack.c.l.b16 %v5708_v56 }
 0x7d2   : > { %6031 = vmatpush.bf16.msra.mxu2 %v6751_v4 }
 0x7d6   : > { %v5682_v11 = vpop.f32.mrf.mxu2  ;;  %6032 = vmatpush.bf16.msra.mxu2 %v6750_v15 }
 0x7d7   : > { %v5709_v22 = vpack.c.bf16 %v5682_v11, %v5682_v11  ;;  %v7197_v11 = vld [vmem:[%s11306_s8] ss:$0 sm:$0xff] }
 0x7d9   : > { %v5745_v48 = vunpack.c.l.b16 %v5709_v22 }
 0x7da   : > { %6033 = vmatpush.bf16.msra.mxu2 %v6749_v2 }
 0x7db   : > { %v5748_v60 = vpack.c.b16 %v5745_v48, %v5744_v61 }
 0x7dd   : > { %5694 = vmatmul.bf16.gmra.mxu2 %v5586_v14  ;;  %v6748_v14 = vld [vmem:[%s11307_s9] sm:$0xff] }
 0x7de   : > { %6034 = vmatpush.bf16.msra.mxu2 %v6748_v14 }
 0x809   : > { %v5737_v34 = vpop.permute.xlu1 %5736 }
 0x80a   : > { %v5767_v36 = vsel %vm5764_vm14, %v5724_v27, %v5737_v34  ;;  %v5735_v27 = vpack.c.b16 %v5733_v49, %v5732_v20  ;;  %v6756_v20 = vld [vmem:[%s11309_s11 + $0x8] sm:$0xff] }
 0x80b   : > { %5921 = vmatmul.bf16.vlgmr.msra.gmra.mxu1 %v5767_v36 }
 0x820   : > { %v5685_v47 = vpop.f32.mrf.mxu2 }
 0x821   : > { %v5710_v25 = vpack.c.bf16 %v5685_v47, %v5685_v47  ;;  %v6759_v47 = vld [vmem:[%s11309_s11 + $0x20] sm:$0xff] }
 0x823   : > { %v11195_v46 = vunpack.c.l.b16 %v5710_v25 }
 0x828   : > { %v5687_v9 = vpop.f32.mrf.mxu2 }
 0x829   : > { %v5711_v39 = vpack.c.bf16 %v5687_v9, %v5687_v9 }
 0x82b   : > { %v11197_v8 = vunpack.c.l.b16 %v5711_v39  ;;  %v6758_v39 = vld [vmem:[%s11309_s11 + $0x18] sm:$0xff] }
 0x82d   : > { %v5749_v52 = vpack.c.b16 %v11197_v8, %v11195_v46 }
 0x850   : > { %v5690_v6 = vpop.f32.mrf.mxu2 }
 0x851   : > { %v5712_v3 = vpack.c.bf16 %v5690_v6, %v5690_v6 }
 0x853   : > { %v5754_v19 = vunpack.c.l.b16 %v5712_v3 }
 0x858   : > { %v5692_v38 = vpop.f32.mrf.mxu2 }
 0x859   : > { %v5713_v21 = vpack.c.bf16 %v5692_v38, %v5692_v38  ;;  %v6757_v38 = vld [vmem:[%s11309_s11 + $0x10] sm:$0xff] }
 0x85b   : > { %v5755_v43 = vunpack.c.l.b16 %v5713_v21 }
 0x85d   : > { %v5758_v28 = vpack.c.b16 %v5755_v43, %v5754_v19 }
 0x85f   : > { %5760 = vrot.lane.b32.xlu0 %v5758_v28, %s7218_s22 }
 0x860   : > { %v5695_v57 = vpop.f32.mrf.mxu2 }
 0x861   : > { %v5714_v42 = vpack.c.bf16 %v5695_v57, %v5695_v57 }
 0x863   : > { %v5756_v16 = vunpack.c.l.b16 %v5714_v42 }
 0x867   : > { %5738 = vrot.lane.b32.xlu0 %v5735_v27, %s7218_s22  ;;  %v6755_v27 = vld [vmem:[%s11309_s11] sm:$0xff] }
 0x868   : > { %v5697_v63 = vpop.f32.mrf.mxu2 }
 0x869   : > { %v5715_v32 = vpack.c.bf16 %v5697_v63, %v5697_v63  ;;  %v7198_v63 = vld [vmem:[%s11308_s10] ss:$0 sm:$0xff] }
 0x86b   : > { %v5757_v23 = vunpack.c.l.b16 %v5715_v32 }
 0x86d   : > { %v5759_v31 = vpack.c.b16 %v5757_v23, %v5756_v16 }
 0x86f   : > { %5762 = vrot.lane.b32.xlu2 %v5759_v31, %s7218_s22 }
 0x888   : > { %v5922_v40 = vpop.f32.mrf.mxu1 }
 0x889   : > { %v5923_v25 = vadd.f32 %v7197_v11, %v5922_v40 }
 0x890   : > { %v5924_v36 = vpop.f32.mrf.mxu1 }
 0x891   : > { %v5925_v9 = vadd.f32 %v7197_v11, %v5924_v36 }
 0x8c9   : > { %v5763_v5 = vpop.permute.xlu2 %5762 }
 0x8ca   : > { %v5779_v1 = vsel %vm5764_vm14, %v5749_v52, %v5763_v5 }
 0x8d1   : > { %v5761_v12 = vpop.permute.xlu0 %5760 }
 0x8d2   : > { %v5775_v55 = vsel %vm5764_vm14, %v5748_v60, %v5761_v12 }
 0x8d3   : > { %5940 = vmatmul.bf16.vlgmr.msrb.gmra.mxu3 %v5775_v55 }
 0x8d9   : > { %v5739_v59 = vpop.permute.xlu0 %5738 }
 0x8da   : > { %v5771_v13 = vsel %vm5764_vm14, %v5725_v53, %v5739_v59  ;;  %v6084_v53 = vunpack.c.l.b16 %v6058_v50 }
 0x8db   : > { %5926 = vmatmul.bf16.gmra.mxu1 %v5771_v13 }
 0x8dc   : > { %v6090_v34 = vpack.c.b16 %v6084_v53, %v6084_v53 }
 0x8de   : > { %v6104_v37 = vsel %vm6102_vm15, %v6090_v34, 0 }
 0x8df   : > { %6108 = vmatpush.bf16.msrb.mxu1 %v6104_v37 }
 0x8e3   : > { %5945 = vmatmul.bf16.gmra.mxu3 %v5779_v1  ;;  %6109 = vmatpush.bf16.msrb.mxu1 %v6759_v47 }
 0x8e7   : > { %6110 = vmatpush.bf16.msrb.mxu1 %v6758_v39 }
 0x8eb   : > { %6111 = vmatpush.bf16.msrb.mxu1 %v6757_v38 }
 0x8ef   : > { %6112 = vmatpush.bf16.msrb.mxu1 %v6756_v20 }
 0x8f3   : > { %6113 = vmatpush.bf16.msrb.mxu1 %v6755_v27 }
 0x956   : > { %v5941_v17 = vpop.f32.mrf.mxu3 }
 0x957   : > { %v5942_v8 = vadd.f32 %v5941_v17, %v5923_v25 }
 0x958   : > { %v5927_v6 = vpop.f32.mrf.mxu1 }
 0x959   : > { %v5928_v43 = vadd.f32 %v7197_v11, %v5927_v6 }
 0x95e   : > { %v5943_v46 = vpop.f32.mrf.mxu3 }
 0x95f   : > { %v5944_v52 = vadd.f32 %v5943_v46, %v5925_v9 }
 0x960   : > { %v5929_v19 = vpop.f32.mrf.mxu1 }
 0x961   : > { %v5951_v3 = vpack.c.bf16 %v5944_v52, %v5942_v8  ;;  %v5930_v62 = vadd.f32 %v7197_v11, %v5929_v19 }
 0x963   : > { %6649 = vmatmul.msk.bf16.vlgmr.msra.gmra.mxu2 %vm6017_vm0, %v5951_v3 }
 0x966   : > { %v5946_v21 = vpop.f32.mrf.mxu3 }
 0x967   : > { %v5947_v45 = vadd.f32 %v5946_v21, %v5928_v43 }
 0x96e   : > { %v5948_v28 = vpop.f32.mrf.mxu3 }
 0x96f   : > { %v5949_v57 = vadd.f32 %v5948_v28, %v5930_v62 }
 0x971   : > { %v5952_v49 = vpack.c.bf16 %v5949_v57, %v5947_v45 }
 0x973   : > { %6650 = vmatmul.msk.bf16.gmra.mxu2 %vm6017_vm0, %v5952_v49 }
 0x9e6   : > { %v6036_v42 = vpop.f32.mrf.mxu2 }
 0x9e7   : > { %v6037_v16 = vadd.f32 %v7198_v63, %v6036_v42 }
 0x9ee   : > { %v6038_v32 = vpop.f32.mrf.mxu2 }
 0x9ef   : > { %v6039_v23 = vadd.f32 %v7198_v63, %v6038_v32 }
 0x9f1   : > { %v6046_v31 = vpack.c.bf16 %v6039_v23, %v6037_v16 }
 0x9f3   : > { %6671 = vmatmul.msk.bf16.vlgmr.msrb.gmra.mxu1 %vm1573_vm4, %v6046_v31 }
 0x9f6   : > { %v6041_v0 = vpop.f32.mrf.mxu2 }
 0x9f7   : > { %v6042_v35 = vadd.f32 %v7198_v63, %v6041_v0 }
 0x9fe   : > { %v6043_v7 = vpop.f32.mrf.mxu2 }
 0x9ff   : > { %v6044_v41 = vadd.f32 %v7198_v63, %v6043_v7 }
 0xa01   : > { %v6047_v54 = vpack.c.bf16 %v6044_v41, %v6042_v35 }
 0xa03   : > { %6672 = vmatmul.msk.bf16.gmra.mxu1 %vm1573_vm4, %v6047_v54 }
 0xa70   : > { %v6115_v44 = vpop.f32.mrf.mxu1 }
 0xa71   : > { %v6116_v58 = vadd.f32 %v7199_v33, %v6115_v44 }
 0xa73   : > { %6125 = vst [vmem:[%s440_s17] sm:$0xff] %v6116_v58 }
 0xa78   : > { %v6117_v18 = vpop.f32.mrf.mxu1 }
 0xa79   : > { %v6118_v10 = vadd.f32 %v7199_v33, %v6117_v18 }
 0xa7b   : > { %6126 = vst [vmem:[%s440_s17 + $0x8] sm:$0xff] %v6118_v10 }
 0xa80   : > { %v6120_v26 = vpop.f32.mrf.mxu1 }
 0xa81   : > { %v6121_v22 = vadd.f32 %v7199_v33, %v6120_v26 }
 0xa83   : > { %6127 = vst [vmem:[%s440_s17 + $0x10] sm:$0xff] %v6121_v22 }
 0xa88   : > { %v6122_v30 = vpop.f32.mrf.mxu1 }
 0xa89   : > { %v6123_v24 = vadd.f32 %v7199_v33, %v6122_v30 }
 0xa8b   : > { %6128 = vst [vmem:[%s440_s17 + $0x18] sm:$0xff] %v6123_v24 }
 0xa8c PF: > { %s23_s25 = sadd.s32 1, %s7206_s25  }
 0xa8d   : > { %p20_p5 = scmp.ge.s32.totalorder %s23_s25, 4  }
 0xa8f   :  { %22 = sbr.rel (!%p20_p5) target bundleno = 1 (0x1), region = 102 }

</bundles_post_ra>
